<compile_context>
chip_gen: v7x
topology: tpu7x:2x2x1
jax: 0.10.0
libtpu: 0.0.40
codegen_flags: <defaults>
</compile_context>

<pallas_src>
import math
from functools import partial

import jax
import jax.numpy as jnp
from jax.experimental import pallas as pl
from jax.experimental.pallas import tpu as pltpu


# ---------------------------------------------------------------------------
# Kernels
# ---------------------------------------------------------------------------

def _fr_kernel_full_k(x_ref, w_ref, db_ref, o_ref, *, precision):
    """No reduction axis: o = x @ W^T - x[:, j-block] * diag(W)_j + b_j."""
    j = pl.program_id(1)
    tn = o_ref.shape[1]

    # F.linear contraction: contract last dim of x with last dim of W
    # (W stays in its natural (out, in) layout — no transpose, pure MXU feed).
    z = jax.lax.dot_general(
        x_ref[...], w_ref[...],
        dimension_numbers=(((1,), (1,)), ((), ())),
        preferred_element_type=jnp.float32,
        precision=precision)

    # Diagonal-mask removal reuses the x tile already resident in VMEM.
    if tn == x_ref.shape[1]:          # single output block along D
        xj = x_ref[...]
    else:
        start = j * tn
        if tn % 128 == 0:
            start = pl.multiple_of(start, 128)
        xj = x_ref[:, pl.ds(start, tn)]

    diag = db_ref[0:1, :]
    bias = db_ref[1:2, :]
    o_ref[...] = (z - xj.astype(jnp.float32) * diag + bias).astype(o_ref.dtype)


def _fr_kernel_tiled_k(x_ref, w_ref, db_ref, o_ref, acc_ref, *, precision):
    """(i, j, k) grid with f32 VMEM accumulator; requires tn == tk."""
    j = pl.program_id(1)
    k = pl.program_id(2)

    @pl.when(k == 0)
    def _init():
        acc_ref[...] = jnp.zeros_like(acc_ref)

    acc_ref[...] += jax.lax.dot_general(
        x_ref[...], w_ref[...],
        dimension_numbers=(((1,), (1,)), ((), ())),
        preferred_element_type=jnp.float32,
        precision=precision)

    # Diagonal removal folded into the k == j step: with tn == tk, x_ref holds
    # exactly x[:, j*tn:(j+1)*tn] there, so no duplicate x input is needed.
    @pl.when(k == j)
    def _diag():
        acc_ref[...] -= x_ref[...].astype(jnp.float32) * db_ref[0:1, :]

    @pl.when(k == pl.num_programs(2) - 1)
    def _finalize():
        o_ref[...] = (acc_ref[...] + db_ref[1:2, :]).astype(o_ref.dtype)


# ---------------------------------------------------------------------------
# Planning helpers
# ---------------------------------------------------------------------------

def _vmem_budget_bytes():
    """Per-generation VMEM budget: capacity minus ~16 MiB headroom, capped at 96 MiB."""
    cap = 64 * 1024 * 1024  # conservative fallback (v7x-sized)
    try:
        info = pltpu.get_tpu_info()
        cap = int(getattr(info, "vmem_capacity_bytes", cap))
    except Exception:
        pass
    return max(16 * 1024 * 1024, min(cap - 16 * 1024 * 1024, 96 * 1024 * 1024))


def _pick_tile(dim, candidates):
    for t in candidates:
        if t <= dim and dim % t == 0:
            return t
    return dim  # full-extent block is always a legal block shape


def _plan_full_k(B, D, itemsize, budget):
    """Pick (tm, tn) for the full-K path, or None if it cannot fit VMEM."""
    tm_opts = [t for t in (1024, 512, 256, 128, 64, 32, 16, 8)
               if t <= B and B % t == 0] or [B]
    tn_opts = [t for t in (1024, 512, 256, 128)
               if t <= D and D % t == 0] or [D]

    def fits(tm, tn):
        x_b = 2 * tm * D * itemsize          # double-buffered x stream
        w_b = 2 * tn * D * itemsize          # double-buffered W stream
        o_b = 2 * tm * tn * itemsize         # double-buffered output stream
        db_b = 2 * 8 * max(tn, 128) * 4      # (2, tn) sublane-padded side band
        return x_b + w_b + o_b + db_b <= budget

    for tm in tm_opts:
        for tn in tn_opts:
            if fits(tm, tn):
                # Keep >= 2 blocks along a parallel axis so both v7x TCs get work
                # (the revisit of the unchanged W/x block across that axis is free).
                if (B // tm) * (D // tn) == 1:
                    if tm >= 16 and (tm // 2) % 8 == 0 and B % (tm // 2) == 0:
                        tm //= 2
                    elif tn >= 256 and (tn // 2) % 128 == 0 and D % (tn // 2) == 0:
                        tn //= 2
                return tm, tn
    return None


# ---------------------------------------------------------------------------
# Public wrapper
# ---------------------------------------------------------------------------

def feature_regression(x, W, b, *, precision=jax.lax.Precision.HIGHEST,
                       compute_dtype=None, interpret=False):
    """z_h = x @ (W * (ones - eye))^T + b  (PyTorch FeatureRegression.forward)."""
    B, D = x.shape
    assert W.shape == (D, D) and b.shape == (D,)

    if compute_dtype is not None:  # e.g. jnp.bfloat16: halves HBM traffic, bf16 MXU
        x = x.astype(compute_dtype)
        W = W.astype(compute_dtype)

    # diag(W) and bias merged into one (2, D) f32 side band — a single DMA stream
    # replacing both the dense (D, D) mask and two separate (1, D) inputs.
    db = jnp.stack([jnp.diagonal(W).astype(jnp.float32),
                    b.astype(jnp.float32)], axis=0)

    out_dtype = x.dtype
    itemsize = jnp.dtype(x.dtype).itemsize
    budget = _vmem_budget_bytes()
    params = dict(vmem_limit_bytes=budget)

    plan = _plan_full_k(B, D, itemsize, budget)
    if plan is not None:
        tm, tn = plan
        grid = (B // tm, D // tn)
        return pl.pallas_call(
            partial(_fr_kernel_full_k, precision=precision),
            out_shape=jax.ShapeDtypeStruct((B, D), out_dtype),
            grid_spec=pltpu.PrefetchScalarGridSpec(
                num_scalar_prefetch=0,
                grid=grid,
                in_specs=[
                    pl.BlockSpec((tm, D), lambda i, j: (i, 0)),   # x  (full K rows)
                    pl.BlockSpec((tn, D), lambda i, j: (j, 0)),   # W  (natural (out, in))
                    pl.BlockSpec((2, tn), lambda i, j: (0, j)),   # [diag(W); bias]
                ],
                out_specs=pl.BlockSpec((tm, tn), lambda i, j: (i, j)),
            ),
            compiler_params=pltpu.CompilerParams(
                dimension_semantics=("parallel", "parallel"), **params),
            interpret=interpret,
        )(x, W, db)

    # ---- Tiled-K fallback (only for very large D that cannot hold full rows) ----
    tnk = _pick_tile(D, (512, 256, 128))   # tn == tk (required by the k == j trick)
    tm = _pick_tile(B, (512, 256, 128, 64, 32, 16, 8))
    while (tm > 8 and B % (tm // 2) == 0 and (tm // 2) % 8 == 0 and
           2 * (tm * tnk + tnk * tnk + tm * tnk) * itemsize + tm * tnk * 4 > budget):
        tm //= 2
    grid = (B // tm, D // tnk, D // tnk)
    return pl.pallas_call(
        partial(_fr_kernel_tiled_k, precision=precision),
        out_shape=jax.ShapeDtypeStruct((B, D), out_dtype),
        grid_spec=pltpu.PrefetchScalarGridSpec(
            num_scalar_prefetch=0,
            grid=grid,
            in_specs=[
                pl.BlockSpec((tm, tnk), lambda i, j, k: (i, k)),   # x
                pl.BlockSpec((tnk, tnk), lambda i, j, k: (j, k)),  # W
                pl.BlockSpec((2, tnk), lambda i, j, k: (0, j)),    # [diag(W); bias]
            ],
            out_specs=pl.BlockSpec((tm, tnk), lambda i, j, k: (i, j)),
            scratch_shapes=[pltpu.VMEM((tm, tnk), jnp.float32)],
        ),
        compiler_params=pltpu.CompilerParams(
            dimension_semantics=("parallel", "parallel", "arbitrary"), **params),
        interpret=interpret,
    )(x, W, db)


# ---------------------------------------------------------------------------
# Self-check
# ---------------------------------------------------------------------------

def _run_check(key, batch, input_size):
    k_x, k_w, k_b = jax.random.split(key, 3)

    # Deterministic "reset_parameters": uniform(-stdv, stdv), stdv = 1/sqrt(input_size)
    stdv = 1.0 / math.sqrt(input_size)
    W = jax.random.uniform(k_w, (input_size, input_size),
                           minval=-stdv, maxval=stdv, dtype=jnp.float32)
    b = jax.random.uniform(k_b, (input_size,),
                           minval=-stdv, maxval=stdv, dtype=jnp.float32)
    x = jax.random.normal(k_x, (batch, input_size), dtype=jnp.float32)

    z_h = feature_regression(x, W, b)
    jax.block_until_ready(z_h)

    # Reference: same semantics as F.linear(x, W * (ones - eye), b)
    m = (jnp.ones((input_size, input_size), jnp.float32)
         - jnp.eye(input_size, dtype=jnp.float32))
    ref = jnp.dot(x, (W * m).T, precision=jax.lax.Precision.HIGHEST) + b
    assert jnp.allclose(z_h, ref, atol=1e-4, rtol=1e-4), (
        f"mismatch vs reference at B={batch}, D={input_size}")


if __name__ == "__main__":
    key = jax.random.PRNGKey(0)
    k1, k2 = jax.random.split(key, 2)

    # Moderate shape: full-K path, 2x1 grid (both parallel axes, no reduction axis).
    _run_check(k1, batch=256, input_size=512)

    # Tiny shape: full-extent blocks, single-step grid.
    _run_check(k2, batch=4, input_size=32)

    # TODO(synk): for production, consider compute_dtype=jnp.bfloat16 (bf16 MXU,
    # half the HBM traffic) when the surrounding imputation model tolerates it.
    print("KERNEL_OK")
</pallas_src>

<mosaic_0001>
module attributes {stable_mosaic.version = 11 : i64} {
  func.func @_fr_kernel_full_k(%arg0: i32, %arg1: i32, %arg2: memref<128x512xf32, #tpu.memory_space<vmem>>, %arg3: memref<512x512xf32, #tpu.memory_space<vmem>>, %arg4: memref<2x512xf32, #tpu.memory_space<vmem>>, %arg5: memref<128x512xf32, #tpu.memory_space<vmem>>) attributes {dimension_semantics = [#tpu.dimension_semantics<parallel>, #tpu.dimension_semantics<parallel>], iteration_bounds = array<i64: 2, 1>, scalar_prefetch = 0 : i64, scratch_operands = 0 : i64, tpu.core_type = #tpu.core_type<tc>, window_params = [{transform_indices = @transform_0, window_bounds = array<i64: 128, 512>}, {transform_indices = @transform_1, window_bounds = array<i64: 512, 512>}, {transform_indices = @transform_2, window_bounds = array<i64: 2, 512>}, {transform_indices = @transform_3, window_bounds = array<i64: 128, 512>}]} {
    %c0 = arith.constant 0 : index
    %c0_0 = arith.constant 0 : index
    %0 = vector.load %arg2[%c0, %c0_0] : memref<128x512xf32, #tpu.memory_space<vmem>>, vector<128x512xf32>
    %c0_1 = arith.constant 0 : index
    %c0_2 = arith.constant 0 : index
    %1 = vector.load %arg3[%c0_1, %c0_2] : memref<512x512xf32, #tpu.memory_space<vmem>>, vector<512x512xf32>
    %cst = arith.constant dense<0.000000e+00> : vector<128x512xf32>
    %2 = tpu.matmul %0, %1, %cst {dimension_numbers = #tpu.dot_dimension_numbers<[1], [1], [0], [0], [0, 0, 1, 0], [], []>, precision = #tpu.contract_precision<fp32>} : vector<128x512xf32>, vector<512x512xf32>, vector<128x512xf32> -> vector<128x512xf32>
    %c0_3 = arith.constant 0 : index
    %c0_4 = arith.constant 0 : index
    %3 = vector.load %arg2[%c0_3, %c0_4] : memref<128x512xf32, #tpu.memory_space<vmem>>, vector<128x512xf32>
    %c0_5 = arith.constant 0 : index
    %c0_6 = arith.constant 0 : index
    %4 = vector.load %arg4[%c0_5, %c0_6] : memref<2x512xf32, #tpu.memory_space<vmem>>, vector<1x512xf32>
    %c1 = arith.constant 1 : index
    %c0_7 = arith.constant 0 : index
    %5 = vector.load %arg4[%c1, %c0_7] : memref<2x512xf32, #tpu.memory_space<vmem>>, vector<1x512xf32>
    %6 = vector.broadcast %4 : vector<1x512xf32> to vector<128x512xf32>
    %7 = arith.mulf %3, %6 : vector<128x512xf32>
    %8 = arith.subf %2, %7 : vector<128x512xf32>
    %9 = vector.broadcast %5 : vector<1x512xf32> to vector<128x512xf32>
    %10 = arith.addf %8, %9 : vector<128x512xf32>
    %c0_8 = arith.constant 0 : index
    %c0_9 = arith.constant 0 : index
    %11 = vector.load %arg5[%c0_8, %c0_9] : memref<128x512xf32, #tpu.memory_space<vmem>>, vector<128x512xf32>
    tpu.vector_store %arg5[%c0_8, %c0_9], %10 {strides = array<i32>} : memref<128x512xf32, #tpu.memory_space<vmem>>, vector<128x512xf32>,
    return
  }
  func.func @transform_0(%arg0: i32, %arg1: i32) -> (i32, i32) {
    %c0_i32 = arith.constant 0 : i32
    %c0_i32_0 = arith.constant 0 : i32
    return %arg0, %c0_i32 : i32, i32
  }
  func.func @transform_1(%arg0: i32, %arg1: i32) -> (i32, i32) {
    %c0_i32 = arith.constant 0 : i32
    %c0_i32_0 = arith.constant 0 : i32
    return %arg1, %c0_i32 : i32, i32
  }
  func.func @transform_2(%arg0: i32, %arg1: i32) -> (i32, i32) {
    %c0_i32 = arith.constant 0 : i32
    %c0_i32_0 = arith.constant 0 : i32
    return %c0_i32, %arg1 : i32, i32
  }
  func.func @transform_3(%arg0: i32, %arg1: i32) -> (i32, i32) {
    %c0_i32 = arith.constant 0 : i32
    return %arg0, %arg1 : i32, i32
  }
}

</mosaic_0001>

<bundles_post_ra>
// kernel: tpu_custom_call.1
= control target key start
LH: loop header
LB: loop body
LE: loop exit
PB: predicated region body
PF: predicated region fallthrough
CT: control target
= control target key end

     0   :  { %8 = vsyncpa [#allocation3], 0  ;;  %s18714_s0 = inlined_call_operand.hbm [shape: f32[256,512], index: 0, kind: input, shape index: {}]   ;;  %s18715_s1 = inlined_call_operand.hbm [shape: f32[512,512], index: 1, kind: input, shape index: {}]   ;;  %s18716_s2 = inlined_call_operand.hbm [shape: f32[2,512], index: 2, kind: input, shape index: {}]   ;;  %s18717_s3 = inlined_call_operand.hbm [shape: f32[256,512], index: 3, kind: output, shape index: {}]  }
   0x1   :  { %10 = vsyncpa [#allocation3 + $0x1], 0 }
   0x2   :  { %11 = vsyncpa [#allocation6], 0 }
   0x3   :  { %12 = vsyncpa [#allocation4], 0 }
   0x4   :  { %14 = vsyncpa [#allocation4 + $0x1], 0  ;;  %s12472_s12 = smov 0   ;;  %s12474_s13 = smov 0  }
   0x5   :  { %s12476_s14 = smov 0   ;;  %s12478_s15 = smov 0  }
   0x6   :  { %s12480_s16 = smov 0   ;;  %s12482_s17 = smov 0  }
   0x7 LB: > { %s9854_s18 = sadd.s32 4294967295, %s12442_s17   ;;  %s9855_s19 = sadd.s32 4294967294, %s12442_s17   ;;  %s12442_s17 = sphi %s12482_s17, %s20_s17   ;;  %s12438_s16 = sphi %s12480_s16, %s22575_s16   ;;  %s12434_s15 = sphi %s12478_s15, %s22574_s15   ;;  %s12430_s14 = sphi %s12476_s14, %s22573_s14   ;;  %s12426_s13 = sphi %s12474_s13, %s22572_s13   ;;  %s12422_s12 = sphi %s12472_s12, %s22571_s12  }
   0x8   : > { %p52_p0 = scmp.ne.s32.totalorder %s12426_s13, %s12422_s12  ;;  %p12506_p1 = scmp.eq.s32.totalorder %s9854_s18, 0 }
   0x9   : > { %p12510_p2 = scmp.eq.s32.totalorder %s9854_s18, 1  ;;  %p136_p3 = scmp.eq.s32.totalorder %s9855_s19, 1 }
   0xa   : > { %s20199_s20 = scalar_select %p12506_p1, 1, 0 }
   0xb   : > { %p12516_p4 = por %p12506_p1, %p52_p0  ;;  %p9856_p5 = scmp.ge.s32.totalorder %s12442_s17, 1 }
   0xc   : > { %p12521_p6 = por %p136_p3, %p52_p0  ;;  %p143_p7 = scmp.lt.s32.totalorder %s12442_s17, 3 }
   0xd   : > { %s20201_s22 = scalar_select %p12516_p4, 1, 0 }
   0xe   : > { %s20202_s23 = scalar_select %p12521_p6, 1, 0 }
   0xf   : > { %p12526_p8 = pnand %p9856_p5, %p143_p7  ;;  %s12444_s25 = smov [#allocation5]  }
  0x10   : > { %s159_s26 = sshll.u32 %s12444_s25, 4  ;;  %s12445_s28 = smov [#allocation7]   ;;  %s12530_s26 = int_to_ptr.vmem [resolvable:$true] %s159_s26 }
  0x11   : > { %p12131_p9 = pneg %p12526_p8  ;;  %s176_s29 = sshll.u32 %s12445_s28, 4  ;;  %s12541_s29 = int_to_ptr.vmem [resolvable:$true] %s176_s29 }
  0x12   : > { %s12270_s5 = scalar_lea.hbm %s18715_s1, 32768 }
  0x13   : > { %p12537_p11 = pnand %p12131_p9, %p12506_p1  ;;  %p12271_p12 = scmp.ne.s32.totalorder %s18715_s1, %s12270_s5 }
  0x14   : > { %p12277_p5 = scmp.lt.u32.totalorder %s12270_s5, %s18715_s1 }
  0x15   : > { %p12272_p13 = pneg %p12537_p11 }
  0x17   : > { %p12273_p0 = pnand %p12272_p13, %p12271_p12 }
  0x19   : > { %p12274_p3 = pneg %p12273_p0 }
  0x1b   : > { %p12279_p7 = pnand %p12277_p5, %p12274_p3 }
  0x1d   : > { %12282 = shalt.err (!%p12279_p7)
}
  0x1e   : > { %s12283_s10 = scalar_lea.vmem %s12530_s26, 32768  ;;  %p12291_p1 = scmp.lt.s32.totalorder %s12530_s26, %s12530_s26 }
  0x1f   : > { %p12284_p9 = scmp.ne.s32.totalorder %s12530_s26, %s12283_s10  ;;  %p12292_p12 = scmp.lt.s32.totalorder %s12283_s10, %s12283_s10 }
  0x21   : > { %p12286_p10 = pnand %p12284_p9, %p12272_p13  ;;  %p12293_p0 = por %p12292_p12, %p12291_p1 }
  0x23   : > { %p12287_p6 = pneg %p12286_p10 }
  0x25   : > { %p12294_p4 = pnand %p12293_p0, %p12287_p6 }
  0x27   : > { %12297 = shalt.err (!%p12294_p4)
}
  0x28   : > { %s12446_s11 = smov 512   ;;  %s12447_s18 = smov 32  }
  0x29   : > { %12134 = dma.hbm_to_vmem [thread:$0]  (!%p12537_p11), %s18715_s1, 32768, %s12530_s26, [#allocation6], %s12446_s11, %s12446_s11, %s12447_s18  }
  0x2a   : > { %s12298_s4 = scalar_lea.hbm %s18716_s2, 128 }
  0x2b   : > { %p12299_p1 = scmp.ne.s32.totalorder %s18716_s2, %s12298_s4  ;;  %p12305_p10 = scmp.lt.u32.totalorder %s12298_s4, %s18716_s2 }
  0x2d   : > { %p12301_p4 = pnand %p12299_p1, %p12272_p13 }
  0x2f   : > { %p12302_p6 = pneg %p12301_p4 }
  0x31   : > { %p12307_p3 = pnand %p12305_p10, %p12302_p6 }
  0x33   : > { %12310 = shalt.err (!%p12307_p3)
}
  0x34   : > { %s12311_s26 = scalar_lea.vmem %s12541_s29, 128  ;;  %p12319_p12 = scmp.lt.s32.totalorder %s12541_s29, %s12541_s29 }
  0x35   : > { %p12312_p5 = scmp.ne.s32.totalorder %s12541_s29, %s12311_s26  ;;  %p12320_p0 = scmp.lt.s32.totalorder %s12311_s26, %s12311_s26 }
  0x37   : > { %p12314_p7 = pnand %p12312_p5, %p12272_p13  ;;  %p12321_p1 = por %p12320_p0, %p12319_p12 }
  0x39   : > { %p12315_p9 = pneg %p12314_p7 }
  0x3b   : > { %p12322_p4 = pnand %p12321_p1, %p12315_p9 }
  0x3d   : > { %12325 = shalt.err (!%p12322_p4)
}
  0x3e   : > { %12137 = dma.hbm_to_vmem [thread:$0]  (!%p12537_p11), %s18716_s2, 128, %s12541_s29, [#allocation6]  }
  0x3f   : > { %s32_s19 = sadd.s32 1, %s12438_s16  ;;  %s39_s25 = sadd.s32 1, %s12430_s14 }
  0x40   : > { %p34_p13 = scmp.ge.s32.totalorder %s32_s19, 2  ;;  %p46_p6 = scmp.ne.s32.totalorder %s12430_s14, %s12426_s13 }
  0x41   : > { %p47_p10 = scmp.eq.s32.totalorder %s12442_s17, 0  ;;  %p12148_p3 = scmp.lt.s32.totalorder %s12442_s17, 2 }
  0x42   : > { %s22577_s19 = smov (%p34_p13, %s32_s19), 0  ;;  %p12608_p7 = por %p12510_p2, %p46_p6 }
  0x43   : > { %p48_p5 = por %p47_p10, %p46_p6  ;;  %s36_s28 = ssub.s32 %s12438_s16, %s22577_s19 }
  0x44   : > { %s20205_s27 = scalar_select %p12608_p7, 1, 0 }
  0x45   : > { %s187_s30 = sand.u32 1, %s12430_s14   ;;  %p37_p9 = scmp.eq.s32.totalorder %s36_s28, 0 }
  0x46   : > { %s9860_s29 = sshll.u32 %s187_s30, 9  ;;  %s9876_s4 = sshll.u32 %s12438_s16, 13 }
  0x47   : > { %s12617_s5 = scalar_select %p37_p9, %s12430_s14, %s39_s25  }
  0x48   : > { %s12622_s8 = scalar_lea.hbm %s18714_s0, %s9876_s4  ;;  %s191_s21 = scalar_lea.vmem [#allocation2], %s9860_s29 }
  0x49   : > { %s199_s26 = sshll.u32 %s191_s21, 4  ;;  %p12626_p2 = pnand %p12148_p3, %p48_p5  ;;  %s12630_s26 = int_to_ptr.vmem [resolvable:$true] %s199_s26 }
  0x4a   : > { %s12632_s10 = scalar_lea.sflag [#allocation3], %s187_s30  ;;  %s12326_s25 = scalar_lea.hbm %s12622_s8, 8192 }
  0x4b   : > { %p12327_p11 = scmp.ne.s32.totalorder %s12622_s8, %s12326_s25  ;;  %p12328_p12 = pneg %p12626_p2 }
  0x4c   : > { %s12331_s4 = scalar_lea.hbm %s18714_s0, 16384  ;;  %p12332_p4 = scmp.lt.u32.totalorder %s12622_s8, %s18714_s0 }
  0x4d   : > { %p12329_p0 = pnand %p12328_p12, %p12327_p11  ;;  %p12333_p13 = scmp.lt.u32.totalorder %s12331_s4, %s12326_s25 }
  0x4e   : > { %p12335_p10 = scmp.lt.u32.totalorder %s12326_s25, %s12622_s8 }
  0x4f   : > { %p12330_p1 = pneg %p12329_p0  ;;  %p12334_p6 = por %p12333_p13, %p12332_p4 }
  0x51   : > { %p12336_p3 = por %p12335_p10, %p12334_p6 }
  0x53   : > { %p12337_p5 = pnand %p12336_p3, %p12330_p1 }
  0x55   : > { %12340 = shalt.err (!%p12337_p5)
}
  0x56   : > { %s12341_s30 = scalar_lea.vmem %s12630_s26, 8192  ;;  %s12448_s21 = smov [#allocation2]  }
  0x57   : > { %p12342_p9 = scmp.ne.s32.totalorder %s12630_s26, %s12341_s30  ;;  %s12346_s28 = sshll.u32 %s12448_s21, 4  ;;  %s12347_s28 = int_to_ptr.vmem [resolvable:$false] %s12346_s28 }
  0x58   : > { %s12348_s29 = scalar_lea.vmem %s12347_s28, 16384  ;;  %p12349_p7 = scmp.lt.s32.totalorder %s12630_s26, %s12347_s28 }
  0x59   : > { %p12344_p11 = pnand %p12342_p9, %p12328_p12  ;;  %p12350_p4 = scmp.lt.s32.totalorder %s12348_s29, %s12341_s30 }
  0x5b   : > { %p12345_p0 = pneg %p12344_p11  ;;  %p12351_p13 = por %p12350_p4, %p12349_p7 }
  0x5d   : > { %p12352_p6 = pnand %p12351_p13, %p12345_p0 }
  0x5f   : > { %12355 = shalt.err (!%p12352_p6)
}
  0x60   : > { %12141 = dma.hbm_to_vmem [thread:$0]  (!%p12626_p2), %s12622_s8, 8192, %s12630_s26, %s12632_s10, %s12446_s11, %s12446_s11, %s12447_s18  }
  0x61   : > { %211 = sbr.rel (%p12526_p8) target bundleno = 1970 (0x7b2), region = 32 }
  0x68   : > { %s12666_s25 = sand.u32 1, %s12426_s13   ;;  %p20207_p7 = scmp.ne.s32.totalorder %s20201_s22, 0 }
  0x69   : > { %s9865_s4 = sshll.u32 %s12666_s25, 9  ;;  %s214_s6 = scalar_lea.sflag [#allocation3], %s12666_s25 }
  0x6a   : > { %s12672_s9 = scalar_lea.vmem [#allocation2], %s9865_s4 }
  0x6b   : > { %12409 = dma.done.wait (%p20207_p7), %s214_s6, 8192  }
  0x6c   : > { %12411 = vsyncadd (%p20207_p7), %s214_s6, 4294959104  ;;  %p20208_p2 = scmp.ne.s32.totalorder %s20199_s20, 0 }
  0x6e   : > { %12413 = dma.done.wait (%p20208_p2), [#allocation6], 32896  }
  0x6f   : > { %12415 = vsyncadd (%p20208_p2), [#allocation6], 4294934400  ;;  %v318_v0 = vld [vmem:[#allocation5 + $0x8] sm:$0xff]  ;;  %v317_v7 = vld [vmem:[#allocation5] sm:$0xff]  ;;  %s18416_s20 = scalar_lea.vmem [#allocation8], %s9865_s4  ;;  %s9878_s22 = sshll.u32 %s12434_s15, 13 }
  0x70   : > { %v322_v1 = vld [vmem:[#allocation5 + $0x28] sm:$0xff]  ;;  %v573_v3 = vand.u32 4294901760, %v318_v0  ;;  %v321_v8 = vld [vmem:[#allocation5 + $0x20] sm:$0xff]  ;;  %v575_v10 = vand.u32 4294901760, %v317_v7  ;;  %s9747_s24 = sshll.u32 %s18416_s20, 4  ;;  %s18660_s8 = scalar_lea.hbm %s18717_s3, %s9878_s22  ;;  %s18662_s24 = int_to_ptr.vmem [resolvable:$true] %s9747_s24 }
  0x71   : > { %v446_v2 = vld [vmem:[#allocation5 + $0x408] sm:$0xff]  ;;  %v577_v4 = vand.u32 4294901760, %v322_v1  ;;  %v579_v11 = vand.u32 4294901760, %v321_v8  ;;  %v445_v12 = vld [vmem:[#allocation5 + $0x400] sm:$0xff]  ;;  %s9731_s15 = scalar_lea.sflag [#allocation4], %s12666_s25  ;;  %s12356_s26 = scalar_lea.vmem %s18662_s24, 8192 }
  0x72   : > { %v450_v5 = vld [vmem:[#allocation5 + $0x428] sm:$0xff]  ;;  %v5001_v6 = vand.u32 4294901760, %v446_v2  ;;  %v449_v13 = vld [vmem:[#allocation5 + $0x420] sm:$0xff]  ;;  %v12684_v16 = vsub.f32 %v318_v0, %v573_v3  ;;  %v12696_v25 = vsub.f32 %v317_v7, %v575_v10  ;;  %v5003_v28 = vand.u32 4294901760, %v445_v12  ;;  %p12357_p8 = scmp.ne.s32.totalorder %s18662_s24, %s12356_s26  ;;  %p22568_p12 = scmp.ne.s32.totalorder %s20205_s27, 0 }
  0x73   : > { %v5005_v9 = vand.u32 4294901760, %v450_v5  ;;  %v326_v14 = vld [vmem:[#allocation5 + $0x48] sm:$0xff]  ;;  %v12682_v15 = vpack.c.bf16 %v577_v4, %v573_v3  ;;  %v12686_v17 = vsub.f32 %v322_v1, %v577_v4  ;;  %v12694_v24 = vpack.c.bf16 %v579_v11, %v575_v10  ;;  %v325_v26 = vld [vmem:[#allocation5 + $0x40] sm:$0xff]  ;;  %s12449_s10 = smov [#allocation8]  }
  0x74   : > { %20210 = vst [vmem:[#allocation13_spill] sm:$0xff] %v12684_v16  ;;  %v12688_v18 = vsub.f32 %v446_v2, %v5001_v6  ;;  %v330_v19 = vld [vmem:[#allocation5 + $0x68] sm:$0xff]  ;;  %20216 = vst [vmem:[#allocation19_spill] sm:$0xff] %v12696_v25  ;;  %v12699_v27 = vsub.f32 %v321_v8, %v579_v11  ;;  %v5007_v29 = vand.u32 4294901760, %v449_v13  ;;  %v581_v30 = vand.u32 4294901760, %v326_v14  ;;  %v329_v31 = vld [vmem:[#allocation5 + $0x60] sm:$0xff]  ;;  %p12358_p1 = pnand %p12357_p8, %p22568_p12 }
  0x75   : > { %20209 = vst [vmem:[#allocation12_spill] sm:$0xff] %v12682_v15  ;;  %20211 = vst [vmem:[#allocation14_spill] sm:$0xff] %v12686_v17  ;;  %v454_v20 = vld [vmem:[#allocation5 + $0x448] sm:$0xff]  ;;  %v12690_v22 = vpack.c.bf16 %v5005_v9, %v5001_v6  ;;  %v12692_v23 = vsub.f32 %v450_v5, %v5005_v9  ;;  %9880 = vmatprep.subr.bf16.mxu0 %v12682_v15  ;;  %v585_v32 = vand.u32 4294901760, %v330_v19  ;;  %v583_v35 = vand.u32 4294901760, %v325_v26  ;;  %v453_v36 = vld [vmem:[#allocation5 + $0x440] sm:$0xff] }
  0x76   : > { %20212 = vst [vmem:[#allocation15_spill] sm:$0xff] %v12688_v18  ;;  %v458_v21 = vld [vmem:[#allocation5 + $0x468] sm:$0xff]  ;;  %20215 = vst [vmem:[#allocation18_spill] sm:$0xff] %v12694_v24  ;;  %9882 = vmatpush1.bf16.xpose.msra.mxu0 %v12694_v24  ;;  %v5009_v33 = vand.u32 4294901760, %v454_v20  ;;  %v457_v37 = vld [vmem:[#allocation5 + $0x460] sm:$0xff]  ;;  %v12703_v38 = vpack.c.bf16 %v5007_v29, %v5003_v28  ;;  %v12705_v39 = vsub.f32 %v445_v12, %v5003_v28  ;;  %v587_v51 = vand.u32 4294901760, %v329_v31  ;;  %p12359_p10 = pneg %p12358_p1 }
  0x77   : > { %20213 = vst [vmem:[#allocation16_spill] sm:$0xff] %v12690_v22  ;;  %20214 = vst [vmem:[#allocation17_spill] sm:$0xff] %v12692_v23  ;;  %10648 = vmatprep.subr.bf16.mxu1 %v12690_v22  ;;  %v5013_v34 = vand.u32 4294901760, %v458_v21  ;;  %v12707_v40 = vsub.f32 %v449_v13, %v5007_v29  ;;  %v12709_v41 = vsub.f32 %v326_v14, %v581_v30  ;;  %v334_v42 = vld [vmem:[#allocation5 + $0x88] sm:$0xff]  ;;  %v5011_v53 = vand.u32 4294901760, %v453_v36  ;;  %v333_v58 = vld [vmem:[#allocation5 + $0x80] sm:$0xff] }
  0x78   : > { %20217 = vst [vmem:[#allocation20_spill] sm:$0xff] %v12699_v27  ;;  %20218 = vst [vmem:[#allocation21_spill] sm:$0xff] %v12703_v38  ;;  %v338_v43 = vld [vmem:[#allocation5 + $0xa8] sm:$0xff]  ;;  %v12711_v45 = vpack.c.bf16 %v585_v32, %v581_v30  ;;  %v12713_v46 = vsub.f32 %v330_v19, %v585_v32  ;;  %v12717_v48 = vsub.f32 %v454_v20, %v5009_v33  ;;  %10650 = vmatpush1.bf16.xpose.msra.mxu1 %v12703_v38  ;;  %v337_v59 = vld [vmem:[#allocation5 + $0xa0] sm:$0xff]  ;;  %s12360_s7 = sshll.u32 %s12449_s10, 4  ;;  %s12361_s7 = int_to_ptr.vmem [resolvable:$false] %s12360_s7 }
  0x79   : > { %20219 = vst [vmem:[#allocation22_spill] sm:$0xff] %v12705_v39  ;;  %20220 = vst [vmem:[#allocation23_spill] sm:$0xff] %v12707_v40  ;;  %v462_v44 = vld [vmem:[#allocation5 + $0x488] sm:$0xff]  ;;  %v12715_v47 = vpack.c.bf16 %v5013_v34, %v5009_v33  ;;  %v12720_v50 = vsub.f32 %v458_v21, %v5013_v34  ;;  %v12722_v52 = vsub.f32 %v325_v26, %v583_v35  ;;  %v5015_v54 = vand.u32 4294901760, %v457_v37  ;;  %v461_v0 = vld [vmem:[#allocation5 + $0x480] sm:$0xff]  ;;  %s12362_s30 = scalar_lea.vmem %s12361_s7, 16384  ;;  %p12363_p3 = scmp.lt.s32.totalorder %s18662_s24, %s12361_s7 }
  0x7a   : > { %20221 = vst [vmem:[#allocation24_spill] sm:$0xff] %v12709_v41  ;;  %20222 = vst [vmem:[#allocation25_spill] sm:$0xff] %v12711_v45  ;;  %v466_v49 = vld [vmem:[#allocation5 + $0x4a8] sm:$0xff]  ;;  %9884 = vmatprep.subr.bf16.mxu0 %v12711_v45  ;;  %v589_v55 = vand.u32 4294901760, %v334_v42  ;;  %v593_v56 = vand.u32 4294901760, %v338_v43  ;;  %v5017_v57 = vand.u32 4294901760, %v462_v44  ;;  %v12726_v60 = vpack.c.bf16 %v587_v51, %v583_v35  ;;  %p12364_p5 = scmp.lt.s32.totalorder %s12362_s30, %s12356_s26 }
  0x7b   : > { %20223 = vst [vmem:[#allocation26_spill] sm:$0xff] %v12713_v46  ;;  %20224 = vst [vmem:[#allocation27_spill] sm:$0xff] %v12715_v47  ;;  %10652 = vmatprep.subr.bf16.mxu1 %v12715_v47  ;;  %v12728_v61 = vsub.f32 %v329_v31, %v587_v51  ;;  %v12730_v62 = vsub.f32 %v453_v36, %v5011_v53  ;;  %v5021_v63 = vand.u32 4294901760, %v466_v49  ;;  %v465_v1 = vld [vmem:[#allocation5 + $0x4a0] sm:$0xff]  ;;  %v342_v2 = vld [vmem:[#allocation5 + $0xc8] sm:$0xff]  ;;  %v591_v14 = vand.u32 4294901760, %v333_v58 }
  0x7c   : > { %20225 = vst [vmem:[#allocation28_spill] sm:$0xff] %v12717_v48  ;;  %20226 = vst [vmem:[#allocation29_spill] sm:$0xff] %v12720_v50  ;;  %v12732_v3 = vpack.c.bf16 %v5015_v54, %v5011_v53  ;;  %v12734_v4 = vsub.f32 %v457_v37, %v5015_v54  ;;  %v12736_v5 = vpack.c.bf16 %v593_v56, %v589_v55  ;;  %v346_v7 = vld [vmem:[#allocation5 + $0xe8] sm:$0xff]  ;;  %v595_v19 = vand.u32 4294901760, %v337_v59  ;;  %v341_v31 = vld [vmem:[#allocation5 + $0xc0] sm:$0xff]  ;;  %p12365_p9 = por %p12364_p5, %p12363_p3 }
  0x7d   : > { %20227 = vst [vmem:[#allocation30_spill] sm:$0xff] %v12722_v52  ;;  %20228 = vst [vmem:[#allocation31_spill] sm:$0xff] %v12726_v60  ;;  %v12738_v6 = vsub.f32 %v334_v42, %v589_v55  ;;  %v470_v8 = vld [vmem:[#allocation5 + $0x4c8] sm:$0xff]  ;;  %v12740_v10 = vsub.f32 %v338_v43, %v593_v56  ;;  %v12742_v11 = vpack.c.bf16 %v5021_v63, %v5017_v57  ;;  %v5019_v20 = vand.u32 4294901760, %v461_v0  ;;  %v345_v32 = vld [vmem:[#allocation5 + $0xe0] sm:$0xff] }
  0x7e   : > { %20229 = vst [vmem:[#allocation32_spill] sm:$0xff] %v12728_v61  ;;  %20230 = vst [vmem:[#allocation33_spill] sm:$0xff] %v12730_v62  ;;  %v474_v9 = vld [vmem:[#allocation5 + $0x4e8] sm:$0xff]  ;;  %v12744_v12 = vsub.f32 %v462_v44, %v5017_v57  ;;  %v12746_v13 = vsub.f32 %v466_v49, %v5021_v63  ;;  %9886 = vmatpush1.bf16.xpose.msra.mxu0 %v12726_v60  ;;  %v5023_v21 = vand.u32 4294901760, %v465_v1  ;;  %v597_v26 = vand.u32 4294901760, %v342_v2  ;;  %v469_v37 = vld [vmem:[#allocation5 + $0x4c0] sm:$0xff]  ;;  %p12366_p11 = pnand %p12365_p9, %p12359_p10 }
  0x7f   : > { %20231 = vst [vmem:[#allocation34_spill] sm:$0xff] %v12732_v3  ;;  %20232 = vst [vmem:[#allocation35_spill] sm:$0xff] %v12734_v4  ;;  %9888 = vmatprep.subr.bf16.mxu0 %v12736_v5  ;;  %v601_v28 = vand.u32 4294901760, %v346_v7  ;;  %v5025_v29 = vand.u32 4294901760, %v470_v8  ;;  %v5029_v30 = vand.u32 4294901760, %v474_v9  ;;  %v12750_v33 = vpack.c.bf16 %v595_v19, %v591_v14  ;;  %v473_v42 = vld [vmem:[#allocation5 + $0x4e0] sm:$0xff] }
  0x80   : > { %20233 = vst [vmem:[#allocation36_spill] sm:$0xff] %v12736_v5  ;;  %20234 = vst [vmem:[#allocation37_spill] sm:$0xff] %v12738_v6  ;;  %v12752_v34 = vsub.f32 %v333_v58, %v591_v14  ;;  %v12754_v35 = vsub.f32 %v337_v59, %v595_v19  ;;  %v12756_v36 = vpack.c.bf16 %v5023_v21, %v5019_v20  ;;  %v350_v43 = vld [vmem:[#allocation5 + $0x108] sm:$0xff]  ;;  %10654 = vmatpush1.bf16.xpose.msra.mxu1 %v12732_v3  ;;  %v349_v3 = vld [vmem:[#allocation5 + $0x100] sm:$0xff] }
  0x81   : > { %20235 = vst [vmem:[#allocation38_spill] sm:$0xff] %v12740_v10  ;;  %20236 = vst [vmem:[#allocation39_spill] sm:$0xff] %v12742_v11  ;;  %v12759_v44 = vsub.f32 %v461_v0, %v5019_v20  ;;  %v12761_v49 = vsub.f32 %v465_v1, %v5023_v21  ;;  %v12763_v51 = vpack.c.bf16 %v601_v28, %v597_v26  ;;  %v354_v54 = vld [vmem:[#allocation5 + $0x128] sm:$0xff]  ;;  %10656 = vmatprep.subr.bf16.mxu1 %v12742_v11  ;;  %v353_v5 = vld [vmem:[#allocation5 + $0x120] sm:$0xff] }
  0x82   : > { %20237 = vst [vmem:[#allocation40_spill] sm:$0xff] %v12744_v12  ;;  %20238 = vst [vmem:[#allocation41_spill] sm:$0xff] %v12746_v13  ;;  %v12765_v53 = vsub.f32 %v342_v2, %v597_v26  ;;  %v478_v55 = vld [vmem:[#allocation5 + $0x508] sm:$0xff]  ;;  %v12768_v57 = vsub.f32 %v346_v7, %v601_v28  ;;  %v12770_v58 = vpack.c.bf16 %v5029_v30, %v5025_v29  ;;  %v599_v0 = vand.u32 4294901760, %v341_v31 }
  0x83   : > { %20239 = vst [vmem:[#allocation42_spill] sm:$0xff] %v12750_v33  ;;  %20240 = vst [vmem:[#allocation43_spill] sm:$0xff] %v12752_v34  ;;  %v482_v56 = vld [vmem:[#allocation5 + $0x528] sm:$0xff]  ;;  %v12772_v59 = vsub.f32 %v470_v8, %v5025_v29  ;;  %v12774_v63 = vsub.f32 %v474_v9, %v5029_v30  ;;  %v603_v1 = vand.u32 4294901760, %v345_v32  ;;  %v5027_v14 = vand.u32 4294901760, %v469_v37  ;;  %v477_v9 = vld [vmem:[#allocation5 + $0x500] sm:$0xff] }
  0x84   : > { %20241 = vst [vmem:[#allocation44_spill] sm:$0xff] %v12754_v35  ;;  %20242 = vst [vmem:[#allocation45_spill] sm:$0xff] %v12756_v36  ;;  %v5031_v19 = vand.u32 4294901760, %v473_v42  ;;  %v605_v20 = vand.u32 4294901760, %v350_v43  ;;  %v609_v2 = vand.u32 4294901760, %v354_v54  ;;  %v5033_v21 = vand.u32 4294901760, %v478_v55 }
  0x85   : > { %20243 = vst [vmem:[#allocation46_spill] sm:$0xff] %v12759_v44  ;;  %20244 = vst [vmem:[#allocation47_spill] sm:$0xff] %v12761_v49  ;;  %v5037_v26 = vand.u32 4294901760, %v482_v56  ;;  %v12776_v60 = vpack.c.bf16 %v603_v1, %v599_v0  ;;  %v12778_v7 = vsub.f32 %v341_v31, %v599_v0  ;;  %v12780_v28 = vsub.f32 %v345_v32, %v603_v1  ;;  %v481_v29 = vld [vmem:[#allocation5 + $0x520] sm:$0xff]  ;;  %v358_v30 = vld [vmem:[#allocation5 + $0x148] sm:$0xff] }
  0x86   : > { %20245 = vst [vmem:[#allocation48_spill] sm:$0xff] %v12763_v51  ;;  %20246 = vst [vmem:[#allocation49_spill] sm:$0xff] %v12765_v53  ;;  %v12782_v8 = vpack.c.bf16 %v5031_v19, %v5027_v14  ;;  %9890 = vmatpush1.bf16.xpose.msra.mxu0 %v12750_v33  ;;  %v12785_v11 = vsub.f32 %v469_v37, %v5027_v14  ;;  %v12787_v47 = vsub.f32 %v473_v42, %v5031_v19  ;;  %v362_v24 = vld [vmem:[#allocation5 + $0x168] sm:$0xff] }
  0x87   : > { %20247 = vst [vmem:[#allocation50_spill] sm:$0xff] %v12768_v57  ;;  %20248 = vst [vmem:[#allocation51_spill] sm:$0xff] %v12770_v58  ;;  %v12789_v38 = vpack.c.bf16 %v609_v2, %v605_v20  ;;  %v12791_v45 = vsub.f32 %v350_v43, %v605_v20  ;;  %v486_v31 = vld [vmem:[#allocation5 + $0x548] sm:$0xff]  ;;  %9892 = vmatprep.subr.bf16.mxu0 %v12763_v51  ;;  %v12794_v32 = vsub.f32 %v354_v54, %v609_v2  ;;  %v361_v51 = vld [vmem:[#allocation5 + $0x160] sm:$0xff] }
  0x88   : > { %20249 = vst [vmem:[#allocation52_spill] sm:$0xff] %v12772_v59  ;;  %20250 = vst [vmem:[#allocation53_spill] sm:$0xff] %v12774_v63  ;;  %v490_v0 = vld [vmem:[#allocation5 + $0x568] sm:$0xff]  ;;  %v12796_v1 = vpack.c.bf16 %v5037_v26, %v5033_v21  ;;  %v12798_v22 = vsub.f32 %v478_v55, %v5033_v21  ;;  %v12800_v33 = vsub.f32 %v482_v56, %v5037_v26  ;;  %v607_v37 = vand.u32 4294901760, %v349_v3  ;;  %v485_v21 = vld [vmem:[#allocation5 + $0x540] sm:$0xff] }
  0x89   : > { %20251 = vst [vmem:[#allocation54_spill] sm:$0xff] %v12776_v60  ;;  %20252 = vst [vmem:[#allocation55_spill] sm:$0xff] %v12778_v7  ;;  %v611_v42 = vand.u32 4294901760, %v353_v5  ;;  %v5035_v14 = vand.u32 4294901760, %v477_v9  ;;  %v5039_v19 = vand.u32 4294901760, %v481_v29  ;;  %10658 = vmatpush1.bf16.xpose.msra.mxu1 %v12756_v36  ;;  %v613_v43 = vand.u32 4294901760, %v358_v30 }
  0x8a   : > { %20253 = vst [vmem:[#allocation56_spill] sm:$0xff] %v12780_v28  ;;  %20254 = vst [vmem:[#allocation57_spill] sm:$0xff] %v12782_v8  ;;  %v617_v20 = vand.u32 4294901760, %v362_v24  ;;  %v5041_v15 = vand.u32 4294901760, %v486_v31  ;;  %10660 = vmatprep.subr.bf16.mxu1 %v12770_v58  ;;  %v12806_v55 = vsub.f32 %v349_v3, %v607_v37  ;;  %v489_v26 = vld [vmem:[#allocation5 + $0x560] sm:$0xff]  ;;  %v370_v58 = vld [vmem:[#allocation5 + $0x1a8] sm:$0xff] }
  0x8b   : > { %20255 = vst [vmem:[#allocation58_spill] sm:$0xff] %v12785_v11  ;;  %20256 = vst [vmem:[#allocation59_spill] sm:$0xff] %v12787_v47  ;;  %v357_v47 = vld [vmem:[#allocation5 + $0x140] sm:$0xff]  ;;  %v12804_v54 = vpack.c.bf16 %v611_v42, %v607_v37  ;;  %v12808_v56 = vsub.f32 %v353_v5, %v611_v42  ;;  %v12810_v2 = vpack.c.bf16 %v5039_v19, %v5035_v14  ;;  %v494_v28 = vld [vmem:[#allocation5 + $0x588] sm:$0xff] }
  0x8c   : > { %20257 = vst [vmem:[#allocation60_spill] sm:$0xff] %v12789_v38  ;;  %20258 = vst [vmem:[#allocation61_spill] sm:$0xff] %v12791_v45  ;;  %v5045_v45 = vand.u32 4294901760, %v490_v0  ;;  %v12812_v36 = vsub.f32 %v477_v9, %v5035_v14  ;;  %v12818_v11 = vsub.f32 %v358_v30, %v613_v43  ;;  %v498_v7 = vld [vmem:[#allocation5 + $0x5a8] sm:$0xff]  ;;  %v12820_v3 = vsub.f32 %v362_v24, %v617_v20 }
  0x8d   : > { %20259 = vst [vmem:[#allocation62_spill] sm:$0xff] %v12794_v32  ;;  %20260 = vst [vmem:[#allocation63_spill] sm:$0xff] %v12796_v1  ;;  %v12816_v32 = vpack.c.bf16 %v617_v20, %v613_v43  ;;  %v12824_v37 = vsub.f32 %v486_v31, %v5041_v15  ;;  %v619_v9 = vand.u32 4294901760, %v361_v51  ;;  %v5043_v14 = vand.u32 4294901760, %v485_v21  ;;  %v497_v20 = vld [vmem:[#allocation5 + $0x5a0] sm:$0xff]  ;;  %v502_v63 = vld [vmem:[#allocation5 + $0x5c8] sm:$0xff] }
  0x8e   : > { %20261 = vst [vmem:[#allocation64_spill] sm:$0xff] %v12798_v22  ;;  %20262 = vst [vmem:[#allocation65_spill] sm:$0xff] %v12800_v33  ;;  %v366_v33 = vld [vmem:[#allocation5 + $0x188] sm:$0xff]  ;;  %v12814_v22 = vsub.f32 %v481_v29, %v5039_v19  ;;  %v12822_v5 = vpack.c.bf16 %v5045_v45, %v5041_v15  ;;  %v12826_v42 = vsub.f32 %v490_v0, %v5045_v45  ;;  %v5047_v29 = vand.u32 4294901760, %v489_v26  ;;  %v493_v0 = vld [vmem:[#allocation5 + $0x580] sm:$0xff] }
  0x8f   : > { %20263 = vst [vmem:[#allocation66_spill] sm:$0xff] %v12804_v54  ;;  %20264 = vst [vmem:[#allocation67_spill] sm:$0xff] %v12806_v55  ;;  %9894 = vmatpush1.bf16.xpose.msra.mxu0 %v12776_v60  ;;  %v621_v19 = vand.u32 4294901760, %v366_v33  ;;  %v625_v30 = vand.u32 4294901760, %v370_v58  ;;  %v5049_v43 = vand.u32 4294901760, %v494_v28  ;;  %v12834_v45 = vsub.f32 %v361_v51, %v619_v9  ;;  %v506_v59 = vld [vmem:[#allocation5 + $0x5e8] sm:$0xff] }
  0x90   : > { %20265 = vst [vmem:[#allocation68_spill] sm:$0xff] %v12808_v56  ;;  %20266 = vst [vmem:[#allocation69_spill] sm:$0xff] %v12810_v2  ;;  %v615_v56 = vand.u32 4294901760, %v357_v47  ;;  %9896 = vmatprep.subr.bf16.mxu0 %v12789_v38  ;;  %v12836_v31 = vpack.c.bf16 %v5047_v29, %v5043_v14  ;;  %v12838_v60 = vsub.f32 %v485_v21, %v5043_v14  ;;  %v378_v38 = vld [vmem:[#allocation5 + $0x1e8] sm:$0xff]  ;;  %v5051_v14 = vand.u32 4294901760, %v493_v0 }
  0x91   : > { %20267 = vst [vmem:[#allocation70_spill] sm:$0xff] %v12812_v36  ;;  %20268 = vst [vmem:[#allocation71_spill] sm:$0xff] %v12814_v22  ;;  %v365_v22 = vld [vmem:[#allocation5 + $0x180] sm:$0xff]  ;;  %v12844_v55 = vsub.f32 %v366_v33, %v621_v19  ;;  %10662 = vmatpush1.bf16.xpose.msra.mxu1 %v12782_v8  ;;  %v5055_v33 = vand.u32 4294901760, %v497_v20  ;;  %v510_v57 = vld [vmem:[#allocation5 + $0x608] sm:$0xff] }
  0x92   : > { %20269 = vst [vmem:[#allocation72_spill] sm:$0xff] %v12816_v32  ;;  %20270 = vst [vmem:[#allocation73_spill] sm:$0xff] %v12818_v11  ;;  %v5053_v11 = vand.u32 4294901760, %v498_v7  ;;  %v369_v36 = vld [vmem:[#allocation5 + $0x1a0] sm:$0xff]  ;;  %v12830_v24 = vpack.c.bf16 %v619_v9, %v615_v56  ;;  %v12832_v15 = vsub.f32 %v357_v47, %v615_v56  ;;  %v12847_v47 = vsub.f32 %v370_v58, %v625_v30  ;;  %v514_v53 = vld [vmem:[#allocation5 + $0x628] sm:$0xff] }
  0x93   : > { %20271 = vst [vmem:[#allocation74_spill] sm:$0xff] %v12820_v3  ;;  %20272 = vst [vmem:[#allocation75_spill] sm:$0xff] %v12822_v5  ;;  %v12842_v3 = vpack.c.bf16 %v625_v30, %v621_v19  ;;  %v12851_v56 = vsub.f32 %v494_v28, %v5049_v43  ;;  %10664 = vmatprep.subr.bf16.mxu1 %v12796_v1  ;;  %v623_v21 = vand.u32 4294901760, %v365_v22  ;;  %v633_v19 = vand.u32 4294901760, %v378_v38  ;;  %v377_v8 = vld [vmem:[#allocation5 + $0x1e0] sm:$0xff]  ;;  %v382_v1 = vld [vmem:[#allocation5 + $0x208] sm:$0xff] }
  0x94   : > { %20273 = vst [vmem:[#allocation76_spill] sm:$0xff] %v12824_v37  ;;  %20274 = vst [vmem:[#allocation77_spill] sm:$0xff] %v12826_v42  ;;  %v374_v42 = vld [vmem:[#allocation5 + $0x1c8] sm:$0xff]  ;;  %v12840_v37 = vsub.f32 %v489_v26, %v5047_v29  ;;  %v12849_v51 = vpack.c.bf16 %v5053_v11, %v5049_v43  ;;  %v12853_v9 = vsub.f32 %v498_v7, %v5053_v11  ;;  %v627_v26 = vand.u32 4294901760, %v369_v36  ;;  %v501_v7 = vld [vmem:[#allocation5 + $0x5c0] sm:$0xff] }
  0x95   : > { %20275 = vst [vmem:[#allocation78_spill] sm:$0xff] %v12830_v24  ;;  %20276 = vst [vmem:[#allocation79_spill] sm:$0xff] %v12832_v15  ;;  %v629_v29 = vand.u32 4294901760, %v374_v42  ;;  %v12858_v30 = vsub.f32 %v365_v22, %v623_v21  ;;  %v12862_v11 = vpack.c.bf16 %v5055_v33, %v5051_v14  ;;  %v505_v43 = vld [vmem:[#allocation5 + $0x5e0] sm:$0xff]  ;;  %v386_v15 = vld [vmem:[#allocation5 + $0x228] sm:$0xff]  ;;  %v12873_v22 = vsub.f32 %v378_v38, %v633_v19 }
  0x96   : > { %20277 = vst [vmem:[#allocation80_spill] sm:$0xff] %v12834_v45  ;;  %20278 = vst [vmem:[#allocation81_spill] sm:$0xff] %v12836_v31  ;;  %v12856_v58 = vpack.c.bf16 %v627_v26, %v623_v21  ;;  %v12860_v28 = vsub.f32 %v369_v36, %v627_v26  ;;  %v402_v49 = vld [vmem:[#allocation5 + $0x2a8] sm:$0xff] }
  0x97   : > { %20279 = vst [vmem:[#allocation82_spill] sm:$0xff] %v12838_v60  ;;  %20280 = vst [vmem:[#allocation83_spill] sm:$0xff] %v12840_v37  ;;  %v5061_v37 = vand.u32 4294901760, %v506_v59  ;;  %v373_v60 = vld [vmem:[#allocation5 + $0x1c0] sm:$0xff]  ;;  %v12870_v45 = vsub.f32 %v374_v42, %v629_v29  ;;  %9898 = vmatpush1.bf16.xpose.msra.mxu0 %v12804_v54  ;;  %v5063_v42 = vand.u32 4294901760, %v505_v43  ;;  %v410_v44 = vld [vmem:[#allocation5 + $0x2e8] sm:$0xff] }
  0x98   : > { %20281 = vst [vmem:[#allocation84_spill] sm:$0xff] %v12842_v3  ;;  %20282 = vst [vmem:[#allocation85_spill] sm:$0xff] %v12844_v55  ;;  %v5057_v55 = vand.u32 4294901760, %v502_v63  ;;  %9900 = vmatprep.subr.bf16.mxu0 %v12816_v32  ;;  %v385_v54 = vld [vmem:[#allocation5 + $0x220] sm:$0xff]  ;;  %v390_v32 = vld [vmem:[#allocation5 + $0x248] sm:$0xff] }
  0x99   : > { %20283 = vst [vmem:[#allocation86_spill] sm:$0xff] %v12847_v47  ;;  %20284 = vst [vmem:[#allocation87_spill] sm:$0xff] %v12849_v51  ;;  %v12868_v47 = vpack.c.bf16 %v633_v19, %v629_v29  ;;  %v12879_v26 = vsub.f32 %v506_v59, %v5061_v37  ;;  %v641_v29 = vand.u32 4294901760, %v386_v15  ;;  %10666 = vmatpush1.bf16.xpose.msra.mxu1 %v12810_v2  ;;  %v513_v19 = vld [vmem:[#allocation5 + $0x620] sm:$0xff]  ;;  %v534_v35 = vld [vmem:[#allocation5 + $0x6c8] sm:$0xff] }
  0x9a   : > { %20285 = vst [vmem:[#allocation88_spill] sm:$0xff] %v12851_v56  ;;  %20286 = vst [vmem:[#allocation89_spill] sm:$0xff] %v12853_v9  ;;  %v12864_v9 = vsub.f32 %v493_v0, %v5051_v14  ;;  %v12866_v56 = vsub.f32 %v497_v20, %v5055_v33  ;;  %v12875_v36 = vpack.c.bf16 %v5061_v37, %v5057_v55  ;;  %v631_v0 = vand.u32 4294901760, %v373_v60  ;;  %v509_v37 = vld [vmem:[#allocation5 + $0x600] sm:$0xff]  ;;  %v538_v34 = vld [vmem:[#allocation5 + $0x6e8] sm:$0xff] }
  0x9b   : > { %20287 = vst [vmem:[#allocation90_spill] sm:$0xff] %v12856_v58  ;;  %20288 = vst [vmem:[#allocation91_spill] sm:$0xff] %v12858_v30  ;;  %v12877_v21 = vsub.f32 %v502_v63, %v5057_v55  ;;  %v635_v20 = vand.u32 4294901760, %v377_v8  ;;  %v5059_v14 = vand.u32 4294901760, %v501_v7  ;;  %v637_v33 = vand.u32 4294901760, %v382_v1  ;;  %10668 = vmatprep.subr.bf16.mxu1 %v12822_v5  ;;  %v426_v12 = vld [vmem:[#allocation5 + $0x368] sm:$0xff] }
  0x9c   : > { %20289 = vst [vmem:[#allocation92_spill] sm:$0xff] %v12860_v28  ;;  %20290 = vst [vmem:[#allocation93_spill] sm:$0xff] %v12862_v11  ;;  %v12885_v63 = vsub.f32 %v373_v60, %v631_v0  ;;  %v394_v28 = vld [vmem:[#allocation5 + $0x268] sm:$0xff] }
  0x9d   : > { %20291 = vst [vmem:[#allocation94_spill] sm:$0xff] %v12864_v9  ;;  %20292 = vst [vmem:[#allocation95_spill] sm:$0xff] %v12866_v56  ;;  %v5069_v56 = vand.u32 4294901760, %v514_v53  ;;  %v381_v9 = vld [vmem:[#allocation5 + $0x200] sm:$0xff]  ;;  %v12883_v38 = vpack.c.bf16 %v635_v20, %v631_v0  ;;  %v12887_v59 = vsub.f32 %v377_v8, %v635_v20  ;;  %v12889_v55 = vpack.c.bf16 %v5063_v42, %v5059_v14  ;;  %v518_v60 = vld [vmem:[#allocation5 + $0x648] sm:$0xff] }
  0x9e   : > { %20293 = vst [vmem:[#allocation96_spill] sm:$0xff] %v12868_v47  ;;  %20294 = vst [vmem:[#allocation97_spill] sm:$0xff] %v12870_v45  ;;  %v5065_v45 = vand.u32 4294901760, %v510_v57  ;;  %v12898_v2 = vsub.f32 %v382_v1, %v637_v33  ;;  %v522_v0 = vld [vmem:[#allocation5 + $0x668] sm:$0xff]  ;;  %v12900_v8 = vsub.f32 %v386_v15, %v641_v29  ;;  %v639_v5 = vand.u32 4294901760, %v381_v9 }
  0x9f   : > { %20295 = vst [vmem:[#allocation98_spill] sm:$0xff] %v12873_v22  ;;  %20296 = vst [vmem:[#allocation99_spill] sm:$0xff] %v12875_v36  ;;  %v12896_v22 = vpack.c.bf16 %v641_v29, %v637_v33  ;;  %v5077_v1 = vand.u32 4294901760, %v522_v0  ;;  %v389_v33 = vld [vmem:[#allocation5 + $0x240] sm:$0xff]  ;;  %9902 = vmatpush1.bf16.xpose.msra.mxu0 %v12830_v24 }
  0xa0   : > { %20297 = vst [vmem:[#allocation100_spill] sm:$0xff] %v12877_v21  ;;  %20298 = vst [vmem:[#allocation101_spill] sm:$0xff] %v12879_v26  ;;  %v12892_v26 = vsub.f32 %v501_v7, %v5059_v14  ;;  %v12894_v21 = vsub.f32 %v505_v43, %v5063_v42  ;;  %v12902_v20 = vpack.c.bf16 %v5069_v56, %v5065_v45  ;;  %v643_v7 = vand.u32 4294901760, %v385_v54 }
  0xa1   : > { %20299 = vst [vmem:[#allocation102_spill] sm:$0xff] %v12883_v38  ;;  %20300 = vst [vmem:[#allocation103_spill] sm:$0xff] %v12885_v63  ;;  %v12906_v63 = vsub.f32 %v514_v53, %v5069_v56  ;;  %v5067_v14 = vand.u32 4294901760, %v509_v37  ;;  %v5071_v43 = vand.u32 4294901760, %v513_v19  ;;  %v645_v42 = vand.u32 4294901760, %v390_v32  ;;  %v521_v56 = vld [vmem:[#allocation5 + $0x660] sm:$0xff]  ;;  %9904 = vmatprep.subr.bf16.mxu0 %v12842_v3  ;;  %10670 = vmatpush1.bf16.xpose.msra.mxu1 %v12836_v31 }
  0xa2   : > { %20301 = vst [vmem:[#allocation104_spill] sm:$0xff] %v12887_v59  ;;  %20302 = vst [vmem:[#allocation105_spill] sm:$0xff] %v12889_v55  ;;  %v12904_v59 = vsub.f32 %v510_v57, %v5065_v45  ;;  %v12909_v15 = vpack.c.bf16 %v643_v7, %v639_v5  ;;  %v12911_v29 = vsub.f32 %v381_v9, %v639_v5  ;;  %v517_v45 = vld [vmem:[#allocation5 + $0x640] sm:$0xff]  ;;  %v526_v5 = vld [vmem:[#allocation5 + $0x688] sm:$0xff]  ;;  %10672 = vmatprep.subr.bf16.mxu1 %v12849_v51 }
  0xa3   : > { %20303 = vst [vmem:[#allocation106_spill] sm:$0xff] %v12892_v26  ;;  %20304 = vst [vmem:[#allocation107_spill] sm:$0xff] %v12894_v21  ;;  %v649_v21 = vand.u32 4294901760, %v394_v28  ;;  %v5073_v26 = vand.u32 4294901760, %v518_v60  ;;  %v12913_v57 = vsub.f32 %v385_v54, %v643_v7  ;;  %v12915_v53 = vpack.c.bf16 %v5071_v43, %v5067_v14  ;;  %v530_v9 = vld [vmem:[#allocation5 + $0x6a8] sm:$0xff]  ;;  %v529_v31 = vld [vmem:[#allocation5 + $0x6a0] sm:$0xff] }
  0xa4   : > { %20305 = vst [vmem:[#allocation108_spill] sm:$0xff] %v12896_v22  ;;  %20306 = vst [vmem:[#allocation109_spill] sm:$0xff] %v12898_v2  ;;  %v393_v2 = vld [vmem:[#allocation5 + $0x260] sm:$0xff]  ;;  %v12924_v24 = vsub.f32 %v390_v32, %v645_v42  ;;  %v5081_v3 = vand.u32 4294901760, %v526_v5 }
  0xa5   : > { %20307 = vst [vmem:[#allocation110_spill] sm:$0xff] %v12900_v8  ;;  %20308 = vst [vmem:[#allocation111_spill] sm:$0xff] %v12902_v20  ;;  %v12920_v8 = vsub.f32 %v513_v19, %v5071_v43  ;;  %v12922_v30 = vpack.c.bf16 %v649_v21, %v645_v42  ;;  %v12926_v54 = vsub.f32 %v394_v28, %v649_v21  ;;  %v651_v19 = vand.u32 4294901760, %v393_v2  ;;  %v397_v28 = vld [vmem:[#allocation5 + $0x280] sm:$0xff] }
  0xa6   : > { %20309 = vst [vmem:[#allocation112_spill] sm:$0xff] %v12904_v59  ;;  %20310 = vst [vmem:[#allocation113_spill] sm:$0xff] %v12906_v63  ;;  %v398_v63 = vld [vmem:[#allocation5 + $0x288] sm:$0xff]  ;;  %v12918_v59 = vsub.f32 %v509_v37, %v5067_v14  ;;  %v12928_v7 = vpack.c.bf16 %v5077_v1, %v5073_v26  ;;  %v647_v37 = vand.u32 4294901760, %v389_v33  ;;  %v5075_v14 = vand.u32 4294901760, %v517_v45  ;;  %v401_v21 = vld [vmem:[#allocation5 + $0x2a0] sm:$0xff] }
  0xa7   : > { %20311 = vst [vmem:[#allocation114_spill] sm:$0xff] %v12909_v15  ;;  %20312 = vst [vmem:[#allocation115_spill] sm:$0xff] %v12911_v29  ;;  %v12932_v29 = vsub.f32 %v522_v0, %v5077_v1  ;;  %v5079_v43 = vand.u32 4294901760, %v521_v56  ;;  %v653_v32 = vand.u32 4294901760, %v398_v63  ;;  %v657_v42 = vand.u32 4294901760, %v402_v49  ;;  %v525_v1 = vld [vmem:[#allocation5 + $0x680] sm:$0xff]  ;;  %9906 = vmatpush1.bf16.xpose.msra.mxu0 %v12856_v58 }
  0xa8   : > { %20313 = vst [vmem:[#allocation116_spill] sm:$0xff] %v12913_v57  ;;  %20314 = vst [vmem:[#allocation117_spill] sm:$0xff] %v12915_v53  ;;  %v12930_v57 = vsub.f32 %v518_v60, %v5073_v26  ;;  %v12938_v26 = vsub.f32 %v389_v33, %v647_v37  ;;  %v12940_v60 = vsub.f32 %v393_v2, %v651_v19  ;;  %9908 = vmatprep.subr.bf16.mxu0 %v12868_v47  ;;  %v537_v58 = vld [vmem:[#allocation5 + $0x6e0] sm:$0xff] }
  0xa9   : > { %20315 = vst [vmem:[#allocation118_spill] sm:$0xff] %v12918_v59  ;;  %20316 = vst [vmem:[#allocation119_spill] sm:$0xff] %v12920_v8  ;;  %v12942_v0 = vpack.c.bf16 %v5079_v43, %v5075_v14  ;;  %v12946_v51 = vsub.f32 %v521_v56, %v5079_v43  ;;  %v12948_v8 = vpack.c.bf16 %v657_v42, %v653_v32  ;;  %v659_v56 = vand.u32 4294901760, %v401_v21 }
  0xaa   : > { %20317 = vst [vmem:[#allocation120_spill] sm:$0xff] %v12922_v30  ;;  %20318 = vst [vmem:[#allocation121_spill] sm:$0xff] %v12924_v24  ;;  %v5085_v24 = vand.u32 4294901760, %v530_v9  ;;  %v12950_v59 = vsub.f32 %v398_v63, %v653_v32  ;;  %v12952_v33 = vsub.f32 %v402_v49, %v657_v42  ;;  %v5087_v43 = vand.u32 4294901760, %v529_v31  ;;  %v405_v49 = vld [vmem:[#allocation5 + $0x2c0] sm:$0xff]  ;;  %10674 = vmatpush1.bf16.xpose.msra.mxu1 %v12862_v11 }
  0xab   : > { %20319 = vst [vmem:[#allocation122_spill] sm:$0xff] %v12926_v54  ;;  %20320 = vst [vmem:[#allocation123_spill] sm:$0xff] %v12928_v7  ;;  %v12936_v54 = vpack.c.bf16 %v651_v19, %v647_v37  ;;  %v12956_v37 = vsub.f32 %v526_v5, %v5081_v3  ;;  %v665_v32 = vand.u32 4294901760, %v410_v44  ;;  %v409_v42 = vld [vmem:[#allocation5 + $0x2e0] sm:$0xff]  ;;  %10676 = vmatprep.subr.bf16.mxu1 %v12875_v36 }
  0xac   : > { %20321 = vst [vmem:[#allocation124_spill] sm:$0xff] %v12930_v57  ;;  %20322 = vst [vmem:[#allocation125_spill] sm:$0xff] %v12932_v29  ;;  %v406_v29 = vld [vmem:[#allocation5 + $0x2c8] sm:$0xff]  ;;  %v12944_v57 = vsub.f32 %v517_v45, %v5075_v14  ;;  %v12954_v2 = vpack.c.bf16 %v5085_v24, %v5081_v3  ;;  %v12958_v19 = vsub.f32 %v530_v9, %v5085_v24  ;;  %v655_v45 = vand.u32 4294901760, %v397_v28  ;;  %v533_v9 = vld [vmem:[#allocation5 + $0x6c0] sm:$0xff] }
  0xad   : > { %20323 = vst [vmem:[#allocation126_spill] sm:$0xff] %v12936_v54  ;;  %20324 = vst [vmem:[#allocation127_spill] sm:$0xff] %v12938_v26  ;;  %v5083_v14 = vand.u32 4294901760, %v525_v1  ;;  %v661_v63 = vand.u32 4294901760, %v406_v29  ;;  %v12966_v24 = vsub.f32 %v401_v21, %v659_v56  ;;  %v418_v26 = vld [vmem:[#allocation5 + $0x328] sm:$0xff]  ;;  %v12980_v21 = vsub.f32 %v410_v44, %v665_v32 }
  0xae   : > { %20325 = vst [vmem:[#allocation128_spill] sm:$0xff] %v12940_v60  ;;  %20326 = vst [vmem:[#allocation129_spill] sm:$0xff] %v12942_v0  ;;  %v12964_v3 = vsub.f32 %v397_v28, %v655_v45  ;;  %v542_v28 = vld [vmem:[#allocation5 + $0x708] sm:$0xff] }
  0xaf   : > { %20327 = vst [vmem:[#allocation130_spill] sm:$0xff] %v12944_v57  ;;  %20328 = vst [vmem:[#allocation131_spill] sm:$0xff] %v12946_v51  ;;  %v5093_v51 = vand.u32 4294901760, %v538_v34  ;;  %v12968_v5 = vpack.c.bf16 %v5087_v43, %v5083_v14  ;;  %v12971_v47 = vsub.f32 %v525_v1, %v5083_v14  ;;  %v12975_v57 = vpack.c.bf16 %v665_v32, %v661_v63 }
  0xb0   : > { %20329 = vst [vmem:[#allocation132_spill] sm:$0xff] %v12948_v8  ;;  %20330 = vst [vmem:[#allocation133_spill] sm:$0xff] %v12950_v59  ;;  %v5089_v59 = vand.u32 4294901760, %v534_v35  ;;  %v12977_v60 = vsub.f32 %v406_v29, %v661_v63  ;;  %v663_v1 = vand.u32 4294901760, %v405_v49  ;;  %v5091_v14 = vand.u32 4294901760, %v533_v9  ;;  %9910 = vmatpush1.bf16.xpose.msra.mxu0 %v12883_v38 }
  0xb1   : > { %20331 = vst [vmem:[#allocation134_spill] sm:$0xff] %v12952_v33  ;;  %20332 = vst [vmem:[#allocation135_spill] sm:$0xff] %v12954_v2  ;;  %v12962_v33 = vpack.c.bf16 %v659_v56, %v655_v45  ;;  %v546_v45 = vld [vmem:[#allocation5 + $0x728] sm:$0xff]  ;;  %v12986_v11 = vsub.f32 %v538_v34, %v5093_v51  ;;  %v673_v29 = vand.u32 4294901760, %v418_v26  ;;  %v5097_v63 = vand.u32 4294901760, %v542_v28  ;;  %v541_v34 = vld [vmem:[#allocation5 + $0x700] sm:$0xff]  ;;  %9912 = vmatprep.subr.bf16.mxu0 %v12896_v22 }
  0xb2   : > { %20333 = vst [vmem:[#allocation136_spill] sm:$0xff] %v12956_v37  ;;  %20334 = vst [vmem:[#allocation137_spill] sm:$0xff] %v12958_v19  ;;  %v414_v19 = vld [vmem:[#allocation5 + $0x308] sm:$0xff]  ;;  %v12973_v37 = vsub.f32 %v529_v31, %v5087_v43  ;;  %v12982_v56 = vpack.c.bf16 %v5093_v51, %v5089_v59  ;;  %v667_v31 = vand.u32 4294901760, %v409_v42  ;;  %v5095_v43 = vand.u32 4294901760, %v537_v58  ;;  %v545_v51 = vld [vmem:[#allocation5 + $0x720] sm:$0xff]  ;;  %10678 = vmatpush1.bf16.xpose.msra.mxu1 %v12889_v55 }
  0xb3   : > { %20335 = vst [vmem:[#allocation138_spill] sm:$0xff] %v12962_v33  ;;  %20336 = vst [vmem:[#allocation139_spill] sm:$0xff] %v12964_v3  ;;  %v417_v3 = vld [vmem:[#allocation5 + $0x320] sm:$0xff]  ;;  %v12990_v44 = vsub.f32 %v405_v49, %v663_v1  ;;  %v12997_v36 = vsub.f32 %v533_v9, %v5091_v14  ;;  %v550_v49 = vld [vmem:[#allocation5 + $0x748] sm:$0xff]  ;;  %10680 = vmatprep.subr.bf16.mxu1 %v12902_v20 }
  0xb4   : > { %20337 = vst [vmem:[#allocation140_spill] sm:$0xff] %v12966_v24  ;;  %20338 = vst [vmem:[#allocation141_spill] sm:$0xff] %v12968_v5  ;;  %v12984_v24 = vsub.f32 %v534_v35, %v5089_v59  ;;  %v12988_v13 = vpack.c.bf16 %v667_v31, %v663_v1  ;;  %v12992_v32 = vsub.f32 %v409_v42, %v667_v31  ;;  %v422_v59 = vld [vmem:[#allocation5 + $0x348] sm:$0xff]  ;;  %v425_v22 = vld [vmem:[#allocation5 + $0x360] sm:$0xff] }
  0xb5   : > { %20339 = vst [vmem:[#allocation142_spill] sm:$0xff] %v12971_v47  ;;  %20340 = vst [vmem:[#allocation143_spill] sm:$0xff] %v12973_v37  ;;  %v669_v37 = vand.u32 4294901760, %v414_v19  ;;  %v413_v47 = vld [vmem:[#allocation5 + $0x300] sm:$0xff]  ;;  %v12994_v35 = vpack.c.bf16 %v5095_v43, %v5091_v14  ;;  %v554_v1 = vld [vmem:[#allocation5 + $0x768] sm:$0xff]  ;;  %v13006_v42 = vsub.f32 %v418_v26, %v673_v29  ;;  %v5099_v14 = vand.u32 4294901760, %v541_v34 }
  0xb6   : > { %20341 = vst [vmem:[#allocation144_spill] sm:$0xff] %v12975_v57  ;;  %20342 = vst [vmem:[#allocation145_spill] sm:$0xff] %v12977_v60  ;;  %v5101_v60 = vand.u32 4294901760, %v546_v45  ;;  %v671_v9 = vand.u32 4294901760, %v413_v47  ;;  %v434_v20 = vld [vmem:[#allocation5 + $0x3a8] sm:$0xff] }
  0xb7   : > { %20343 = vst [vmem:[#allocation146_spill] sm:$0xff] %v12980_v21  ;;  %20344 = vst [vmem:[#allocation147_spill] sm:$0xff] %v12982_v56  ;;  %v13003_v21 = vsub.f32 %v414_v19, %v669_v37  ;;  %v681_v19 = vand.u32 4294901760, %v426_v12  ;;  %v13024_v55 = vsub.f32 %v541_v34, %v5099_v14  ;;  %v683_v34 = vand.u32 4294901760, %v425_v22 }
  0xb8   : > { %20345 = vst [vmem:[#allocation148_spill] sm:$0xff] %v12984_v24  ;;  %20346 = vst [vmem:[#allocation149_spill] sm:$0xff] %v12986_v11  ;;  %v12999_v11 = vsub.f32 %v537_v58, %v5095_v43  ;;  %v13001_v24 = vpack.c.bf16 %v673_v29, %v669_v37  ;;  %v13008_v31 = vpack.c.bf16 %v5101_v60, %v5097_v63  ;;  %v675_v58 = vand.u32 4294901760, %v417_v3  ;;  %v549_v29 = vld [vmem:[#allocation5 + $0x740] sm:$0xff] }
  0xb9   : > { %20347 = vst [vmem:[#allocation150_spill] sm:$0xff] %v12988_v13  ;;  %20348 = vst [vmem:[#allocation151_spill] sm:$0xff] %v12990_v44  ;;  %v13012_v38 = vsub.f32 %v546_v45, %v5101_v60  ;;  %v5103_v43 = vand.u32 4294901760, %v545_v51  ;;  %v677_v37 = vand.u32 4294901760, %v422_v59  ;;  %9914 = vmatpush1.bf16.xpose.msra.mxu0 %v12909_v15 }
  0xba   : > { %20349 = vst [vmem:[#allocation152_spill] sm:$0xff] %v12992_v32  ;;  %20350 = vst [vmem:[#allocation153_spill] sm:$0xff] %v12994_v35  ;;  %v13010_v32 = vsub.f32 %v542_v28, %v5097_v63  ;;  %v13016_v26 = vpack.c.bf16 %v675_v58, %v671_v9  ;;  %v13018_v28 = vsub.f32 %v413_v47, %v671_v9  ;;  %v553_v63 = vld [vmem:[#allocation5 + $0x760] sm:$0xff]  ;;  %9916 = vmatprep.subr.bf16.mxu0 %v12922_v30  ;;  %v442_v30 = vld [vmem:[#allocation5 + $0x3e8] sm:$0xff] }
  0xbb   : > { %20351 = vst [vmem:[#allocation154_spill] sm:$0xff] %v12997_v36  ;;  %20352 = vst [vmem:[#allocation155_spill] sm:$0xff] %v12999_v11  ;;  %v5109_v11 = vand.u32 4294901760, %v554_v1  ;;  %v421_v36 = vld [vmem:[#allocation5 + $0x340] sm:$0xff]  ;;  %v13020_v60 = vsub.f32 %v417_v3, %v675_v58  ;;  %v13022_v45 = vpack.c.bf16 %v5103_v43, %v5099_v14  ;;  %v13030_v44 = vsub.f32 %v422_v59, %v677_v37 }
  0xbc   : > { %20353 = vst [vmem:[#allocation156_spill] sm:$0xff] %v13001_v24  ;;  %20354 = vst [vmem:[#allocation157_spill] sm:$0xff] %v13003_v21  ;;  %v5105_v21 = vand.u32 4294901760, %v550_v49  ;;  %v13032_v47 = vsub.f32 %v426_v12, %v681_v19  ;;  %v5107_v14 = vand.u32 4294901760, %v549_v29  ;;  %v689_v59 = vand.u32 4294901760, %v434_v20  ;;  %10682 = vmatpush1.bf16.xpose.msra.mxu1 %v12915_v53  ;;  %v437_v53 = vld [vmem:[#allocation5 + $0x3c0] sm:$0xff] }
  0xbd   : > { %20355 = vst [vmem:[#allocation158_spill] sm:$0xff] %v13006_v42  ;;  %20356 = vst [vmem:[#allocation159_spill] sm:$0xff] %v13008_v31  ;;  %v13028_v42 = vpack.c.bf16 %v681_v19, %v677_v37  ;;  %v558_v31 = vld [vmem:[#allocation5 + $0x788] sm:$0xff]  ;;  %v13038_v58 = vsub.f32 %v554_v1, %v5109_v11  ;;  %v557_v1 = vld [vmem:[#allocation5 + $0x780] sm:$0xff]  ;;  %10684 = vmatprep.subr.bf16.mxu1 %v12928_v7 }
  0xbe   : > { %20357 = vst [vmem:[#allocation160_spill] sm:$0xff] %v13010_v32  ;;  %20358 = vst [vmem:[#allocation161_spill] sm:$0xff] %v13012_v38  ;;  %v430_v38 = vld [vmem:[#allocation5 + $0x388] sm:$0xff]  ;;  %v13026_v32 = vsub.f32 %v545_v51, %v5103_v43  ;;  %v13034_v3 = vpack.c.bf16 %v5109_v11, %v5105_v21  ;;  %v13036_v9 = vsub.f32 %v550_v49, %v5105_v21  ;;  %v5111_v51 = vand.u32 4294901760, %v553_v63  ;;  %v561_v19 = vld [vmem:[#allocation5 + $0x7a0] sm:$0xff] }
  0xbf   : > { %20359 = vst [vmem:[#allocation162_spill] sm:$0xff] %v13016_v26  ;;  %20360 = vst [vmem:[#allocation163_spill] sm:$0xff] %v13018_v28  ;;  %v562_v26 = vld [vmem:[#allocation5 + $0x7a8] sm:$0xff]  ;;  %v685_v43 = vand.u32 4294901760, %v430_v38  ;;  %v5113_v37 = vand.u32 4294901760, %v558_v31  ;;  %v13046_v11 = vsub.f32 %v425_v22, %v683_v34  ;;  %v13050_v15 = vsub.f32 %v549_v29, %v5107_v14  ;;  %v569_v7 = vld [vmem:[#allocation5 + $0x7e0] sm:$0xff] }
  0xc0   : > { %20361 = vst [vmem:[#allocation164_spill] sm:$0xff] %v13020_v60  ;;  %20362 = vst [vmem:[#allocation165_spill] sm:$0xff] %v13022_v45  ;;  %v679_v60 = vand.u32 4294901760, %v421_v36  ;;  %v13048_v49 = vpack.c.bf16 %v5111_v51, %v5107_v14  ;;  %v13059_v22 = vsub.f32 %v434_v20, %v689_v59  ;;  %v5115_v14 = vand.u32 4294901760, %v557_v1 }
  0xc1   : > { %20363 = vst [vmem:[#allocation166_spill] sm:$0xff] %v13024_v55  ;;  %20364 = vst [vmem:[#allocation167_spill] sm:$0xff] %v13026_v32  ;;  %v429_v32 = vld [vmem:[#allocation5 + $0x380] sm:$0xff]  ;;  %v13056_v28 = vsub.f32 %v430_v38, %v685_v43  ;;  %v5119_v38 = vand.u32 4294901760, %v561_v19  ;;  %9918 = vmatpush1.bf16.xpose.msra.mxu0 %v12936_v54 }
  0xc2   : > { %20365 = vst [vmem:[#allocation168_spill] sm:$0xff] %v13028_v42  ;;  %20366 = vst [vmem:[#allocation169_spill] sm:$0xff] %v13030_v44  ;;  %v5117_v44 = vand.u32 4294901760, %v562_v26  ;;  %v433_v55 = vld [vmem:[#allocation5 + $0x3a0] sm:$0xff]  ;;  %v13042_v12 = vpack.c.bf16 %v683_v34, %v679_v60  ;;  %v13044_v21 = vsub.f32 %v421_v36, %v679_v60  ;;  %v13063_v60 = vsub.f32 %v558_v31, %v5113_v37 }
  0xc3   : > { %20367 = vst [vmem:[#allocation170_spill] sm:$0xff] %v13032_v47  ;;  %20368 = vst [vmem:[#allocation171_spill] sm:$0xff] %v13034_v3  ;;  %v13054_v47 = vpack.c.bf16 %v689_v59, %v685_v43  ;;  %v566_v3 = vld [vmem:[#allocation5 + $0x7c8] sm:$0xff]  ;;  %v687_v29 = vand.u32 4294901760, %v429_v32  ;;  %v697_v43 = vand.u32 4294901760, %v442_v30  ;;  %9920 = vmatprep.subr.bf16.mxu0 %v12948_v8 }
  0xc4   : > { %20369 = vst [vmem:[#allocation172_spill] sm:$0xff] %v13036_v9  ;;  %20370 = vst [vmem:[#allocation173_spill] sm:$0xff] %v13038_v58  ;;  %v438_v58 = vld [vmem:[#allocation5 + $0x3c8] sm:$0xff]  ;;  %v13052_v9 = vsub.f32 %v553_v63, %v5111_v51  ;;  %v13061_v36 = vpack.c.bf16 %v5117_v44, %v5113_v37  ;;  %v13065_v34 = vsub.f32 %v562_v26, %v5117_v44  ;;  %v691_v63 = vand.u32 4294901760, %v433_v55  ;;  %v441_v26 = vld [vmem:[#allocation5 + $0x3e0] sm:$0xff] }
  0xc5   : > { %20371 = vst [vmem:[#allocation174_spill] sm:$0xff] %v13042_v12  ;;  %20372 = vst [vmem:[#allocation175_spill] sm:$0xff] %v13046_v11  ;;  %v570_v12 = vld [vmem:[#allocation5 + $0x7e8] sm:$0xff]  ;;  %v693_v51 = vand.u32 4294901760, %v438_v58  ;;  %v13070_v59 = vsub.f32 %v429_v32, %v687_v29  ;;  %v13074_v44 = vpack.c.bf16 %v5119_v38, %v5115_v14  ;;  %v565_v37 = vld [vmem:[#allocation5 + $0x7c0] sm:$0xff]  ;;  %v13086_v32 = vsub.f32 %v442_v30, %v697_v43 }
  0xc6   : > { %20373 = vst [vmem:[#allocation176_spill] sm:$0xff] %v13048_v49  ;;  %20374 = vst [vmem:[#allocation177_spill] sm:$0xff] %v13050_v15  ;;  %v13068_v20 = vpack.c.bf16 %v691_v63, %v687_v29  ;;  %v13072_v31 = vsub.f32 %v433_v55, %v691_v63  ;;  %v254_v11 = vld [vmem:[%s12672_s9 + $0x8] sm:$0xff]  ;;  %10686 = vmatpush1.bf16.xpose.msra.mxu1 %v12942_v0  ;;  %v20392_v30 = vand.u32 4294901760, %v12684_v16 }
  0xc7   : > { %20375 = vst [vmem:[#allocation178_spill] sm:$0xff] %v13052_v9  ;;  %20376 = vst [vmem:[#allocation179_spill] sm:$0xff] %v13054_v47  ;;  %v5125_v9 = vand.u32 4294901760, %v570_v12  ;;  %v13082_v15 = vsub.f32 %v438_v58, %v693_v51  ;;  %v13095_v58 = vand.u32 4294901760, %v254_v11  ;;  %10688 = vmatprep.subr.bf16.mxu1 %v12954_v2 }
  0xc8   : > { %20377 = vst [vmem:[#allocation180_spill] sm:$0xff] %v13056_v28  ;;  %20378 = vst [vmem:[#allocation181_spill] sm:$0xff] %v13059_v22  ;;  %v5121_v28 = vand.u32 4294901760, %v566_v3  ;;  %v13080_v22 = vpack.c.bf16 %v697_v43, %v693_v51  ;;  %v253_v43 = vld [vmem:[%s12672_s9] sm:$0xff]  ;;  %v961_v0 = vsub.f32 %v12684_v16, %v20392_v30  ;;  %v18923_v30 = vand.u32 4294901760, %v12699_v27 }
  0xc9   : > { %20379 = vst [vmem:[#allocation182_spill] sm:$0xff] %v13061_v36  ;;  %20380 = vst [vmem:[#allocation183_spill] sm:$0xff] %v13063_v60  ;;  %v13078_v60 = vsub.f32 %v561_v19, %v5119_v38  ;;  %v13092_v63 = vsub.f32 %v570_v12, %v5125_v9  ;;  %v699_v19 = vand.u32 4294901760, %v441_v26  ;;  %v5127_v38 = vand.u32 4294901760, %v569_v7  ;;  %9922 = vmatpush1.bf16.xpose.msra.mxu0 %v12962_v33 }
  0xca   : > { %20381 = vst [vmem:[#allocation184_spill] sm:$0xff] %v13065_v34  ;;  %20382 = vst [vmem:[#allocation185_spill] sm:$0xff] %v13068_v20  ;;  %v13076_v34 = vsub.f32 %v557_v1, %v5115_v14  ;;  %v13088_v55 = vpack.c.bf16 %v5125_v9, %v5121_v28  ;;  %v13090_v29 = vsub.f32 %v566_v3, %v5121_v28  ;;  %v695_v1 = vand.u32 4294901760, %v437_v53 }
  0xcb   : > { %20383 = vst [vmem:[#allocation186_spill] sm:$0xff] %v13074_v44  ;;  %20384 = vst [vmem:[#allocation187_spill] sm:$0xff] %v13078_v60  ;;  %v5123_v14 = vand.u32 4294901760, %v565_v37  ;;  %v13106_v9 = vsub.f32 %v441_v26, %v699_v19  ;;  %v13113_v51 = vsub.f32 %v569_v7, %v5127_v38  ;;  %v13116_v54 = vsub.f32 %v254_v11, %v13095_v58 }
  0xcc   : > { %20385 = vst [vmem:[#allocation188_spill] sm:$0xff] %v13080_v22  ;;  %20386 = vst [vmem:[#allocation189_spill] sm:$0xff] %v13088_v55  ;;  %v13102_v28 = vpack.c.bf16 %v699_v19, %v695_v1  ;;  %v13104_v3 = vsub.f32 %v437_v53, %v695_v1  ;;  %v20393_v53 = vand.u32 4294901760, %v12686_v17  ;;  %v20394_v1 = vand.u32 4294901760, %v12688_v18  ;;  %9924 = vmatprep.subr.bf16.mxu0 %v12975_v57 }
  0xcd   : > { %20387 = vst [vmem:[#allocation190_spill] sm:$0xff] %v13092_v63  ;;  %20388 = vst [vmem:[#allocation191_spill] sm:$0xff] %v13095_v58  ;;  %v13108_v12 = vpack.c.bf16 %v5127_v38, %v5123_v14  ;;  %v13111_v8 = vsub.f32 %v565_v37, %v5123_v14  ;;  %v18911_v37 = vand.u32 4294901760, %v12692_v23  ;;  %v13128_v14 = vand.u32 4294901760, %v253_v43 }
  0xce   : > { %20389 = vst [vmem:[#allocation192_spill] sm:$0xff] %v13102_v28  ;;  %20391 = vst [vmem:[#allocation194_spill] sm:$0xff] %v13116_v54  ;;  %v973_v26 = vsub.f32 %v12686_v17, %v20393_v53  ;;  %v5389_v19 = vsub.f32 %v12688_v18, %v20394_v1  ;;  %v13131_v7 = vand.u32 4294901760, %v13116_v54  ;;  %v962_v11 = vand.u32 4294901760, %v961_v0  ;;  %10690 = vmatpush1.bf16.xpose.msra.mxu1 %v12968_v5 }
  0xcf   : > { %20390 = vst [vmem:[#allocation193_spill] sm:$0xff] %v13108_v12  ;;  %20395 = vst [vmem:[#allocation195_spill] sm:$0xff] %v13128_v14  ;;  %v18922_v38 = vand.u32 4294901760, %v12696_v25  ;;  %v5401_v53 = vsub.f32 %v12692_v23, %v18911_v37  ;;  %v13139_v1 = vsub.f32 %v253_v43, %v13128_v14  ;;  %10692 = vmatprep.subr.bf16.mxu1 %v12982_v56  ;;  %v18944_v56 = vand.u32 4294901760, %v12730_v62  ;;  %v20572_v17 = vld [vmem:[#allocation180_spill] sm:$0xff] }
  0xd0   : > { %20396 = vst [vmem:[#allocation196_spill] sm:$0xff] %v13131_v7  ;;  %v974_v2 = vand.u32 4294901760, %v973_v26  ;;  %v5390_v16 = vand.u32 4294901760, %v5389_v19  ;;  %v704_v18 = vsub.f32 %v13116_v54, %v13131_v7  ;;  %v979_v26 = vsub.f32 %v12699_v27, %v18923_v30 }
  0xd1   : > { %20397 = vst [vmem:[#allocation197_spill] sm:$0xff] %v13139_v1  ;;  %v967_v0 = vsub.f32 %v12696_v25, %v18922_v38  ;;  %v18924_v19 = vand.u32 4294901760, %v12705_v39  ;;  %v5402_v43 = vand.u32 4294901760, %v5401_v53  ;;  %v13155_v33 = vand.u32 4294901760, %v13139_v1  ;;  %9926 = vmatpush1.bf16.xpose.msra.mxu0 %v12988_v13  ;;  %v302_v25 = vld [vmem:[%s12672_s9 + $0x188] sm:$0xff] }
  0xd2   : > { %v13152_v37 = vpack.c.bf16 %v974_v2, %v962_v11  ;;  %v18925_v7 = vand.u32 4294901760, %v12707_v40  ;;  %v705_v54 = vand.u32 4294901760, %v704_v18  ;;  %v980_v23 = vand.u32 4294901760, %v979_v26  ;;  %9928 = vmatprep.subr.bf16.mxu0 %v13001_v24 }
  0xd3   : > { %20398 = vst [vmem:[#allocation198_spill] sm:$0xff] %v13155_v33  ;;  %v968_v14 = vand.u32 4294901760, %v967_v0  ;;  %v5395_v38 = vsub.f32 %v12705_v39, %v18924_v19  ;;  %v13162_v30 = vpack.c.bf16 %v5402_v43, %v5390_v16  ;;  %v710_v2 = vsub.f32 %v13139_v1, %v13155_v33  ;;  %v20399_v1 = vld [vmem:[#allocation159_spill] sm:$0xff]  ;;  %v20434_v39 = vld [vmem:[#allocation86_spill] sm:$0xff] }
  0xd4   : > { %v5407_v11 = vsub.f32 %v12707_v40, %v18925_v7  ;;  %v18928_v53 = vand.u32 4294901760, %v12709_v41  ;;  %706 = vmatprep.mubr.f32.mxu0 %v705_v54  ;;  %v18931_v26 = vand.u32 4294901760, %v12713_v46  ;;  %v18934_v16 = vand.u32 4294901760, %v12717_v48  ;;  %5134 = vmatprep.mubr.f32.mxu1 %v705_v54 }
  0xd5   : > { %v13171_v18 = vpack.c.bf16 %v980_v23, %v968_v14  ;;  %v5396_v0 = vand.u32 4294901760, %v5395_v38  ;;  %v13175_v43 = vand.u32 4294901760, %v710_v2  ;;  %v18935_v33 = vand.u32 4294901760, %v12720_v50 }
  0xd6   : > { %v5408_v19 = vand.u32 4294901760, %v5407_v11  ;;  %v985_v7 = vsub.f32 %v12709_v41, %v18928_v53  ;;  %v997_v23 = vsub.f32 %v12713_v46, %v18931_v26  ;;  %v5413_v14 = vsub.f32 %v12717_v48, %v18934_v16  ;;  %10694 = vmatpush1.bf16.xpose.msra.mxu1 %v12994_v35 }
  0xd7   : > { %v18940_v38 = vand.u32 4294901760, %v12722_v52  ;;  %v18941_v54 = vand.u32 4294901760, %v12728_v61  ;;  %v5425_v53 = vsub.f32 %v12720_v50, %v18935_v33  ;;  %v18951_v33 = vand.u32 4294901760, %v12734_v4  ;;  %10696 = vmatprep.subr.bf16.mxu1 %v20399_v1 }
  0xd8   : > { %v13189_v2 = vpack.c.bf16 %v5408_v19, %v5396_v0  ;;  %v986_v11 = vand.u32 4294901760, %v985_v7  ;;  %v998_v26 = vand.u32 4294901760, %v997_v23  ;;  %v5414_v5 = vand.u32 4294901760, %v5413_v14 }
  0xd9   : > { %v991_v16 = vsub.f32 %v12722_v52, %v18940_v38  ;;  %v1003_v19 = vsub.f32 %v12728_v61, %v18941_v54  ;;  %v5426_v7 = vand.u32 4294901760, %v5425_v53  ;;  %v5419_v0 = vsub.f32 %v12730_v62, %v18944_v56  ;;  %v20402_v62 = vld [vmem:[#allocation43_spill] sm:$0xff] }
  0xda   : > { %v18959_v23 = vand.u32 4294901760, %v12738_v6  ;;  %v13208_v14 = vpack.c.bf16 %v998_v26, %v986_v11  ;;  %v18958_v38 = vand.u32 4294901760, %v12740_v10  ;;  %v5431_v53 = vsub.f32 %v12734_v4, %v18951_v33  ;;  %v20400_v11 = vld [vmem:[#allocation40_spill] sm:$0xff] }
  0xdb   : > { %v992_v13 = vand.u32 4294901760, %v991_v16  ;;  %v1004_v57 = vand.u32 4294901760, %v1003_v19  ;;  %v13212_v54 = vpack.c.bf16 %v5426_v7, %v5414_v5  ;;  %v5420_v24 = vand.u32 4294901760, %v5419_v0  ;;  %v20401_v19 = vld [vmem:[#allocation41_spill] sm:$0xff]  ;;  %v20403_v4 = vld [vmem:[#allocation44_spill] sm:$0xff] }
  0xdc   : > { %v1009_v56 = vsub.f32 %v12738_v6, %v18959_v23  ;;  %v1021_v16 = vsub.f32 %v12740_v10, %v18958_v38  ;;  %v18964_v5 = vand.u32 4294901760, %v20400_v11  ;;  %v18966_v7 = vand.u32 4294901760, %v20401_v19  ;;  %v20404_v38 = vld [vmem:[#allocation46_spill] sm:$0xff] }
  0xdd   : > { %v13221_v26 = vpack.c.bf16 %v1004_v57, %v992_v13  ;;  %v5432_v0 = vand.u32 4294901760, %v5431_v53  ;;  %v18967_v33 = vand.u32 4294901760, %v20402_v62  ;;  %v18968_v61 = vand.u32 4294901760, %v20403_v4  ;;  %v20406_v6 = vld [vmem:[#allocation162_spill] sm:$0xff] }
  0xde   : > { %v1010_v35 = vand.u32 4294901760, %v1009_v56  ;;  %v1022_v52 = vand.u32 4294901760, %v1021_v16  ;;  %v5437_v13 = vsub.f32 %v20400_v11, %v18964_v5  ;;  %v5449_v57 = vsub.f32 %v20401_v19, %v18966_v7  ;;  %v20405_v16 = vld [vmem:[#allocation47_spill] sm:$0xff]  ;;  %9930 = vmatpush1.bf16.xpose.msra.mxu0 %v20406_v6  ;;  %10698 = vmatpush1.bf16.xpose.msra.mxu1 %v13022_v45 }
  0xdf   : > { %v18972_v23 = vand.u32 4294901760, %v20404_v38  ;;  %v13237_v1 = vpack.c.bf16 %v5432_v0, %v5420_v24  ;;  %v1015_v56 = vsub.f32 %v20402_v62, %v18967_v33  ;;  %v1027_v53 = vsub.f32 %v20403_v4, %v18968_v61  ;;  %9932 = vmatprep.subr.bf16.mxu0 %v13028_v42  ;;  %v20407_v4 = vld [vmem:[#allocation49_spill] sm:$0xff] }
  0xe0   : > { %v18975_v10 = vand.u32 4294901760, %v20405_v16  ;;  %v13247_v5 = vpack.c.bf16 %v1022_v52, %v1010_v35  ;;  %v5438_v11 = vand.u32 4294901760, %v5437_v13  ;;  %v5450_v7 = vand.u32 4294901760, %v5449_v57  ;;  %v20408_v35 = vld [vmem:[#allocation50_spill] sm:$0xff]  ;;  %v20409_v57 = vld [vmem:[#allocation52_spill] sm:$0xff] }
  0xe1   : > { %v5443_v24 = vsub.f32 %v20404_v38, %v18972_v23  ;;  %v1016_v0 = vand.u32 4294901760, %v1015_v56  ;;  %v1028_v33 = vand.u32 4294901760, %v1027_v53  ;;  %v18980_v62 = vand.u32 4294901760, %v20407_v4  ;;  %v20410_v53 = vld [vmem:[#allocation53_spill] sm:$0xff] }
  0xe2   : > { %v5455_v61 = vsub.f32 %v20405_v16, %v18975_v10  ;;  %v13257_v19 = vpack.c.bf16 %v5450_v7, %v5438_v11  ;;  %v18986_v13 = vand.u32 4294901760, %v20408_v35  ;;  %v18987_v6 = vand.u32 4294901760, %v20409_v57  ;;  %v20411_v16 = vld [vmem:[#allocation171_spill] sm:$0xff] }
  0xe3   : > { %v5444_v52 = vand.u32 4294901760, %v5443_v24  ;;  %v13262_v23 = vpack.c.bf16 %v1028_v33, %v1016_v0  ;;  %v1033_v56 = vsub.f32 %v20407_v4, %v18980_v62  ;;  %v18989_v10 = vand.u32 4294901760, %v20410_v53  ;;  %10700 = vmatprep.subr.bf16.mxu1 %v20411_v16  ;;  %v20412_v24 = vld [vmem:[#allocation55_spill] sm:$0xff]  ;;  %v20413_v0 = vld [vmem:[#allocation56_spill] sm:$0xff]  ;;  %v20414_v16 = vld [vmem:[#allocation58_spill] sm:$0xff] }
  0xe4   : > { %v5456_v42 = vand.u32 4294901760, %v5455_v61  ;;  %v1045_v11 = vsub.f32 %v20408_v35, %v18986_v13  ;;  %v5461_v7 = vsub.f32 %v20409_v57, %v18987_v6  ;;  %v18994_v33 = vand.u32 4294901760, %v20412_v24  ;;  %v20417_v35 = vld [vmem:[#allocation174_spill] sm:$0xff] }
  0xe5   : > { %v18996_v61 = vand.u32 4294901760, %v20413_v0  ;;  %v1034_v38 = vand.u32 4294901760, %v1033_v56  ;;  %v5473_v62 = vsub.f32 %v20410_v53, %v18989_v10  ;;  %v18997_v4 = vand.u32 4294901760, %v20414_v16  ;;  %v20416_v10 = vld [vmem:[#allocation61_spill] sm:$0xff] }
  0xe6   : > { %v13277_v45 = vpack.c.bf16 %v5456_v42, %v5444_v52  ;;  %v1046_v50 = vand.u32 4294901760, %v1045_v11  ;;  %v5462_v48 = vand.u32 4294901760, %v5461_v7  ;;  %v1039_v13 = vsub.f32 %v20412_v24, %v18994_v33  ;;  %v20415_v52 = vld [vmem:[#allocation59_spill] sm:$0xff]  ;;  %9934 = vmatpush1.bf16.xpose.msra.mxu0 %v20417_v35  ;;  %v20418_v33 = vld [vmem:[#allocation62_spill] sm:$0xff]  ;;  %10702 = vmatpush1.bf16.xpose.msra.mxu1 %v13048_v49 }
  0xe7   : > { %v1051_v6 = vsub.f32 %v20413_v0, %v18996_v61  ;;  %v5474_v57 = vand.u32 4294901760, %v5473_v62  ;;  %v5467_v42 = vsub.f32 %v20414_v16, %v18997_v4  ;;  %v19001_v56 = vand.u32 4294901760, %v20415_v52  ;;  %9936 = vmatprep.subr.bf16.mxu0 %v13054_v47  ;;  %v20421_v47 = vld [vmem:[#allocation67_spill] sm:$0xff]  ;;  %10704 = vmatprep.subr.bf16.mxu1 %v13061_v36 }
  0xe8   : > { %v19005_v53 = vand.u32 4294901760, %v20416_v10  ;;  %v13295_v11 = vpack.c.bf16 %v1046_v50, %v1034_v38  ;;  %v1040_v7 = vand.u32 4294901760, %v1039_v13  ;;  %v19004_v24 = vand.u32 4294901760, %v20418_v33  ;;  %v20420_v13 = vld [vmem:[#allocation65_spill] sm:$0xff] }
  0xe9   : > { %v1052_v40 = vand.u32 4294901760, %v1051_v6  ;;  %v13299_v61 = vpack.c.bf16 %v5474_v57, %v5462_v48  ;;  %v5468_v62 = vand.u32 4294901760, %v5467_v42  ;;  %v5479_v4 = vsub.f32 %v20415_v52, %v19001_v56  ;;  %v20419_v6 = vld [vmem:[#allocation64_spill] sm:$0xff] }
  0xea   : > { %v1057_v16 = vsub.f32 %v20416_v10, %v19005_v53  ;;  %v1069_v50 = vsub.f32 %v20418_v33, %v19004_v24  ;;  %v19012_v38 = vand.u32 4294901760, %v20419_v6  ;;  %v19014_v48 = vand.u32 4294901760, %v20420_v13  ;;  %v20422_v52 = vld [vmem:[#allocation68_spill] sm:$0xff]  ;;  %v20423_v53 = vld [vmem:[#allocation70_spill] sm:$0xff] }
  0xeb   : > { %v13307_v35 = vpack.c.bf16 %v1052_v40, %v1040_v7  ;;  %v5480_v57 = vand.u32 4294901760, %v5479_v4  ;;  %v19015_v56 = vand.u32 4294901760, %v20421_v47  ;;  %v19018_v0 = vand.u32 4294901760, %v20422_v52 }
  0xec   : > { %v1058_v42 = vand.u32 4294901760, %v1057_v16  ;;  %v1070_v40 = vand.u32 4294901760, %v1069_v50  ;;  %v5485_v7 = vsub.f32 %v20419_v6, %v19012_v38  ;;  %v5497_v24 = vsub.f32 %v20420_v13, %v19014_v48  ;;  %v20424_v50 = vld [vmem:[#allocation71_spill] sm:$0xff] }
  0xed   : > { %v19020_v33 = vand.u32 4294901760, %v20423_v53  ;;  %v13325_v49 = vpack.c.bf16 %v5480_v57, %v5468_v62  ;;  %v1063_v4 = vsub.f32 %v20421_v47, %v19015_v56  ;;  %v1075_v16 = vsub.f32 %v20422_v52, %v19018_v0  ;;  %v20425_v47 = vld [vmem:[#allocation73_spill] sm:$0xff] }
  0xee   : > { %v19021_v36 = vand.u32 4294901760, %v20424_v50  ;;  %v13334_v10 = vpack.c.bf16 %v1070_v40, %v1058_v42  ;;  %v5486_v38 = vand.u32 4294901760, %v5485_v7  ;;  %v5498_v6 = vand.u32 4294901760, %v5497_v24  ;;  %9938 = vmatpush1.bf16.xpose.msra.mxu0 %v13068_v20  ;;  %v20426_v40 = vld [vmem:[#allocation74_spill] sm:$0xff]  ;;  %v20427_v24 = vld [vmem:[#allocation76_spill] sm:$0xff]  ;;  %10706 = vmatpush1.bf16.xpose.msra.mxu1 %v13074_v44 }
  0xef   : > { %v5491_v48 = vsub.f32 %v20423_v53, %v19020_v33  ;;  %v1064_v62 = vand.u32 4294901760, %v1063_v4  ;;  %v1076_v57 = vand.u32 4294901760, %v1075_v16  ;;  %v19027_v13 = vand.u32 4294901760, %v20425_v47  ;;  %9940 = vmatprep.subr.bf16.mxu0 %v13080_v22  ;;  %v20430_v22 = vld [vmem:[#allocation80_spill] sm:$0xff]  ;;  %v20431_v53 = vld [vmem:[#allocation82_spill] sm:$0xff]  ;;  %10708 = vmatprep.subr.bf16.mxu1 %v13088_v55 }
  0xf0   : > { %v5503_v56 = vsub.f32 %v20424_v50, %v19021_v36  ;;  %v13344_v0 = vpack.c.bf16 %v5498_v6, %v5486_v38  ;;  %v19030_v7 = vand.u32 4294901760, %v20426_v40  ;;  %v19032_v52 = vand.u32 4294901760, %v20427_v24  ;;  %v20428_v36 = vld [vmem:[#allocation77_spill] sm:$0xff] }
  0xf1   : > { %v5492_v42 = vand.u32 4294901760, %v5491_v48  ;;  %v13349_v33 = vpack.c.bf16 %v1076_v57, %v1064_v62  ;;  %v1081_v16 = vsub.f32 %v20425_v47, %v19027_v13  ;;  %v19033_v50 = vand.u32 4294901760, %v20428_v36  ;;  %v20429_v48 = vld [vmem:[#allocation79_spill] sm:$0xff] }
  0xf2   : > { %v5504_v4 = vand.u32 4294901760, %v5503_v56  ;;  %v1093_v6 = vsub.f32 %v20426_v40, %v19030_v7  ;;  %v5509_v38 = vsub.f32 %v20427_v24, %v19032_v52  ;;  %v19044_v20 = vand.u32 4294901760, %v20429_v48 }
  0xf3   : > { %v19047_v62 = vand.u32 4294901760, %v20430_v22  ;;  %v1082_v57 = vand.u32 4294901760, %v1081_v16  ;;  %v5521_v13 = vsub.f32 %v20428_v36, %v19033_v50  ;;  %v19046_v47 = vand.u32 4294901760, %v20431_v53  ;;  %v20432_v50 = vld [vmem:[#allocation83_spill] sm:$0xff]  ;;  %v20433_v36 = vld [vmem:[#allocation85_spill] sm:$0xff] }
  0xf4   : > { %v13364_v56 = vpack.c.bf16 %v5504_v4, %v5492_v42  ;;  %v1094_v7 = vand.u32 4294901760, %v1093_v6  ;;  %v5510_v40 = vand.u32 4294901760, %v5509_v38  ;;  %v1087_v52 = vsub.f32 %v20429_v48, %v19044_v20 }
  0xf5   : > { %v1099_v42 = vsub.f32 %v20430_v22, %v19047_v62  ;;  %v5522_v4 = vand.u32 4294901760, %v5521_v13  ;;  %v5515_v16 = vsub.f32 %v20431_v53, %v19046_v47  ;;  %v19048_v44 = vand.u32 4294901760, %v20432_v50  ;;  %v20438_v53 = vld [vmem:[#allocation92_spill] sm:$0xff] }
  0xf6   : > { %v19051_v24 = vand.u32 4294901760, %v20433_v36  ;;  %v13382_v55 = vpack.c.bf16 %v1094_v7, %v1082_v57  ;;  %v1088_v6 = vand.u32 4294901760, %v1087_v52  ;;  %v19053_v46 = vand.u32 4294901760, %v20434_v39  ;;  %9942 = vmatpush1.bf16.xpose.msra.mxu0 %v13102_v28  ;;  %v20435_v7 = vld [vmem:[#allocation88_spill] sm:$0xff]  ;;  %v20436_v57 = vld [vmem:[#allocation89_spill] sm:$0xff]  ;;  %10710 = vmatpush1.bf16.xpose.msra.mxu1 %v13108_v12 }
  0xf7   : > { %v1100_v38 = vand.u32 4294901760, %v1099_v42  ;;  %v13385_v20 = vpack.c.bf16 %v5522_v4, %v5510_v40  ;;  %v5516_v48 = vand.u32 4294901760, %v5515_v16  ;;  %v5527_v13 = vsub.f32 %v20432_v50, %v19048_v44  ;;  %9944 = vmatprep.subr.bf16.mxu0 %v13152_v37  ;;  %v20437_v44 = vld [vmem:[#allocation91_spill] sm:$0xff]  ;;  %10712 = vmatprep.subr.bf16.mxu1 %v13162_v30  ;;  %v20443_v30 = vld [vmem:[#allocation98_spill] sm:$0xff]  ;;  %v262_v22 = vld [vmem:[%s12672_s9 + $0x48] sm:$0xff] }
  0xf8   : > { %v1105_v47 = vsub.f32 %v20433_v36, %v19051_v24  ;;  %v1117_v52 = vsub.f32 %v20434_v39, %v19053_v46  ;;  %v19056_v40 = vand.u32 4294901760, %v20435_v7  ;;  %v19058_v42 = vand.u32 4294901760, %v20436_v57  ;;  %v20439_v46 = vld [vmem:[#allocation94_spill] sm:$0xff] }
  0xf9   : > { %v13394_v62 = vpack.c.bf16 %v1100_v38, %v1088_v6  ;;  %v5528_v4 = vand.u32 4294901760, %v5527_v13  ;;  %v19062_v50 = vand.u32 4294901760, %v20437_v44  ;;  %v19064_v24 = vand.u32 4294901760, %v20438_v53 }
  0xfa   : > { %v1106_v16 = vand.u32 4294901760, %v1105_v47  ;;  %v1118_v36 = vand.u32 4294901760, %v1117_v52  ;;  %v5533_v6 = vsub.f32 %v20435_v7, %v19056_v40  ;;  %v5545_v38 = vsub.f32 %v20436_v57, %v19058_v42  ;;  %v20440_v52 = vld [vmem:[#allocation95_spill] sm:$0xff] }
  0xfb   : > { %v13412_v37 = vpack.c.bf16 %v5528_v4, %v5516_v48  ;;  %v1111_v47 = vsub.f32 %v20437_v44, %v19062_v50  ;;  %v1123_v13 = vsub.f32 %v20438_v53, %v19064_v24  ;;  %v19067_v40 = vand.u32 4294901760, %v20440_v52  ;;  %v20442_v44 = vld [vmem:[#allocation97_spill] sm:$0xff] }
  0xfc   : > { %v13422_v7 = vpack.c.bf16 %v1118_v36, %v1106_v16  ;;  %v5534_v42 = vand.u32 4294901760, %v5533_v6  ;;  %v5546_v28 = vand.u32 4294901760, %v5545_v38  ;;  %v20441_v12 = vand.u32 4294901760, %v20439_v46  ;;  %v20444_v16 = vld [vmem:[#allocation100_spill] sm:$0xff] }
  0xfd   : > { %v1112_v4 = vand.u32 4294901760, %v1111_v47  ;;  %v1124_v57 = vand.u32 4294901760, %v1123_v13  ;;  %v5551_v50 = vsub.f32 %v20440_v52, %v19067_v40  ;;  %v19069_v24 = vand.u32 4294901760, %v20442_v44  ;;  %712 = vmatmul.mubr.f32.vlgmr.msra.gmra.mrb[0].mxu0 %v13175_v43  ;;  %v20445_v13 = vld [vmem:[#allocation101_spill] sm:$0xff]  ;;  %5140 = vmatmul.mubr.f32.vlgmr.msra.gmra.mrb[0].mxu1 %v13175_v43 }
  0xfe   : > { %v5539_v48 = vsub.f32 %v20439_v46, %v20441_v12  ;;  %v13431_v53 = vpack.c.bf16 %v5546_v28, %v5534_v42  ;;  %v19072_v36 = vand.u32 4294901760, %v20443_v30  ;;  %v19074_v6 = vand.u32 4294901760, %v20444_v16  ;;  %9946 = vmatpush1.bf16.xpose.msra.mxu0 %v13171_v18  ;;  %v20448_v46 = vld [vmem:[#allocation106_spill] sm:$0xff]  ;;  %10714 = vmatpush1.bf16.xpose.msra.mxu1 %v13189_v2  ;;  %v20450_v43 = vld [vmem:[#allocation109_spill] sm:$0xff] }
  0xff   : > { %v13436_v38 = vpack.c.bf16 %v1124_v57, %v1112_v4  ;;  %v5552_v12 = vand.u32 4294901760, %v5551_v50  ;;  %v1129_v47 = vsub.f32 %v20442_v44, %v19069_v24  ;;  %v19075_v40 = vand.u32 4294901760, %v20445_v13  ;;  %v20447_v4 = vld [vmem:[#allocation104_spill] sm:$0xff]  ;;  %9948 = vmatprep.subr.bf16.mxu0 %v13208_v14  ;;  %10716 = vmatprep.subr.bf16.mxu1 %v13212_v54 }
 0x100   : > { %v5540_v39 = vand.u32 4294901760, %v5539_v48  ;;  %v1141_v28 = vsub.f32 %v20443_v30, %v19072_v36  ;;  %v5557_v42 = vsub.f32 %v20444_v16, %v19074_v6  ;;  %v20446_v48 = vld [vmem:[#allocation103_spill] sm:$0xff]  ;;  %v19080_v50 = vand.u32 4294901760, %v20447_v4 }
 0x101   : > { %v19076_v57 = vand.u32 4294901760, %v20446_v48  ;;  %v1130_v24 = vand.u32 4294901760, %v1129_v47  ;;  %v5569_v18 = vsub.f32 %v20445_v13, %v19075_v40  ;;  %v19081_v44 = vand.u32 4294901760, %v20448_v46  ;;  %v20449_v47 = vld [vmem:[#allocation107_spill] sm:$0xff]  ;;  %v20451_v13 = vld [vmem:[#allocation110_spill] sm:$0xff] }
 0x102   : > { %v13452_v52 = vpack.c.bf16 %v5552_v12, %v5540_v39  ;;  %v1142_v36 = vand.u32 4294901760, %v1141_v28  ;;  %v5558_v30 = vand.u32 4294901760, %v5557_v42  ;;  %v1147_v39 = vsub.f32 %v20447_v4, %v19080_v50 }
 0x103   : > { %v1135_v6 = vsub.f32 %v20446_v48, %v19076_v57  ;;  %v5570_v14 = vand.u32 4294901760, %v5569_v18  ;;  %v5563_v12 = vsub.f32 %v20448_v46, %v19081_v44  ;;  %v19083_v40 = vand.u32 4294901760, %v20449_v47 }
 0x104   : > { %v19087_v28 = vand.u32 4294901760, %v20450_v43  ;;  %v13472_v42 = vpack.c.bf16 %v1142_v36, %v1130_v24  ;;  %v1148_v48 = vand.u32 4294901760, %v1147_v39  ;;  %v19086_v16 = vand.u32 4294901760, %v20451_v13  ;;  %v20452_v24 = vld [vmem:[#allocation112_spill] sm:$0xff] }
 0x105   : > { %v1136_v57 = vand.u32 4294901760, %v1135_v6  ;;  %v13475_v50 = vpack.c.bf16 %v5570_v14, %v5558_v30  ;;  %v5564_v2 = vand.u32 4294901760, %v5563_v12  ;;  %v5575_v18 = vsub.f32 %v20449_v47, %v19083_v40  ;;  %v20453_v30 = vld [vmem:[#allocation113_spill] sm:$0xff]  ;;  %v20454_v12 = vld [vmem:[#allocation115_spill] sm:$0xff]  ;;  %v20455_v47 = vld [vmem:[#allocation116_spill] sm:$0xff] }
 0x106   : > { %v1153_v44 = vsub.f32 %v20450_v43, %v19087_v28  ;;  %v1165_v54 = vsub.f32 %v20451_v13, %v19086_v16  ;;  %v19089_v36 = vand.u32 4294901760, %v20452_v24  ;;  %v19093_v6 = vand.u32 4294901760, %v20453_v30  ;;  %9950 = vmatpush1.bf16.xpose.msra.mxu0 %v13221_v26  ;;  %v20456_v28 = vld [vmem:[#allocation118_spill] sm:$0xff]  ;;  %v257_v43 = vld [vmem:[%s12672_s9 + $0x20] sm:$0xff]  ;;  %10718 = vmatpush1.bf16.xpose.msra.mxu1 %v13237_v1 }
 0x107   : > { %v13483_v46 = vpack.c.bf16 %v1148_v48, %v1136_v57  ;;  %v5576_v39 = vand.u32 4294901760, %v5575_v18  ;;  %v19095_v40 = vand.u32 4294901760, %v20454_v12  ;;  %v19096_v4 = vand.u32 4294901760, %v20455_v47  ;;  %v258_v18 = vld [vmem:[%s12672_s9 + $0x28] sm:$0xff]  ;;  %9952 = vmatprep.subr.bf16.mxu0 %v13247_v5  ;;  %10720 = vmatprep.subr.bf16.mxu1 %v13257_v19 }
 0x108   : > { %v1154_v14 = vand.u32 4294901760, %v1153_v44  ;;  %v1166_v48 = vand.u32 4294901760, %v1165_v54  ;;  %v5581_v57 = vsub.f32 %v20452_v24, %v19089_v36  ;;  %v5593_v16 = vsub.f32 %v20453_v30, %v19093_v6  ;;  %v20457_v36 = vld [vmem:[#allocation119_spill] sm:$0xff] }
 0x109   : > { %v13502_v44 = vpack.c.bf16 %v5576_v39, %v5564_v2  ;;  %v1159_v26 = vsub.f32 %v20454_v12, %v19095_v40  ;;  %v1171_v54 = vsub.f32 %v20455_v47, %v19096_v4  ;;  %v19099_v24 = vand.u32 4294901760, %v20457_v36  ;;  %v261_v12 = vld [vmem:[%s12672_s9 + $0x40] sm:$0xff] }
 0x10a   : > { %v13513_v6 = vpack.c.bf16 %v1166_v48, %v1154_v14  ;;  %v5582_v13 = vand.u32 4294901760, %v5581_v57  ;;  %v5594_v30 = vand.u32 4294901760, %v5593_v16  ;;  %v20458_v5 = vand.u32 4294901760, %v20456_v28 }
 0x10b   : > { %v1160_v39 = vand.u32 4294901760, %v1159_v26  ;;  %v1172_v40 = vand.u32 4294901760, %v1171_v54  ;;  %v5599_v4 = vsub.f32 %v20457_v36, %v19099_v24  ;;  %v13522_v47 = vand.u32 4294901760, %v258_v18  ;;  %v20463_v54 = vld [vmem:[#allocation121_spill] sm:$0xff] }
 0x10c   : > { %v5587_v2 = vsub.f32 %v20456_v28, %v20458_v5  ;;  %v13525_v14 = vpack.c.bf16 %v5594_v30, %v5582_v13  ;;  %v13527_v48 = vand.u32 4294901760, %v257_v43  ;;  %v13529_v57 = vand.u32 4294901760, %v262_v22  ;;  %v20466_v13 = vld [vmem:[#allocation122_spill] sm:$0xff] }
 0x10d   : > { %20459 = vst [vmem:[#allocation199_spill] sm:$0xff] %v13522_v47  ;;  %v13531_v5 = vpack.c.bf16 %v1172_v40, %v1160_v39  ;;  %v5600_v1 = vand.u32 4294901760, %v5599_v4  ;;  %v13534_v26 = vsub.f32 %v258_v18, %v13522_v47  ;;  %v19104_v28 = vand.u32 4294901760, %v20463_v54  ;;  %v20469_v18 = vld [vmem:[#allocation125_spill] sm:$0xff] }
 0x10e   : > { %v5588_v16 = vand.u32 4294901760, %v5587_v2  ;;  %20460 = vst [vmem:[#allocation200_spill] sm:$0xff] %v13527_v48  ;;  %20461 = vst [vmem:[#allocation201_spill] sm:$0xff] %v13529_v57  ;;  %v13538_v24 = vsub.f32 %v257_v43, %v13527_v48  ;;  %v13541_v19 = vsub.f32 %v262_v22, %v13529_v57  ;;  %v19108_v30 = vand.u32 4294901760, %v20466_v13  ;;  %v20467_v2 = vld [vmem:[#allocation124_spill] sm:$0xff]  ;;  %9954 = vmatpush1.bf16.xpose.msra.mxu0 %v13262_v23  ;;  %v265_v48 = vld [vmem:[%s12672_s9 + $0x60] sm:$0xff] }
 0x10f   : > { %20462 = vst [vmem:[#allocation202_spill] sm:$0xff] %v13534_v26  ;;  %v19109_v36 = vand.u32 4294901760, %v20467_v2  ;;  %v13549_v40 = vand.u32 4294901760, %v13534_v26  ;;  %v1177_v4 = vsub.f32 %v20463_v54, %v19104_v28  ;;  %v19116_v43 = vand.u32 4294901760, %v20469_v18  ;;  %9956 = vmatprep.subr.bf16.mxu0 %v13295_v11  ;;  %10722 = vmatpush1.bf16.xpose.msra.mxu1 %v13277_v45 }
 0x110   : > { %20464 = vst [vmem:[#allocation203_spill] sm:$0xff] %v13538_v24  ;;  %20465 = vst [vmem:[#allocation204_spill] sm:$0xff] %v13541_v19  ;;  %v13546_v41 = vpack.c.bf16 %v5600_v1, %v5588_v16  ;;  %v13557_v22 = vand.u32 4294901760, %v13538_v24  ;;  %v13560_v39 = vand.u32 4294901760, %v13541_v19  ;;  %v1189_v16 = vsub.f32 %v20466_v13, %v19108_v30  ;;  %10724 = vmatprep.subr.bf16.mxu1 %v13299_v61 }
 0x111   : > { %20468 = vst [vmem:[#allocation205_spill] sm:$0xff] %v13549_v40  ;;  %v5605_v1 = vsub.f32 %v20467_v2, %v19109_v36  ;;  %v720_v23 = vsub.f32 %v13534_v26, %v13549_v40  ;;  %v1178_v28 = vand.u32 4294901760, %v1177_v4  ;;  %v5617_v54 = vsub.f32 %v20469_v18, %v19116_v43  ;;  %v20474_v26 = vld [vmem:[#allocation127_spill] sm:$0xff]  ;;  %v266_v18 = vld [vmem:[%s12672_s9 + $0x68] sm:$0xff] }
 0x112   : > { %20470 = vst [vmem:[#allocation206_spill] sm:$0xff] %v13557_v22  ;;  %20471 = vst [vmem:[#allocation207_spill] sm:$0xff] %v13560_v39  ;;  %v13574_v57 = vand.u32 4294901760, %v261_v12  ;;  %v726_v30 = vsub.f32 %v13538_v24, %v13557_v22  ;;  %v736_v36 = vsub.f32 %v13541_v19, %v13560_v39  ;;  %v1190_v2 = vand.u32 4294901760, %v1189_v16  ;;  %v20475_v39 = vld [vmem:[#allocation128_spill] sm:$0xff] }
 0x113   : > { %v5606_v13 = vand.u32 4294901760, %v5605_v1  ;;  %v721_v11 = vand.u32 4294901760, %v720_v23  ;;  %v5618_v40 = vand.u32 4294901760, %v5617_v54  ;;  %v19128_v43 = vand.u32 4294901760, %v20474_v26  ;;  %v270_v1 = vld [vmem:[%s12672_s9 + $0x88] sm:$0xff]  ;;  %v20477_v23 = vld [vmem:[#allocation130_spill] sm:$0xff] }
 0x114   : > { %20472 = vst [vmem:[#allocation208_spill] sm:$0xff] %v13574_v57  ;;  %v13582_v4 = vsub.f32 %v261_v12, %v13574_v57  ;;  %v727_v22 = vand.u32 4294901760, %v726_v30  ;;  %v737_v24 = vand.u32 4294901760, %v736_v36  ;;  %v13588_v47 = vpack.c.bf16 %v1190_v2, %v1178_v28  ;;  %v20478_v36 = vld [vmem:[#allocation131_spill] sm:$0xff] }
 0x115   : > { %v19129_v16 = vand.u32 4294901760, %v20475_v39  ;;  %722 = vmatprep.mubr.f32.mxu0 %v721_v11  ;;  %5150 = vmatprep.mubr.f32.mxu1 %v721_v11  ;;  %v13592_v45 = vpack.c.bf16 %v5618_v40, %v5606_v13  ;;  %v1183_v54 = vsub.f32 %v20474_v26, %v19128_v43  ;;  %v19133_v61 = vand.u32 4294901760, %v20477_v23  ;;  %v20491_v26 = vld [vmem:[#allocation137_spill] sm:$0xff] }
 0x116   : > { %20473 = vst [vmem:[#allocation209_spill] sm:$0xff] %v13582_v4  ;;  %v13595_v12 = vand.u32 4294901760, %v13582_v4  ;;  %728 = vmatmul.mubr.f32.gmra.mrb[2].mxu0 %v727_v22  ;;  %5156 = vmatmul.mubr.f32.gmra.mrb[2].mxu1 %v727_v22  ;;  %v19139_v30 = vand.u32 4294901760, %v20478_v36  ;;  %v13605_v2 = vand.u32 4294901760, %v266_v18  ;;  %v13607_v13 = vand.u32 4294901760, %v265_v48 }
 0x117   : > { %v1195_v28 = vsub.f32 %v20475_v39, %v19129_v16  ;;  %738 = vmatprep.mubr.f32.mxu0 %v737_v24  ;;  %5166 = vmatprep.mubr.f32.mxu1 %v737_v24  ;;  %v1184_v11 = vand.u32 4294901760, %v1183_v54  ;;  %v5611_v22 = vsub.f32 %v20477_v23, %v19133_v61  ;;  %v13614_v43 = vand.u32 4294901760, %v270_v1 }
 0x118   : > { %20476 = vst [vmem:[#allocation210_spill] sm:$0xff] %v13595_v12  ;;  %20479 = vst [vmem:[#allocation211_spill] sm:$0xff] %v13605_v2  ;;  %v742_v40 = vsub.f32 %v13582_v4, %v13595_v12  ;;  %9958 = vmatpush1.bf16.xpose.msra.mxu0 %v13307_v35  ;;  %v5623_v19 = vsub.f32 %v20478_v36, %v19139_v30  ;;  %v13621_v39 = vsub.f32 %v266_v18, %v13605_v2  ;;  %v20485_v35 = vld [vmem:[#allocation133_spill] sm:$0xff] }
 0x119   : > { %20480 = vst [vmem:[#allocation212_spill] sm:$0xff] %v13607_v13  ;;  %20481 = vst [vmem:[#allocation213_spill] sm:$0xff] %v13614_v43  ;;  %v1196_v16 = vand.u32 4294901760, %v1195_v28  ;;  %v13624_v24 = vsub.f32 %v265_v48, %v13607_v13  ;;  %9960 = vmatprep.subr.bf16.mxu0 %v13334_v10  ;;  %v5612_v61 = vand.u32 4294901760, %v5611_v22  ;;  %v13628_v12 = vsub.f32 %v270_v1, %v13614_v43  ;;  %v20489_v1 = vld [vmem:[#allocation134_spill] sm:$0xff]  ;;  %v20553_v2 = vld [vmem:[#allocation169_spill] sm:$0xff] }
 0x11a   : > { %20482 = vst [vmem:[#allocation214_spill] sm:$0xff] %v13621_v39  ;;  %v743_v54 = vand.u32 4294901760, %v742_v40  ;;  %v19144_v28 = vand.u32 4294901760, %v20485_v35  ;;  %v5624_v23 = vand.u32 4294901760, %v5623_v19  ;;  %v13634_v30 = vand.u32 4294901760, %v13621_v39  ;;  %10726 = vmatpush1.bf16.xpose.msra.mxu1 %v13325_v49  ;;  %v20490_v40 = vld [vmem:[#allocation136_spill] sm:$0xff] }
 0x11b   : > { %20483 = vst [vmem:[#allocation215_spill] sm:$0xff] %v13624_v24  ;;  %20484 = vst [vmem:[#allocation216_spill] sm:$0xff] %v13628_v12  ;;  %v13631_v4 = vpack.c.bf16 %v1196_v16, %v1184_v11  ;;  %v13637_v18 = vand.u32 4294901760, %v13624_v24  ;;  %v13641_v10 = vand.u32 4294901760, %v13628_v12  ;;  %v269_v11 = vld [vmem:[%s12672_s9 + $0x80] sm:$0xff]  ;;  %10728 = vmatprep.subr.bf16.mxu1 %v13344_v0  ;;  %v19160_v43 = vand.u32 4294901760, %v20491_v26 }
 0x11c   : > { %20486 = vst [vmem:[#allocation217_spill] sm:$0xff] %v13634_v30  ;;  %744 = vmatmul.mubr.f32.gmra.mrb[4].mxu0 %v743_v54  ;;  %v1201_v48 = vsub.f32 %v20485_v35, %v19144_v28  ;;  %5172 = vmatmul.mubr.f32.gmra.mrb[4].mxu1 %v743_v54  ;;  %v13650_v22 = vpack.c.bf16 %v5624_v23, %v5612_v61  ;;  %v20492_v19 = vand.u32 4294901760, %v20489_v1  ;;  %v20493_v0 = vand.u32 4294901760, %v20490_v40 }
 0x11d   : > { %20487 = vst [vmem:[#allocation218_spill] sm:$0xff] %v13637_v18  ;;  %20488 = vst [vmem:[#allocation219_spill] sm:$0xff] %v13641_v10  ;;  %v752_v49 = vsub.f32 %v13621_v39, %v13634_v30  ;;  %v758_v36 = vsub.f32 %v13624_v24, %v13637_v18  ;;  %v768_v28 = vsub.f32 %v13628_v12, %v13641_v10  ;;  %v13668_v30 = vand.u32 4294901760, %v269_v11  ;;  %v274_v24 = vld [vmem:[%s12672_s9 + $0xa8] sm:$0xff]  ;;  %v20495_v39 = vld [vmem:[#allocation139_spill] sm:$0xff] }
 0x11e   : > { %v1202_v16 = vand.u32 4294901760, %v1201_v48  ;;  %v1213_v35 = vsub.f32 %v20489_v1, %v20492_v19  ;;  %v5629_v23 = vsub.f32 %v20490_v40, %v20493_v0  ;;  %v5641_v18 = vsub.f32 %v20491_v26, %v19160_v43  ;;  %v20498_v1 = vld [vmem:[#allocation142_spill] sm:$0xff]  ;;  %v273_v26 = vld [vmem:[%s12672_s9 + $0xa0] sm:$0xff] }
 0x11f   : > { %v753_v61 = vand.u32 4294901760, %v752_v49  ;;  %v759_v54 = vand.u32 4294901760, %v758_v36  ;;  %20494 = vst [vmem:[#allocation220_spill] sm:$0xff] %v13668_v30  ;;  %v769_v10 = vand.u32 4294901760, %v768_v28  ;;  %v19162_v19 = vand.u32 4294901760, %v20495_v39  ;;  %v20497_v36 = vld [vmem:[#allocation140_spill] sm:$0xff] }
 0x120   : > { %v1214_v48 = vand.u32 4294901760, %v1213_v35  ;;  %v5630_v12 = vand.u32 4294901760, %v5629_v23  ;;  %9962 = vmatpush1.bf16.xpose.msra.mxu0 %v13349_v33  ;;  %v5642_v0 = vand.u32 4294901760, %v5641_v18  ;;  %v13674_v49 = vsub.f32 %v269_v11, %v13668_v30  ;;  %v20499_v33 = vld [vmem:[#allocation143_spill] sm:$0xff]  ;;  %v278_v11 = vld [vmem:[%s12672_s9 + $0xc8] sm:$0xff]  ;;  %v20544_v30 = vld [vmem:[#allocation166_spill] sm:$0xff] }
 0x121   : > { %754 = vmatprep.mubr.f32.mxu0 %v753_v61  ;;  %9964 = vmatprep.subr.bf16.mxu0 %v13382_v55  ;;  %v1207_v28 = vsub.f32 %v20495_v39, %v19162_v19  ;;  %v19165_v23 = vand.u32 4294901760, %v20499_v33  ;;  %v13686_v18 = vand.u32 4294901760, %v274_v24  ;;  %v20502_v55 = vand.u32 4294901760, %v20497_v36 }
 0x122   : > { %20496 = vst [vmem:[#allocation221_spill] sm:$0xff] %v13674_v49  ;;  %5182 = vmatprep.mubr.f32.mxu1 %v753_v61  ;;  %v13680_v35 = vpack.c.bf16 %v1214_v48, %v1202_v16  ;;  %760 = vmatmul.mubr.f32.gmra.mrb[6].mxu0 %v759_v54  ;;  %v13689_v40 = vpack.c.bf16 %v5642_v0, %v5630_v12  ;;  %v13692_v43 = vand.u32 4294901760, %v13674_v49  ;;  %v20503_v61 = vand.u32 4294901760, %v20498_v1 }
 0x123   : > { %20500 = vst [vmem:[#allocation222_spill] sm:$0xff] %v13686_v18  ;;  %5188 = vmatmul.mubr.f32.gmra.mrb[6].mxu1 %v759_v54  ;;  %v1219_v16 = vsub.f32 %v20497_v36, %v20502_v55  ;;  %770 = vmatprep.mubr.f32.mxu0 %v769_v10  ;;  %v1208_v19 = vand.u32 4294901760, %v1207_v28  ;;  %v5647_v12 = vsub.f32 %v20499_v33, %v19165_v23  ;;  %v13707_v0 = vand.u32 4294901760, %v273_v26  ;;  %v20509_v23 = vld [vmem:[#allocation145_spill] sm:$0xff] }
 0x124   : > { %20501 = vst [vmem:[#allocation223_spill] sm:$0xff] %v13692_v43  ;;  %v5635_v48 = vsub.f32 %v20498_v1, %v20503_v61  ;;  %10730 = vmatpush1.bf16.xpose.msra.mxu1 %v13364_v56  ;;  %v13705_v54 = vsub.f32 %v274_v24, %v13686_v18  ;;  %5198 = vmatprep.mubr.f32.mxu1 %v769_v10  ;;  %v13712_v1 = vand.u32 4294901760, %v278_v11  ;;  %v19174_v33 = vand.u32 4294901760, %v20509_v23  ;;  %v20511_v10 = vld [vmem:[#allocation146_spill] sm:$0xff] }
 0x125   : > { %20505 = vst [vmem:[#allocation225_spill] sm:$0xff] %v13707_v0  ;;  %10732 = vmatprep.subr.bf16.mxu1 %v13385_v20  ;;  %v774_v55 = vsub.f32 %v13674_v49, %v13692_v43  ;;  %v1220_v61 = vand.u32 4294901760, %v1219_v16  ;;  %v5648_v28 = vand.u32 4294901760, %v5647_v12  ;;  %v13718_v24 = vsub.f32 %v273_v26, %v13707_v0  ;;  %v290_v0 = vld [vmem:[%s12672_s9 + $0x128] sm:$0xff] }
 0x126   : > { %20504 = vst [vmem:[#allocation224_spill] sm:$0xff] %v13705_v54  ;;  %v5636_v56 = vand.u32 4294901760, %v5635_v48  ;;  %20506 = vst [vmem:[#allocation226_spill] sm:$0xff] %v13712_v1  ;;  %v13715_v36 = vand.u32 4294901760, %v13705_v54  ;;  %v13724_v20 = vsub.f32 %v278_v11, %v13712_v1  ;;  %v19180_v16 = vand.u32 4294901760, %v20511_v10  ;;  %v277_v48 = vld [vmem:[%s12672_s9 + $0xc0] sm:$0xff] }
 0x127   : > { %20508 = vst [vmem:[#allocation228_spill] sm:$0xff] %v13718_v24  ;;  %v775_v39 = vand.u32 4294901760, %v774_v55  ;;  %v13721_v18 = vpack.c.bf16 %v1220_v61, %v1208_v19  ;;  %v13733_v49 = vand.u32 4294901760, %v13718_v24  ;;  %v1225_v26 = vsub.f32 %v20509_v23, %v19174_v33  ;;  %v20514_v55 = vld [vmem:[#allocation148_spill] sm:$0xff] }
 0x128   : > { %20507 = vst [vmem:[#allocation227_spill] sm:$0xff] %v13715_v36  ;;  %20510 = vst [vmem:[#allocation229_spill] sm:$0xff] %v13724_v20  ;;  %v13728_v43 = vpack.c.bf16 %v5648_v28, %v5636_v56  ;;  %v784_v12 = vsub.f32 %v13705_v54, %v13715_v36  ;;  %9966 = vmatpush1.bf16.xpose.msra.mxu0 %v13394_v62  ;;  %v13740_v19 = vand.u32 4294901760, %v13724_v20  ;;  %v19190_v61 = vand.u32 4294901760, %v20514_v55  ;;  %v20515_v56 = vld [vmem:[#allocation149_spill] sm:$0xff] }
 0x129   : > { %20512 = vst [vmem:[#allocation230_spill] sm:$0xff] %v13733_v49  ;;  %5204 = vmatmul.mubr.f32.gmra.mrb[8].mxu1 %v775_v39  ;;  %v1237_v11 = vsub.f32 %v20511_v10, %v19180_v16  ;;  %9968 = vmatprep.subr.bf16.mxu0 %v13422_v7  ;;  %v790_v62 = vsub.f32 %v13718_v24, %v13733_v49  ;;  %v1226_v36 = vand.u32 4294901760, %v1225_v26  ;;  %v13750_v54 = vand.u32 4294901760, %v277_v48  ;;  %v20519_v49 = vld [vmem:[#allocation151_spill] sm:$0xff]  ;;  %v20520_v10 = vld [vmem:[#allocation152_spill] sm:$0xff] }
 0x12a   : > { %20513 = vst [vmem:[#allocation231_spill] sm:$0xff] %v13740_v19  ;;  %776 = vmatmul.mubr.f32.gmra.mrb[8].mxu0 %v775_v39  ;;  %v785_v33 = vand.u32 4294901760, %v784_v12  ;;  %v800_v23 = vsub.f32 %v13724_v20, %v13740_v19  ;;  %v5653_v28 = vsub.f32 %v20514_v55, %v19190_v61  ;;  %v20517_v7 = vand.u32 4294901760, %v20515_v56  ;;  %v282_v19 = vld [vmem:[%s12672_s9 + $0xe8] sm:$0xff]  ;;  %v281_v20 = vld [vmem:[%s12672_s9 + $0xe0] sm:$0xff] }
 0x12b   : > { %20516 = vst [vmem:[#allocation232_spill] sm:$0xff] %v13750_v54  ;;  %v1238_v16 = vand.u32 4294901760, %v1237_v11  ;;  %v791_v12 = vand.u32 4294901760, %v790_v62  ;;  %v13762_v26 = vsub.f32 %v277_v48, %v13750_v54  ;;  %v19193_v24 = vand.u32 4294901760, %v20519_v49 }
 0x12c   : > { %v5665_v39 = vsub.f32 %v20515_v56, %v20517_v7  ;;  %10734 = vmatpush1.bf16.xpose.msra.mxu1 %v13412_v37  ;;  %786 = vmatprep.mubr.f32.mxu0 %v785_v33  ;;  %v19197_v11 = vand.u32 4294901760, %v20520_v10  ;;  %v801_v61 = vand.u32 4294901760, %v800_v23  ;;  %v5654_v7 = vand.u32 4294901760, %v5653_v28  ;;  %v286_v23 = vld [vmem:[%s12672_s9 + $0x108] sm:$0xff] }
 0x12d   : > { %20518 = vst [vmem:[#allocation233_spill] sm:$0xff] %v13762_v26  ;;  %10736 = vmatprep.subr.bf16.mxu1 %v13431_v53  ;;  %5214 = vmatprep.mubr.f32.mxu1 %v785_v33  ;;  %v13769_v55 = vpack.c.bf16 %v1238_v16, %v1226_v36  ;;  %v13772_v48 = vand.u32 4294901760, %v13762_v26  ;;  %v1231_v62 = vsub.f32 %v20519_v49, %v19193_v24  ;;  %v20522_v53 = vld [vmem:[#allocation154_spill] sm:$0xff]  ;;  %v20523_v16 = vld [vmem:[#allocation155_spill] sm:$0xff]  ;;  %v19234_v13 = vand.u32 4294901760, %v20544_v30 }
 0x12e   : > { %v5666_v37 = vand.u32 4294901760, %v5665_v39  ;;  %792 = vmatmul.mubr.f32.gmra.mrb[10].mxu0 %v791_v12  ;;  %5220 = vmatmul.mubr.f32.gmra.mrb[10].mxu1 %v791_v12  ;;  %v1243_v56 = vsub.f32 %v20520_v10, %v19197_v11  ;;  %v19199_v33 = vand.u32 4294901760, %v20522_v53  ;;  %v19204_v28 = vand.u32 4294901760, %v20523_v16 }
 0x12f   : > { %20521 = vst [vmem:[#allocation234_spill] sm:$0xff] %v13772_v48  ;;  %802 = vmatprep.mubr.f32.mxu0 %v801_v61  ;;  %5230 = vmatprep.mubr.f32.mxu1 %v801_v61  ;;  %v13785_v39 = vand.u32 4294901760, %v282_v19  ;;  %v13787_v12 = vand.u32 4294901760, %v281_v20  ;;  %v806_v24 = vsub.f32 %v13762_v26, %v13772_v48  ;;  %v1232_v49 = vand.u32 4294901760, %v1231_v62 }
 0x130   : > { %v13782_v36 = vpack.c.bf16 %v5666_v37, %v5654_v7  ;;  %v1244_v54 = vand.u32 4294901760, %v1243_v56  ;;  %v5659_v11 = vsub.f32 %v20522_v53, %v19199_v33  ;;  %9970 = vmatpush1.bf16.xpose.msra.mxu0 %v13436_v38  ;;  %v5671_v61 = vsub.f32 %v20523_v16, %v19204_v28  ;;  %v20529_v38 = vld [vmem:[#allocation157_spill] sm:$0xff]  ;;  %v285_v53 = vld [vmem:[%s12672_s9 + $0x100] sm:$0xff] }
 0x131   : > { %20524 = vst [vmem:[#allocation235_spill] sm:$0xff] %v13785_v39  ;;  %20525 = vst [vmem:[#allocation236_spill] sm:$0xff] %v13787_v12  ;;  %v13799_v7 = vsub.f32 %v282_v19, %v13785_v39  ;;  %v13802_v37 = vsub.f32 %v281_v20, %v13787_v12  ;;  %v13804_v10 = vand.u32 4294901760, %v286_v23  ;;  %9972 = vmatprep.subr.bf16.mxu0 %v13472_v42  ;;  %v807_v56 = vand.u32 4294901760, %v806_v24  ;;  %v20534_v24 = vld [vmem:[#allocation160_spill] sm:$0xff]  ;;  %v20541_v39 = vld [vmem:[#allocation163_spill] sm:$0xff] }
 0x132   : > { %v13807_v62 = vpack.c.bf16 %v1244_v54, %v1232_v49  ;;  %v5660_v33 = vand.u32 4294901760, %v5659_v11  ;;  %v19209_v48 = vand.u32 4294901760, %v20529_v38  ;;  %v5672_v26 = vand.u32 4294901760, %v5671_v61  ;;  %v20533_v49 = vld [vmem:[#allocation158_spill] sm:$0xff]  ;;  %v20535_v61 = vld [vmem:[#allocation161_spill] sm:$0xff] }
 0x133   : > { %20526 = vst [vmem:[#allocation237_spill] sm:$0xff] %v13799_v7  ;;  %20527 = vst [vmem:[#allocation238_spill] sm:$0xff] %v13802_v37  ;;  %v13811_v28 = vand.u32 4294901760, %v13799_v7  ;;  %v13814_v19 = vand.u32 4294901760, %v13802_v37  ;;  %v13817_v20 = vsub.f32 %v286_v23, %v13804_v10  ;;  %808 = vmatmul.mubr.f32.gmra.mrb[12].mxu0 %v807_v56  ;;  %5236 = vmatmul.mubr.f32.gmra.mrb[12].mxu1 %v807_v56  ;;  %v20537_v11 = vand.u32 4294901760, %v20533_v49 }
 0x134   : > { %20528 = vst [vmem:[#allocation239_spill] sm:$0xff] %v13804_v10  ;;  %10738 = vmatpush1.bf16.xpose.msra.mxu1 %v13452_v52  ;;  %v1249_v42 = vsub.f32 %v20529_v38, %v19209_v48  ;;  %v13828_v12 = vpack.c.bf16 %v5672_v26, %v5660_v33  ;;  %v20539_v33 = vand.u32 4294901760, %v20535_v61  ;;  %v19236_v1 = vand.u32 4294901760, %v20541_v39 }
 0x135   : > { %20530 = vst [vmem:[#allocation157_spill] sm:$0xff] %v13811_v28  ;;  %20531 = vst [vmem:[#allocation240_spill] sm:$0xff] %v13814_v19  ;;  %10740 = vmatprep.subr.bf16.mxu1 %v13475_v50  ;;  %v816_v52 = vsub.f32 %v13799_v7, %v13811_v28  ;;  %v822_v23 = vsub.f32 %v13802_v37, %v13814_v19  ;;  %v13835_v48 = vand.u32 4294901760, %v13817_v20  ;;  %v20538_v50 = vand.u32 4294901760, %v20534_v24 }
 0x136   : > { %20532 = vst [vmem:[#allocation241_spill] sm:$0xff] %v13817_v20  ;;  %v1250_v54 = vand.u32 4294901760, %v1249_v42  ;;  %v1261_v16 = vsub.f32 %v20533_v49, %v20537_v11  ;;  %v5689_v56 = vsub.f32 %v20535_v61, %v20539_v33  ;;  %v13848_v42 = vand.u32 4294901760, %v285_v53 }
 0x137   : > { %20536 = vst [vmem:[#allocation158_spill] sm:$0xff] %v13835_v48  ;;  %v5677_v26 = vsub.f32 %v20534_v24, %v20538_v50  ;;  %v817_v28 = vand.u32 4294901760, %v816_v52  ;;  %v823_v19 = vand.u32 4294901760, %v822_v23  ;;  %v832_v37 = vsub.f32 %v13817_v20, %v13835_v48  ;;  %v20543_v52 = vld [vmem:[#allocation164_spill] sm:$0xff]  ;;  %v289_v48 = vld [vmem:[%s12672_s9 + $0x120] sm:$0xff] }
 0x138   : > { %20540 = vst [vmem:[#allocation160_spill] sm:$0xff] %v13848_v42  ;;  %v1262_v7 = vand.u32 4294901760, %v1261_v16  ;;  %v5690_v11 = vand.u32 4294901760, %v5689_v56  ;;  %9974 = vmatpush1.bf16.xpose.msra.mxu0 %v13483_v46  ;;  %v13854_v33 = vsub.f32 %v285_v53, %v13848_v42  ;;  %v19235_v23 = vand.u32 4294901760, %v20543_v52  ;;  %v294_v20 = vld [vmem:[%s12672_s9 + $0x148] sm:$0xff] }
 0x139   : > { %v5678_v10 = vand.u32 4294901760, %v5677_v26  ;;  %818 = vmatprep.mubr.f32.mxu0 %v817_v28  ;;  %v833_v50 = vand.u32 4294901760, %v832_v37  ;;  %9976 = vmatprep.subr.bf16.mxu0 %v13513_v6  ;;  %v1255_v46 = vsub.f32 %v20541_v39, %v19236_v1  ;;  %v20545_v37 = vld [vmem:[#allocation167_spill] sm:$0xff]  ;;  %v19250_v57 = vand.u32 4294901760, %v20553_v2 }
 0x13a   : > { %20542 = vst [vmem:[#allocation161_spill] sm:$0xff] %v13854_v33  ;;  %5246 = vmatprep.mubr.f32.mxu1 %v817_v28  ;;  %v13861_v16 = vpack.c.bf16 %v1262_v7, %v1250_v54  ;;  %v19239_v53 = vand.u32 4294901760, %v20545_v37  ;;  %824 = vmatmul.mubr.f32.gmra.mrb[14].mxu0 %v823_v19  ;;  %v13870_v56 = vand.u32 4294901760, %v13854_v33  ;;  %v1267_v6 = vsub.f32 %v20543_v52, %v19235_v23 }
 0x13b   : > { %v13863_v26 = vpack.c.bf16 %v5690_v11, %v5678_v10  ;;  %5252 = vmatmul.mubr.f32.gmra.mrb[14].mxu1 %v823_v19  ;;  %v5683_v10 = vsub.f32 %v20544_v30, %v19234_v13  ;;  %v13878_v28 = vand.u32 4294901760, %v290_v0  ;;  %834 = vmatprep.mubr.f32.mxu0 %v833_v50  ;;  %v1256_v7 = vand.u32 4294901760, %v1255_v46 }
 0x13c   : > { %20546 = vst [vmem:[#allocation163_spill] sm:$0xff] %v13870_v56  ;;  %10742 = vmatpush1.bf16.xpose.msra.mxu1 %v13502_v44  ;;  %v5695_v19 = vsub.f32 %v20545_v37, %v19239_v53  ;;  %v13884_v54 = vand.u32 4294901760, %v289_v48  ;;  %v13886_v11 = vand.u32 4294901760, %v294_v20  ;;  %5262 = vmatprep.mubr.f32.mxu1 %v833_v50  ;;  %v838_v13 = vsub.f32 %v13854_v33, %v13870_v56  ;;  %v293_v56 = vld [vmem:[%s12672_s9 + $0x140] sm:$0xff] }
 0x13d   : > { %20547 = vst [vmem:[#allocation164_spill] sm:$0xff] %v13878_v28  ;;  %10744 = vmatprep.subr.bf16.mxu1 %v13525_v14  ;;  %v1268_v23 = vand.u32 4294901760, %v1267_v6  ;;  %v5684_v1 = vand.u32 4294901760, %v5683_v10  ;;  %v13892_v44 = vsub.f32 %v290_v0, %v13878_v28  ;;  %v20555_v6 = vld [vmem:[#allocation170_spill] sm:$0xff] }
 0x13e   : > { %20548 = vst [vmem:[#allocation166_spill] sm:$0xff] %v13884_v54  ;;  %20549 = vst [vmem:[#allocation167_spill] sm:$0xff] %v13886_v11  ;;  %v5696_v46 = vand.u32 4294901760, %v5695_v19  ;;  %v13895_v42 = vsub.f32 %v289_v48, %v13884_v54  ;;  %v13898_v53 = vsub.f32 %v294_v20, %v13886_v11  ;;  %v839_v27 = vand.u32 4294901760, %v838_v13 }
 0x13f   : > { %20550 = vst [vmem:[#allocation242_spill] sm:$0xff] %v13892_v44  ;;  %v13901_v14 = vpack.c.bf16 %v1268_v23, %v1256_v7  ;;  %v13904_v50 = vand.u32 4294901760, %v13892_v44  ;;  %v19257_v10 = vand.u32 4294901760, %v20555_v6  ;;  %v1273_v13 = vsub.f32 %v20553_v2, %v19250_v57  ;;  %v20558_v23 = vld [vmem:[#allocation172_spill] sm:$0xff] }
 0x140   : > { %20551 = vst [vmem:[#allocation243_spill] sm:$0xff] %v13895_v42  ;;  %20552 = vst [vmem:[#allocation244_spill] sm:$0xff] %v13898_v53  ;;  %v13908_v0 = vpack.c.bf16 %v5696_v46, %v5684_v1  ;;  %v13911_v19 = vand.u32 4294901760, %v13895_v42  ;;  %v13914_v48 = vand.u32 4294901760, %v13898_v53  ;;  %9978 = vmatpush1.bf16.xpose.msra.mxu0 %v13531_v5  ;;  %5268 = vmatmul.mubr.f32.gmra.mrb[16].mxu1 %v839_v27  ;;  %v19264_v7 = vand.u32 4294901760, %v20558_v23  ;;  %v20559_v46 = vld [vmem:[#allocation173_spill] sm:$0xff] }
 0x141   : > { %20554 = vst [vmem:[#allocation169_spill] sm:$0xff] %v13904_v50  ;;  %v848_v20 = vsub.f32 %v13892_v44, %v13904_v50  ;;  %v1285_v1 = vsub.f32 %v20555_v6, %v19257_v10  ;;  %9980 = vmatprep.subr.bf16.mxu0 %v13588_v47  ;;  %840 = vmatmul.mubr.f32.gmra.mrb[16].mxu0 %v839_v27  ;;  %v1274_v50 = vand.u32 4294901760, %v1273_v13  ;;  %v13932_v44 = vand.u32 4294901760, %v293_v56 }
 0x142   : > { %20556 = vst [vmem:[#allocation170_spill] sm:$0xff] %v13911_v19  ;;  %20557 = vst [vmem:[#allocation245_spill] sm:$0xff] %v13914_v48  ;;  %v854_v5 = vsub.f32 %v13895_v42, %v13911_v19  ;;  %v864_v57 = vsub.f32 %v13898_v53, %v13914_v48  ;;  %v5701_v33 = vsub.f32 %v20558_v23, %v19264_v7  ;;  %v20561_v54 = vand.u32 4294901760, %v20559_v46 }
 0x143   : > { %20560 = vst [vmem:[#allocation172_spill] sm:$0xff] %v13932_v44  ;;  %v849_v11 = vand.u32 4294901760, %v848_v20  ;;  %v1286_v10 = vand.u32 4294901760, %v1285_v1  ;;  %v13942_v42 = vsub.f32 %v293_v56, %v13932_v44  ;;  %v19275_v13 = vand.u32 4294901760, %v13044_v21  ;;  %v298_v20 = vld [vmem:[%s12672_s9 + $0x168] sm:$0xff]  ;;  %v297_v1 = vld [vmem:[%s12672_s9 + $0x160] sm:$0xff] }
 0x144   : > { %v5713_v47 = vsub.f32 %v20559_v46, %v20561_v54  ;;  %10746 = vmatpush1.bf16.xpose.msra.mxu1 %v13546_v41  ;;  %v855_v27 = vand.u32 4294901760, %v854_v5  ;;  %v865_v19 = vand.u32 4294901760, %v864_v57  ;;  %v5702_v48 = vand.u32 4294901760, %v5701_v33  ;;  %v20563_v54 = vld [vmem:[#allocation175_spill] sm:$0xff]  ;;  %v20565_v56 = vld [vmem:[#allocation177_spill] sm:$0xff]  ;;  %v20566_v44 = vld [vmem:[#allocation178_spill] sm:$0xff] }
 0x145   : > { %20562 = vst [vmem:[#allocation173_spill] sm:$0xff] %v13942_v42  ;;  %10748 = vmatprep.subr.bf16.mxu1 %v13592_v45  ;;  %850 = vmatprep.mubr.f32.mxu0 %v849_v11  ;;  %v13948_v7 = vpack.c.bf16 %v1286_v10, %v1274_v50  ;;  %v19276_v28 = vand.u32 4294901760, %v20563_v54  ;;  %v13952_v41 = vand.u32 4294901760, %v13942_v42  ;;  %v1279_v57 = vsub.f32 %v13044_v21, %v19275_v13 }
 0x146   : > { %v5714_v53 = vand.u32 4294901760, %v5713_v47  ;;  %5278 = vmatprep.mubr.f32.mxu1 %v849_v11  ;;  %856 = vmatmul.mubr.f32.gmra.mrb[18].mxu0 %v855_v27  ;;  %v19279_v5 = vand.u32 4294901760, %v20565_v56  ;;  %v19286_v45 = vand.u32 4294901760, %v20566_v44  ;;  %v13965_v50 = vand.u32 4294901760, %v298_v20 }
 0x147   : > { %20564 = vst [vmem:[#allocation246_spill] sm:$0xff] %v13952_v41  ;;  %5284 = vmatmul.mubr.f32.gmra.mrb[18].mxu1 %v855_v27  ;;  %866 = vmatprep.mubr.f32.mxu0 %v865_v19  ;;  %v1291_v11 = vsub.f32 %v20563_v54, %v19276_v28  ;;  %v13967_v10 = vand.u32 4294901760, %v297_v1  ;;  %v870_v47 = vsub.f32 %v13942_v42, %v13952_v41  ;;  %v1280_v13 = vand.u32 4294901760, %v1279_v57 }
 0x148   : > { %v13960_v33 = vpack.c.bf16 %v5714_v53, %v5702_v48  ;;  %20567 = vst [vmem:[#allocation178_spill] sm:$0xff] %v13965_v50  ;;  %5294 = vmatprep.mubr.f32.mxu1 %v865_v19  ;;  %v5707_v27 = vsub.f32 %v20565_v56, %v19279_v5  ;;  %v5719_v53 = vsub.f32 %v20566_v44, %v19286_v45  ;;  %v13984_v41 = vand.u32 4294901760, %v302_v25 }
 0x149   : > { %20568 = vst [vmem:[#allocation247_spill] sm:$0xff] %v13967_v10  ;;  %9982 = vmatpush1.bf16.xpose.msra.mxu0 %v13631_v4  ;;  %v1292_v48 = vand.u32 4294901760, %v1291_v11  ;;  %v13979_v28 = vsub.f32 %v298_v20, %v13965_v50  ;;  %v13982_v19 = vsub.f32 %v297_v1, %v13967_v10  ;;  %v871_v57 = vand.u32 4294901760, %v870_v47  ;;  %v301_v11 = vld [vmem:[%s12672_s9 + $0x180] sm:$0xff]  ;;  %v20576_v47 = vld [vmem:[#allocation181_spill] sm:$0xff]  ;;  %v306_v50 = vld [vmem:[%s12672_s9 + $0x1a8] sm:$0xff] }
 0x14a   : > { %20571 = vst [vmem:[#allocation250_spill] sm:$0xff] %v13984_v41  ;;  %9984 = vmatprep.subr.bf16.mxu0 %v13680_v35  ;;  %v5708_v5 = vand.u32 4294901760, %v5707_v27  ;;  %v5720_v42 = vand.u32 4294901760, %v5719_v53  ;;  %v19287_v56 = vand.u32 4294901760, %v20572_v17  ;;  %v13997_v1 = vsub.f32 %v302_v25, %v13984_v41  ;;  %v20577_v53 = vld [vmem:[#allocation183_spill] sm:$0xff] }
 0x14b   : > { %20569 = vst [vmem:[#allocation248_spill] sm:$0xff] %v13979_v28  ;;  %20570 = vst [vmem:[#allocation249_spill] sm:$0xff] %v13982_v19  ;;  %v13988_v54 = vpack.c.bf16 %v1292_v48, %v1280_v13  ;;  %v13991_v4 = vand.u32 4294901760, %v13979_v28  ;;  %v13994_v20 = vand.u32 4294901760, %v13982_v19  ;;  %872 = vmatmul.mubr.f32.gmra.mrb[20].mxu0 %v871_v57  ;;  %v19300_v27 = vand.u32 4294901760, %v20576_v47  ;;  %5300 = vmatmul.mubr.f32.gmra.mrb[20].mxu1 %v871_v57 }
 0x14c   : > { %20575 = vst [vmem:[#allocation252_spill] sm:$0xff] %v13997_v1  ;;  %10750 = vmatpush1.bf16.xpose.msra.mxu1 %v13650_v22  ;;  %v14001_v35 = vpack.c.bf16 %v5720_v42, %v5708_v5  ;;  %v1297_v13 = vsub.f32 %v20572_v17, %v19287_v56  ;;  %v14014_v42 = vand.u32 4294901760, %v13997_v1  ;;  %v20579_v5 = vld [vmem:[#allocation184_spill] sm:$0xff]  ;;  %v14023_v41 = vand.u32 4294901760, %v301_v11 }
 0x14d   : > { %20573 = vst [vmem:[#allocation180_spill] sm:$0xff] %v13991_v4  ;;  %20574 = vst [vmem:[#allocation251_spill] sm:$0xff] %v13994_v20  ;;  %10752 = vmatprep.subr.bf16.mxu1 %v13689_v40  ;;  %v880_v25 = vsub.f32 %v13979_v28, %v13991_v4  ;;  %v886_v22 = vsub.f32 %v13982_v19, %v13994_v20  ;;  %v19311_v45 = vand.u32 4294901760, %v20579_v5  ;;  %v20580_v40 = vand.u32 4294901760, %v20577_v53 }
 0x14e   : > { %20578 = vst [vmem:[#allocation181_spill] sm:$0xff] %v14014_v42  ;;  %v1298_v56 = vand.u32 4294901760, %v1297_v13  ;;  %v1309_v48 = vsub.f32 %v20576_v47, %v19300_v27  ;;  %20581 = vst [vmem:[#allocation184_spill] sm:$0xff] %v14023_v41  ;;  %v896_v20 = vsub.f32 %v13997_v1, %v14014_v42  ;;  %v14031_v27 = vsub.f32 %v301_v11, %v14023_v41 }
 0x14f   : > { %v5725_v57 = vsub.f32 %v20577_v53, %v20580_v40  ;;  %v881_v4 = vand.u32 4294901760, %v880_v25  ;;  %v887_v28 = vand.u32 4294901760, %v886_v22  ;;  %v5737_v13 = vsub.f32 %v20579_v5, %v19311_v45  ;;  %v305_v53 = vld [vmem:[%s12672_s9 + $0x1a0] sm:$0xff] }
 0x150   : > { %v1310_v19 = vand.u32 4294901760, %v1309_v48  ;;  %20582 = vst [vmem:[#allocation253_spill] sm:$0xff] %v14031_v27  ;;  %v19308_v40 = vand.u32 4294901760, %v13070_v59  ;;  %v897_v25 = vand.u32 4294901760, %v896_v20  ;;  %v19310_v42 = vand.u32 4294901760, %v13072_v31 }
 0x151   : > { %v5726_v10 = vand.u32 4294901760, %v5725_v57  ;;  %9986 = vmatpush1.bf16.xpose.msra.mxu0 %v13721_v18  ;;  %882 = vmatprep.mubr.f32.mxu0 %v881_v4  ;;  %v5738_v22 = vand.u32 4294901760, %v5737_v13  ;;  %v19309_v1 = vand.u32 4294901760, %v13076_v34  ;;  %v14043_v11 = vand.u32 4294901760, %v14031_v27  ;;  %v310_v57 = vld [vmem:[%s12672_s9 + $0x1c8] sm:$0xff] }
 0x152   : > { %9988 = vmatprep.subr.bf16.mxu0 %v13769_v55  ;;  %5310 = vmatprep.mubr.f32.mxu1 %v881_v4  ;;  %v14040_v48 = vpack.c.bf16 %v1310_v19, %v1298_v56  ;;  %v1303_v18 = vsub.f32 %v13070_v59, %v19308_v40  ;;  %v19314_v20 = vand.u32 4294901760, %v13078_v60  ;;  %v1315_v55 = vsub.f32 %v13072_v31, %v19310_v42 }
 0x153   : > { %20583 = vst [vmem:[#allocation254_spill] sm:$0xff] %v14043_v11  ;;  %888 = vmatmul.mubr.f32.gmra.mrb[22].mxu0 %v887_v28  ;;  %5316 = vmatmul.mubr.f32.gmra.mrb[22].mxu1 %v887_v28  ;;  %v14050_v13 = vpack.c.bf16 %v5738_v22, %v5726_v10  ;;  %v5731_v56 = vsub.f32 %v13076_v34, %v19309_v1  ;;  %v14058_v19 = vand.u32 4294901760, %v306_v50  ;;  %v14066_v10 = vand.u32 4294901760, %v305_v53 }
 0x154   : > { %10754 = vmatpush1.bf16.xpose.msra.mxu1 %v13728_v43  ;;  %898 = vmatprep.mubr.f32.mxu0 %v897_v25  ;;  %v902_v4 = vsub.f32 %v14031_v27, %v14043_v11  ;;  %v1304_v40 = vand.u32 4294901760, %v1303_v18  ;;  %v5743_v28 = vsub.f32 %v13078_v60, %v19314_v20  ;;  %v1316_v22 = vand.u32 4294901760, %v1315_v55 }
 0x155   : > { %20584 = vst [vmem:[#allocation255_spill] sm:$0xff] %v14058_v19  ;;  %20585 = vst [vmem:[#allocation256_spill] sm:$0xff] %v14066_v10  ;;  %10756 = vmatprep.subr.bf16.mxu1 %v13782_v36  ;;  %5326 = vmatprep.mubr.f32.mxu1 %v897_v25  ;;  %v5732_v1 = vand.u32 4294901760, %v5731_v56  ;;  %v14070_v42 = vsub.f32 %v306_v50, %v14058_v19  ;;  %v14072_v43 = vand.u32 4294901760, %v310_v57  ;;  %v19319_v20 = vand.u32 4294901760, %v13082_v15  ;;  %v309_v25 = vld [vmem:[%s12672_s9 + $0x1c0] sm:$0xff] }
 0x156   : > { %v903_v45 = vand.u32 4294901760, %v902_v4  ;;  %v5744_v11 = vand.u32 4294901760, %v5743_v28  ;;  %v14075_v18 = vsub.f32 %v305_v53, %v14066_v10  ;;  %v14078_v27 = vpack.c.bf16 %v1316_v22, %v1304_v40 }
 0x157   : > { %20586 = vst [vmem:[#allocation257_spill] sm:$0xff] %v14070_v42  ;;  %20587 = vst [vmem:[#allocation258_spill] sm:$0xff] %v14072_v43  ;;  %v14081_v41 = vand.u32 4294901760, %v14070_v42  ;;  %v14084_v36 = vsub.f32 %v310_v57, %v14072_v43  ;;  %v19320_v50 = vand.u32 4294901760, %v13086_v32  ;;  %v1321_v40 = vsub.f32 %v13082_v15, %v19319_v20  ;;  %v313_v43 = vld [vmem:[%s12672_s9 + $0x1e0] sm:$0xff] }
 0x158   : > { %20588 = vst [vmem:[#allocation259_spill] sm:$0xff] %v14075_v18  ;;  %904 = vmatmul.mubr.f32.gmra.mrb[24].mxu0 %v903_v45  ;;  %5332 = vmatmul.mubr.f32.gmra.mrb[24].mxu1 %v903_v45  ;;  %v14088_v55 = vpack.c.bf16 %v5744_v11, %v5732_v1  ;;  %v14091_v53 = vand.u32 4294901760, %v14075_v18  ;;  %v19327_v56 = vand.u32 4294901760, %v13090_v29  ;;  %v19338_v1 = vand.u32 4294901760, %v13092_v63 }
 0x159   : > { %20589 = vst [vmem:[#allocation260_spill] sm:$0xff] %v14081_v41  ;;  %20590 = vst [vmem:[#allocation261_spill] sm:$0xff] %v14084_v36  ;;  %9990 = vmatpush1.bf16.xpose.msra.mxu0 %v13807_v62  ;;  %v912_v57 = vsub.f32 %v14070_v42, %v14081_v41  ;;  %v14101_v4 = vand.u32 4294901760, %v14084_v36  ;;  %v1333_v45 = vsub.f32 %v13086_v32, %v19320_v50  ;;  %v1322_v62 = vand.u32 4294901760, %v1321_v40 }
 0x15a   : > { %20591 = vst [vmem:[#allocation262_spill] sm:$0xff] %v14091_v53  ;;  %9992 = vmatprep.subr.bf16.mxu0 %v13861_v16  ;;  %v918_v11 = vsub.f32 %v14075_v18, %v14091_v53  ;;  %v5749_v28 = vsub.f32 %v13090_v29, %v19327_v56  ;;  %v14113_v22 = vand.u32 4294901760, %v309_v25  ;;  %v5761_v42 = vsub.f32 %v13092_v63, %v19338_v1  ;;  %v314_v18 = vld [vmem:[%s12672_s9 + $0x1e8] sm:$0xff] }
 0x15b   : > { %20592 = vst [vmem:[#allocation263_spill] sm:$0xff] %v14101_v4  ;;  %v913_v20 = vand.u32 4294901760, %v912_v57  ;;  %v928_v50 = vsub.f32 %v14084_v36, %v14101_v4  ;;  %v1334_v41 = vand.u32 4294901760, %v1333_v45  ;;  %v19336_v56 = vand.u32 4294901760, %v13104_v3 }
 0x15c   : > { %20593 = vst [vmem:[#allocation264_spill] sm:$0xff] %v14113_v22  ;;  %10758 = vmatpush1.bf16.xpose.msra.mxu1 %v13828_v12  ;;  %v919_v16 = vand.u32 4294901760, %v918_v11  ;;  %v5750_v53 = vand.u32 4294901760, %v5749_v28  ;;  %v14122_v40 = vsub.f32 %v309_v25, %v14113_v22  ;;  %v5762_v4 = vand.u32 4294901760, %v5761_v42 }
 0x15d   : > { %10760 = vmatprep.subr.bf16.mxu1 %v13863_v26  ;;  %914 = vmatprep.mubr.f32.mxu0 %v913_v20  ;;  %v929_v57 = vand.u32 4294901760, %v928_v50  ;;  %v10003_v45 = vpack.c.bf16 %v1334_v41, %v1322_v62  ;;  %v19337_v36 = vand.u32 4294901760, %v13106_v9  ;;  %v1327_v25 = vsub.f32 %v13104_v3, %v19336_v56 }
 0x15e   : > { %5342 = vmatprep.mubr.f32.mxu1 %v913_v20  ;;  %920 = vmatmul.mubr.f32.gmra.mrb[26].mxu0 %v919_v16  ;;  %v14130_v12 = vand.u32 4294901760, %v14122_v40  ;;  %v19341_v11 = vand.u32 4294901760, %v13111_v8  ;;  %v19342_v28 = vand.u32 4294901760, %v13113_v51  ;;  %v10771_v26 = vpack.c.bf16 %v5762_v4, %v5750_v53 }
 0x15f   : > { %5348 = vmatmul.mubr.f32.gmra.mrb[26].mxu1 %v919_v16  ;;  %930 = vmatprep.mubr.f32.mxu0 %v929_v57  ;;  %v1339_v41 = vsub.f32 %v13106_v9, %v19337_v36  ;;  %v14140_v42 = vand.u32 4294901760, %v314_v18  ;;  %v14142_v20 = vand.u32 4294901760, %v313_v43  ;;  %v1328_v62 = vand.u32 4294901760, %v1327_v25 }
 0x160   : > { %20594 = vst [vmem:[#allocation265_spill] sm:$0xff] %v14130_v12  ;;  %5358 = vmatprep.mubr.f32.mxu1 %v929_v57  ;;  %v934_v50 = vsub.f32 %v14122_v40, %v14130_v12  ;;  %v5755_v56 = vsub.f32 %v13111_v8, %v19341_v11  ;;  %v5767_v53 = vsub.f32 %v13113_v51, %v19342_v28 }
 0x161   : > { %20595 = vst [vmem:[#allocation266_spill] sm:$0xff] %v14140_v42  ;;  %20596 = vst [vmem:[#allocation267_spill] sm:$0xff] %v14142_v20  ;;  %9994 = vmatpush1.bf16.xpose.msra.mxu0 %v13901_v14  ;;  %v1340_v4 = vand.u32 4294901760, %v1339_v41  ;;  %v14154_v16 = vsub.f32 %v314_v18, %v14140_v42  ;;  %v14157_v57 = vsub.f32 %v313_v43, %v14142_v20 }
 0x162   : > { %9996 = vmatprep.subr.bf16.mxu0 %v13948_v7  ;;  %v935_v25 = vand.u32 4294901760, %v934_v50  ;;  %v5756_v36 = vand.u32 4294901760, %v5755_v56  ;;  %v5768_v1 = vand.u32 4294901760, %v5767_v53  ;;  %v20601_v50 = vld [vmem:[#allocation183_spill] sm:$0xff] }
 0x163   : > { %v10005_v12 = vpack.c.bf16 %v1340_v4, %v1328_v62  ;;  %v14161_v11 = vand.u32 4294901760, %v14154_v16  ;;  %v14164_v28 = vand.u32 4294901760, %v14157_v57  ;;  %v20604_v62 = vld [vmem:[#allocation15_spill] sm:$0xff] }
 0x164   : > { %10762 = vmatpush1.bf16.xpose.msra.mxu1 %v13908_v0  ;;  %936 = vmatmul.mubr.f32.gmra.mrb[28].mxu0 %v935_v25  ;;  %v10773_v14 = vpack.c.bf16 %v5768_v1, %v5756_v36  ;;  %v20600_v1 = vld [vmem:[#allocation177_spill] sm:$0xff]  ;;  %v20606_v4 = vld [vmem:[#allocation19_spill] sm:$0xff]  ;;  %v20609_v36 = vld [vmem:[#allocation26_spill] sm:$0xff] }
 0x165   : > { %20597 = vst [vmem:[#allocation268_spill] sm:$0xff] %v14161_v11  ;;  %20598 = vst [vmem:[#allocation269_spill] sm:$0xff] %v14164_v28  ;;  %10764 = vmatprep.subr.bf16.mxu1 %v13960_v33  ;;  %5364 = vmatmul.mubr.f32.gmra.mrb[28].mxu1 %v935_v25  ;;  %v944_v7 = vsub.f32 %v14154_v16, %v14161_v11  ;;  %v950_v43 = vsub.f32 %v14157_v57, %v14164_v28  ;;  %v20607_v25 = vld [vmem:[#allocation20_spill] sm:$0xff]  ;;  %v20619_v28 = vld [vmem:[#allocation37_spill] sm:$0xff] }
 0x166   : > { %v10009_v41 = vpack.c.bf16 %v20607_v25, %v20606_v4  ;;  %v20613_v33 = vld [vmem:[#allocation28_spill] sm:$0xff]  ;;  %v20620_v11 = vld [vmem:[#allocation38_spill] sm:$0xff] }
 0x167   : > { %v945_v18 = vand.u32 4294901760, %v944_v7  ;;  %v951_v56 = vand.u32 4294901760, %v950_v43  ;;  %v20602_v43 = vld [vmem:[#allocation13_spill] sm:$0xff]  ;;  %v20610_v7 = vld [vmem:[#allocation195_spill] sm:$0xff] }
 0x169   : > { %9998 = vmatpush1.bf16.xpose.msra.mxu0 %v13988_v54  ;;  %946 = vmatprep.mubr.f32.mxu0 %v945_v18  ;;  %v20614_v54 = vld [vmem:[#allocation29_spill] sm:$0xff] }
 0x16a   : > { %10000 = vmatprep.subr.bf16.mxu0 %v14040_v48  ;;  %5374 = vmatprep.mubr.f32.mxu1 %v945_v18  ;;  %v20603_v18 = vld [vmem:[#allocation14_spill] sm:$0xff]  ;;  %v20612_v48 = vld [vmem:[#allocation23_spill] sm:$0xff]  ;;  %v10779_v0 = vpack.c.bf16 %v20614_v54, %v20613_v33  ;;  %v20622_v54 = vld [vmem:[#allocation33_spill] sm:$0xff] }
 0x16b   : > { %952 = vmatmul.mubr.f32.gmra.mrb[30].mxu0 %v951_v56  ;;  %5380 = vmatmul.mubr.f32.gmra.mrb[30].mxu1 %v951_v56  ;;  %v10007_v56 = vpack.c.bf16 %v20603_v18, %v20602_v43 }
 0x16c   : > { %10766 = vmatpush1.bf16.xpose.msra.mxu1 %v14001_v35  ;;  %1343 = vmatprep.mubr.f32.mxu0 %v13095_v58  ;;  %v20611_v35 = vld [vmem:[#allocation22_spill] sm:$0xff] }
 0x16d   : > { %10768 = vmatprep.subr.bf16.mxu1 %v14050_v13  ;;  %5771 = vmatprep.mubr.f32.mxu1 %v13095_v58  ;;  %v20615_v58 = vld [vmem:[#allocation199_spill] sm:$0xff] }
 0x171   : > { %10002 = vmatpush1.bf16.xpose.msra.mxu0 %v14078_v27  ;;  %v20599_v27 = vld [vmem:[#allocation175_spill] sm:$0xff] }
 0x172   : > { %10004 = vmatprep.subr.bf16.mxu0 %v10003_v45  ;;  %v20605_v45 = vld [vmem:[#allocation17_spill] sm:$0xff] }
 0x173   : > { %v10775_v53 = vpack.c.bf16 %v20605_v45, %v20604_v62 }
 0x174   : > { %10770 = vmatpush1.bf16.xpose.msra.mxu1 %v14088_v55  ;;  %v20608_v55 = vld [vmem:[#allocation24_spill] sm:$0xff] }
 0x175   : > { %10772 = vmatprep.subr.bf16.mxu1 %v10771_v26  ;;  %v10011_v13 = vpack.c.bf16 %v20609_v36, %v20608_v55  ;;  %v20618_v26 = vld [vmem:[#allocation200_spill] sm:$0xff] }
 0x179   : > { %10006 = vmatpush1.bf16.xpose.msra.mxu0 %v10005_v12  ;;  %v10777_v12 = vpack.c.bf16 %v20612_v48, %v20611_v35  ;;  %v20621_v48 = vld [vmem:[#allocation201_spill] sm:$0xff] }
 0x17a   : > { %10008 = vmatprep.subr.bf16.mxu0 %v10007_v56 }
 0x17c   : > { %10774 = vmatpush1.bf16.xpose.msra.mxu1 %v10773_v14  ;;  %v20616_v14 = vld [vmem:[#allocation30_spill] sm:$0xff] }
 0x17d   : > { %10776 = vmatprep.subr.bf16.mxu1 %v10775_v53  ;;  %v20617_v53 = vld [vmem:[#allocation32_spill] sm:$0xff] }
 0x17e   : > { %v10013_v56 = vpack.c.bf16 %v20617_v53, %v20616_v14  ;;  %v20627_v53 = vld [vmem:[#allocation211_spill] sm:$0xff] }
 0x180   : > { %1345 = vmatmul.mubr.f32.vlgmr.msra.gmra.mrb[0].mxu0 %v20610_v7 }
 0x181   : > { %10010 = vmatpush1.bf16.xpose.msra.mxu0 %v10009_v41  ;;  %1351 = vmatprep.mubr.f32.mxu0 %v20615_v58  ;;  %v10015_v41 = vpack.c.bf16 %v20620_v11, %v20619_v28  ;;  %v20629_v11 = vld [vmem:[#allocation44_spill] sm:$0xff] }
 0x182   : > { %10012 = vmatprep.subr.bf16.mxu0 %v10011_v13  ;;  %v20623_v13 = vld [vmem:[#allocation35_spill] sm:$0xff]  ;;  %v20632_v28 = vld [vmem:[#allocation212_spill] sm:$0xff] }
 0x183   : > { %5773 = vmatmul.mubr.f32.vlgmr.msra.gmra.mrb[0].mxu1 %v20610_v7  ;;  %v10781_v33 = vpack.c.bf16 %v20623_v13, %v20622_v54  ;;  %v20626_v7 = vld [vmem:[#allocation208_spill] sm:$0xff]  ;;  %v20630_v54 = vld [vmem:[#allocation49_spill] sm:$0xff] }
 0x184   : > { %10778 = vmatpush1.bf16.xpose.msra.mxu1 %v10777_v12  ;;  %5779 = vmatprep.mubr.f32.mxu1 %v20615_v58  ;;  %v20624_v12 = vld [vmem:[#allocation40_spill] sm:$0xff] }
 0x185   : > { %10780 = vmatprep.subr.bf16.mxu1 %v10779_v0  ;;  %1353 = vmatmul.mubr.f32.gmra.mrb[2].mxu0 %v20618_v26  ;;  %v20625_v0 = vld [vmem:[#allocation41_spill] sm:$0xff] }
 0x186   : > { %1359 = vmatprep.mubr.f32.mxu0 %v20621_v48  ;;  %v10783_v58 = vpack.c.bf16 %v20625_v0, %v20624_v12  ;;  %v20634_v0 = vld [vmem:[#allocation46_spill] sm:$0xff] }
 0x187   : > { %5781 = vmatmul.mubr.f32.gmra.mrb[2].mxu1 %v20618_v26  ;;  %v20628_v26 = vld [vmem:[#allocation43_spill] sm:$0xff] }
 0x188   : > { %5787 = vmatprep.mubr.f32.mxu1 %v20621_v48  ;;  %v10017_v13 = vpack.c.bf16 %v20629_v11, %v20628_v26  ;;  %v20631_v48 = vld [vmem:[#allocation50_spill] sm:$0xff]  ;;  %v20638_v11 = vld [vmem:[#allocation220_spill] sm:$0xff]  ;;  %v20644_v26 = vld [vmem:[#allocation225_spill] sm:$0xff] }
 0x189   : > { %10014 = vmatpush1.bf16.xpose.msra.mxu0 %v10013_v56  ;;  %v10019_v56 = vpack.c.bf16 %v20631_v48, %v20630_v54  ;;  %v20639_v48 = vld [vmem:[#allocation222_spill] sm:$0xff]  ;;  %v20641_v54 = vld [vmem:[#allocation56_spill] sm:$0xff] }
 0x18a   : > { %10016 = vmatprep.subr.bf16.mxu0 %v10015_v41  ;;  %1361 = vmatmul.mubr.f32.gmra.mrb[4].mxu0 %v20626_v7  ;;  %v20633_v41 = vld [vmem:[#allocation213_spill] sm:$0xff] }
 0x18b   : > { %5789 = vmatmul.mubr.f32.gmra.mrb[4].mxu1 %v20626_v7  ;;  %1367 = vmatprep.mubr.f32.mxu0 %v20627_v53  ;;  %v20635_v7 = vld [vmem:[#allocation47_spill] sm:$0xff] }
 0x18c   : > { %10782 = vmatpush1.bf16.xpose.msra.mxu1 %v10781_v33  ;;  %5795 = vmatprep.mubr.f32.mxu1 %v20627_v53  ;;  %v10785_v12 = vpack.c.bf16 %v20635_v7, %v20634_v0  ;;  %v20636_v33 = vld [vmem:[#allocation52_spill] sm:$0xff]  ;;  %v20642_v0 = vld [vmem:[#allocation61_spill] sm:$0xff] }
 0x18d   : > { %10784 = vmatprep.subr.bf16.mxu1 %v10783_v58  ;;  %v20637_v58 = vld [vmem:[#allocation53_spill] sm:$0xff] }
 0x18e   : > { %1369 = vmatmul.mubr.f32.gmra.mrb[6].mxu0 %v20632_v28  ;;  %v10787_v53 = vpack.c.bf16 %v20637_v58, %v20636_v33  ;;  %v20646_v58 = vld [vmem:[#allocation58_spill] sm:$0xff] }
 0x18f   : > { %5797 = vmatmul.mubr.f32.gmra.mrb[6].mxu1 %v20632_v28  ;;  %1375 = vmatprep.mubr.f32.mxu0 %v20633_v41  ;;  %v20640_v28 = vld [vmem:[#allocation55_spill] sm:$0xff] }
 0x190   : > { %5803 = vmatprep.mubr.f32.mxu1 %v20633_v41  ;;  %v10021_v7 = vpack.c.bf16 %v20641_v54, %v20640_v28  ;;  %v20643_v41 = vld [vmem:[#allocation62_spill] sm:$0xff]  ;;  %v20650_v54 = vld [vmem:[#allocation232_spill] sm:$0xff] }
 0x191   : > { %10018 = vmatpush1.bf16.xpose.msra.mxu0 %v10017_v13  ;;  %v10023_v13 = vpack.c.bf16 %v20643_v41, %v20642_v0  ;;  %v20651_v41 = vld [vmem:[#allocation235_spill] sm:$0xff]  ;;  %v20653_v0 = vld [vmem:[#allocation68_spill] sm:$0xff] }
 0x192   : > { %10020 = vmatprep.subr.bf16.mxu0 %v10019_v56  ;;  %1377 = vmatmul.mubr.f32.gmra.mrb[8].mxu0 %v20638_v11  ;;  %v20645_v56 = vld [vmem:[#allocation226_spill] sm:$0xff]  ;;  %v20656_v28 = vld [vmem:[#allocation236_spill] sm:$0xff] }
 0x193   : > { %5805 = vmatmul.mubr.f32.gmra.mrb[8].mxu1 %v20638_v11  ;;  %1383 = vmatprep.mubr.f32.mxu0 %v20639_v48  ;;  %v20647_v11 = vld [vmem:[#allocation59_spill] sm:$0xff] }
 0x194   : > { %10786 = vmatpush1.bf16.xpose.msra.mxu1 %v10785_v12  ;;  %5811 = vmatprep.mubr.f32.mxu1 %v20639_v48  ;;  %v10789_v33 = vpack.c.bf16 %v20647_v11, %v20646_v58  ;;  %v20648_v12 = vld [vmem:[#allocation64_spill] sm:$0xff]  ;;  %v20654_v58 = vld [vmem:[#allocation73_spill] sm:$0xff] }
 0x195   : > { %10788 = vmatprep.subr.bf16.mxu1 %v10787_v53  ;;  %v20649_v53 = vld [vmem:[#allocation65_spill] sm:$0xff] }
 0x196   : > { %1385 = vmatmul.mubr.f32.gmra.mrb[10].mxu0 %v20644_v26  ;;  %v10791_v48 = vpack.c.bf16 %v20649_v53, %v20648_v12  ;;  %v20658_v53 = vld [vmem:[#allocation70_spill] sm:$0xff] }
 0x197   : > { %5813 = vmatmul.mubr.f32.gmra.mrb[10].mxu1 %v20644_v26  ;;  %1391 = vmatprep.mubr.f32.mxu0 %v20645_v56  ;;  %v20652_v26 = vld [vmem:[#allocation67_spill] sm:$0xff] }
 0x198   : > { %5819 = vmatprep.mubr.f32.mxu1 %v20645_v56  ;;  %v10025_v11 = vpack.c.bf16 %v20653_v0, %v20652_v26  ;;  %v20655_v56 = vld [vmem:[#allocation74_spill] sm:$0xff]  ;;  %v20662_v0 = vld [vmem:[#allocation160_spill] sm:$0xff] }
 0x199   : > { %10022 = vmatpush1.bf16.xpose.msra.mxu0 %v10021_v7  ;;  %v10027_v7 = vpack.c.bf16 %v20655_v56, %v20654_v58  ;;  %v20663_v56 = vld [vmem:[#allocation164_spill] sm:$0xff]  ;;  %v20668_v26 = vld [vmem:[#allocation166_spill] sm:$0xff] }
 0x19a   : > { %10024 = vmatprep.subr.bf16.mxu0 %v10023_v13  ;;  %1393 = vmatmul.mubr.f32.gmra.mrb[12].mxu0 %v20650_v54  ;;  %v20657_v13 = vld [vmem:[#allocation239_spill] sm:$0xff]  ;;  %v20665_v58 = vld [vmem:[#allocation80_spill] sm:$0xff] }
 0x19b   : > { %5821 = vmatmul.mubr.f32.gmra.mrb[12].mxu1 %v20650_v54  ;;  %1399 = vmatprep.mubr.f32.mxu0 %v20651_v41  ;;  %v20659_v54 = vld [vmem:[#allocation71_spill] sm:$0xff] }
 0x19c   : > { %10790 = vmatpush1.bf16.xpose.msra.mxu1 %v10789_v33  ;;  %5827 = vmatprep.mubr.f32.mxu1 %v20651_v41  ;;  %v10793_v12 = vpack.c.bf16 %v20659_v54, %v20658_v53  ;;  %v20660_v33 = vld [vmem:[#allocation76_spill] sm:$0xff]  ;;  %v20666_v53 = vld [vmem:[#allocation85_spill] sm:$0xff] }
 0x19d   : > { %10792 = vmatprep.subr.bf16.mxu1 %v10791_v48  ;;  %v20661_v48 = vld [vmem:[#allocation77_spill] sm:$0xff] }
 0x19e   : > { %1401 = vmatmul.mubr.f32.gmra.mrb[14].mxu0 %v20656_v28  ;;  %v10795_v41 = vpack.c.bf16 %v20661_v48, %v20660_v33  ;;  %v20670_v48 = vld [vmem:[#allocation82_spill] sm:$0xff] }
 0x19f   : > { %5829 = vmatmul.mubr.f32.gmra.mrb[14].mxu1 %v20656_v28  ;;  %1407 = vmatprep.mubr.f32.mxu0 %v20657_v13  ;;  %v20664_v28 = vld [vmem:[#allocation79_spill] sm:$0xff] }
 0x1a0   : > { %5835 = vmatprep.mubr.f32.mxu1 %v20657_v13  ;;  %v10029_v54 = vpack.c.bf16 %v20665_v58, %v20664_v28  ;;  %v20667_v13 = vld [vmem:[#allocation86_spill] sm:$0xff]  ;;  %v20674_v58 = vld [vmem:[#allocation172_spill] sm:$0xff]  ;;  %v20680_v28 = vld [vmem:[#allocation247_spill] sm:$0xff] }
 0x1a1   : > { %10026 = vmatpush1.bf16.xpose.msra.mxu0 %v10025_v11  ;;  %v10031_v11 = vpack.c.bf16 %v20667_v13, %v20666_v53  ;;  %v20675_v13 = vld [vmem:[#allocation178_spill] sm:$0xff]  ;;  %v20677_v53 = vld [vmem:[#allocation92_spill] sm:$0xff] }
 0x1a2   : > { %10028 = vmatprep.subr.bf16.mxu0 %v10027_v7  ;;  %1409 = vmatmul.mubr.f32.gmra.mrb[16].mxu0 %v20662_v0  ;;  %v20669_v7 = vld [vmem:[#allocation167_spill] sm:$0xff] }
 0x1a3   : > { %5837 = vmatmul.mubr.f32.gmra.mrb[16].mxu1 %v20662_v0  ;;  %1415 = vmatprep.mubr.f32.mxu0 %v20663_v56  ;;  %v20671_v0 = vld [vmem:[#allocation83_spill] sm:$0xff] }
 0x1a4   : > { %10794 = vmatpush1.bf16.xpose.msra.mxu1 %v10793_v12  ;;  %5843 = vmatprep.mubr.f32.mxu1 %v20663_v56  ;;  %v10797_v33 = vpack.c.bf16 %v20671_v0, %v20670_v48  ;;  %v20672_v12 = vld [vmem:[#allocation88_spill] sm:$0xff]  ;;  %v20678_v48 = vld [vmem:[#allocation97_spill] sm:$0xff] }
 0x1a5   : > { %10796 = vmatprep.subr.bf16.mxu1 %v10795_v41  ;;  %v20673_v41 = vld [vmem:[#allocation89_spill] sm:$0xff] }
 0x1a6   : > { %1417 = vmatmul.mubr.f32.gmra.mrb[18].mxu0 %v20668_v26  ;;  %v10799_v56 = vpack.c.bf16 %v20673_v41, %v20672_v12  ;;  %v20682_v41 = vld [vmem:[#allocation94_spill] sm:$0xff] }
 0x1a7   : > { %5845 = vmatmul.mubr.f32.gmra.mrb[18].mxu1 %v20668_v26  ;;  %1423 = vmatprep.mubr.f32.mxu0 %v20669_v7  ;;  %v20676_v26 = vld [vmem:[#allocation91_spill] sm:$0xff] }
 0x1a8   : > { %5851 = vmatprep.mubr.f32.mxu1 %v20669_v7  ;;  %v10033_v0 = vpack.c.bf16 %v20677_v53, %v20676_v26  ;;  %v20679_v7 = vld [vmem:[#allocation98_spill] sm:$0xff]  ;;  %v20686_v53 = vld [vmem:[#allocation184_spill] sm:$0xff] }
 0x1a9   : > { %10030 = vmatpush1.bf16.xpose.msra.mxu0 %v10029_v54  ;;  %v10035_v54 = vpack.c.bf16 %v20679_v7, %v20678_v48  ;;  %v20688_v7 = vld [vmem:[#allocation104_spill] sm:$0xff] }
 0x1aa   : > { %10032 = vmatprep.subr.bf16.mxu0 %v10031_v11  ;;  %1425 = vmatmul.mubr.f32.gmra.mrb[20].mxu0 %v20674_v58  ;;  %v20681_v11 = vld [vmem:[#allocation250_spill] sm:$0xff] }
 0x1ab   : > { %5853 = vmatmul.mubr.f32.gmra.mrb[20].mxu1 %v20674_v58  ;;  %1431 = vmatprep.mubr.f32.mxu0 %v20675_v13  ;;  %v20683_v58 = vld [vmem:[#allocation95_spill] sm:$0xff] }
 0x1ac   : > { %10798 = vmatpush1.bf16.xpose.msra.mxu1 %v10797_v33  ;;  %5859 = vmatprep.mubr.f32.mxu1 %v20675_v13  ;;  %v10801_v12 = vpack.c.bf16 %v20683_v58, %v20682_v41  ;;  %v20684_v33 = vld [vmem:[#allocation100_spill] sm:$0xff]  ;;  %v20689_v41 = vld [vmem:[#allocation109_spill] sm:$0xff] }
 0x1ad   : > { %10800 = vmatprep.subr.bf16.mxu1 %v10799_v56  ;;  %v20685_v56 = vld [vmem:[#allocation101_spill] sm:$0xff] }
 0x1ae   : > { %1433 = vmatmul.mubr.f32.gmra.mrb[22].mxu0 %v20680_v28  ;;  %v10803_v13 = vpack.c.bf16 %v20685_v56, %v20684_v33  ;;  %v20692_v56 = vld [vmem:[#allocation106_spill] sm:$0xff] }
 0x1af   : > { %5861 = vmatmul.mubr.f32.gmra.mrb[22].mxu1 %v20680_v28  ;;  %1439 = vmatprep.mubr.f32.mxu0 %v20681_v11  ;;  %v20687_v28 = vld [vmem:[#allocation103_spill] sm:$0xff] }
 0x1b0   : > { %5867 = vmatprep.mubr.f32.mxu1 %v20681_v11  ;;  %v10037_v58 = vpack.c.bf16 %v20688_v7, %v20687_v28  ;;  %v20690_v11 = vld [vmem:[#allocation110_spill] sm:$0xff]  ;;  %v20710_v28 = vld [vmem:[#allocation131_spill] sm:$0xff] }
 0x1b1   : > { %10034 = vmatpush1.bf16.xpose.msra.mxu0 %v10033_v0  ;;  %v10039_v0 = vpack.c.bf16 %v20690_v11, %v20689_v41  ;;  %v20697_v11 = vld [vmem:[#allocation116_spill] sm:$0xff]  ;;  %v20708_v41 = vld [vmem:[#allocation134_spill] sm:$0xff] }
 0x1b2   : > { %10036 = vmatprep.subr.bf16.mxu0 %v10035_v54  ;;  %1441 = vmatmul.mubr.f32.gmra.mrb[24].mxu0 %v20686_v53  ;;  %v20691_v54 = vld [vmem:[#allocation258_spill] sm:$0xff] }
 0x1b3   : > { %5869 = vmatmul.mubr.f32.gmra.mrb[24].mxu1 %v20686_v53  ;;  %1447 = vmatprep.mubr.f32.mxu0 %v14058_v19  ;;  %v20693_v53 = vld [vmem:[#allocation107_spill] sm:$0xff]  ;;  %v20709_v7 = vld [vmem:[#allocation130_spill] sm:$0xff] }
 0x1b4   : > { %10802 = vmatpush1.bf16.xpose.msra.mxu1 %v10801_v12  ;;  %5875 = vmatprep.mubr.f32.mxu1 %v14058_v19  ;;  %v10805_v33 = vpack.c.bf16 %v20693_v53, %v20692_v56  ;;  %v20694_v12 = vld [vmem:[#allocation112_spill] sm:$0xff]  ;;  %v20698_v56 = vld [vmem:[#allocation121_spill] sm:$0xff]  ;;  %v10813_v48 = vpack.c.bf16 %v20710_v28, %v20709_v7 }
 0x1b5   : > { %10804 = vmatprep.subr.bf16.mxu1 %v10803_v13  ;;  %v20695_v13 = vld [vmem:[#allocation113_spill] sm:$0xff] }
 0x1b6   : > { %1449 = vmatmul.mubr.f32.gmra.mrb[26].mxu0 %v14066_v10  ;;  %v10807_v19 = vpack.c.bf16 %v20695_v13, %v20694_v12  ;;  %v20701_v13 = vld [vmem:[#allocation118_spill] sm:$0xff] }
 0x1b7   : > { %5877 = vmatmul.mubr.f32.gmra.mrb[26].mxu1 %v14066_v10  ;;  %1455 = vmatprep.mubr.f32.mxu0 %v20691_v54  ;;  %v20696_v10 = vld [vmem:[#allocation115_spill] sm:$0xff] }
 0x1b8   : > { %5883 = vmatprep.mubr.f32.mxu1 %v20691_v54  ;;  %v10041_v53 = vpack.c.bf16 %v20697_v11, %v20696_v10  ;;  %v20699_v54 = vld [vmem:[#allocation122_spill] sm:$0xff]  ;;  %v20705_v11 = vld [vmem:[#allocation127_spill] sm:$0xff]  ;;  %v20707_v10 = vld [vmem:[#allocation133_spill] sm:$0xff] }
 0x1b9   : > { %10038 = vmatpush1.bf16.xpose.msra.mxu0 %v10037_v58  ;;  %v10043_v58 = vpack.c.bf16 %v20699_v54, %v20698_v56  ;;  %v20706_v54 = vld [vmem:[#allocation128_spill] sm:$0xff] }
 0x1ba   : > { %10040 = vmatprep.subr.bf16.mxu0 %v10039_v0  ;;  %1457 = vmatmul.mubr.f32.gmra.mrb[28].mxu0 %v14113_v22  ;;  %v20700_v0 = vld [vmem:[#allocation194_spill] sm:$0xff]  ;;  %v10045_v56 = vpack.c.bf16 %v20706_v54, %v20705_v11  ;;  %v20718_v11 = vld [vmem:[#allocation143_spill] sm:$0xff] }
 0x1bb   : > { %5885 = vmatmul.mubr.f32.gmra.mrb[28].mxu1 %v14113_v22  ;;  %1463 = vmatprep.mubr.f32.mxu0 %v14140_v42  ;;  %v20702_v22 = vld [vmem:[#allocation119_spill] sm:$0xff]  ;;  %v20717_v54 = vld [vmem:[#allocation142_spill] sm:$0xff] }
 0x1bc   : > { %10806 = vmatpush1.bf16.xpose.msra.mxu1 %v10805_v33  ;;  %5891 = vmatprep.mubr.f32.mxu1 %v14140_v42  ;;  %v10809_v12 = vpack.c.bf16 %v20702_v22, %v20701_v13  ;;  %v20703_v33 = vld [vmem:[#allocation124_spill] sm:$0xff]  ;;  %v20712_v13 = vld [vmem:[#allocation137_spill] sm:$0xff]  ;;  %v10817_v26 = vpack.c.bf16 %v20718_v11, %v20717_v54 }
 0x1bd   : > { %10808 = vmatprep.subr.bf16.mxu1 %v10807_v19  ;;  %v20704_v19 = vld [vmem:[#allocation125_spill] sm:$0xff]  ;;  %v20711_v22 = vld [vmem:[#allocation136_spill] sm:$0xff] }
 0x1be   : > { %1465 = vmatmul.mubr.f32.gmra.mrb[30].mxu0 %v14142_v20  ;;  %v10811_v42 = vpack.c.bf16 %v20704_v19, %v20703_v33  ;;  %v20716_v19 = vld [vmem:[#allocation146_spill] sm:$0xff] }
 0x1bf   : > { %5893 = vmatmul.mubr.f32.gmra.mrb[30].mxu1 %v14142_v20  ;;  %1665 = vmatprep.mubr.f32.mxu0 %v20700_v0  ;;  %v10047_v20 = vpack.c.bf16 %v20708_v41, %v20707_v10  ;;  %v20719_v41 = vld [vmem:[#allocation148_spill] sm:$0xff]  ;;  %v20720_v10 = vld [vmem:[#allocation149_spill] sm:$0xff] }
 0x1c0   : > { %6093 = vmatprep.mubr.f32.mxu1 %v20700_v0  ;;  %v10815_v0 = vpack.c.bf16 %v20712_v13, %v20711_v22  ;;  %v10819_v28 = vpack.c.bf16 %v20720_v10, %v20719_v41  ;;  %v20724_v13 = vld [vmem:[#allocation155_spill] sm:$0xff] }
 0x1c1   : > { %10042 = vmatpush1.bf16.xpose.msra.mxu0 %v10041_v53  ;;  %v20713_v53 = vld [vmem:[#allocation139_spill] sm:$0xff] }
 0x1c2   : > { %10044 = vmatprep.subr.bf16.mxu0 %v10043_v58  ;;  %v20714_v58 = vld [vmem:[#allocation140_spill] sm:$0xff] }
 0x1c4   : > { %10810 = vmatpush1.bf16.xpose.msra.mxu1 %v10809_v12  ;;  %v10049_v12 = vpack.c.bf16 %v20714_v58, %v20713_v53 }
 0x1c5   : > { %10812 = vmatprep.subr.bf16.mxu1 %v10811_v42  ;;  %v20715_v42 = vld [vmem:[#allocation145_spill] sm:$0xff] }
 0x1c6   : > { %v10051_v33 = vpack.c.bf16 %v20716_v19, %v20715_v42  ;;  %v20725_v19 = vpack.c.bf16 %v20533_v49, %v20529_v38 }
 0x1c9   : > { %10046 = vmatpush1.bf16.xpose.msra.mxu0 %v10045_v56  ;;  %v20721_v56 = vld [vmem:[#allocation151_spill] sm:$0xff] }
 0x1ca   : > { %10048 = vmatprep.subr.bf16.mxu0 %v10047_v20  ;;  %v20722_v20 = vld [vmem:[#allocation152_spill] sm:$0xff] }
 0x1cc   : > { %10814 = vmatpush1.bf16.xpose.msra.mxu1 %v10813_v48  ;;  %v10053_v48 = vpack.c.bf16 %v20722_v20, %v20721_v56 }
 0x1cd   : > { %10816 = vmatprep.subr.bf16.mxu1 %v10815_v0  ;;  %v20723_v0 = vld [vmem:[#allocation154_spill] sm:$0xff] }
 0x1ce   : > { %v10821_v22 = vpack.c.bf16 %v20724_v13, %v20723_v0 }
 0x1d1   : > { %10050 = vmatpush1.bf16.xpose.msra.mxu0 %v10049_v12  ;;  %v20726_v12 = vpack.c.bf16 %v20535_v61, %v20534_v24 }
 0x1d2   : > { %10052 = vmatprep.subr.bf16.mxu0 %v10051_v33  ;;  %v20729_v33 = vpack.c.bf16 %v20545_v37, %v20544_v30 }
 0x1d4   : > { %10818 = vmatpush1.bf16.xpose.msra.mxu1 %v10817_v26  ;;  %v20727_v26 = vpack.c.bf16 %v20543_v52, %v20541_v39 }
 0x1d5   : > { %10820 = vmatprep.subr.bf16.mxu1 %v10819_v28  ;;  %v20728_v28 = vpack.c.bf16 %v20555_v6, %v20553_v2 }
 0x1d9   : > { %10054 = vmatpush1.bf16.xpose.msra.mxu0 %v10053_v48  ;;  %v20732_v48 = vpack.c.bf16 %v20576_v47, %v20572_v17 }
 0x1da   : > { %10056 = vmatprep.subr.bf16.mxu0 %v20725_v19  ;;  %v20730_v19 = vpack.c.bf16 %v20559_v46, %v20558_v23 }
 0x1dc   : > { %10822 = vmatpush1.bf16.xpose.msra.mxu1 %v10821_v22  ;;  %v20731_v22 = vpack.c.bf16 %v20599_v27, %v13044_v21 }
 0x1dd   : > { %10824 = vmatprep.subr.bf16.mxu1 %v20726_v12  ;;  %v20733_v12 = vpack.c.bf16 %v20566_v44, %v20600_v1 }
 0x1e1   : > { %10058 = vmatpush1.bf16.xpose.msra.mxu0 %v20727_v26  ;;  %v20734_v26 = vpack.c.bf16 %v20579_v5, %v20601_v50 }
 0x1e2   : > { %10060 = vmatprep.subr.bf16.mxu0 %v20728_v28  ;;  %v20735_v28 = vpack.c.bf16 %v13072_v31, %v13070_v59 }
 0x1e4   : > { %10826 = vmatpush1.bf16.xpose.msra.mxu1 %v20729_v33  ;;  %v20736_v33 = vpack.c.bf16 %v13086_v32, %v13082_v15 }
 0x1e5   : > { %10828 = vmatprep.subr.bf16.mxu1 %v20730_v19  ;;  %v20737_v19 = vpack.c.bf16 %v13078_v60, %v13076_v34  ;;  %v20744_v60 = vld [vmem:[#allocation18_spill] sm:$0xff] }
 0x1e9   : > { %10062 = vmatpush1.bf16.xpose.msra.mxu0 %v20731_v22  ;;  %v20738_v22 = vpack.c.bf16 %v13092_v63, %v13090_v29  ;;  %v20746_v63 = vld [vmem:[#allocation25_spill] sm:$0xff] }
 0x1ea   : > { %10064 = vmatprep.subr.bf16.mxu0 %v20732_v48  ;;  %v20739_v48 = vpack.c.bf16 %v13106_v9, %v13104_v3 }
 0x1ec   : > { %10830 = vmatpush1.bf16.xpose.msra.mxu1 %v20733_v12  ;;  %v20740_v12 = vld [vmem:[#allocation12_spill] sm:$0xff] }
 0x1ed   : > { %10832 = vmatprep.subr.bf16.mxu1 %v20734_v26  ;;  %v20741_v26 = vpack.c.bf16 %v13113_v51, %v13111_v8 }
 0x1f1   : > { %10066 = vmatpush1.bf16.xpose.msra.mxu0 %v20735_v28  ;;  %v20742_v28 = vld [vmem:[#allocation16_spill] sm:$0xff] }
 0x1f2   : > { %10068 = vmatprep.subr.bf16.mxu0 %v20736_v33  ;;  %v20743_v33 = vld [vmem:[#allocation197_spill] sm:$0xff] }
 0x1f4   : > { %10834 = vmatpush1.bf16.xpose.msra.mxu1 %v20737_v19  ;;  %v20745_v19 = vld [vmem:[#allocation202_spill] sm:$0xff] }
 0x1f5   : > { %10836 = vmatprep.subr.bf16.mxu1 %v20738_v22  ;;  %v20747_v22 = vld [vmem:[#allocation21_spill] sm:$0xff] }
 0x1f9   : > { %10070 = vmatpush1.bf16.xpose.msra.mxu0 %v20739_v48  ;;  %v20748_v48 = vld [vmem:[#allocation27_spill] sm:$0xff] }
 0x1fa   : > { %10072 = vmatprep.subr.bf16.mxu0 %v20740_v12  ;;  %v20749_v12 = vld [vmem:[#allocation203_spill] sm:$0xff] }
 0x1fc   : > { %10838 = vmatpush1.bf16.xpose.msra.mxu1 %v20741_v26  ;;  %v20750_v26 = vld [vmem:[#allocation204_spill] sm:$0xff] }
 0x1fd   : > { %10840 = vmatprep.subr.bf16.mxu1 %v20742_v28  ;;  %v20752_v28 = vld [vmem:[#allocation36_spill] sm:$0xff] }
 0x200   : > { %1668 = vmatmul.mubr.f32.vlgmr.msra.gmra.mrb[0].mxu0 %v20743_v33 }
 0x201   : > { %10074 = vmatpush1.bf16.xpose.msra.mxu0 %v20744_v60  ;;  %1675 = vmatprep.mubr.f32.mxu0 %v20745_v19  ;;  %v20751_v60 = vld [vmem:[#allocation31_spill] sm:$0xff] }
 0x202   : > { %10076 = vmatprep.subr.bf16.mxu0 %v20746_v63  ;;  %v20753_v63 = vld [vmem:[#allocation209_spill] sm:$0xff] }
 0x203   : > { %6096 = vmatmul.mubr.f32.vlgmr.msra.gmra.mrb[0].mxu1 %v20743_v33  ;;  %v20754_v33 = vld [vmem:[#allocation214_spill] sm:$0xff] }
 0x204   : > { %10842 = vmatpush1.bf16.xpose.msra.mxu1 %v20747_v22  ;;  %6103 = vmatprep.mubr.f32.mxu1 %v20745_v19  ;;  %v20755_v19 = vld [vmem:[#allocation34_spill] sm:$0xff]  ;;  %v20757_v22 = vld [vmem:[#allocation215_spill] sm:$0xff] }
 0x205   : > { %10844 = vmatprep.subr.bf16.mxu1 %v20748_v48  ;;  %1678 = vmatmul.mubr.f32.gmra.mrb[2].mxu0 %v20749_v12  ;;  %v20756_v48 = vld [vmem:[#allocation39_spill] sm:$0xff] }
 0x206   : > { %1685 = vmatprep.mubr.f32.mxu0 %v20750_v26 }
 0x207   : > { %6106 = vmatmul.mubr.f32.gmra.mrb[2].mxu1 %v20749_v12  ;;  %v20758_v12 = vld [vmem:[#allocation216_spill] sm:$0xff] }
 0x208   : > { %6113 = vmatprep.mubr.f32.mxu1 %v20750_v26  ;;  %v20759_v26 = vld [vmem:[#allocation42_spill] sm:$0xff] }
 0x209   : > { %10078 = vmatpush1.bf16.xpose.msra.mxu0 %v20751_v60 }
 0x20a   : > { %10080 = vmatprep.subr.bf16.mxu0 %v20752_v28  ;;  %1688 = vmatmul.mubr.f32.gmra.mrb[4].mxu0 %v20753_v63  ;;  %v20760_v28 = vld [vmem:[#allocation48_spill] sm:$0xff] }
 0x20b   : > { %6116 = vmatmul.mubr.f32.gmra.mrb[4].mxu1 %v20753_v63  ;;  %1695 = vmatprep.mubr.f32.mxu0 %v20754_v33  ;;  %v20761_v63 = vld [vmem:[#allocation221_spill] sm:$0xff] }
 0x20c   : > { %10846 = vmatpush1.bf16.xpose.msra.mxu1 %v20755_v19  ;;  %6123 = vmatprep.mubr.f32.mxu1 %v20754_v33  ;;  %v20762_v19 = vld [vmem:[#allocation224_spill] sm:$0xff]  ;;  %v20763_v33 = vld [vmem:[#allocation45_spill] sm:$0xff] }
 0x20d   : > { %10848 = vmatprep.subr.bf16.mxu1 %v20756_v48  ;;  %v20764_v48 = vld [vmem:[#allocation51_spill] sm:$0xff] }
 0x20e   : > { %1698 = vmatmul.mubr.f32.gmra.mrb[6].mxu0 %v20757_v22 }
 0x20f   : > { %6126 = vmatmul.mubr.f32.gmra.mrb[6].mxu1 %v20757_v22  ;;  %1705 = vmatprep.mubr.f32.mxu0 %v20758_v12  ;;  %v20765_v22 = vld [vmem:[#allocation228_spill] sm:$0xff] }
 0x210   : > { %6133 = vmatprep.mubr.f32.mxu1 %v20758_v12  ;;  %v20766_v12 = vld [vmem:[#allocation229_spill] sm:$0xff] }
 0x211   : > { %10082 = vmatpush1.bf16.xpose.msra.mxu0 %v20759_v26  ;;  %v20768_v26 = vld [vmem:[#allocation60_spill] sm:$0xff] }
 0x212   : > { %10084 = vmatprep.subr.bf16.mxu0 %v20760_v28  ;;  %1708 = vmatmul.mubr.f32.gmra.mrb[8].mxu0 %v20761_v63  ;;  %v20767_v28 = vld [vmem:[#allocation54_spill] sm:$0xff] }
 0x213   : > { %6136 = vmatmul.mubr.f32.gmra.mrb[8].mxu1 %v20761_v63  ;;  %1715 = vmatprep.mubr.f32.mxu0 %v20762_v19  ;;  %v20769_v63 = vld [vmem:[#allocation233_spill] sm:$0xff] }
 0x214   : > { %10850 = vmatpush1.bf16.xpose.msra.mxu1 %v20763_v33  ;;  %6143 = vmatprep.mubr.f32.mxu1 %v20762_v19  ;;  %v20770_v33 = vld [vmem:[#allocation237_spill] sm:$0xff] }
 0x215   : > { %10852 = vmatprep.subr.bf16.mxu1 %v20764_v48  ;;  %v20771_v19 = vld [vmem:[#allocation57_spill] sm:$0xff]  ;;  %v20772_v48 = vld [vmem:[#allocation63_spill] sm:$0xff] }
 0x216   : > { %1718 = vmatmul.mubr.f32.gmra.mrb[10].mxu0 %v20765_v22 }
 0x217   : > { %6146 = vmatmul.mubr.f32.gmra.mrb[10].mxu1 %v20765_v22  ;;  %1725 = vmatprep.mubr.f32.mxu0 %v20766_v12  ;;  %v20773_v22 = vld [vmem:[#allocation238_spill] sm:$0xff] }
 0x218   : > { %6153 = vmatprep.mubr.f32.mxu1 %v20766_v12  ;;  %v20774_v12 = vld [vmem:[#allocation241_spill] sm:$0xff] }
 0x219   : > { %10086 = vmatpush1.bf16.xpose.msra.mxu0 %v20767_v28  ;;  %v20776_v28 = vld [vmem:[#allocation72_spill] sm:$0xff] }
 0x21a   : > { %10088 = vmatprep.subr.bf16.mxu0 %v20768_v26  ;;  %1728 = vmatmul.mubr.f32.gmra.mrb[12].mxu0 %v20769_v63  ;;  %v20775_v26 = vld [vmem:[#allocation66_spill] sm:$0xff] }
 0x21b   : > { %6156 = vmatmul.mubr.f32.gmra.mrb[12].mxu1 %v20769_v63  ;;  %1735 = vmatprep.mubr.f32.mxu0 %v20770_v33  ;;  %v20777_v63 = vld [vmem:[#allocation161_spill] sm:$0xff] }
 0x21c   : > { %10854 = vmatpush1.bf16.xpose.msra.mxu1 %v20771_v19  ;;  %6163 = vmatprep.mubr.f32.mxu1 %v20770_v33  ;;  %v20778_v19 = vld [vmem:[#allocation242_spill] sm:$0xff]  ;;  %v20779_v33 = vld [vmem:[#allocation69_spill] sm:$0xff] }
 0x21d   : > { %10856 = vmatprep.subr.bf16.mxu1 %v20772_v48  ;;  %v20780_v48 = vld [vmem:[#allocation75_spill] sm:$0xff] }
 0x21e   : > { %1738 = vmatmul.mubr.f32.gmra.mrb[14].mxu0 %v20773_v22 }
 0x21f   : > { %6166 = vmatmul.mubr.f32.gmra.mrb[14].mxu1 %v20773_v22  ;;  %1745 = vmatprep.mubr.f32.mxu0 %v20774_v12  ;;  %v20781_v22 = vld [vmem:[#allocation243_spill] sm:$0xff] }
 0x220   : > { %6173 = vmatprep.mubr.f32.mxu1 %v20774_v12  ;;  %v20782_v12 = vld [vmem:[#allocation244_spill] sm:$0xff] }
 0x221   : > { %10090 = vmatpush1.bf16.xpose.msra.mxu0 %v20775_v26  ;;  %v20784_v26 = vld [vmem:[#allocation84_spill] sm:$0xff] }
 0x222   : > { %10092 = vmatprep.subr.bf16.mxu0 %v20776_v28  ;;  %1748 = vmatmul.mubr.f32.gmra.mrb[16].mxu0 %v20777_v63  ;;  %v20783_v28 = vld [vmem:[#allocation78_spill] sm:$0xff] }
 0x223   : > { %6176 = vmatmul.mubr.f32.gmra.mrb[16].mxu1 %v20777_v63  ;;  %1755 = vmatprep.mubr.f32.mxu0 %v20778_v19  ;;  %v20785_v63 = vld [vmem:[#allocation173_spill] sm:$0xff] }
 0x224   : > { %10858 = vmatpush1.bf16.xpose.msra.mxu1 %v20779_v33  ;;  %6183 = vmatprep.mubr.f32.mxu1 %v20778_v19  ;;  %v20786_v33 = vld [vmem:[#allocation248_spill] sm:$0xff]  ;;  %v20787_v19 = vld [vmem:[#allocation81_spill] sm:$0xff] }
 0x225   : > { %10860 = vmatprep.subr.bf16.mxu1 %v20780_v48  ;;  %v20788_v48 = vld [vmem:[#allocation87_spill] sm:$0xff] }
 0x226   : > { %1758 = vmatmul.mubr.f32.gmra.mrb[18].mxu0 %v20781_v22 }
 0x227   : > { %6186 = vmatmul.mubr.f32.gmra.mrb[18].mxu1 %v20781_v22  ;;  %1765 = vmatprep.mubr.f32.mxu0 %v20782_v12  ;;  %v20789_v22 = vld [vmem:[#allocation249_spill] sm:$0xff] }
 0x228   : > { %6193 = vmatprep.mubr.f32.mxu1 %v20782_v12  ;;  %v20790_v12 = vld [vmem:[#allocation252_spill] sm:$0xff] }
 0x229   : > { %10094 = vmatpush1.bf16.xpose.msra.mxu0 %v20783_v28  ;;  %v20792_v28 = vld [vmem:[#allocation96_spill] sm:$0xff] }
 0x22a   : > { %10096 = vmatprep.subr.bf16.mxu0 %v20784_v26  ;;  %1768 = vmatmul.mubr.f32.gmra.mrb[20].mxu0 %v20785_v63  ;;  %v20791_v26 = vld [vmem:[#allocation90_spill] sm:$0xff] }
 0x22b   : > { %6196 = vmatmul.mubr.f32.gmra.mrb[20].mxu1 %v20785_v63  ;;  %1775 = vmatprep.mubr.f32.mxu0 %v20786_v33  ;;  %v20793_v63 = vld [vmem:[#allocation253_spill] sm:$0xff] }
 0x22c   : > { %10862 = vmatpush1.bf16.xpose.msra.mxu1 %v20787_v19  ;;  %6203 = vmatprep.mubr.f32.mxu1 %v20786_v33  ;;  %v20794_v19 = vld [vmem:[#allocation257_spill] sm:$0xff] }
 0x22d   : > { %10864 = vmatprep.subr.bf16.mxu1 %v20788_v48  ;;  %v20795_v33 = vld [vmem:[#allocation93_spill] sm:$0xff]  ;;  %v20796_v48 = vld [vmem:[#allocation99_spill] sm:$0xff] }
 0x22e   : > { %1778 = vmatmul.mubr.f32.gmra.mrb[22].mxu0 %v20789_v22 }
 0x22f   : > { %6206 = vmatmul.mubr.f32.gmra.mrb[22].mxu1 %v20789_v22  ;;  %1785 = vmatprep.mubr.f32.mxu0 %v20790_v12  ;;  %v20797_v22 = vld [vmem:[#allocation259_spill] sm:$0xff] }
 0x230   : > { %6213 = vmatprep.mubr.f32.mxu1 %v20790_v12  ;;  %v20798_v12 = vld [vmem:[#allocation261_spill] sm:$0xff] }
 0x231   : > { %10098 = vmatpush1.bf16.xpose.msra.mxu0 %v20791_v26  ;;  %v20800_v26 = vld [vmem:[#allocation108_spill] sm:$0xff] }
 0x232   : > { %10100 = vmatprep.subr.bf16.mxu0 %v20792_v28  ;;  %1788 = vmatmul.mubr.f32.gmra.mrb[24].mxu0 %v20793_v63  ;;  %v20799_v28 = vld [vmem:[#allocation102_spill] sm:$0xff] }
 0x233   : > { %6216 = vmatmul.mubr.f32.gmra.mrb[24].mxu1 %v20793_v63  ;;  %1795 = vmatprep.mubr.f32.mxu0 %v20794_v19  ;;  %v20802_v63 = vld [vmem:[#allocation111_spill] sm:$0xff] }
 0x234   : > { %10866 = vmatpush1.bf16.xpose.msra.mxu1 %v20795_v33  ;;  %6223 = vmatprep.mubr.f32.mxu1 %v20794_v19  ;;  %v20801_v19 = vld [vmem:[#allocation105_spill] sm:$0xff]  ;;  %v20813_v33 = vld [vmem:[#allocation144_spill] sm:$0xff] }
 0x235   : > { %10868 = vmatprep.subr.bf16.mxu1 %v20796_v48  ;;  %v20811_v48 = vld [vmem:[#allocation135_spill] sm:$0xff] }
 0x236   : > { %1798 = vmatmul.mubr.f32.gmra.mrb[26].mxu0 %v20797_v22 }
 0x237   : > { %6226 = vmatmul.mubr.f32.gmra.mrb[26].mxu1 %v20797_v22  ;;  %1805 = vmatprep.mubr.f32.mxu0 %v20798_v12  ;;  %v20803_v22 = vld [vmem:[#allocation196_spill] sm:$0xff] }
 0x238   : > { %6233 = vmatprep.mubr.f32.mxu1 %v20798_v12  ;;  %v20804_v12 = vld [vmem:[#allocation114_spill] sm:$0xff] }
 0x239   : > { %10102 = vmatpush1.bf16.xpose.msra.mxu0 %v20799_v28  ;;  %v20807_v28 = vld [vmem:[#allocation123_spill] sm:$0xff] }
 0x23a   : > { %10104 = vmatprep.subr.bf16.mxu0 %v20800_v26  ;;  %1808 = vmatmul.mubr.f32.gmra.mrb[28].mxu0 %v14122_v40  ;;  %v20805_v26 = vld [vmem:[#allocation120_spill] sm:$0xff] }
 0x23b   : > { %6236 = vmatmul.mubr.f32.gmra.mrb[28].mxu1 %v14122_v40  ;;  %1815 = vmatprep.mubr.f32.mxu0 %v14154_v16  ;;  %v20806_v40 = vld [vmem:[#allocation117_spill] sm:$0xff] }
 0x23c   : > { %10870 = vmatpush1.bf16.xpose.msra.mxu1 %v20801_v19  ;;  %6243 = vmatprep.mubr.f32.mxu1 %v14154_v16  ;;  %v20808_v19 = vld [vmem:[#allocation126_spill] sm:$0xff]  ;;  %v20809_v16 = vld [vmem:[#allocation132_spill] sm:$0xff] }
 0x23d   : > { %10872 = vmatprep.subr.bf16.mxu1 %v20802_v63  ;;  %v20810_v63 = vld [vmem:[#allocation129_spill] sm:$0xff] }
 0x23e   : > { %1818 = vmatmul.mubr.f32.gmra.mrb[30].mxu0 %v14157_v57 }
 0x23f   : > { %6246 = vmatmul.mubr.f32.gmra.mrb[30].mxu1 %v14157_v57  ;;  %1955 = vmatprep.mubr.f32.mxu0 %v20803_v22  ;;  %v20812_v57 = vld [vmem:[#allocation138_spill] sm:$0xff] }
 0x240   : > { %6383 = vmatprep.mubr.f32.mxu1 %v20803_v22  ;;  %v20814_v22 = vld [vmem:[#allocation141_spill] sm:$0xff] }
 0x241   : > { %10106 = vmatpush1.bf16.xpose.msra.mxu0 %v20804_v12  ;;  %v20815_v12 = vld [vmem:[#allocation147_spill] sm:$0xff] }
 0x242   : > { %10108 = vmatprep.subr.bf16.mxu0 %v20805_v26  ;;  %v20816_v26 = vld [vmem:[#allocation150_spill] sm:$0xff] }
 0x244   : > { %10874 = vmatpush1.bf16.xpose.msra.mxu1 %v20806_v40  ;;  %v20817_v40 = vld [vmem:[#allocation156_spill] sm:$0xff] }
 0x245   : > { %10876 = vmatprep.subr.bf16.mxu1 %v20807_v28  ;;  %v20818_v28 = vld [vmem:[#allocation153_spill] sm:$0xff] }
 0x249   : > { %10110 = vmatpush1.bf16.xpose.msra.mxu0 %v20808_v19  ;;  %v20819_v19 = vld [vmem:[#allocation159_spill] sm:$0xff] }
 0x24a   : > { %10112 = vmatprep.subr.bf16.mxu0 %v20809_v16  ;;  %v20820_v16 = vld [vmem:[#allocation162_spill] sm:$0xff] }
 0x24c   : > { %10878 = vmatpush1.bf16.xpose.msra.mxu1 %v20810_v63  ;;  %v20821_v63 = vld [vmem:[#allocation168_spill] sm:$0xff] }
 0x24d   : > { %10880 = vmatprep.subr.bf16.mxu1 %v20811_v48  ;;  %v20822_v48 = vld [vmem:[#allocation165_spill] sm:$0xff] }
 0x251   : > { %10114 = vmatpush1.bf16.xpose.msra.mxu0 %v20812_v57  ;;  %v20823_v57 = vld [vmem:[#allocation171_spill] sm:$0xff] }
 0x252   : > { %10116 = vmatprep.subr.bf16.mxu0 %v20813_v33  ;;  %v20824_v33 = vld [vmem:[#allocation174_spill] sm:$0xff] }
 0x254   : > { %10882 = vmatpush1.bf16.xpose.msra.mxu1 %v20814_v22  ;;  %v20825_v22 = vld [vmem:[#allocation179_spill] sm:$0xff] }
 0x255   : > { %10884 = vmatprep.subr.bf16.mxu1 %v20815_v12  ;;  %v20826_v12 = vld [vmem:[#allocation176_spill] sm:$0xff] }
 0x259   : > { %10118 = vmatpush1.bf16.xpose.msra.mxu0 %v20816_v26  ;;  %v20827_v26 = vld [vmem:[#allocation182_spill] sm:$0xff] }
 0x25a   : > { %10120 = vmatprep.subr.bf16.mxu0 %v20817_v40  ;;  %v20828_v40 = vld [vmem:[#allocation185_spill] sm:$0xff] }
 0x25c   : > { %10886 = vmatpush1.bf16.xpose.msra.mxu1 %v20818_v28  ;;  %v20829_v28 = vld [vmem:[#allocation188_spill] sm:$0xff] }
 0x25d   : > { %10888 = vmatprep.subr.bf16.mxu1 %v20819_v19  ;;  %v20830_v19 = vld [vmem:[#allocation186_spill] sm:$0xff] }
 0x261   : > { %10122 = vmatpush1.bf16.xpose.msra.mxu0 %v20820_v16  ;;  %v20831_v16 = vld [vmem:[#allocation189_spill] sm:$0xff] }
 0x262   : > { %10124 = vmatprep.subr.bf16.mxu0 %v20821_v63 }
 0x264   : > { %10890 = vmatpush1.bf16.xpose.msra.mxu1 %v20822_v48  ;;  %v20832_v48 = vand.u32 4294901760, %v20602_v43  ;;  %v20840_v43 = vand.u32 4294901760, %v20608_v55 }
 0x265   : > { %10892 = vmatprep.subr.bf16.mxu1 %v20823_v57  ;;  %v20833_v57 = vand.u32 4294901760, %v20603_v18  ;;  %v20841_v18 = vand.u32 4294901760, %v20609_v36  ;;  %v20852_v36 = vld [vmem:[#allocation32_spill] sm:$0xff] }
 0x266   : > { %v20853_v55 = vand.u32 4294901760, %v20852_v36  ;;  %v20869_v36 = vld [vmem:[#allocation217_spill] sm:$0xff] }
 0x267   : > { %v10135_v63 = vpack.c.bf16 %v20833_v57, %v20832_v48  ;;  %v10139_v48 = vpack.c.bf16 %v20841_v18, %v20840_v43  ;;  %v20842_v57 = vld [vmem:[#allocation198_spill] sm:$0xff] }
 0x269   : > { %10126 = vmatpush1.bf16.xpose.msra.mxu0 %v20824_v33  ;;  %v20834_v33 = vld [vmem:[#allocation192_spill] sm:$0xff] }
 0x26a   : > { %10128 = vmatprep.subr.bf16.mxu0 %v20825_v22  ;;  %v20835_v22 = vand.u32 4294901760, %v20604_v62  ;;  %v20843_v62 = vand.u32 4294901760, %v20611_v35  ;;  %v20851_v35 = vand.u32 4294901760, %v20616_v14  ;;  %v20864_v14 = vld [vmem:[#allocation40_spill] sm:$0xff] }
 0x26c   : > { %10894 = vmatpush1.bf16.xpose.msra.mxu1 %v20826_v12  ;;  %v20836_v12 = vand.u32 4294901760, %v20605_v45  ;;  %v20844_v45 = vld [vmem:[#allocation23_spill] sm:$0xff] }
 0x26d   : > { %10896 = vmatprep.subr.bf16.mxu1 %v20827_v26 }
 0x26e   : > { %v10903_v26 = vpack.c.bf16 %v20836_v12, %v20835_v22  ;;  %v20845_v12 = vand.u32 4294901760, %v20844_v45  ;;  %v20846_v22 = vld [vmem:[#allocation28_spill] sm:$0xff]  ;;  %v20859_v45 = vld [vmem:[#allocation207_spill] sm:$0xff] }
 0x271   : > { %10130 = vmatpush1.bf16.xpose.msra.mxu0 %v20828_v40  ;;  %v20837_v40 = vld [vmem:[#allocation193_spill] sm:$0xff] }
 0x272   : > { %10132 = vmatprep.subr.bf16.mxu0 %v20829_v28 }
 0x274   : > { %10898 = vmatpush1.bf16.xpose.msra.mxu1 %v20830_v19  ;;  %v20838_v19 = vand.u32 4294901760, %v20606_v4 }
 0x275   : > { %10900 = vmatprep.subr.bf16.mxu1 %v20831_v16  ;;  %v20839_v16 = vand.u32 4294901760, %v20607_v25  ;;  %v20850_v25 = vld [vmem:[#allocation205_spill] sm:$0xff] }
 0x277   : > { %v10137_v28 = vpack.c.bf16 %v20839_v16, %v20838_v19  ;;  %v10141_v19 = vpack.c.bf16 %v20853_v55, %v20851_v35  ;;  %v20855_v16 = vld [vmem:[#allocation37_spill] sm:$0xff]  ;;  %v20868_v35 = vld [vmem:[#allocation210_spill] sm:$0xff]  ;;  %v20870_v55 = vld [vmem:[#allocation43_spill] sm:$0xff] }
 0x278   : > { %v20856_v43 = vand.u32 4294901760, %v20855_v16  ;;  %v20872_v16 = vld [vmem:[#allocation44_spill] sm:$0xff] }
 0x279   : > { %10134 = vmatpush1.bf16.xpose.msra.mxu0 %v20834_v33 }
 0x27a   : > { %10136 = vmatprep.subr.bf16.mxu0 %v10135_v63  ;;  %v10905_v63 = vpack.c.bf16 %v20845_v12, %v20843_v62  ;;  %v20862_v12 = vld [vmem:[#allocation35_spill] sm:$0xff] }
 0x27c   : > { %10902 = vmatpush1.bf16.xpose.msra.mxu1 %v20837_v40  ;;  %v20848_v40 = vld [vmem:[#allocation29_spill] sm:$0xff] }
 0x27d   : > { %10904 = vmatprep.subr.bf16.mxu1 %v10903_v26  ;;  %v20847_v26 = vand.u32 4294901760, %v20846_v22  ;;  %v20849_v4 = vand.u32 4294901760, %v20848_v40  ;;  %v20857_v40 = vld [vmem:[#allocation38_spill] sm:$0xff]  ;;  %v20865_v22 = vand.u32 4294901760, %v20864_v14  ;;  %v20882_v14 = vld [vmem:[#allocation47_spill] sm:$0xff] }
 0x27e   : > { %v20858_v18 = vand.u32 4294901760, %v20857_v40  ;;  %v20874_v40 = vld [vmem:[#allocation49_spill] sm:$0xff] }
 0x27f   : > { %v10907_v33 = vpack.c.bf16 %v20849_v4, %v20847_v26  ;;  %v20866_v26 = vld [vmem:[#allocation41_spill] sm:$0xff] }
 0x280   : > { %1959 = vmatmul.mubr.f32.vlgmr.msra.gmra.mrb[0].mxu0 %v20842_v57  ;;  %v10143_v62 = vpack.c.bf16 %v20858_v18, %v20856_v43  ;;  %v20867_v4 = vand.u32 4294901760, %v20866_v26  ;;  %v20875_v18 = vand.u32 4294901760, %v20874_v40 }
 0x281   : > { %10138 = vmatpush1.bf16.xpose.msra.mxu0 %v10137_v28  ;;  %1967 = vmatprep.mubr.f32.mxu0 %v20850_v25  ;;  %v20854_v28 = vld [vmem:[#allocation206_spill] sm:$0xff] }
 0x282   : > { %10140 = vmatprep.subr.bf16.mxu0 %v10139_v48  ;;  %v20860_v48 = vld [vmem:[#allocation33_spill] sm:$0xff] }
 0x283   : > { %6387 = vmatmul.mubr.f32.vlgmr.msra.gmra.mrb[0].mxu1 %v20842_v57  ;;  %v20861_v57 = vand.u32 4294901760, %v20860_v48 }
 0x284   : > { %10906 = vmatpush1.bf16.xpose.msra.mxu1 %v10905_v63  ;;  %6395 = vmatprep.mubr.f32.mxu1 %v20850_v25  ;;  %v10911_v25 = vpack.c.bf16 %v20867_v4, %v20865_v22  ;;  %v20883_v22 = vand.u32 4294901760, %v20882_v14  ;;  %v20884_v4 = vld [vmem:[#allocation52_spill] sm:$0xff]  ;;  %v20899_v14 = vld [vmem:[#allocation231_spill] sm:$0xff] }
 0x285   : > { %10908 = vmatprep.subr.bf16.mxu1 %v10907_v33  ;;  %1971 = vmatmul.mubr.f32.gmra.mrb[2].mxu0 %v20854_v28  ;;  %v20863_v33 = vand.u32 4294901760, %v20862_v12  ;;  %v20879_v12 = vld [vmem:[#allocation219_spill] sm:$0xff] }
 0x286   : > { %1979 = vmatprep.mubr.f32.mxu0 %v20859_v45 }
 0x287   : > { %6399 = vmatmul.mubr.f32.gmra.mrb[2].mxu1 %v20854_v28  ;;  %v10909_v63 = vpack.c.bf16 %v20863_v33, %v20861_v57  ;;  %v20871_v28 = vand.u32 4294901760, %v20870_v55  ;;  %v20878_v57 = vld [vmem:[#allocation218_spill] sm:$0xff] }
 0x288   : > { %6407 = vmatprep.mubr.f32.mxu1 %v20859_v45  ;;  %v20876_v45 = vld [vmem:[#allocation50_spill] sm:$0xff] }
 0x289   : > { %10142 = vmatpush1.bf16.xpose.msra.mxu0 %v10141_v19  ;;  %v20873_v19 = vand.u32 4294901760, %v20872_v16  ;;  %v20877_v48 = vand.u32 4294901760, %v20876_v45  ;;  %v20880_v33 = vld [vmem:[#allocation46_spill] sm:$0xff]  ;;  %v20889_v16 = vld [vmem:[#allocation227_spill] sm:$0xff] }
 0x28a   : > { %10144 = vmatprep.subr.bf16.mxu0 %v10143_v62  ;;  %1983 = vmatmul.mubr.f32.gmra.mrb[4].mxu0 %v20868_v35 }
 0x28b   : > { %6411 = vmatmul.mubr.f32.gmra.mrb[4].mxu1 %v20868_v35  ;;  %1991 = vmatprep.mubr.f32.mxu0 %v20869_v36  ;;  %v10145_v43 = vpack.c.bf16 %v20873_v19, %v20871_v28  ;;  %v10147_v62 = vpack.c.bf16 %v20877_v48, %v20875_v18  ;;  %v20886_v35 = vld [vmem:[#allocation53_spill] sm:$0xff]  ;;  %v20888_v28 = vld [vmem:[#allocation223_spill] sm:$0xff]  ;;  %v20892_v18 = vld [vmem:[#allocation56_spill] sm:$0xff] }
 0x28c   : > { %10910 = vmatpush1.bf16.xpose.msra.mxu1 %v10909_v63  ;;  %6419 = vmatprep.mubr.f32.mxu1 %v20869_v36  ;;  %v20881_v63 = vand.u32 4294901760, %v20880_v33  ;;  %v20887_v36 = vand.u32 4294901760, %v20886_v35  ;;  %v20890_v19 = vld [vmem:[#allocation55_spill] sm:$0xff]  ;;  %v20894_v48 = vld [vmem:[#allocation61_spill] sm:$0xff] }
 0x28d   : > { %10912 = vmatprep.subr.bf16.mxu1 %v10911_v25  ;;  %v20885_v25 = vand.u32 4294901760, %v20884_v4  ;;  %v20891_v40 = vand.u32 4294901760, %v20890_v19  ;;  %v20902_v4 = vld [vmem:[#allocation59_spill] sm:$0xff] }
 0x28e   : > { %1995 = vmatmul.mubr.f32.gmra.mrb[6].mxu0 %v20878_v57  ;;  %v10913_v26 = vpack.c.bf16 %v20883_v22, %v20881_v63  ;;  %v20898_v63 = vld [vmem:[#allocation230_spill] sm:$0xff] }
 0x28f   : > { %6423 = vmatmul.mubr.f32.gmra.mrb[6].mxu1 %v20878_v57  ;;  %2003 = vmatprep.mubr.f32.mxu0 %v20879_v12  ;;  %v10915_v55 = vpack.c.bf16 %v20887_v36, %v20885_v25  ;;  %v20895_v57 = vand.u32 4294901760, %v20894_v48  ;;  %v20900_v22 = vld [vmem:[#allocation58_spill] sm:$0xff]  ;;  %v20903_v25 = vand.u32 4294901760, %v20902_v4  ;;  %v20904_v36 = vld [vmem:[#allocation64_spill] sm:$0xff] }
 0x290   : > { %6431 = vmatprep.mubr.f32.mxu1 %v20879_v12  ;;  %v20896_v12 = vld [vmem:[#allocation62_spill] sm:$0xff] }
 0x291   : > { %10146 = vmatpush1.bf16.xpose.msra.mxu0 %v10145_v43  ;;  %v20893_v43 = vand.u32 4294901760, %v20892_v18  ;;  %v20897_v33 = vand.u32 4294901760, %v20896_v12  ;;  %v20909_v18 = vld [vmem:[#allocation157_spill] sm:$0xff]  ;;  %v20919_v4 = vld [vmem:[#allocation158_spill] sm:$0xff] }
 0x292   : > { %10148 = vmatprep.subr.bf16.mxu0 %v10147_v62  ;;  %2007 = vmatmul.mubr.f32.gmra.mrb[8].mxu0 %v20888_v28 }
 0x293   : > { %6435 = vmatmul.mubr.f32.gmra.mrb[8].mxu1 %v20888_v28  ;;  %2015 = vmatprep.mubr.f32.mxu0 %v20889_v16  ;;  %v10149_v45 = vpack.c.bf16 %v20893_v43, %v20891_v40  ;;  %v10151_v62 = vpack.c.bf16 %v20897_v33, %v20895_v57  ;;  %v20906_v28 = vld [vmem:[#allocation65_spill] sm:$0xff]  ;;  %v20908_v40 = vld [vmem:[#allocation234_spill] sm:$0xff]  ;;  %v20910_v43 = vld [vmem:[#allocation67_spill] sm:$0xff] }
 0x294   : > { %10914 = vmatpush1.bf16.xpose.msra.mxu1 %v10913_v26  ;;  %6443 = vmatprep.mubr.f32.mxu1 %v20889_v16  ;;  %v20901_v26 = vand.u32 4294901760, %v20900_v22  ;;  %v20907_v16 = vand.u32 4294901760, %v20906_v28  ;;  %v20911_v48 = vand.u32 4294901760, %v20910_v43  ;;  %v20912_v57 = vld [vmem:[#allocation68_spill] sm:$0xff]  ;;  %v20914_v33 = vld [vmem:[#allocation73_spill] sm:$0xff] }
 0x295   : > { %10916 = vmatprep.subr.bf16.mxu1 %v10915_v55  ;;  %v20905_v55 = vand.u32 4294901760, %v20904_v36  ;;  %v20922_v36 = vld [vmem:[#allocation71_spill] sm:$0xff] }
 0x296   : > { %2019 = vmatmul.mubr.f32.gmra.mrb[10].mxu0 %v20898_v63  ;;  %v10917_v35 = vpack.c.bf16 %v20903_v25, %v20901_v26  ;;  %v20918_v26 = vld [vmem:[#allocation240_spill] sm:$0xff]  ;;  %v20920_v25 = vld [vmem:[#allocation70_spill] sm:$0xff] }
 0x297   : > { %6447 = vmatmul.mubr.f32.gmra.mrb[10].mxu1 %v20898_v63  ;;  %2027 = vmatprep.mubr.f32.mxu0 %v20899_v14  ;;  %v10919_v19 = vpack.c.bf16 %v20907_v16, %v20905_v55  ;;  %v20915_v63 = vand.u32 4294901760, %v20914_v33  ;;  %v20923_v55 = vand.u32 4294901760, %v20922_v36  ;;  %v20924_v16 = vld [vmem:[#allocation76_spill] sm:$0xff]  ;;  %v20939_v36 = vld [vmem:[#allocation245_spill] sm:$0xff] }
 0x298   : > { %6455 = vmatprep.mubr.f32.mxu1 %v20899_v14  ;;  %v20916_v14 = vld [vmem:[#allocation74_spill] sm:$0xff] }
 0x299   : > { %10150 = vmatpush1.bf16.xpose.msra.mxu0 %v10149_v45  ;;  %v20913_v45 = vand.u32 4294901760, %v20912_v57  ;;  %v20917_v22 = vand.u32 4294901760, %v20916_v14  ;;  %v20929_v57 = vld [vmem:[#allocation169_spill] sm:$0xff] }
 0x29a   : > { %10152 = vmatprep.subr.bf16.mxu0 %v10151_v62  ;;  %2031 = vmatmul.mubr.f32.gmra.mrb[12].mxu0 %v20908_v40 }
 0x29b   : > { %6459 = vmatmul.mubr.f32.gmra.mrb[12].mxu1 %v20908_v40  ;;  %2039 = vmatprep.mubr.f32.mxu0 %v20909_v18  ;;  %v10153_v12 = vpack.c.bf16 %v20913_v45, %v20911_v48  ;;  %v10155_v62 = vpack.c.bf16 %v20917_v22, %v20915_v63  ;;  %v20926_v40 = vld [vmem:[#allocation77_spill] sm:$0xff]  ;;  %v20928_v48 = vld [vmem:[#allocation163_spill] sm:$0xff]  ;;  %v20932_v63 = vld [vmem:[#allocation80_spill] sm:$0xff] }
 0x29c   : > { %10918 = vmatpush1.bf16.xpose.msra.mxu1 %v10917_v35  ;;  %6467 = vmatprep.mubr.f32.mxu1 %v20909_v18  ;;  %v20921_v35 = vand.u32 4294901760, %v20920_v25  ;;  %v20927_v18 = vand.u32 4294901760, %v20926_v40  ;;  %v20930_v45 = vld [vmem:[#allocation79_spill] sm:$0xff]  ;;  %v20934_v22 = vld [vmem:[#allocation85_spill] sm:$0xff] }
 0x29d   : > { %10920 = vmatprep.subr.bf16.mxu1 %v10919_v19  ;;  %v20925_v19 = vand.u32 4294901760, %v20924_v16  ;;  %v20931_v33 = vand.u32 4294901760, %v20930_v45  ;;  %v20942_v16 = vld [vmem:[#allocation83_spill] sm:$0xff] }
 0x29e   : > { %2043 = vmatmul.mubr.f32.gmra.mrb[14].mxu0 %v20918_v26  ;;  %v10921_v28 = vpack.c.bf16 %v20923_v55, %v20921_v35  ;;  %v20938_v35 = vld [vmem:[#allocation170_spill] sm:$0xff] }
 0x29f   : > { %6471 = vmatmul.mubr.f32.gmra.mrb[14].mxu1 %v20918_v26  ;;  %2051 = vmatprep.mubr.f32.mxu0 %v20919_v4  ;;  %v10923_v43 = vpack.c.bf16 %v20927_v18, %v20925_v19  ;;  %v20935_v26 = vand.u32 4294901760, %v20934_v22  ;;  %v20940_v55 = vld [vmem:[#allocation82_spill] sm:$0xff]  ;;  %v20943_v19 = vand.u32 4294901760, %v20942_v16  ;;  %v20944_v18 = vld [vmem:[#allocation88_spill] sm:$0xff]  ;;  %v20959_v16 = vld [vmem:[#allocation181_spill] sm:$0xff] }
 0x2a0   : > { %6479 = vmatprep.mubr.f32.mxu1 %v20919_v4  ;;  %v20936_v4 = vld [vmem:[#allocation86_spill] sm:$0xff] }
 0x2a1   : > { %10154 = vmatpush1.bf16.xpose.msra.mxu0 %v10153_v12  ;;  %v20933_v12 = vand.u32 4294901760, %v20932_v63  ;;  %v20937_v25 = vand.u32 4294901760, %v20936_v4  ;;  %v20949_v63 = vld [vmem:[#allocation180_spill] sm:$0xff] }
 0x2a2   : > { %10156 = vmatprep.subr.bf16.mxu0 %v10155_v62  ;;  %2055 = vmatmul.mubr.f32.gmra.mrb[16].mxu0 %v20928_v48 }
 0x2a3   : > { %6483 = vmatmul.mubr.f32.gmra.mrb[16].mxu1 %v20928_v48  ;;  %2063 = vmatprep.mubr.f32.mxu0 %v20929_v57  ;;  %v10157_v14 = vpack.c.bf16 %v20933_v12, %v20931_v33  ;;  %v10159_v62 = vpack.c.bf16 %v20937_v25, %v20935_v26  ;;  %v20946_v48 = vld [vmem:[#allocation89_spill] sm:$0xff]  ;;  %v20948_v33 = vld [vmem:[#allocation246_spill] sm:$0xff]  ;;  %v20950_v12 = vld [vmem:[#allocation91_spill] sm:$0xff] }
 0x2a4   : > { %10922 = vmatpush1.bf16.xpose.msra.mxu1 %v10921_v28  ;;  %6491 = vmatprep.mubr.f32.mxu1 %v20929_v57  ;;  %v20941_v28 = vand.u32 4294901760, %v20940_v55  ;;  %v20947_v57 = vand.u32 4294901760, %v20946_v48  ;;  %v20951_v22 = vand.u32 4294901760, %v20950_v12  ;;  %v20952_v26 = vld [vmem:[#allocation92_spill] sm:$0xff]  ;;  %v20954_v25 = vld [vmem:[#allocation97_spill] sm:$0xff] }
 0x2a5   : > { %10924 = vmatprep.subr.bf16.mxu1 %v10923_v43  ;;  %v20945_v43 = vand.u32 4294901760, %v20944_v18  ;;  %v20962_v18 = vld [vmem:[#allocation95_spill] sm:$0xff] }
 0x2a6   : > { %2067 = vmatmul.mubr.f32.gmra.mrb[18].mxu0 %v20938_v35  ;;  %v10925_v40 = vpack.c.bf16 %v20943_v19, %v20941_v28  ;;  %v20958_v28 = vld [vmem:[#allocation251_spill] sm:$0xff]  ;;  %v20960_v19 = vld [vmem:[#allocation94_spill] sm:$0xff] }
 0x2a7   : > { %6495 = vmatmul.mubr.f32.gmra.mrb[18].mxu1 %v20938_v35  ;;  %2075 = vmatprep.mubr.f32.mxu0 %v20939_v36  ;;  %v10927_v45 = vpack.c.bf16 %v20947_v57, %v20945_v43  ;;  %v20955_v35 = vand.u32 4294901760, %v20954_v25  ;;  %v20963_v43 = vand.u32 4294901760, %v20962_v18  ;;  %v20964_v57 = vld [vmem:[#allocation100_spill] sm:$0xff]  ;;  %v20979_v18 = vld [vmem:[#allocation263_spill] sm:$0xff] }
 0x2a8   : > { %6503 = vmatprep.mubr.f32.mxu1 %v20939_v36  ;;  %v20956_v36 = vld [vmem:[#allocation98_spill] sm:$0xff] }
 0x2a9   : > { %10158 = vmatpush1.bf16.xpose.msra.mxu0 %v10157_v14  ;;  %v20953_v14 = vand.u32 4294901760, %v20952_v26  ;;  %v20957_v55 = vand.u32 4294901760, %v20956_v36  ;;  %v20969_v26 = vld [vmem:[#allocation260_spill] sm:$0xff] }
 0x2aa   : > { %10160 = vmatprep.subr.bf16.mxu0 %v10159_v62  ;;  %2079 = vmatmul.mubr.f32.gmra.mrb[20].mxu0 %v20948_v33 }
 0x2ab   : > { %6507 = vmatmul.mubr.f32.gmra.mrb[20].mxu1 %v20948_v33  ;;  %2087 = vmatprep.mubr.f32.mxu0 %v20949_v63  ;;  %v10161_v4 = vpack.c.bf16 %v20953_v14, %v20951_v22  ;;  %v10163_v62 = vpack.c.bf16 %v20957_v55, %v20955_v35  ;;  %v20966_v33 = vld [vmem:[#allocation101_spill] sm:$0xff]  ;;  %v20968_v22 = vld [vmem:[#allocation254_spill] sm:$0xff]  ;;  %v20970_v14 = vld [vmem:[#allocation103_spill] sm:$0xff] }
 0x2ac   : > { %10926 = vmatpush1.bf16.xpose.msra.mxu1 %v10925_v40  ;;  %6515 = vmatprep.mubr.f32.mxu1 %v20949_v63  ;;  %v20961_v40 = vand.u32 4294901760, %v20960_v19  ;;  %v20967_v63 = vand.u32 4294901760, %v20966_v33  ;;  %v20971_v25 = vand.u32 4294901760, %v20970_v14  ;;  %v20972_v35 = vld [vmem:[#allocation104_spill] sm:$0xff]  ;;  %v20974_v55 = vld [vmem:[#allocation109_spill] sm:$0xff] }
 0x2ad   : > { %10928 = vmatprep.subr.bf16.mxu1 %v10927_v45  ;;  %v20965_v45 = vand.u32 4294901760, %v20964_v57  ;;  %v20982_v57 = vld [vmem:[#allocation107_spill] sm:$0xff] }
 0x2ae   : > { %2091 = vmatmul.mubr.f32.gmra.mrb[22].mxu0 %v20958_v28  ;;  %v10929_v48 = vpack.c.bf16 %v20963_v43, %v20961_v40  ;;  %v20978_v40 = vld [vmem:[#allocation262_spill] sm:$0xff] }
 0x2af   : > { %6519 = vmatmul.mubr.f32.gmra.mrb[22].mxu1 %v20958_v28  ;;  %2099 = vmatprep.mubr.f32.mxu0 %v20959_v16  ;;  %v10931_v12 = vpack.c.bf16 %v20967_v63, %v20965_v45  ;;  %v20975_v28 = vand.u32 4294901760, %v20974_v55  ;;  %v20980_v43 = vld [vmem:[#allocation106_spill] sm:$0xff]  ;;  %v20983_v45 = vand.u32 4294901760, %v20982_v57  ;;  %v20984_v63 = vld [vmem:[#allocation112_spill] sm:$0xff]  ;;  %v20999_v57 = vld [vmem:[#allocation191_spill] sm:$0xff] }
 0x2b0   : > { %6527 = vmatprep.mubr.f32.mxu1 %v20959_v16  ;;  %v20976_v16 = vld [vmem:[#allocation110_spill] sm:$0xff] }
 0x2b1   : > { %10162 = vmatpush1.bf16.xpose.msra.mxu0 %v10161_v4  ;;  %v20973_v4 = vand.u32 4294901760, %v20972_v35  ;;  %v20977_v19 = vand.u32 4294901760, %v20976_v16  ;;  %v20989_v35 = vld [vmem:[#allocation268_spill] sm:$0xff] }
 0x2b2   : > { %10164 = vmatprep.subr.bf16.mxu0 %v10163_v62  ;;  %2103 = vmatmul.mubr.f32.gmra.mrb[24].mxu0 %v20968_v22 }
 0x2b3   : > { %6531 = vmatmul.mubr.f32.gmra.mrb[24].mxu1 %v20968_v22  ;;  %2111 = vmatprep.mubr.f32.mxu0 %v20969_v26  ;;  %v10165_v36 = vpack.c.bf16 %v20973_v4, %v20971_v25  ;;  %v10167_v62 = vpack.c.bf16 %v20977_v19, %v20975_v28  ;;  %v20986_v22 = vld [vmem:[#allocation113_spill] sm:$0xff]  ;;  %v20990_v4 = vld [vmem:[#allocation115_spill] sm:$0xff]  ;;  %v20992_v28 = vld [vmem:[#allocation116_spill] sm:$0xff] }
 0x2b4   : > { %10930 = vmatpush1.bf16.xpose.msra.mxu1 %v10929_v48  ;;  %6539 = vmatprep.mubr.f32.mxu1 %v20969_v26  ;;  %v20981_v48 = vand.u32 4294901760, %v20980_v43  ;;  %v20987_v26 = vand.u32 4294901760, %v20986_v22  ;;  %v20988_v25 = vld [vmem:[#allocation265_spill] sm:$0xff]  ;;  %v20991_v55 = vand.u32 4294901760, %v20990_v4 }
 0x2b5   : > { %10932 = vmatprep.subr.bf16.mxu1 %v10931_v12  ;;  %v20985_v12 = vand.u32 4294901760, %v20984_v63  ;;  %v20994_v19 = vld [vmem:[#allocation121_spill] sm:$0xff]  ;;  %v21002_v63 = vld [vmem:[#allocation119_spill] sm:$0xff] }
 0x2b6   : > { %2115 = vmatmul.mubr.f32.gmra.mrb[26].mxu0 %v20978_v40  ;;  %v10933_v33 = vpack.c.bf16 %v20983_v45, %v20981_v48  ;;  %v20998_v48 = vld [vmem:[#allocation269_spill] sm:$0xff]  ;;  %v21000_v45 = vld [vmem:[#allocation118_spill] sm:$0xff] }
 0x2b7   : > { %6543 = vmatmul.mubr.f32.gmra.mrb[26].mxu1 %v20978_v40  ;;  %2123 = vmatprep.mubr.f32.mxu0 %v20979_v18  ;;  %v10935_v14 = vpack.c.bf16 %v20987_v26, %v20985_v12  ;;  %v20995_v40 = vand.u32 4294901760, %v20994_v19  ;;  %v21003_v12 = vand.u32 4294901760, %v21002_v63  ;;  %v21004_v26 = vld [vmem:[#allocation124_spill] sm:$0xff]  ;;  %v21017_v63 = vld [vmem:[#allocation131_spill] sm:$0xff] }
 0x2b8   : > { %6551 = vmatprep.mubr.f32.mxu1 %v20979_v18  ;;  %v20996_v18 = vld [vmem:[#allocation122_spill] sm:$0xff] }
 0x2b9   : > { %10166 = vmatpush1.bf16.xpose.msra.mxu0 %v10165_v36  ;;  %v20993_v36 = vand.u32 4294901760, %v20992_v28  ;;  %v20997_v43 = vand.u32 4294901760, %v20996_v18  ;;  %v21012_v18 = vld [vmem:[#allocation133_spill] sm:$0xff] }
 0x2ba   : > { %10168 = vmatprep.subr.bf16.mxu0 %v10167_v62  ;;  %2127 = vmatmul.mubr.f32.gmra.mrb[28].mxu0 %v20988_v25 }
 0x2bb   : > { %6555 = vmatmul.mubr.f32.gmra.mrb[28].mxu1 %v20988_v25  ;;  %2135 = vmatprep.mubr.f32.mxu0 %v20989_v35  ;;  %v10169_v16 = vpack.c.bf16 %v20993_v36, %v20991_v55  ;;  %v10171_v62 = vpack.c.bf16 %v20997_v43, %v20995_v40  ;;  %v21006_v25 = vld [vmem:[#allocation125_spill] sm:$0xff]  ;;  %v21008_v55 = vld [vmem:[#allocation127_spill] sm:$0xff]  ;;  %v21010_v36 = vld [vmem:[#allocation128_spill] sm:$0xff]  ;;  %v21013_v43 = vand.u32 4294901760, %v21012_v18 }
 0x2bc   : > { %10934 = vmatpush1.bf16.xpose.msra.mxu1 %v10933_v33  ;;  %6563 = vmatprep.mubr.f32.mxu1 %v20989_v35  ;;  %v21001_v33 = vand.u32 4294901760, %v21000_v45  ;;  %v21007_v35 = vand.u32 4294901760, %v21006_v25  ;;  %v21009_v28 = vand.u32 4294901760, %v21008_v55  ;;  %v21011_v19 = vand.u32 4294901760, %v21010_v36 }
 0x2bd   : > { %10936 = vmatprep.subr.bf16.mxu1 %v10935_v14  ;;  %v21005_v14 = vand.u32 4294901760, %v21004_v26  ;;  %v21024_v55 = vand.u32 4294901760, %v20714_v58  ;;  %v21025_v36 = vand.u32 4294901760, %v20715_v42  ;;  %v21033_v58 = vand.u32 4294901760, %v20722_v20 }
 0x2be   : > { %2139 = vmatmul.mubr.f32.gmra.mrb[30].mxu0 %v20998_v48  ;;  %v10937_v22 = vpack.c.bf16 %v21003_v12, %v21001_v33  ;;  %v10173_v40 = vpack.c.bf16 %v21011_v19, %v21009_v28  ;;  %v21018_v12 = vand.u32 4294901760, %v21017_v63  ;;  %v21034_v63 = vand.u32 4294901760, %v20529_v38 }
 0x2bf   : > { %6567 = vmatmul.mubr.f32.gmra.mrb[30].mxu1 %v20998_v48  ;;  %2402 = vmatprep.mubr.f32.mxu0 %v20999_v57  ;;  %v10939_v4 = vpack.c.bf16 %v21007_v35, %v21005_v14  ;;  %v21014_v48 = vld [vmem:[#allocation134_spill] sm:$0xff]  ;;  %v21019_v14 = vld [vmem:[#allocation136_spill] sm:$0xff]  ;;  %v21041_v38 = vand.u32 4294901760, %v20543_v52  ;;  %v21042_v20 = vand.u32 4294901760, %v20553_v2  ;;  %v21049_v2 = vand.u32 4294901760, %v20599_v27 }
 0x2c0   : > { %6830 = vmatprep.mubr.f32.mxu1 %v20999_v57  ;;  %v21015_v45 = vand.u32 4294901760, %v21014_v48  ;;  %v21058_v27 = vand.u32 4294901760, %v13082_v15  ;;  %v21067_v15 = vand.u32 4294901760, %v13106_v9 }
 0x2c1   : > { %10170 = vmatpush1.bf16.xpose.msra.mxu0 %v10169_v16  ;;  %v21016_v16 = vand.u32 4294901760, %v20709_v7  ;;  %v21026_v7 = vld [vmem:[#allocation146_spill] sm:$0xff] }
 0x2c2   : > { %10172 = vmatprep.subr.bf16.mxu0 %v10171_v62  ;;  %v10175_v33 = vpack.c.bf16 %v21015_v45, %v21013_v43  ;;  %v21020_v62 = vand.u32 4294901760, %v21019_v14  ;;  %v21027_v19 = vand.u32 4294901760, %v21026_v7  ;;  %v21029_v43 = vand.u32 4294901760, %v20718_v11 }
 0x2c3   : > { %v10941_v26 = vpack.c.bf16 %v21018_v12, %v21016_v16  ;;  %v21030_v45 = vand.u32 4294901760, %v20719_v41  ;;  %v21036_v12 = vand.u32 4294901760, %v20723_v0  ;;  %v21037_v41 = vand.u32 4294901760, %v20724_v13 }
 0x2c4   : > { %10938 = vmatpush1.bf16.xpose.msra.mxu1 %v10937_v22  ;;  %v21021_v22 = vld [vmem:[#allocation137_spill] sm:$0xff]  ;;  %v10179_v18 = vpack.c.bf16 %v21027_v19, %v21025_v36  ;;  %v21039_v14 = vand.u32 4294901760, %v20535_v61  ;;  %v21043_v0 = vand.u32 4294901760, %v20555_v6  ;;  %v21046_v61 = vand.u32 4294901760, %v20558_v23 }
 0x2c5   : > { %10940 = vmatprep.subr.bf16.mxu1 %v10939_v4  ;;  %v21022_v25 = vand.u32 4294901760, %v21021_v22  ;;  %v21023_v4 = vand.u32 4294901760, %v20713_v53  ;;  %v21032_v53 = vand.u32 4294901760, %v20721_v56  ;;  %v21040_v56 = vand.u32 4294901760, %v20541_v39 }
 0x2c6   : > { %v10187_v13 = vpack.c.bf16 %v21043_v0, %v21042_v20  ;;  %v21044_v22 = vand.u32 4294901760, %v20544_v30  ;;  %v21048_v39 = vand.u32 4294901760, %v13044_v21  ;;  %v21050_v6 = vand.u32 4294901760, %v20572_v17  ;;  %v21077_v20 = vld [vmem:[#allocation18_spill] sm:$0xff]  ;;  %v21078_v0 = vld [vmem:[#allocation199_spill] sm:$0xff] }
 0x2c7   : > { %v10943_v35 = vpack.c.bf16 %v21022_v25, %v21020_v62  ;;  %v10177_v28 = vpack.c.bf16 %v21024_v55, %v21023_v4  ;;  %v10181_v42 = vpack.c.bf16 %v21033_v58, %v21032_v53  ;;  %v21051_v30 = vand.u32 4294901760, %v20576_v47  ;;  %v14871_v53 = vld [vmem:[#allocation5 + $0x38] sm:$0xff] }
 0x2c8   : > { %v10189_v52 = vpack.c.bf16 %v21049_v2, %v21048_v39  ;;  %v21052_v55 = vand.u32 4294901760, %v20600_v1  ;;  %v21053_v23 = vand.u32 4294901760, %v20566_v44  ;;  %v21055_v36 = vand.u32 4294901760, %v20579_v5  ;;  %v14873_v58 = vld [vmem:[#allocation5 + $0x418] sm:$0xff] }
 0x2c9   : > { %10174 = vmatpush1.bf16.xpose.msra.mxu0 %v10173_v40  ;;  %v21028_v40 = vand.u32 4294901760, %v20717_v54  ;;  %v21035_v54 = vand.u32 4294901760, %v20533_v49  ;;  %v10185_v49 = vpack.c.bf16 %v21041_v38, %v21040_v56  ;;  %v21056_v21 = vand.u32 4294901760, %v13070_v59  ;;  %v14941_v2 = vld [vmem:[#allocation5 + $0x58] sm:$0xff] }
 0x2ca   : > { %10176 = vmatprep.subr.bf16.mxu0 %v10175_v33  ;;  %v21031_v33 = vand.u32 4294901760, %v20720_v10  ;;  %v21038_v10 = vand.u32 4294901760, %v20534_v24  ;;  %v21045_v24 = vand.u32 4294901760, %v20545_v37  ;;  %v10191_v37 = vpack.c.bf16 %v21051_v30, %v21050_v6  ;;  %v14945_v6 = vld [vmem:[#allocation5 + $0x458] sm:$0xff]  ;;  %v21085_v30 = vld [vmem:[#allocation27_spill] sm:$0xff] }
 0x2cb   : > { %v10945_v48 = vpack.c.bf16 %v21029_v43, %v21028_v40  ;;  %v10183_v11 = vpack.c.bf16 %v21035_v54, %v21034_v63  ;;  %v21057_v17 = vand.u32 4294901760, %v13072_v31  ;;  %v21059_v1 = vand.u32 4294901760, %v13086_v32  ;;  %v21064_v43 = vld [vmem:[#allocation190_spill] sm:$0xff] }
 0x2cc   : > { %10942 = vmatpush1.bf16.xpose.msra.mxu1 %v10941_v26  ;;  %v10947_v16 = vpack.c.bf16 %v21031_v33, %v21030_v45  ;;  %v10949_v26 = vpack.c.bf16 %v21037_v41, %v21036_v12  ;;  %v10951_v62 = vpack.c.bf16 %v21039_v14, %v21038_v10  ;;  %v10953_v25 = vpack.c.bf16 %v21045_v24, %v21044_v22  ;;  %v14897_v41 = vld [vmem:[#allocation5 + $0x10] sm:$0xff]  ;;  %v21075_v14 = vld [vmem:[#allocation195_spill] sm:$0xff] }
 0x2cd   : > { %10944 = vmatprep.subr.bf16.mxu1 %v10943_v35  ;;  %v21047_v35 = vand.u32 4294901760, %v20559_v46  ;;  %v21054_v46 = vand.u32 4294901760, %v20601_v50  ;;  %v10193_v47 = vpack.c.bf16 %v21057_v17, %v21056_v21  ;;  %v10195_v44 = vpack.c.bf16 %v21059_v1, %v21058_v27  ;;  %v14901_v10 = vld [vmem:[#allocation5 + $0x410] sm:$0xff] }
 0x2ce   : > { %v21060_v19 = vand.u32 4294901760, %v13076_v34  ;;  %v21063_v5 = vand.u32 4294901760, %v13090_v29  ;;  %v21066_v59 = vand.u32 4294901760, %v13104_v3  ;;  %v21068_v32 = vand.u32 4294901760, %v13111_v8  ;;  %v14869_v29 = vld [vmem:[#allocation5 + $0x18] sm:$0xff]  ;;  %v21087_v21 = vld [vmem:[#allocation201_spill] sm:$0xff] }
 0x2cf   : > { %v10955_v4 = vpack.c.bf16 %v21047_v35, %v21046_v61  ;;  %v10959_v7 = vpack.c.bf16 %v21055_v36, %v21054_v46  ;;  %v21069_v34 = vand.u32 4294901760, %v13113_v51  ;;  %v19408_v3 = vand.u32 4294901760, %v14869_v29  ;;  %v14878_v8 = vld [vmem:[#allocation5 + $0x438] sm:$0xff]  ;;  %v21082_v35 = vld [vmem:[#allocation21_spill] sm:$0xff] }
 0x2d0   : > { %v10197_v31 = vpack.c.bf16 %v21067_v15, %v21066_v59  ;;  %v19405_v9 = vand.u32 4294901760, %v14871_v53  ;;  %v19403_v51 = vand.u32 4294901760, %v14873_v58  ;;  %v19401_v63 = vand.u32 4294901760, %v14878_v8  ;;  %v14954_v36 = vld [vmem:[#allocation5 + $0x50] sm:$0xff] }
 0x2d1   : > { %10178 = vmatpush1.bf16.xpose.msra.mxu0 %v10177_v28  ;;  %v10957_v28 = vpack.c.bf16 %v21053_v23, %v21052_v55  ;;  %v10965_v33 = vpack.c.bf16 %v21069_v34, %v21068_v32  ;;  %v14885_v54 = vsub.f32 %v14869_v29, %v19408_v3  ;;  %v19400_v56 = vand.u32 4294901760, %v14897_v41  ;;  %v15095_v3 = vld [vmem:[#allocation5 + $0xf8] sm:$0xff] }
 0x2d2   : > { %10180 = vmatprep.subr.bf16.mxu0 %v10179_v18  ;;  %v21061_v18 = vld [vmem:[#allocation187_spill] sm:$0xff]  ;;  %v14895_v12 = vsub.f32 %v14873_v58, %v19403_v51  ;;  %v19398_v55 = vand.u32 4294901760, %v14941_v2  ;;  %v19392_v46 = vand.u32 4294901760, %v14945_v6 }
 0x2d3   : > { %v21062_v50 = vand.u32 4294901760, %v21061_v18  ;;  %21072 = vst [vmem:[#allocation175_spill] sm:$0xff] %v14885_v54  ;;  %v14919_v22 = vsub.f32 %v14897_v41, %v19400_v56  ;;  %v14978_v18 = vld [vmem:[#allocation5 + $0x450] sm:$0xff] }
 0x2d4   : > { %10946 = vmatpush1.bf16.xpose.msra.mxu1 %v10945_v48  ;;  %v21065_v48 = vand.u32 4294901760, %v21064_v43  ;;  %21074 = vst [vmem:[#allocation183_spill] sm:$0xff] %v14895_v12  ;;  %v14965_v27 = vsub.f32 %v14941_v2, %v19398_v55  ;;  %v19388_v59 = vand.u32 4294901760, %v14978_v18  ;;  %v21107_v55 = vld [vmem:[#allocation42_spill] sm:$0xff] }
 0x2d5   : > { %10948 = vmatprep.subr.bf16.mxu1 %v10947_v16  ;;  %v10961_v40 = vpack.c.bf16 %v21062_v50, %v21060_v19  ;;  %v21070_v16 = vld [vmem:[#allocation12_spill] sm:$0xff]  ;;  %21080 = vst [vmem:[#allocation14_spill] sm:$0xff] %v14919_v22  ;;  %v14980_v50 = vld [vmem:[#allocation5 + $0x470] sm:$0xff]  ;;  %v21140_v22 = vld [vmem:[#allocation239_spill] sm:$0xff] }
 0x2d6   : > { %v10963_v45 = vpack.c.bf16 %v21065_v48, %v21063_v5  ;;  %21088 = vst [vmem:[#allocation20_spill] sm:$0xff] %v14965_v27  ;;  %v21094_v48 = vld [vmem:[#allocation36_spill] sm:$0xff]  ;;  %v19387_v15 = vand.u32 4294901760, %v14980_v50  ;;  %v15010_v32 = vsub.f32 %v14978_v18, %v19388_v59  ;;  %v21135_v27 = vld [vmem:[#allocation63_spill] sm:$0xff] }
 0x2d8   : > { %21098 = vst [vmem:[#allocation130_spill] sm:$0xff] %v15010_v32  ;;  %v15015_v34 = vsub.f32 %v14980_v50, %v19387_v15  ;;  %v21101_v15 = vld [vmem:[#allocation212_spill] sm:$0xff] }
 0x2d9   : > { %10182 = vmatpush1.bf16.xpose.msra.mxu0 %v10181_v42  ;;  %v21071_v42 = vld [vmem:[#allocation16_spill] sm:$0xff] }
 0x2da   : > { %10184 = vmatprep.subr.bf16.mxu0 %v10183_v11  ;;  %v14890_v11 = vsub.f32 %v14871_v53, %v19405_v9  ;;  %21099 = vst [vmem:[#allocation139_spill] sm:$0xff] %v15015_v34  ;;  %v21113_v9 = vld [vmem:[#allocation45_spill] sm:$0xff] }
 0x2dc   : > { %10950 = vmatpush1.bf16.xpose.msra.mxu1 %v10949_v26  ;;  %21073 = vst [vmem:[#allocation177_spill] sm:$0xff] %v14890_v11  ;;  %v14899_v26 = vld [vmem:[#allocation5 + $0x30] sm:$0xff] }
 0x2dd   : > { %10952 = vmatprep.subr.bf16.mxu1 %v10951_v62  ;;  %v14907_v62 = vsub.f32 %v14878_v8, %v19401_v63  ;;  %v19399_v38 = vand.u32 4294901760, %v14899_v26  ;;  %v21110_v63 = vld [vmem:[#allocation48_spill] sm:$0xff]  ;;  %v15201_v11 = vld [vmem:[#allocation5 + $0x510] sm:$0xff] }
 0x2de   : > { %21143 = vst [vmem:[#allocation228_spill] sm:$0xff] %v15201_v11 }
 0x2df   : > { %21076 = vst [vmem:[#allocation13_spill] sm:$0xff] %v14907_v62  ;;  %v14924_v24 = vsub.f32 %v14899_v26, %v19399_v38 }
 0x2e1   : > { %10186 = vmatpush1.bf16.xpose.msra.mxu0 %v10185_v49  ;;  %v14911_v49 = vld [vmem:[#allocation5 + $0x430] sm:$0xff]  ;;  %21081 = vst [vmem:[#allocation15_spill] sm:$0xff] %v14924_v24 }
 0x2e2   : > { %10188 = vmatprep.subr.bf16.mxu0 %v10187_v13  ;;  %v21079_v13 = vld [vmem:[#allocation25_spill] sm:$0xff]  ;;  %v19393_v61 = vand.u32 4294901760, %v14911_v49 }
 0x2e3   : > { %v15203_v24 = vld [vmem:[#allocation5 + $0x530] sm:$0xff] }
 0x2e4   : > { %10954 = vmatpush1.bf16.xpose.msra.mxu1 %v10953_v25  ;;  %v19394_v25 = vand.u32 4294901760, %v14901_v10  ;;  %v14939_v39 = vsub.f32 %v14911_v49, %v19393_v61  ;;  %21144 = vst [vmem:[#allocation229_spill] sm:$0xff] %v15203_v24 }
 0x2e5   : > { %10956 = vmatprep.subr.bf16.mxu1 %v10955_v4 }
 0x2e6   : > { %v14934_v4 = vsub.f32 %v14901_v10, %v19394_v25  ;;  %21084 = vst [vmem:[#allocation19_spill] sm:$0xff] %v14939_v39  ;;  %v15049_v25 = vld [vmem:[#allocation5 + $0x490] sm:$0xff] }
 0x2e7   : > { %v19413_v51 = vand.u32 4294901760, %v15049_v25 }
 0x2e8   : > { %21083 = vst [vmem:[#allocation17_spill] sm:$0xff] %v14934_v4  ;;  %v15178_v4 = vld [vmem:[#allocation5 + $0x538] sm:$0xff] }
 0x2e9   : > { %10190 = vmatpush1.bf16.xpose.msra.mxu0 %v10189_v52  ;;  %v14943_v52 = vld [vmem:[#allocation5 + $0x78] sm:$0xff]  ;;  %21136 = vst [vmem:[#allocation214_spill] sm:$0xff] %v15178_v4 }
 0x2ea   : > { %10192 = vmatprep.subr.bf16.mxu0 %v10191_v37  ;;  %v21086_v37 = vld [vmem:[#allocation200_spill] sm:$0xff]  ;;  %v19395_v23 = vand.u32 4294901760, %v14943_v52 }
 0x2ec   : > { %10958 = vmatpush1.bf16.xpose.msra.mxu1 %v10957_v28  ;;  %v14951_v28 = vld [vmem:[#allocation5 + $0x478] sm:$0xff]  ;;  %v14970_v1 = vsub.f32 %v14943_v52, %v19395_v23  ;;  %v15051_v23 = vld [vmem:[#allocation5 + $0x4b0] sm:$0xff] }
 0x2ed   : > { %10960 = vmatprep.subr.bf16.mxu1 %v10959_v7  ;;  %v14956_v7 = vld [vmem:[#allocation5 + $0x70] sm:$0xff]  ;;  %v19391_v17 = vand.u32 4294901760, %v14951_v28 }
 0x2ee   : > { %21089 = vst [vmem:[#allocation24_spill] sm:$0xff] %v14970_v1  ;;  %v19389_v19 = vand.u32 4294901760, %v14956_v7  ;;  %v21129_v1 = vld [vmem:[#allocation60_spill] sm:$0xff] }
 0x2f0   : > { %v14997_v43 = vsub.f32 %v14956_v7, %v19389_v19 }
 0x2f1   : > { %10194 = vmatpush1.bf16.xpose.msra.mxu0 %v10193_v47  ;;  %v19390_v47 = vand.u32 4294901760, %v14954_v36 }
 0x2f2   : > { %10196 = vmatprep.subr.bf16.mxu0 %v10195_v44  ;;  %v14975_v44 = vsub.f32 %v14945_v6, %v19392_v46  ;;  %21093 = vst [vmem:[#allocation194_spill] sm:$0xff] %v14997_v43  ;;  %v15125_v43 = vld [vmem:[#allocation5 + $0x4d0] sm:$0xff] }
 0x2f3   : > { %v14992_v5 = vsub.f32 %v14954_v36, %v19390_v47  ;;  %v21102_v47 = vld [vmem:[#allocation213_spill] sm:$0xff] }
 0x2f4   : > { %10962 = vmatpush1.bf16.xpose.msra.mxu1 %v10961_v40  ;;  %21090 = vst [vmem:[#allocation26_spill] sm:$0xff] %v14975_v44  ;;  %v14986_v40 = vsub.f32 %v14951_v28, %v19391_v17 }
 0x2f5   : > { %10964 = vmatprep.subr.bf16.mxu1 %v10963_v45  ;;  %21092 = vst [vmem:[#allocation30_spill] sm:$0xff] %v14992_v5  ;;  %v21095_v45 = vld [vmem:[#allocation208_spill] sm:$0xff] }
 0x2f6   : > { %21091 = vst [vmem:[#allocation22_spill] sm:$0xff] %v14986_v40 }
 0x2f9   : > { %10198 = vmatpush1.bf16.xpose.msra.mxu0 %v10197_v31  ;;  %v21097_v31 = vld [vmem:[#allocation34_spill] sm:$0xff] }
 0x2fa   : > { %10200 = vmatprep.subr.bf16.mxu0 %v21070_v16  ;;  %v15019_v16 = vld [vmem:[#allocation5 + $0xb8] sm:$0xff] }
 0x2fc   : > { %10966 = vmatpush1.bf16.xpose.msra.mxu1 %v10965_v33  ;;  %v15017_v33 = vld [vmem:[#allocation5 + $0x98] sm:$0xff] }
 0x2fd   : > { %10968 = vmatprep.subr.bf16.mxu1 %v21071_v42  ;;  %v15021_v42 = vld [vmem:[#allocation5 + $0x498] sm:$0xff] }
 0x2fe   : > { %v19402_v59 = vand.u32 4294901760, %v15021_v42 }
 0x300   : > { %2404 = vmatmul.mubr.f32.vlgmr.msra.gmra.mrb[0].mxu0 %v21075_v14 }
 0x301   : > { %10202 = vmatpush1.bf16.xpose.msra.mxu0 %v21077_v20  ;;  %2410 = vmatprep.mubr.f32.mxu0 %v21078_v0  ;;  %v21100_v20 = vld [vmem:[#allocation39_spill] sm:$0xff] }
 0x302   : > { %10204 = vmatprep.subr.bf16.mxu0 %v21079_v13  ;;  %v19396_v13 = vand.u32 4294901760, %v15017_v33 }
 0x303   : > { %6832 = vmatmul.mubr.f32.vlgmr.msra.gmra.mrb[0].mxu1 %v21075_v14 }
 0x304   : > { %10970 = vmatpush1.bf16.xpose.msra.mxu1 %v21082_v35  ;;  %6838 = vmatprep.mubr.f32.mxu1 %v21078_v0  ;;  %v19397_v35 = vand.u32 4294901760, %v15019_v16 }
 0x305   : > { %10972 = vmatprep.subr.bf16.mxu1 %v21085_v30  ;;  %2412 = vmatmul.mubr.f32.gmra.mrb[2].mxu0 %v21086_v37  ;;  %v15026_v30 = vld [vmem:[#allocation5 + $0x4b8] sm:$0xff] }
 0x306   : > { %2418 = vmatprep.mubr.f32.mxu0 %v21087_v21  ;;  %v19404_v19 = vand.u32 4294901760, %v15026_v30  ;;  %v15045_v17 = vsub.f32 %v15019_v16, %v19397_v35 }
 0x307   : > { %6840 = vmatmul.mubr.f32.gmra.mrb[2].mxu1 %v21086_v37 }
 0x308   : > { %6846 = vmatprep.mubr.f32.mxu1 %v21087_v21  ;;  %21104 = vst [vmem:[#allocation145_spill] sm:$0xff] %v15045_v17  ;;  %v15062_v35 = vsub.f32 %v15026_v30, %v19404_v19  ;;  %v19415_v19 = vand.u32 4294901760, %v15051_v23  ;;  %v15127_v17 = vld [vmem:[#allocation5 + $0x4f0] sm:$0xff] }
 0x309   : > { %10206 = vmatpush1.bf16.xpose.msra.mxu0 %v20751_v60  ;;  %v21096_v60 = vld [vmem:[#allocation211_spill] sm:$0xff] }
 0x30a   : > { %10208 = vmatprep.subr.bf16.mxu0 %v21094_v48  ;;  %2420 = vmatmul.mubr.f32.gmra.mrb[4].mxu0 %v21095_v45  ;;  %v15028_v48 = vld [vmem:[#allocation5 + $0x90] sm:$0xff]  ;;  %21106 = vst [vmem:[#allocation143_spill] sm:$0xff] %v15062_v35  ;;  %v19425_v35 = vand.u32 4294901760, %v15095_v3 }
 0x30b   : > { %6848 = vmatmul.mubr.f32.gmra.mrb[4].mxu1 %v21095_v45  ;;  %2426 = vmatprep.mubr.f32.mxu0 %v21096_v60  ;;  %v19407_v46 = vand.u32 4294901760, %v15028_v48 }
 0x30c   : > { %10974 = vmatpush1.bf16.xpose.msra.mxu1 %v21097_v31  ;;  %6854 = vmatprep.mubr.f32.mxu1 %v21096_v60  ;;  %v15030_v31 = vld [vmem:[#allocation5 + $0xb0] sm:$0xff]  ;;  %v15121_v34 = vsub.f32 %v15095_v3, %v19425_v35 }
 0x30d   : > { %10976 = vmatprep.subr.bf16.mxu1 %v21100_v20  ;;  %v15040_v20 = vsub.f32 %v15017_v33, %v19396_v13  ;;  %v19406_v61 = vand.u32 4294901760, %v15030_v31  ;;  %v15057_v13 = vsub.f32 %v15021_v42, %v19402_v59  ;;  %v15068_v38 = vsub.f32 %v15028_v48, %v19407_v46  ;;  %v21111_v59 = vld [vmem:[#allocation220_spill] sm:$0xff]  ;;  %v15093_v46 = vld [vmem:[#allocation5 + $0xd8] sm:$0xff] }
 0x30e   : > { %2428 = vmatmul.mubr.f32.gmra.mrb[6].mxu0 %v21101_v15  ;;  %21120 = vst [vmem:[#allocation155_spill] sm:$0xff] %v15121_v34  ;;  %v21125_v34 = vld [vmem:[#allocation54_spill] sm:$0xff] }
 0x30f   : > { %6856 = vmatmul.mubr.f32.gmra.mrb[6].mxu1 %v21101_v15  ;;  %2434 = vmatprep.mubr.f32.mxu0 %v21102_v47  ;;  %21103 = vst [vmem:[#allocation140_spill] sm:$0xff] %v15040_v20  ;;  %21105 = vst [vmem:[#allocation142_spill] sm:$0xff] %v15057_v13  ;;  %v15073_v56 = vsub.f32 %v15030_v31, %v19406_v61  ;;  %v15086_v61 = vsub.f32 %v15049_v25, %v19413_v51  ;;  %v15102_v13 = vld [vmem:[#allocation5 + $0x4f8] sm:$0xff]  ;;  %v15104_v51 = vld [vmem:[#allocation5 + $0xd0] sm:$0xff] }
 0x310   : > { %6862 = vmatprep.mubr.f32.mxu1 %v21102_v47  ;;  %21108 = vst [vmem:[#allocation148_spill] sm:$0xff] %v15068_v38  ;;  %v21116_v38 = vld [vmem:[#allocation51_spill] sm:$0xff]  ;;  %v21118_v20 = vld [vmem:[#allocation226_spill] sm:$0xff]  ;;  %v19432_v32 = vand.u32 4294901760, %v15104_v51 }
 0x311   : > { %10210 = vmatpush1.bf16.xpose.msra.mxu0 %v21107_v55  ;;  %21109 = vst [vmem:[#allocation149_spill] sm:$0xff] %v15073_v56  ;;  %v21112_v55 = vld [vmem:[#allocation222_spill] sm:$0xff]  ;;  %21114 = vst [vmem:[#allocation151_spill] sm:$0xff] %v15086_v61  ;;  %v15106_v61 = vld [vmem:[#allocation5 + $0xf0] sm:$0xff] }
 0x312   : > { %10212 = vmatprep.subr.bf16.mxu0 %v21110_v63  ;;  %2436 = vmatmul.mubr.f32.gmra.mrb[8].mxu0 %v21111_v59  ;;  %v15091_v63 = vsub.f32 %v15051_v23, %v19415_v19  ;;  %v15097_v56 = vld [vmem:[#allocation5 + $0x4d8] sm:$0xff]  ;;  %v21117_v19 = vld [vmem:[#allocation225_spill] sm:$0xff]  ;;  %v21127_v40 = vand.u32 4294901760, %v15106_v61 }
 0x313   : > { %6864 = vmatmul.mubr.f32.gmra.mrb[8].mxu1 %v21111_v59  ;;  %2442 = vmatprep.mubr.f32.mxu0 %v21112_v55  ;;  %v21121_v5 = vand.u32 4294901760, %v15097_v56 }
 0x314   : > { %10978 = vmatpush1.bf16.xpose.msra.mxu1 %v21113_v9  ;;  %6870 = vmatprep.mubr.f32.mxu1 %v21112_v55  ;;  %21115 = vst [vmem:[#allocation152_spill] sm:$0xff] %v15091_v63  ;;  %v19423_v9 = vand.u32 4294901760, %v15093_v46  ;;  %v15144_v63 = vsub.f32 %v15104_v51, %v19432_v32  ;;  %v15149_v44 = vsub.f32 %v15106_v61, %v21127_v40  ;;  %v15169_v32 = vld [vmem:[#allocation5 + $0x118] sm:$0xff] }
 0x315   : > { %10980 = vmatprep.subr.bf16.mxu1 %v21116_v38 }
 0x316   : > { %2444 = vmatmul.mubr.f32.gmra.mrb[10].mxu0 %v21117_v19  ;;  %v15116_v38 = vsub.f32 %v15093_v46, %v19423_v9  ;;  %v15133_v9 = vsub.f32 %v15097_v56, %v21121_v5  ;;  %21126 = vst [vmem:[#allocation203_spill] sm:$0xff] %v15144_v63  ;;  %21128 = vst [vmem:[#allocation204_spill] sm:$0xff] %v15149_v44  ;;  %v21130_v5 = vld [vmem:[#allocation232_spill] sm:$0xff]  ;;  %v15171_v44 = vld [vmem:[#allocation5 + $0x138] sm:$0xff] }
 0x317   : > { %6872 = vmatmul.mubr.f32.gmra.mrb[10].mxu1 %v21117_v19  ;;  %2450 = vmatprep.mubr.f32.mxu0 %v21118_v20  ;;  %v15173_v63 = vld [vmem:[#allocation5 + $0x518] sm:$0xff]  ;;  %v19450_v39 = vand.u32 4294901760, %v15171_v44 }
 0x318   : > { %21119 = vst [vmem:[#allocation154_spill] sm:$0xff] %v15116_v38  ;;  %6878 = vmatprep.mubr.f32.mxu1 %v21118_v20  ;;  %21122 = vst [vmem:[#allocation197_spill] sm:$0xff] %v15133_v9  ;;  %v21123_v38 = vand.u32 4294901760, %v15102_v13  ;;  %v19438_v9 = vand.u32 4294901760, %v15125_v43  ;;  %v21145_v54 = vand.u32 4294901760, %v15173_v63 }
 0x319   : > { %10214 = vmatpush1.bf16.xpose.msra.mxu0 %v21125_v34  ;;  %v21131_v34 = vld [vmem:[#allocation235_spill] sm:$0xff]  ;;  %v15197_v62 = vsub.f32 %v15171_v44, %v19450_v39 }
 0x31a   : > { %v15138_v35 = vsub.f32 %v15102_v13, %v21123_v38  ;;  %10216 = vmatprep.subr.bf16.mxu0 %v21129_v1  ;;  %2452 = vmatmul.mubr.f32.gmra.mrb[12].mxu0 %v21130_v5  ;;  %v19440_v38 = vand.u32 4294901760, %v15127_v17  ;;  %v15162_v40 = vsub.f32 %v15125_v43, %v19438_v9  ;;  %v15180_v9 = vld [vmem:[#allocation5 + $0x110] sm:$0xff] }
 0x31b   : > { %6880 = vmatmul.mubr.f32.gmra.mrb[12].mxu1 %v21130_v5  ;;  %2458 = vmatprep.mubr.f32.mxu0 %v21131_v34  ;;  %21137 = vst [vmem:[#allocation215_spill] sm:$0xff] %v15180_v9  ;;  %21142 = vst [vmem:[#allocation224_spill] sm:$0xff] %v15197_v62  ;;  %v19457_v12 = vand.u32 4294901760, %v15180_v9  ;;  %v21149_v62 = vld [vmem:[#allocation66_spill] sm:$0xff] }
 0x31c   : > { %21124 = vst [vmem:[#allocation202_spill] sm:$0xff] %v15138_v35  ;;  %v21132_v35 = vld [vmem:[#allocation57_spill] sm:$0xff]  ;;  %6886 = vmatprep.mubr.f32.mxu1 %v21131_v34  ;;  %21133 = vst [vmem:[#allocation31_spill] sm:$0xff] %v15162_v40  ;;  %v15167_v1 = vsub.f32 %v15127_v17, %v19440_v38  ;;  %v21139_v38 = vld [vmem:[#allocation236_spill] sm:$0xff] }
 0x31d   : > { %10982 = vmatpush1.bf16.xpose.msra.mxu1 %v21132_v35  ;;  %v19448_v35 = vand.u32 4294901760, %v15169_v32  ;;  %v15182_v40 = vld [vmem:[#allocation5 + $0x130] sm:$0xff]  ;;  %v21153_v34 = vld [vmem:[#allocation72_spill] sm:$0xff] }
 0x31e   : > { %21134 = vst [vmem:[#allocation209_spill] sm:$0xff] %v15167_v1  ;;  %10984 = vmatprep.subr.bf16.mxu1 %v21135_v27  ;;  %21138 = vst [vmem:[#allocation216_spill] sm:$0xff] %v15182_v40  ;;  %2460 = vmatmul.mubr.f32.gmra.mrb[14].mxu0 %v21139_v38  ;;  %v15220_v1 = vsub.f32 %v15180_v9, %v19457_v12  ;;  %v15245_v12 = vld [vmem:[#allocation5 + $0x158] sm:$0xff] }
 0x31f   : > { %6888 = vmatmul.mubr.f32.gmra.mrb[14].mxu1 %v21139_v38  ;;  %2466 = vmatprep.mubr.f32.mxu0 %v21140_v22  ;;  %v15192_v27 = vsub.f32 %v15169_v32, %v19448_v35  ;;  %v15209_v35 = vsub.f32 %v15173_v63, %v21145_v54  ;;  %v21151_v38 = vand.u32 4294901760, %v15182_v40  ;;  %v21154_v54 = vld [vmem:[#allocation160_spill] sm:$0xff]  ;;  %21159 = vst [vmem:[#allocation243_spill] sm:$0xff] %v15245_v12 }
 0x320   : > { %6894 = vmatprep.mubr.f32.mxu1 %v21140_v22  ;;  %21150 = vst [vmem:[#allocation238_spill] sm:$0xff] %v15220_v1  ;;  %v15249_v1 = vld [vmem:[#allocation5 + $0x558] sm:$0xff] }
 0x321   : > { %21141 = vst [vmem:[#allocation221_spill] sm:$0xff] %v15192_v27  ;;  %21146 = vst [vmem:[#allocation233_spill] sm:$0xff] %v15209_v35  ;;  %v21147_v27 = vand.u32 4294901760, %v15178_v4  ;;  %10218 = vmatpush1.bf16.xpose.msra.mxu0 %v21149_v62  ;;  %v15225_v22 = vsub.f32 %v15182_v40, %v21151_v38  ;;  %v19463_v35 = vand.u32 4294901760, %v15201_v11  ;;  %v21155_v62 = vld [vmem:[#allocation164_spill] sm:$0xff]  ;;  %v15254_v40 = vld [vmem:[#allocation5 + $0x578] sm:$0xff] }
 0x322   : > { %10220 = vmatprep.subr.bf16.mxu0 %v21153_v34  ;;  %2468 = vmatmul.mubr.f32.gmra.mrb[16].mxu0 %v21154_v54  ;;  %21161 = vst [vmem:[#allocation173_spill] sm:$0xff] %v15249_v1  ;;  %21163 = vst [vmem:[#allocation248_spill] sm:$0xff] %v15254_v40 }
 0x323   : > { %v15214_v39 = vsub.f32 %v15178_v4, %v21147_v27  ;;  %21152 = vst [vmem:[#allocation241_spill] sm:$0xff] %v15225_v22  ;;  %v19465_v27 = vand.u32 4294901760, %v15203_v24  ;;  %6896 = vmatmul.mubr.f32.gmra.mrb[16].mxu1 %v21154_v54  ;;  %2474 = vmatprep.mubr.f32.mxu0 %v21155_v62  ;;  %v15238_v38 = vsub.f32 %v15201_v11, %v19463_v35  ;;  %v15247_v22 = vld [vmem:[#allocation5 + $0x178] sm:$0xff]  ;;  %v21162_v54 = vld [vmem:[#allocation75_spill] sm:$0xff]  ;;  %v15256_v35 = vld [vmem:[#allocation5 + $0x150] sm:$0xff] }
 0x324   : > { %6902 = vmatprep.mubr.f32.mxu1 %v21155_v62  ;;  %21160 = vst [vmem:[#allocation244_spill] sm:$0xff] %v15247_v22  ;;  %v19475_v62 = vand.u32 4294901760, %v15247_v22  ;;  %21164 = vst [vmem:[#allocation249_spill] sm:$0xff] %v15256_v35  ;;  %v21167_v11 = vld [vmem:[#allocation167_spill] sm:$0xff]  ;;  %v19482_v5 = vand.u32 4294901760, %v15256_v35  ;;  %v15277_v4 = vld [vmem:[#allocation5 + $0x550] sm:$0xff] }
 0x325   : > { %21148 = vst [vmem:[#allocation237_spill] sm:$0xff] %v15214_v39  ;;  %v21156_v39 = vld [vmem:[#allocation69_spill] sm:$0xff]  ;;  %21157 = vst [vmem:[#allocation161_spill] sm:$0xff] %v15238_v38  ;;  %v15243_v34 = vsub.f32 %v15203_v24, %v19465_v27  ;;  %v21166_v27 = vld [vmem:[#allocation166_spill] sm:$0xff] }
 0x326   : > { %10986 = vmatpush1.bf16.xpose.msra.mxu1 %v21156_v39  ;;  %v19473_v39 = vand.u32 4294901760, %v15245_v12  ;;  %v15258_v38 = vld [vmem:[#allocation5 + $0x170] sm:$0xff]  ;;  %2476 = vmatmul.mubr.f32.gmra.mrb[18].mxu0 %v21166_v27  ;;  %v15273_v9 = vsub.f32 %v15247_v22, %v19475_v62  ;;  %21170 = vst [vmem:[#allocation259_spill] sm:$0xff] %v15277_v4 }
 0x327   : > { %21158 = vst [vmem:[#allocation242_spill] sm:$0xff] %v15243_v34  ;;  %10988 = vmatprep.subr.bf16.mxu1 %v21162_v54  ;;  %21165 = vst [vmem:[#allocation252_spill] sm:$0xff] %v15258_v38  ;;  %6904 = vmatmul.mubr.f32.gmra.mrb[18].mxu1 %v21166_v27  ;;  %v15279_v24 = vld [vmem:[#allocation5 + $0x570] sm:$0xff]  ;;  %v21172_v27 = vand.u32 4294901760, %v15249_v1  ;;  %v15296_v34 = vsub.f32 %v15256_v35, %v19482_v5  ;;  %v21178_v22 = vand.u32 4294901760, %v15258_v38  ;;  %v15321_v5 = vld [vmem:[#allocation5 + $0x198] sm:$0xff] }
 0x328   : > { %2482 = vmatprep.mubr.f32.mxu0 %v21167_v11  ;;  %v15268_v54 = vsub.f32 %v15245_v12, %v19473_v39  ;;  %21169 = vst [vmem:[#allocation257_spill] sm:$0xff] %v15273_v9  ;;  %21171 = vst [vmem:[#allocation261_spill] sm:$0xff] %v15279_v24  ;;  %6910 = vmatprep.mubr.f32.mxu1 %v21167_v11  ;;  %v21176_v9 = vld [vmem:[#allocation78_spill] sm:$0xff]  ;;  %v21180_v12 = vld [vmem:[#allocation84_spill] sm:$0xff] }
 0x329   : > { %v15285_v39 = vsub.f32 %v15249_v1, %v21172_v27  ;;  %10222 = vmatpush1.bf16.xpose.msra.mxu0 %v21176_v9  ;;  %21177 = vst [vmem:[#allocation23_spill] sm:$0xff] %v15296_v34  ;;  %v15301_v11 = vsub.f32 %v15258_v38, %v21178_v22  ;;  %v21181_v27 = vld [vmem:[#allocation172_spill] sm:$0xff]  ;;  %v21182_v9 = vld [vmem:[#allocation178_spill] sm:$0xff]  ;;  %21186 = vst [vmem:[#allocation32_spill] sm:$0xff] %v15321_v5 }
 0x32a   : > { %21168 = vst [vmem:[#allocation253_spill] sm:$0xff] %v15268_v54  ;;  %v21174_v54 = vand.u32 4294901760, %v15254_v40  ;;  %10224 = vmatprep.subr.bf16.mxu0 %v21180_v12  ;;  %2484 = vmatmul.mubr.f32.gmra.mrb[20].mxu0 %v21181_v27  ;;  %v15325_v34 = vld [vmem:[#allocation5 + $0x598] sm:$0xff]  ;;  %v15353_v1 = vld [vmem:[#allocation5 + $0x590] sm:$0xff] }
 0x32b   : > { %21173 = vst [vmem:[#allocation196_spill] sm:$0xff] %v15285_v39  ;;  %21179 = vst [vmem:[#allocation28_spill] sm:$0xff] %v15301_v11  ;;  %v19488_v39 = vand.u32 4294901760, %v15277_v4  ;;  %6912 = vmatmul.mubr.f32.gmra.mrb[20].mxu1 %v21181_v27  ;;  %2490 = vmatprep.mubr.f32.mxu0 %v21182_v9  ;;  %v15323_v11 = vld [vmem:[#allocation5 + $0x1b8] sm:$0xff]  ;;  %v21189_v27 = vld [vmem:[#allocation87_spill] sm:$0xff] }
 0x32c   : > { %v15290_v62 = vsub.f32 %v15254_v40, %v21174_v54  ;;  %v19490_v54 = vand.u32 4294901760, %v15279_v24  ;;  %6918 = vmatprep.mubr.f32.mxu1 %v21182_v9  ;;  %21187 = vst [vmem:[#allocation206_spill] sm:$0xff] %v15323_v11  ;;  %21188 = vst [vmem:[#allocation37_spill] sm:$0xff] %v15325_v34  ;;  %v19500_v9 = vand.u32 4294901760, %v15323_v11  ;;  %v15330_v38 = vld [vmem:[#allocation5 + $0x5b8] sm:$0xff] }
 0x32d   : > { %v15314_v22 = vsub.f32 %v15277_v4, %v19488_v39  ;;  %21190 = vst [vmem:[#allocation38_spill] sm:$0xff] %v15330_v38  ;;  %v15332_v39 = vld [vmem:[#allocation5 + $0x190] sm:$0xff]  ;;  %v21194_v4 = vld [vmem:[#allocation250_spill] sm:$0xff]  ;;  %21197 = vst [vmem:[#allocation41_spill] sm:$0xff] %v15353_v1 }
 0x32e   : > { %21175 = vst [vmem:[#allocation198_spill] sm:$0xff] %v15290_v62  ;;  %v21183_v62 = vld [vmem:[#allocation81_spill] sm:$0xff]  ;;  %v15319_v12 = vsub.f32 %v15279_v24, %v19490_v54  ;;  %21191 = vst [vmem:[#allocation207_spill] sm:$0xff] %v15332_v39  ;;  %v21193_v54 = vld [vmem:[#allocation247_spill] sm:$0xff]  ;;  %v15349_v35 = vsub.f32 %v15323_v11, %v19500_v9  ;;  %v19507_v40 = vand.u32 4294901760, %v15332_v39 }
 0x32f   : > { %10990 = vmatpush1.bf16.xpose.msra.mxu1 %v21183_v62  ;;  %21184 = vst [vmem:[#allocation29_spill] sm:$0xff] %v15314_v22  ;;  %v19498_v62 = vand.u32 4294901760, %v15321_v5  ;;  %v15334_v22 = vld [vmem:[#allocation5 + $0x1b0] sm:$0xff]  ;;  %2492 = vmatmul.mubr.f32.gmra.mrb[22].mxu0 %v21193_v54 }
 0x330   : > { %21185 = vst [vmem:[#allocation205_spill] sm:$0xff] %v15319_v12  ;;  %10992 = vmatprep.subr.bf16.mxu1 %v21189_v27  ;;  %21192 = vst [vmem:[#allocation33_spill] sm:$0xff] %v15334_v22  ;;  %6920 = vmatmul.mubr.f32.gmra.mrb[22].mxu1 %v21193_v54  ;;  %v15355_v24 = vld [vmem:[#allocation5 + $0x5b0] sm:$0xff]  ;;  %v21199_v54 = vand.u32 4294901760, %v15325_v34  ;;  %v15372_v12 = vsub.f32 %v15332_v39, %v19507_v40  ;;  %v21205_v11 = vand.u32 4294901760, %v15334_v22  ;;  %v15397_v40 = vld [vmem:[#allocation5 + $0x1d8] sm:$0xff] }
 0x331   : > { %2498 = vmatprep.mubr.f32.mxu0 %v21194_v4  ;;  %v15344_v27 = vsub.f32 %v15321_v5, %v19498_v62  ;;  %21196 = vst [vmem:[#allocation40_spill] sm:$0xff] %v15349_v35  ;;  %21198 = vst [vmem:[#allocation210_spill] sm:$0xff] %v15355_v24  ;;  %6926 = vmatprep.mubr.f32.mxu1 %v21194_v4  ;;  %v21203_v35 = vld [vmem:[#allocation90_spill] sm:$0xff]  ;;  %v21207_v5 = vld [vmem:[#allocation96_spill] sm:$0xff] }
 0x332   : > { %v15361_v62 = vsub.f32 %v15325_v34, %v21199_v54  ;;  %10226 = vmatpush1.bf16.xpose.msra.mxu0 %v21203_v35  ;;  %21204 = vst [vmem:[#allocation44_spill] sm:$0xff] %v15372_v12  ;;  %v15377_v4 = vsub.f32 %v15334_v22, %v21205_v11  ;;  %v21208_v54 = vld [vmem:[#allocation184_spill] sm:$0xff]  ;;  %v21209_v35 = vld [vmem:[#allocation255_spill] sm:$0xff]  ;;  %21213 = vst [vmem:[#allocation219_spill] sm:$0xff] %v15397_v40 }
 0x333   : > { %21195 = vst [vmem:[#allocation35_spill] sm:$0xff] %v15344_v27  ;;  %v21201_v27 = vand.u32 4294901760, %v15330_v38  ;;  %10228 = vmatprep.subr.bf16.mxu0 %v21207_v5  ;;  %2500 = vmatmul.mubr.f32.gmra.mrb[24].mxu0 %v21208_v54  ;;  %v15401_v12 = vld [vmem:[#allocation5 + $0x5d8] sm:$0xff]  ;;  %v15429_v34 = vld [vmem:[#allocation5 + $0x5d0] sm:$0xff] }
 0x334   : > { %21200 = vst [vmem:[#allocation217_spill] sm:$0xff] %v15361_v62  ;;  %21206 = vst [vmem:[#allocation49_spill] sm:$0xff] %v15377_v4  ;;  %v19513_v62 = vand.u32 4294901760, %v15353_v1  ;;  %6928 = vmatmul.mubr.f32.gmra.mrb[24].mxu1 %v21208_v54  ;;  %2506 = vmatprep.mubr.f32.mxu0 %v21209_v35  ;;  %v15399_v4 = vld [vmem:[#allocation5 + $0x1f8] sm:$0xff]  ;;  %v21215_v54 = vld [vmem:[#allocation99_spill] sm:$0xff] }
 0x335   : > { %v15366_v9 = vsub.f32 %v15330_v38, %v21201_v27  ;;  %v19515_v27 = vand.u32 4294901760, %v15355_v24  ;;  %6934 = vmatprep.mubr.f32.mxu1 %v21209_v35  ;;  %21214 = vst [vmem:[#allocation46_spill] sm:$0xff] %v15399_v4  ;;  %v19525_v35 = vand.u32 4294901760, %v15399_v4  ;;  %v15406_v22 = vld [vmem:[#allocation5 + $0x5f8] sm:$0xff]  ;;  %21223 = vst [vmem:[#allocation55_spill] sm:$0xff] %v15429_v34 }
 0x336   : > { %v15390_v11 = vsub.f32 %v15353_v1, %v19513_v62  ;;  %21216 = vst [vmem:[#allocation47_spill] sm:$0xff] %v15406_v22  ;;  %v15408_v62 = vld [vmem:[#allocation5 + $0x1d0] sm:$0xff]  ;;  %v21220_v1 = vld [vmem:[#allocation258_spill] sm:$0xff] }
 0x337   : > { %21202 = vst [vmem:[#allocation43_spill] sm:$0xff] %v15366_v9  ;;  %v21210_v9 = vld [vmem:[#allocation93_spill] sm:$0xff]  ;;  %v15395_v5 = vsub.f32 %v15355_v24, %v19515_v27  ;;  %21217 = vst [vmem:[#allocation52_spill] sm:$0xff] %v15408_v62  ;;  %v21219_v27 = vld [vmem:[#allocation256_spill] sm:$0xff]  ;;  %v15425_v39 = vsub.f32 %v15399_v4, %v19525_v35  ;;  %v19532_v38 = vand.u32 4294901760, %v15408_v62 }
 0x338   : > { %10994 = vmatpush1.bf16.xpose.msra.mxu1 %v21210_v9  ;;  %21211 = vst [vmem:[#allocation50_spill] sm:$0xff] %v15390_v11  ;;  %v19523_v9 = vand.u32 4294901760, %v15397_v40  ;;  %v15410_v11 = vld [vmem:[#allocation5 + $0x1f0] sm:$0xff]  ;;  %2508 = vmatmul.mubr.f32.gmra.mrb[26].mxu0 %v21219_v27 }
 0x339   : > { %21212 = vst [vmem:[#allocation218_spill] sm:$0xff] %v15395_v5  ;;  %10996 = vmatprep.subr.bf16.mxu1 %v21215_v54  ;;  %21218 = vst [vmem:[#allocation53_spill] sm:$0xff] %v15410_v11  ;;  %6936 = vmatmul.mubr.f32.gmra.mrb[26].mxu1 %v21219_v27  ;;  %v15431_v24 = vld [vmem:[#allocation5 + $0x5f0] sm:$0xff]  ;;  %v21225_v27 = vand.u32 4294901760, %v15401_v12  ;;  %v15448_v5 = vsub.f32 %v15408_v62, %v19532_v38  ;;  %v21231_v4 = vand.u32 4294901760, %v15410_v11  ;;  %v15473_v38 = vld [vmem:[#allocation5 + $0x218] sm:$0xff] }
 0x33a   : > { %2514 = vmatprep.mubr.f32.mxu0 %v21220_v1  ;;  %v15420_v54 = vsub.f32 %v15397_v40, %v19523_v9  ;;  %21222 = vst [vmem:[#allocation227_spill] sm:$0xff] %v15425_v39  ;;  %21224 = vst [vmem:[#allocation56_spill] sm:$0xff] %v15431_v24  ;;  %6942 = vmatprep.mubr.f32.mxu1 %v21220_v1  ;;  %v21229_v39 = vld [vmem:[#allocation102_spill] sm:$0xff]  ;;  %v21233_v40 = vld [vmem:[#allocation108_spill] sm:$0xff] }
 0x33b   : > { %v15437_v9 = vsub.f32 %v15401_v12, %v21225_v27  ;;  %10230 = vmatpush1.bf16.xpose.msra.mxu0 %v21229_v39  ;;  %21230 = vst [vmem:[#allocation230_spill] sm:$0xff] %v15448_v5  ;;  %v15453_v1 = vsub.f32 %v15410_v11, %v21231_v4  ;;  %v21234_v27 = vld [vmem:[#allocation264_spill] sm:$0xff]  ;;  %v21235_v39 = vld [vmem:[#allocation266_spill] sm:$0xff]  ;;  %21239 = vst [vmem:[#allocation64_spill] sm:$0xff] %v15473_v38 }
 0x33c   : > { %21221 = vst [vmem:[#allocation223_spill] sm:$0xff] %v15420_v54  ;;  %v21227_v54 = vand.u32 4294901760, %v15406_v22  ;;  %10232 = vmatprep.subr.bf16.mxu0 %v21233_v40  ;;  %2516 = vmatmul.mubr.f32.gmra.mrb[28].mxu0 %v21234_v27  ;;  %v15477_v5 = vld [vmem:[#allocation5 + $0x618] sm:$0xff] }
 0x33d   : > { %21226 = vst [vmem:[#allocation61_spill] sm:$0xff] %v15437_v9  ;;  %21232 = vst [vmem:[#allocation231_spill] sm:$0xff] %v15453_v1  ;;  %v19538_v9 = vand.u32 4294901760, %v15429_v34  ;;  %6944 = vmatmul.mubr.f32.gmra.mrb[28].mxu1 %v21234_v27  ;;  %2522 = vmatprep.mubr.f32.mxu0 %v21235_v39  ;;  %v15475_v1 = vld [vmem:[#allocation5 + $0x238] sm:$0xff]  ;;  %v21242_v27 = vld [vmem:[#allocation111_spill] sm:$0xff] }
 0x33e   : > { %v15442_v35 = vsub.f32 %v15406_v22, %v21227_v54  ;;  %v19540_v54 = vand.u32 4294901760, %v15431_v24  ;;  %6950 = vmatprep.mubr.f32.mxu1 %v21235_v39  ;;  %21240 = vst [vmem:[#allocation65_spill] sm:$0xff] %v15475_v1  ;;  %21241 = vst [vmem:[#allocation234_spill] sm:$0xff] %v15477_v5  ;;  %v19549_v39 = vand.u32 4294901760, %v15475_v1  ;;  %v15482_v11 = vld [vmem:[#allocation5 + $0x638] sm:$0xff]  ;;  %v15505_v22 = vld [vmem:[#allocation5 + $0x610] sm:$0xff] }
 0x33f   : > { %v15466_v4 = vsub.f32 %v15429_v34, %v19538_v9  ;;  %21243 = vst [vmem:[#allocation157_spill] sm:$0xff] %v15482_v11  ;;  %v15484_v9 = vld [vmem:[#allocation5 + $0x210] sm:$0xff]  ;;  %21249 = vst [vmem:[#allocation240_spill] sm:$0xff] %v15505_v22 }
 0x340   : > { %21228 = vst [vmem:[#allocation62_spill] sm:$0xff] %v15442_v35  ;;  %v21236_v35 = vld [vmem:[#allocation105_spill] sm:$0xff]  ;;  %v15471_v40 = vsub.f32 %v15431_v24, %v19540_v54  ;;  %21244 = vst [vmem:[#allocation67_spill] sm:$0xff] %v15484_v9  ;;  %v21246_v54 = vld [vmem:[#allocation267_spill] sm:$0xff]  ;;  %v15501_v34 = vsub.f32 %v15475_v1, %v19549_v39  ;;  %v19554_v62 = vand.u32 4294901760, %v15484_v9 }
 0x341   : > { %10998 = vmatpush1.bf16.xpose.msra.mxu1 %v21236_v35  ;;  %21237 = vst [vmem:[#allocation58_spill] sm:$0xff] %v15466_v4  ;;  %v19547_v35 = vand.u32 4294901760, %v15473_v38  ;;  %v15486_v4 = vld [vmem:[#allocation5 + $0x230] sm:$0xff]  ;;  %2524 = vmatmul.mubr.f32.gmra.mrb[30].mxu0 %v21246_v54 }
 0x342   : > { %21238 = vst [vmem:[#allocation59_spill] sm:$0xff] %v15471_v40  ;;  %11000 = vmatprep.subr.bf16.mxu1 %v21242_v27  ;;  %21245 = vst [vmem:[#allocation68_spill] sm:$0xff] %v15486_v4  ;;  %6952 = vmatmul.mubr.f32.gmra.mrb[30].mxu1 %v21246_v54  ;;  %v15507_v24 = vld [vmem:[#allocation5 + $0x630] sm:$0xff]  ;;  %v21251_v54 = vand.u32 4294901760, %v15477_v5  ;;  %v15524_v40 = vsub.f32 %v15484_v9, %v19554_v62  ;;  %v21257_v1 = vand.u32 4294901760, %v15486_v4 }
 0x343   : > { %2659 = vmatprep.mubr.f32.mxu0 %v20999_v57  ;;  %v15496_v27 = vsub.f32 %v15473_v38, %v19547_v35  ;;  %21248 = vst [vmem:[#allocation74_spill] sm:$0xff] %v15501_v34  ;;  %21250 = vst [vmem:[#allocation158_spill] sm:$0xff] %v15507_v24  ;;  %7087 = vmatprep.mubr.f32.mxu1 %v20999_v57  ;;  %v21255_v34 = vld [vmem:[#allocation114_spill] sm:$0xff]  ;;  %v21259_v38 = vld [vmem:[#allocation120_spill] sm:$0xff] }
 0x344   : > { %v15513_v35 = vsub.f32 %v15477_v5, %v21251_v54  ;;  %10234 = vmatpush1.bf16.xpose.msra.mxu0 %v21255_v34  ;;  %21256 = vst [vmem:[#allocation76_spill] sm:$0xff] %v15524_v40  ;;  %v15529_v57 = vsub.f32 %v15486_v4, %v21257_v1  ;;  %v19559_v54 = vand.u32 4294901760, %v15505_v22  ;;  %v15545_v1 = vld [vmem:[#allocation5 + $0x258] sm:$0xff]  ;;  %v21266_v40 = vld [vmem:[#allocation123_spill] sm:$0xff] }
 0x345   : > { %21247 = vst [vmem:[#allocation73_spill] sm:$0xff] %v15496_v27  ;;  %v21253_v27 = vand.u32 4294901760, %v15482_v11  ;;  %10236 = vmatprep.subr.bf16.mxu0 %v21259_v38  ;;  %21263 = vst [vmem:[#allocation79_spill] sm:$0xff] %v15545_v1  ;;  %v15549_v38 = vld [vmem:[#allocation5 + $0x658] sm:$0xff] }
 0x346   : > { %21252 = vst [vmem:[#allocation70_spill] sm:$0xff] %v15513_v35  ;;  %21258 = vst [vmem:[#allocation77_spill] sm:$0xff] %v15529_v57  ;;  %v19561_v35 = vand.u32 4294901760, %v15507_v24  ;;  %v15538_v34 = vsub.f32 %v15505_v22, %v19559_v54  ;;  %v15547_v57 = vld [vmem:[#allocation5 + $0x278] sm:$0xff]  ;;  %v19572_v54 = vand.u32 4294901760, %v15549_v38 }
 0x347   : > { %v15518_v39 = vsub.f32 %v15482_v11, %v21253_v27  ;;  %v21260_v27 = vld [vmem:[#allocation117_spill] sm:$0xff]  ;;  %21264 = vst [vmem:[#allocation80_spill] sm:$0xff] %v15547_v57  ;;  %21265 = vst [vmem:[#allocation85_spill] sm:$0xff] %v15549_v38  ;;  %v15554_v4 = vld [vmem:[#allocation5 + $0x678] sm:$0xff] }
 0x348   : > { %21261 = vst [vmem:[#allocation163_spill] sm:$0xff] %v15538_v34  ;;  %v15543_v62 = vsub.f32 %v15507_v24, %v19561_v35  ;;  %21267 = vst [vmem:[#allocation86_spill] sm:$0xff] %v15554_v4  ;;  %v15557_v34 = vld [vmem:[#allocation5 + $0x250] sm:$0xff]  ;;  %v15576_v9 = vsub.f32 %v15549_v38, %v19572_v54  ;;  %v21275_v5 = vand.u32 4294901760, %v15554_v4 }
 0x349   : > { %21254 = vst [vmem:[#allocation71_spill] sm:$0xff] %v15518_v39  ;;  %11002 = vmatpush1.bf16.xpose.msra.mxu1 %v21260_v27  ;;  %v19568_v27 = vand.u32 4294901760, %v15545_v1  ;;  %v19570_v39 = vand.u32 4294901760, %v15547_v57  ;;  %21268 = vst [vmem:[#allocation170_spill] sm:$0xff] %v15557_v34  ;;  %v15559_v35 = vld [vmem:[#allocation5 + $0x270] sm:$0xff] }
 0x34a   : > { %21262 = vst [vmem:[#allocation169_spill] sm:$0xff] %v15543_v62  ;;  %11004 = vmatprep.subr.bf16.mxu1 %v21266_v40  ;;  %21269 = vst [vmem:[#allocation245_spill] sm:$0xff] %v15559_v35  ;;  %v19576_v11 = vand.u32 4294901760, %v15559_v35  ;;  %v15579_v62 = vld [vmem:[#allocation5 + $0x650] sm:$0xff] }
 0x34b   : > { %v15566_v40 = vsub.f32 %v15545_v1, %v19568_v27  ;;  %v15571_v22 = vsub.f32 %v15547_v57, %v19570_v39  ;;  %21272 = vst [vmem:[#allocation88_spill] sm:$0xff] %v15576_v9  ;;  %21273 = vst [vmem:[#allocation89_spill] sm:$0xff] %v15579_v62  ;;  %v15581_v24 = vld [vmem:[#allocation5 + $0x670] sm:$0xff]  ;;  %v15586_v27 = vsub.f32 %v15554_v4, %v21275_v5  ;;  %v21278_v39 = vand.u32 4294901760, %v15557_v34  ;;  %v21281_v9 = vld [vmem:[#allocation132_spill] sm:$0xff] }
 0x34c   : > { %21274 = vst [vmem:[#allocation246_spill] sm:$0xff] %v15581_v24  ;;  %v15597_v54 = vsub.f32 %v15559_v35, %v19576_v11  ;;  %v19581_v38 = vand.u32 4294901760, %v15579_v62  ;;  %v19583_v57 = vand.u32 4294901760, %v15581_v24  ;;  %v21282_v5 = vld [vmem:[#allocation129_spill] sm:$0xff]  ;;  %v15613_v11 = vld [vmem:[#allocation5 + $0x298] sm:$0xff] }
 0x34d   : > { %21270 = vst [vmem:[#allocation82_spill] sm:$0xff] %v15566_v40  ;;  %21271 = vst [vmem:[#allocation83_spill] sm:$0xff] %v15571_v22  ;;  %v21277_v40 = vld [vmem:[#allocation126_spill] sm:$0xff]  ;;  %v15592_v22 = vsub.f32 %v15557_v34, %v21278_v39 }
 0x34e   : > { %21276 = vst [vmem:[#allocation180_spill] sm:$0xff] %v15586_v27  ;;  %10238 = vmatpush1.bf16.xpose.msra.mxu0 %v21277_v40  ;;  %21280 = vst [vmem:[#allocation92_spill] sm:$0xff] %v15597_v54  ;;  %v15606_v40 = vsub.f32 %v15579_v62, %v19581_v38  ;;  %v15611_v39 = vsub.f32 %v15581_v24, %v19583_v57  ;;  %v15615_v54 = vld [vmem:[#allocation5 + $0x2b8] sm:$0xff]  ;;  %v15627_v57 = vld [vmem:[#allocation5 + $0x2b0] sm:$0xff] }
 0x34f   : > { %21279 = vst [vmem:[#allocation91_spill] sm:$0xff] %v15592_v22  ;;  %10240 = vmatprep.subr.bf16.mxu0 %v21281_v9  ;;  %21285 = vst [vmem:[#allocation251_spill] sm:$0xff] %v15613_v11  ;;  %v15617_v9 = vld [vmem:[#allocation5 + $0x698] sm:$0xff]  ;;  %v21288_v22 = vld [vmem:[#allocation135_spill] sm:$0xff]  ;;  %v19592_v27 = vand.u32 4294901760, %v15615_v54  ;;  %v19598_v4 = vand.u32 4294901760, %v15627_v57 }
 0x350   : > { %21283 = vst [vmem:[#allocation97_spill] sm:$0xff] %v15606_v40  ;;  %21284 = vst [vmem:[#allocation98_spill] sm:$0xff] %v15611_v39  ;;  %v15622_v35 = vld [vmem:[#allocation5 + $0x6b8] sm:$0xff]  ;;  %v19594_v38 = vand.u32 4294901760, %v15617_v9  ;;  %v15625_v40 = vld [vmem:[#allocation5 + $0x290] sm:$0xff] }
 0x351   : > { %11006 = vmatpush1.bf16.xpose.msra.mxu1 %v21282_v5  ;;  %21286 = vst [vmem:[#allocation181_spill] sm:$0xff] %v15615_v54  ;;  %21287 = vst [vmem:[#allocation94_spill] sm:$0xff] %v15617_v9  ;;  %v19590_v5 = vand.u32 4294901760, %v15613_v11  ;;  %v15639_v62 = vsub.f32 %v15615_v54, %v19592_v27  ;;  %v15647_v39 = vld [vmem:[#allocation5 + $0x690] sm:$0xff]  ;;  %v21297_v1 = vand.u32 4294901760, %v15622_v35  ;;  %v21300_v27 = vand.u32 4294901760, %v15625_v40 }
 0x352   : > { %11008 = vmatprep.subr.bf16.mxu1 %v21288_v22  ;;  %21289 = vst [vmem:[#allocation95_spill] sm:$0xff] %v15622_v35  ;;  %21290 = vst [vmem:[#allocation100_spill] sm:$0xff] %v15625_v40  ;;  %v15644_v34 = vsub.f32 %v15617_v9, %v19594_v38  ;;  %v15649_v24 = vld [vmem:[#allocation5 + $0x6b0] sm:$0xff]  ;;  %v15665_v38 = vsub.f32 %v15627_v57, %v19598_v4  ;;  %v19603_v9 = vand.u32 4294901760, %v15647_v39  ;;  %v15681_v4 = vld [vmem:[#allocation5 + $0x2d8] sm:$0xff] }
 0x353   : > { %21291 = vst [vmem:[#allocation101_spill] sm:$0xff] %v15627_v57  ;;  %v15634_v22 = vsub.f32 %v15613_v11, %v19590_v5  ;;  %21293 = vst [vmem:[#allocation260_spill] sm:$0xff] %v15639_v62  ;;  %v15654_v5 = vsub.f32 %v15622_v35, %v21297_v1  ;;  %v15660_v62 = vsub.f32 %v15625_v40, %v21300_v27  ;;  %v19605_v54 = vand.u32 4294901760, %v15649_v24  ;;  %v21304_v1 = vld [vmem:[#allocation141_spill] sm:$0xff]  ;;  %v15690_v57 = vld [vmem:[#allocation5 + $0x6f8] sm:$0xff] }
 0x354   : > { %21294 = vst [vmem:[#allocation103_spill] sm:$0xff] %v15644_v34  ;;  %21295 = vst [vmem:[#allocation104_spill] sm:$0xff] %v15647_v39  ;;  %v21303_v34 = vld [vmem:[#allocation144_spill] sm:$0xff]  ;;  %v21319_v11 = vand.u32 4294901760, %v15690_v57 }
 0x355   : > { %21292 = vst [vmem:[#allocation254_spill] sm:$0xff] %v15634_v22  ;;  %21296 = vst [vmem:[#allocation109_spill] sm:$0xff] %v15649_v24  ;;  %v21299_v22 = vld [vmem:[#allocation138_spill] sm:$0xff]  ;;  %v15679_v27 = vsub.f32 %v15649_v24, %v19605_v54  ;;  %v15695_v54 = vld [vmem:[#allocation5 + $0x2f0] sm:$0xff] }
 0x356   : > { %21298 = vst [vmem:[#allocation110_spill] sm:$0xff] %v15654_v5  ;;  %10242 = vmatpush1.bf16.xpose.msra.mxu0 %v21299_v22  ;;  %21301 = vst [vmem:[#allocation262_spill] sm:$0xff] %v15660_v62  ;;  %v15674_v22 = vsub.f32 %v15647_v39, %v19603_v9  ;;  %v21310_v62 = vld [vmem:[#allocation147_spill] sm:$0xff]  ;;  %v19620_v35 = vand.u32 4294901760, %v15695_v54  ;;  %v15717_v24 = vld [vmem:[#allocation5 + $0x6f0] sm:$0xff] }
 0x357   : > { %21302 = vst [vmem:[#allocation263_spill] sm:$0xff] %v15665_v38  ;;  %10244 = vmatprep.subr.bf16.mxu0 %v21303_v34  ;;  %21306 = vst [vmem:[#allocation107_spill] sm:$0xff] %v15679_v27  ;;  %v15683_v38 = vld [vmem:[#allocation5 + $0x2f8] sm:$0xff]  ;;  %v15715_v27 = vld [vmem:[#allocation5 + $0x6d0] sm:$0xff] }
 0x358   : > { %21305 = vst [vmem:[#allocation106_spill] sm:$0xff] %v15674_v22  ;;  %21307 = vst [vmem:[#allocation112_spill] sm:$0xff] %v15681_v4  ;;  %v15685_v34 = vld [vmem:[#allocation5 + $0x6d8] sm:$0xff]  ;;  %v19614_v5 = vand.u32 4294901760, %v15683_v38  ;;  %v15693_v22 = vld [vmem:[#allocation5 + $0x2d0] sm:$0xff] }
 0x359   : > { %11010 = vmatpush1.bf16.xpose.msra.mxu1 %v21304_v1  ;;  %21308 = vst [vmem:[#allocation113_spill] sm:$0xff] %v15683_v38  ;;  %21309 = vst [vmem:[#allocation265_spill] sm:$0xff] %v15685_v34  ;;  %v19612_v1 = vand.u32 4294901760, %v15681_v4  ;;  %v19616_v9 = vand.u32 4294901760, %v15685_v34 }
 0x35a   : > { %11012 = vmatprep.subr.bf16.mxu1 %v21310_v62  ;;  %21311 = vst [vmem:[#allocation268_spill] sm:$0xff] %v15690_v57  ;;  %21312 = vst [vmem:[#allocation115_spill] sm:$0xff] %v15693_v22  ;;  %v15707_v39 = vsub.f32 %v15683_v38, %v19614_v5  ;;  %v21322_v5 = vand.u32 4294901760, %v15693_v22  ;;  %v19627_v38 = vand.u32 4294901760, %v15717_v24 }
 0x35b   : > { %21313 = vst [vmem:[#allocation116_spill] sm:$0xff] %v15695_v54  ;;  %v15702_v62 = vsub.f32 %v15681_v4, %v19612_v1  ;;  %v15712_v40 = vsub.f32 %v15685_v34, %v19616_v9  ;;  %21317 = vst [vmem:[#allocation191_spill] sm:$0xff] %v15715_v27  ;;  %v15722_v1 = vsub.f32 %v15690_v57, %v21319_v11  ;;  %v19625_v34 = vand.u32 4294901760, %v15715_v27  ;;  %v21326_v11 = vld [vmem:[#allocation153_spill] sm:$0xff] }
 0x35c   : > { %21315 = vst [vmem:[#allocation122_spill] sm:$0xff] %v15707_v39  ;;  %21318 = vst [vmem:[#allocation118_spill] sm:$0xff] %v15717_v24  ;;  %v15728_v39 = vsub.f32 %v15693_v22, %v21322_v5  ;;  %v15733_v9 = vsub.f32 %v15695_v54, %v19620_v35  ;;  %v15747_v5 = vsub.f32 %v15717_v24, %v19627_v38  ;;  %v15749_v35 = vld [vmem:[#allocation5 + $0x318] sm:$0xff]  ;;  %v15763_v38 = vld [vmem:[#allocation5 + $0x330] sm:$0xff] }
 0x35d   : > { %21314 = vst [vmem:[#allocation121_spill] sm:$0xff] %v15702_v62  ;;  %21316 = vst [vmem:[#allocation269_spill] sm:$0xff] %v15712_v40  ;;  %v21321_v62 = vld [vmem:[#allocation150_spill] sm:$0xff]  ;;  %v21325_v40 = vld [vmem:[#allocation156_spill] sm:$0xff]  ;;  %v19642_v57 = vand.u32 4294901760, %v15763_v38 }
 0x35e   : > { %21320 = vst [vmem:[#allocation119_spill] sm:$0xff] %v15722_v1  ;;  %10246 = vmatpush1.bf16.xpose.msra.mxu0 %v21321_v62  ;;  %21323 = vst [vmem:[#allocation124_spill] sm:$0xff] %v15728_v39  ;;  %v15742_v62 = vsub.f32 %v15715_v27, %v19625_v34  ;;  %v21332_v39 = vld [vmem:[#allocation159_spill] sm:$0xff]  ;;  %v15758_v54 = vld [vmem:[#allocation5 + $0x738] sm:$0xff] }
 0x35f   : > { %21324 = vst [vmem:[#allocation125_spill] sm:$0xff] %v15733_v9  ;;  %10248 = vmatprep.subr.bf16.mxu0 %v21325_v40  ;;  %21328 = vst [vmem:[#allocation128_spill] sm:$0xff] %v15747_v5  ;;  %v15751_v9 = vld [vmem:[#allocation5 + $0x338] sm:$0xff]  ;;  %v15783_v5 = vld [vmem:[#allocation5 + $0x710] sm:$0xff]  ;;  %v21341_v4 = vand.u32 4294901760, %v15758_v54 }
 0x360   : > { %21327 = vst [vmem:[#allocation127_spill] sm:$0xff] %v15742_v62  ;;  %21329 = vst [vmem:[#allocation133_spill] sm:$0xff] %v15749_v35  ;;  %v15753_v40 = vld [vmem:[#allocation5 + $0x718] sm:$0xff]  ;;  %v19636_v1 = vand.u32 4294901760, %v15751_v9  ;;  %v15761_v62 = vld [vmem:[#allocation5 + $0x310] sm:$0xff] }
 0x361   : > { %11014 = vmatpush1.bf16.xpose.msra.mxu1 %v21326_v11  ;;  %21330 = vst [vmem:[#allocation134_spill] sm:$0xff] %v15751_v9  ;;  %21331 = vst [vmem:[#allocation131_spill] sm:$0xff] %v15753_v40  ;;  %v19634_v11 = vand.u32 4294901760, %v15749_v35  ;;  %v19638_v34 = vand.u32 4294901760, %v15753_v40  ;;  %v15785_v24 = vld [vmem:[#allocation5 + $0x730] sm:$0xff] }
 0x362   : > { %11016 = vmatprep.subr.bf16.mxu1 %v21332_v39  ;;  %21333 = vst [vmem:[#allocation136_spill] sm:$0xff] %v15758_v54  ;;  %21334 = vst [vmem:[#allocation137_spill] sm:$0xff] %v15761_v62  ;;  %v15775_v27 = vsub.f32 %v15751_v9, %v19636_v1  ;;  %v21344_v1 = vand.u32 4294901760, %v15761_v62  ;;  %v19649_v9 = vand.u32 4294901760, %v15785_v24 }
 0x363   : > { %21335 = vst [vmem:[#allocation146_spill] sm:$0xff] %v15763_v38  ;;  %v15770_v39 = vsub.f32 %v15749_v35, %v19634_v11  ;;  %v15780_v22 = vsub.f32 %v15753_v40, %v19638_v34  ;;  %21339 = vst [vmem:[#allocation16_spill] sm:$0xff] %v15783_v5  ;;  %v15790_v11 = vsub.f32 %v15758_v54, %v21341_v4  ;;  %v19647_v40 = vand.u32 4294901760, %v15783_v5  ;;  %v21348_v4 = vld [vmem:[#allocation165_spill] sm:$0xff] }
 0x364   : > { %21337 = vst [vmem:[#allocation190_spill] sm:$0xff] %v15775_v27  ;;  %21340 = vst [vmem:[#allocation195_spill] sm:$0xff] %v15785_v24  ;;  %v15796_v27 = vsub.f32 %v15761_v62, %v21344_v1  ;;  %v15801_v34 = vsub.f32 %v15763_v38, %v19642_v57  ;;  %v15815_v1 = vsub.f32 %v15785_v24, %v19649_v9  ;;  %v15817_v57 = vld [vmem:[#allocation5 + $0x358] sm:$0xff]  ;;  %v15831_v9 = vld [vmem:[#allocation5 + $0x370] sm:$0xff] }
 0x365   : > { %21336 = vst [vmem:[#allocation187_spill] sm:$0xff] %v15770_v39  ;;  %21338 = vst [vmem:[#allocation12_spill] sm:$0xff] %v15780_v22  ;;  %v21343_v39 = vld [vmem:[#allocation162_spill] sm:$0xff]  ;;  %v21347_v22 = vld [vmem:[#allocation168_spill] sm:$0xff]  ;;  %v19664_v54 = vand.u32 4294901760, %v15831_v9 }
 0x366   : > { %21342 = vst [vmem:[#allocation18_spill] sm:$0xff] %v15790_v11  ;;  %10250 = vmatpush1.bf16.xpose.msra.mxu0 %v21343_v39  ;;  %21345 = vst [vmem:[#allocation199_spill] sm:$0xff] %v15796_v27  ;;  %v15810_v39 = vsub.f32 %v15783_v5, %v19647_v40  ;;  %v21354_v27 = vld [vmem:[#allocation171_spill] sm:$0xff]  ;;  %v15826_v38 = vld [vmem:[#allocation5 + $0x778] sm:$0xff] }
 0x367   : > { %21346 = vst [vmem:[#allocation25_spill] sm:$0xff] %v15801_v34  ;;  %10252 = vmatprep.subr.bf16.mxu0 %v21347_v22  ;;  %21350 = vst [vmem:[#allocation27_spill] sm:$0xff] %v15815_v1  ;;  %v15819_v34 = vld [vmem:[#allocation5 + $0x378] sm:$0xff]  ;;  %v15851_v1 = vld [vmem:[#allocation5 + $0x750] sm:$0xff]  ;;  %v21363_v35 = vand.u32 4294901760, %v15826_v38 }
 0x368   : > { %21349 = vst [vmem:[#allocation21_spill] sm:$0xff] %v15810_v39  ;;  %21351 = vst [vmem:[#allocation200_spill] sm:$0xff] %v15817_v57  ;;  %v15821_v22 = vld [vmem:[#allocation5 + $0x758] sm:$0xff]  ;;  %v19658_v11 = vand.u32 4294901760, %v15819_v34  ;;  %v15829_v39 = vld [vmem:[#allocation5 + $0x350] sm:$0xff] }
 0x369   : > { %11018 = vmatpush1.bf16.xpose.msra.mxu1 %v21348_v4  ;;  %21352 = vst [vmem:[#allocation201_spill] sm:$0xff] %v15819_v34  ;;  %21353 = vst [vmem:[#allocation36_spill] sm:$0xff] %v15821_v22  ;;  %v19656_v4 = vand.u32 4294901760, %v15817_v57  ;;  %v19660_v40 = vand.u32 4294901760, %v15821_v22  ;;  %v15853_v24 = vld [vmem:[#allocation5 + $0x770] sm:$0xff] }
 0x36a   : > { %11020 = vmatprep.subr.bf16.mxu1 %v21354_v27  ;;  %21355 = vst [vmem:[#allocation208_spill] sm:$0xff] %v15826_v38  ;;  %21356 = vst [vmem:[#allocation211_spill] sm:$0xff] %v15829_v39  ;;  %v15843_v5 = vsub.f32 %v15819_v34, %v19658_v11  ;;  %v21366_v11 = vand.u32 4294901760, %v15829_v39  ;;  %v19671_v34 = vand.u32 4294901760, %v15853_v24 }
 0x36b   : > { %21357 = vst [vmem:[#allocation34_spill] sm:$0xff] %v15831_v9  ;;  %v15838_v27 = vsub.f32 %v15817_v57, %v19656_v4  ;;  %v15848_v62 = vsub.f32 %v15821_v22, %v19660_v40  ;;  %21361 = vst [vmem:[#allocation42_spill] sm:$0xff] %v15851_v1  ;;  %v15858_v4 = vsub.f32 %v15826_v38, %v21363_v35  ;;  %v19669_v22 = vand.u32 4294901760, %v15851_v1  ;;  %v21370_v35 = vld [vmem:[#allocation176_spill] sm:$0xff] }
 0x36c   : > { %21359 = vst [vmem:[#allocation212_spill] sm:$0xff] %v15843_v5  ;;  %21362 = vst [vmem:[#allocation48_spill] sm:$0xff] %v15853_v24  ;;  %v15864_v5 = vsub.f32 %v15829_v39, %v21366_v11  ;;  %v15869_v40 = vsub.f32 %v15831_v9, %v19664_v54  ;;  %v15883_v11 = vsub.f32 %v15853_v24, %v19671_v34  ;;  %v15885_v54 = vld [vmem:[#allocation5 + $0x398] sm:$0xff]  ;;  %v15899_v34 = vld [vmem:[#allocation5 + $0x3b0] sm:$0xff] }
 0x36d   : > { %21358 = vst [vmem:[#allocation39_spill] sm:$0xff] %v15838_v27  ;;  %21360 = vst [vmem:[#allocation213_spill] sm:$0xff] %v15848_v62  ;;  %v21365_v27 = vld [vmem:[#allocation174_spill] sm:$0xff]  ;;  %v21369_v62 = vld [vmem:[#allocation179_spill] sm:$0xff]  ;;  %v19686_v38 = vand.u32 4294901760, %v15899_v34 }
 0x36e   : > { %21364 = vst [vmem:[#allocation220_spill] sm:$0xff] %v15858_v4  ;;  %10254 = vmatpush1.bf16.xpose.msra.mxu0 %v21365_v27  ;;  %21367 = vst [vmem:[#allocation222_spill] sm:$0xff] %v15864_v5  ;;  %v15878_v27 = vsub.f32 %v15851_v1, %v19669_v22  ;;  %v21375_v5 = vld [vmem:[#allocation182_spill] sm:$0xff]  ;;  %v15921_v24 = vld [vmem:[#allocation5 + $0x7b0] sm:$0xff] }
 0x36f   : > { %21368 = vst [vmem:[#allocation45_spill] sm:$0xff] %v15869_v40  ;;  %10256 = vmatprep.subr.bf16.mxu0 %v21369_v62  ;;  %21372 = vst [vmem:[#allocation225_spill] sm:$0xff] %v15883_v11  ;;  %v15887_v40 = vld [vmem:[#allocation5 + $0x3b8] sm:$0xff]  ;;  %v15919_v11 = vld [vmem:[#allocation5 + $0x790] sm:$0xff] }
 0x370   : > { %21371 = vst [vmem:[#allocation51_spill] sm:$0xff] %v15878_v27  ;;  %21373 = vst [vmem:[#allocation226_spill] sm:$0xff] %v15887_v40  ;;  %v15889_v62 = vld [vmem:[#allocation5 + $0x798] sm:$0xff]  ;;  %v19680_v4 = vand.u32 4294901760, %v15887_v40  ;;  %v15897_v27 = vld [vmem:[#allocation5 + $0x390] sm:$0xff] }
 0x371   : > { %11022 = vmatpush1.bf16.xpose.msra.mxu1 %v21370_v35  ;;  %21374 = vst [vmem:[#allocation54_spill] sm:$0xff] %v15889_v62  ;;  %v19678_v35 = vand.u32 4294901760, %v15885_v54  ;;  %v15894_v9 = vld [vmem:[#allocation5 + $0x7b8] sm:$0xff]  ;;  %v19682_v22 = vand.u32 4294901760, %v15889_v62  ;;  %21377 = vst [vmem:[#allocation57_spill] sm:$0xff] %v15897_v27 }
 0x372   : > { %11024 = vmatprep.subr.bf16.mxu1 %v21375_v5  ;;  %21376 = vst [vmem:[#allocation60_spill] sm:$0xff] %v15894_v9  ;;  %21378 = vst [vmem:[#allocation63_spill] sm:$0xff] %v15899_v34  ;;  %v15911_v1 = vsub.f32 %v15887_v40, %v19680_v4  ;;  %v21384_v57 = vand.u32 4294901760, %v15894_v9  ;;  %v21387_v4 = vand.u32 4294901760, %v15897_v27  ;;  %v19693_v40 = vand.u32 4294901760, %v15921_v24 }
 0x373   : > { %v15906_v5 = vsub.f32 %v15885_v54, %v19678_v35  ;;  %v15916_v39 = vsub.f32 %v15889_v62, %v19682_v22  ;;  %21382 = vst [vmem:[#allocation75_spill] sm:$0xff] %v15919_v11  ;;  %21383 = vst [vmem:[#allocation78_spill] sm:$0xff] %v15921_v24  ;;  %v15937_v22 = vsub.f32 %v15899_v34, %v19686_v38  ;;  %v19691_v62 = vand.u32 4294901760, %v15919_v11  ;;  %v15953_v38 = vld [vmem:[#allocation5 + $0x3d8] sm:$0xff] }
 0x374   : > { %21380 = vst [vmem:[#allocation72_spill] sm:$0xff] %v15911_v1  ;;  %v15926_v35 = vsub.f32 %v15894_v9, %v21384_v57  ;;  %v15932_v1 = vsub.f32 %v15897_v27, %v21387_v4  ;;  %v21391_v57 = vld [vmem:[#allocation186_spill] sm:$0xff]  ;;  %v15951_v4 = vsub.f32 %v15921_v24, %v19693_v40  ;;  %v15967_v40 = vld [vmem:[#allocation5 + $0x3f0] sm:$0xff]  ;;  %v21398_v24 = vand.u32 4294901760, %v14871_v53 }
 0x375   : > { %21379 = vst [vmem:[#allocation66_spill] sm:$0xff] %v15906_v5  ;;  %21381 = vst [vmem:[#allocation69_spill] sm:$0xff] %v15916_v39  ;;  %v21386_v5 = vld [vmem:[#allocation185_spill] sm:$0xff]  ;;  %v21390_v39 = vld [vmem:[#allocation188_spill] sm:$0xff] }
 0x376   : > { %21385 = vst [vmem:[#allocation84_spill] sm:$0xff] %v15926_v35  ;;  %10258 = vmatpush1.bf16.xpose.msra.mxu0 %v21386_v5  ;;  %21388 = vst [vmem:[#allocation81_spill] sm:$0xff] %v15932_v1  ;;  %v15946_v5 = vsub.f32 %v15919_v11, %v19691_v62  ;;  %v21396_v1 = vld [vmem:[#allocation189_spill] sm:$0xff]  ;;  %v15962_v34 = vld [vmem:[#allocation5 + $0x7f8] sm:$0xff]  ;;  %v21400_v35 = vand.u32 4294901760, %v15953_v38 }
 0x377   : > { %21389 = vst [vmem:[#allocation87_spill] sm:$0xff] %v15937_v22  ;;  %10260 = vmatprep.subr.bf16.mxu0 %v21390_v39  ;;  %21393 = vst [vmem:[#allocation96_spill] sm:$0xff] %v15951_v4  ;;  %v15955_v22 = vld [vmem:[#allocation5 + $0x3f8] sm:$0xff]  ;;  %v21397_v4 = vand.u32 4294901760, %v14869_v29 }
 0x378   : > { %21392 = vst [vmem:[#allocation90_spill] sm:$0xff] %v15946_v5  ;;  %21394 = vst [vmem:[#allocation93_spill] sm:$0xff] %v15955_v22  ;;  %v15957_v39 = vld [vmem:[#allocation5 + $0x7d8] sm:$0xff]  ;;  %v15965_v5 = vld [vmem:[#allocation5 + $0x3d0] sm:$0xff]  ;;  %v15980_v27 = vsub.f32 %v15953_v38, %v21400_v35  ;;  %v21402_v62 = vand.u32 4294901760, %v15955_v22 }
 0x379   : > { %11026 = vmatpush1.bf16.xpose.msra.mxu1 %v21391_v57  ;;  %21395 = vst [vmem:[#allocation99_spill] sm:$0xff] %v15957_v39  ;;  %v15973_v11 = vpack.c.bf16 %v21398_v24, %v21397_v4  ;;  %v21404_v29 = vand.u32 4294901760, %v15957_v39  ;;  %v15993_v4 = vld [vmem:[#allocation5 + $0x7d0] sm:$0xff] }
 0x37a   : > { %11028 = vmatprep.subr.bf16.mxu1 %v21396_v1  ;;  %v19704_v1 = vand.u32 4294901760, %v15962_v34  ;;  %21401 = vst [vmem:[#allocation108_spill] sm:$0xff] %v15980_v27  ;;  %v15985_v9 = vsub.f32 %v15955_v22, %v21402_v62  ;;  %v15995_v57 = vld [vmem:[#allocation5 + $0x7f0] sm:$0xff]  ;;  %v21407_v27 = vld [vmem:[#allocation192_spill] sm:$0xff]  ;;  %v21408_v62 = vand.u32 4294901760, %v14873_v58 }
 0x37b   : > { %21399 = vst [vmem:[#allocation102_spill] sm:$0xff] %v15973_v11  ;;  %v15990_v53 = vsub.f32 %v15957_v39, %v21404_v29  ;;  %v21411_v29 = vand.u32 4294901760, %v15965_v5  ;;  %v19709_v58 = vand.u32 4294901760, %v15995_v57 }
 0x37c   : > { %21403 = vst [vmem:[#allocation105_spill] sm:$0xff] %v15985_v9  ;;  %v16000_v35 = vsub.f32 %v15962_v34, %v19704_v1  ;;  %v21409_v9 = vand.u32 4294901760, %v14878_v8  ;;  %v21414_v1 = vld [vmem:[#allocation193_spill] sm:$0xff] }
 0x37d   : > { %21405 = vst [vmem:[#allocation111_spill] sm:$0xff] %v15990_v53  ;;  %v16012_v24 = vsub.f32 %v15965_v5, %v21411_v29  ;;  %v21412_v53 = vand.u32 4294901760, %v15967_v40 }
 0x37e   : > { %21406 = vst [vmem:[#allocation114_spill] sm:$0xff] %v16000_v35  ;;  %10262 = vmatpush1.bf16.xpose.msra.mxu0 %v21407_v27  ;;  %v16007_v22 = vpack.c.bf16 %v21409_v9, %v21408_v62  ;;  %v19708_v27 = vand.u32 4294901760, %v15993_v4  ;;  %v16031_v9 = vsub.f32 %v15995_v57, %v19709_v58  ;;  %v21417_v62 = vand.u32 4294901760, %v14899_v26 }
 0x37f   : > { %v16017_v39 = vsub.f32 %v15967_v40, %v21412_v53  ;;  %10264 = vmatprep.subr.bf16.mxu0 %v15973_v11  ;;  %v21416_v53 = vand.u32 4294901760, %v14897_v41  ;;  %v21420_v11 = vand.u32 4294901760, %v14943_v52  ;;  %v21423_v58 = vand.u32 4294901760, %v14911_v49 }
 0x380   : > { %21410 = vst [vmem:[#allocation120_spill] sm:$0xff] %v16007_v22  ;;  %v16026_v8 = vsub.f32 %v15993_v4, %v19708_v27  ;;  %21415 = vst [vmem:[#allocation123_spill] sm:$0xff] %v16031_v9  ;;  %v21422_v27 = vand.u32 4294901760, %v14901_v10  ;;  %v21425_v41 = vand.u32 4294901760, %v14945_v6  ;;  %v21426_v26 = vand.u32 4294901760, %v14951_v28 }
 0x381   : > { %21413 = vst [vmem:[#allocation117_spill] sm:$0xff] %v16017_v39  ;;  %11030 = vmatpush1.bf16.xpose.msra.mxu1 %v21414_v1  ;;  %v16038_v29 = vpack.c.bf16 %v21417_v62, %v21416_v53  ;;  %v21419_v1 = vand.u32 4294901760, %v14941_v2  ;;  %v21428_v10 = vand.u32 4294901760, %v14954_v36  ;;  %v21429_v49 = vand.u32 4294901760, %v14956_v7  ;;  %v21472_v62 = vld [vmem:[#allocation243_spill] sm:$0xff] }
 0x382   : > { %11032 = vmatprep.subr.bf16.mxu1 %v16007_v22  ;;  %v16051_v9 = vpack.c.bf16 %v21423_v58, %v21422_v27  ;;  %v16058_v53 = vpack.c.bf16 %v21426_v26, %v21425_v41  ;;  %v21431_v52 = vand.u32 4294901760, %v15017_v33  ;;  %v21432_v6 = vand.u32 4294901760, %v15019_v16  ;;  %v21474_v41 = vld [vmem:[#allocation244_spill] sm:$0xff] }
 0x383   : > { %21418 = vst [vmem:[#allocation126_spill] sm:$0xff] %v16038_v29  ;;  %v16044_v39 = vpack.c.bf16 %v21420_v11, %v21419_v1  ;;  %v16070_v2 = vpack.c.bf16 %v21429_v49, %v21428_v10  ;;  %v21437_v7 = vand.u32 4294901760, %v15021_v42  ;;  %v21438_v33 = vand.u32 4294901760, %v15026_v30  ;;  %v21477_v49 = vld [vmem:[#allocation236_spill] sm:$0xff] }
 0x384   : > { %21424 = vst [vmem:[#allocation129_spill] sm:$0xff] %v16051_v9  ;;  %21427 = vst [vmem:[#allocation135_spill] sm:$0xff] %v16058_v53  ;;  %v16077_v28 = vpack.c.bf16 %v21432_v6, %v21431_v52  ;;  %v21444_v42 = vand.u32 4294901760, %v15095_v3  ;;  %v21449_v3 = vand.u32 4294901760, %v15097_v56  ;;  %v21452_v56 = vand.u32 4294901760, %v15104_v51  ;;  %v21478_v52 = vld [vmem:[#allocation239_spill] sm:$0xff] }
 0x385   : > { %21421 = vst [vmem:[#allocation132_spill] sm:$0xff] %v16044_v39  ;;  %2661 = vmatmul.mubr.f32.vlgmr.msra.gmra.mrb[0].mxu0 %v21075_v14  ;;  %21430 = vst [vmem:[#allocation138_spill] sm:$0xff] %v16070_v2  ;;  %v16093_v16 = vpack.c.bf16 %v21438_v33, %v21437_v7  ;;  %v21459_v51 = vand.u32 4294901760, %v15127_v17  ;;  %v21467_v17 = vld [vmem:[#allocation215_spill] sm:$0xff]  ;;  %v21473_v1 = vand.u32 4294901760, %v21472_v62  ;;  %v21475_v26 = vand.u32 4294901760, %v21474_v41 }
 0x386   : > { %10266 = vmatpush1.bf16.xpose.msra.mxu0 %v16038_v29  ;;  %2667 = vmatprep.mubr.f32.mxu0 %v21078_v0  ;;  %21433 = vst [vmem:[#allocation144_spill] sm:$0xff] %v16077_v28  ;;  %v21479_v6 = vld [vmem:[#allocation228_spill] sm:$0xff]  ;;  %v21508_v41 = vld [vmem:[#allocation37_spill] sm:$0xff] }
 0x387   : > { %10268 = vmatprep.subr.bf16.mxu0 %v16044_v39  ;;  %21439 = vst [vmem:[#allocation147_spill] sm:$0xff] %v16093_v16  ;;  %v16184_v10 = vpack.c.bf16 %v21475_v26, %v21473_v1  ;;  %v256_v1 = vld [vmem:[%s12672_s9 + $0x18] sm:$0xff]  ;;  %v21509_v26 = vand.u32 4294901760, %v21508_v41  ;;  %v21744_v29 = vld [vmem:[#allocation149_spill] sm:$0xff] }
 0x388   : > { %7089 = vmatmul.mubr.f32.vlgmr.msra.gmra.mrb[0].mxu1 %v21075_v14  ;;  %v21434_v14 = vand.u32 4294901760, %v14978_v18 }
 0x389   : > { %11034 = vmatpush1.bf16.xpose.msra.mxu1 %v16051_v9  ;;  %7095 = vmatprep.mubr.f32.mxu1 %v21078_v0  ;;  %v21435_v0 = vand.u32 4294901760, %v14980_v50  ;;  %v21443_v50 = vand.u32 4294901760, %v15093_v46  ;;  %v21450_v46 = vand.u32 4294901760, %v15102_v13  ;;  %21476 = vst [vmem:[#allocation179_spill] sm:$0xff] %v16184_v10 }
 0x38a   : > { %11036 = vmatprep.subr.bf16.mxu1 %v16058_v53  ;;  %2669 = vmatmul.mubr.f32.gmra.mrb[2].mxu0 %v21086_v37 }
 0x38b   : > { %2675 = vmatprep.mubr.f32.mxu0 %v21087_v21  ;;  %v16085_v36 = vpack.c.bf16 %v21435_v0, %v21434_v14  ;;  %v16112_v30 = vpack.c.bf16 %v21444_v42, %v21443_v50  ;;  %v21480_v14 = vand.u32 4294901760, %v21479_v6  ;;  %v21481_v0 = vld [vmem:[#allocation229_spill] sm:$0xff]  ;;  %v21486_v50 = vld [vmem:[#allocation248_spill] sm:$0xff] }
 0x38c   : > { %7097 = vmatmul.mubr.f32.gmra.mrb[2].mxu1 %v21086_v37  ;;  %v21440_v37 = vand.u32 4294901760, %v15028_v48  ;;  %v21482_v7 = vand.u32 4294901760, %v21481_v0  ;;  %v21487_v42 = vand.u32 4294901760, %v21486_v50  ;;  %v21514_v0 = vld [vmem:[#allocation178_spill] sm:$0xff]  ;;  %v21518_v50 = vld [vmem:[#allocation33_spill] sm:$0xff] }
 0x38d   : > { %21436 = vst [vmem:[#allocation141_spill] sm:$0xff] %v16085_v36  ;;  %7103 = vmatprep.mubr.f32.mxu1 %v21087_v21  ;;  %v21441_v21 = vand.u32 4294901760, %v15030_v31  ;;  %21445 = vst [vmem:[#allocation156_spill] sm:$0xff] %v16112_v30  ;;  %v16129_v31 = vpack.c.bf16 %v21450_v46, %v21449_v3  ;;  %v21490_v3 = vld [vmem:[#allocation164_spill] sm:$0xff]  ;;  %v21491_v46 = vld [vmem:[#allocation249_spill] sm:$0xff] }
 0x38e   : > { %10270 = vmatpush1.bf16.xpose.msra.mxu0 %v16070_v2  ;;  %v16193_v33 = vpack.c.bf16 %v21482_v7, %v21480_v14  ;;  %v21513_v14 = vld [vmem:[#allocation172_spill] sm:$0xff]  ;;  %v16244_v7 = vand.u32 4294901760, %v256_v1  ;;  %v21739_v2 = vld [vmem:[#allocation142_spill] sm:$0xff] }
 0x38f   : > { %10272 = vmatprep.subr.bf16.mxu0 %v16077_v28  ;;  %2677 = vmatmul.mubr.f32.gmra.mrb[4].mxu0 %v21095_v45  ;;  %v16106_v18 = vpack.c.bf16 %v21441_v21, %v21440_v37  ;;  %21451 = vst [vmem:[#allocation159_spill] sm:$0xff] %v16129_v31  ;;  %v21484_v37 = vld [vmem:[#allocation173_spill] sm:$0xff]  ;;  %v21751_v22 = vand.u32 4294901760, %v21739_v2 }
 0x390   : > { %7105 = vmatmul.mubr.f32.gmra.mrb[4].mxu1 %v21095_v45  ;;  %2683 = vmatprep.mubr.f32.mxu0 %v21096_v60  ;;  %v21446_v45 = vand.u32 4294901760, %v15049_v25  ;;  %v21453_v25 = vand.u32 4294901760, %v15106_v61  ;;  %v21461_v61 = vand.u32 4294901760, %v15173_v63  ;;  %v21469_v63 = vld [vmem:[#allocation216_spill] sm:$0xff]  ;;  %21483 = vst [vmem:[#allocation176_spill] sm:$0xff] %v16193_v33  ;;  %v21485_v21 = vand.u32 4294901760, %v21484_v37 }
 0x391   : > { %11038 = vmatpush1.bf16.xpose.msra.mxu1 %v16085_v36  ;;  %7111 = vmatprep.mubr.f32.mxu1 %v21096_v60  ;;  %21442 = vst [vmem:[#allocation150_spill] sm:$0xff] %v16106_v18  ;;  %v21447_v60 = vand.u32 4294901760, %v15051_v23  ;;  %v21470_v27 = vand.u32 4294901760, %v21469_v63  ;;  %v21505_v63 = vld [vmem:[#allocation261_spill] sm:$0xff]  ;;  %21515 = vst [vmem:[#allocation192_spill] sm:$0xff] %v16244_v7  ;;  %v21516_v37 = vld [vmem:[#allocation207_spill] sm:$0xff] }
 0x392   : > { %11040 = vmatprep.subr.bf16.mxu1 %v16093_v16  ;;  %v16142_v23 = vpack.c.bf16 %v21453_v25, %v21452_v56  ;;  %v21492_v56 = vand.u32 4294901760, %v21491_v46  ;;  %v21493_v25 = vld [vmem:[#allocation252_spill] sm:$0xff]  ;;  %v21718_v16 = vld [vmem:[#allocation99_spill] sm:$0xff]  ;;  %v21720_v36 = vand.u32 4294901760, %v15962_v34 }
 0x393   : > { %2685 = vmatmul.mubr.f32.gmra.mrb[6].mxu0 %v21101_v15  ;;  %v16121_v48 = vpack.c.bf16 %v21447_v60, %v21446_v45  ;;  %v16201_v45 = vpack.c.bf16 %v21487_v42, %v21485_v21  ;;  %v21489_v60 = vld [vmem:[#allocation160_spill] sm:$0xff]  ;;  %v21517_v21 = vand.u32 4294901760, %v21516_v37  ;;  %v21519_v42 = vand.u32 4294901760, %v21518_v50 }
 0x394   : > { %7113 = vmatmul.mubr.f32.gmra.mrb[6].mxu1 %v21101_v15  ;;  %2691 = vmatprep.mubr.f32.mxu0 %v21102_v47  ;;  %21454 = vst [vmem:[#allocation162_spill] sm:$0xff] %v16142_v23  ;;  %v21456_v15 = vand.u32 4294901760, %v15171_v44  ;;  %v21462_v44 = vld [vmem:[#allocation214_spill] sm:$0xff]  ;;  %v21546_v50 = vld [vmem:[#allocation64_spill] sm:$0xff] }
 0x395   : > { %21448 = vst [vmem:[#allocation153_spill] sm:$0xff] %v16121_v48  ;;  %7119 = vmatprep.mubr.f32.mxu1 %v21102_v47  ;;  %v21455_v47 = vand.u32 4294901760, %v15169_v32  ;;  %v21463_v32 = vand.u32 4294901760, %v21462_v44  ;;  %21488 = vst [vmem:[#allocation182_spill] sm:$0xff] %v16201_v45 }
 0x396   : > { %10274 = vmatpush1.bf16.xpose.msra.mxu0 %v16106_v18 }
 0x397   : > { %10276 = vmatprep.subr.bf16.mxu0 %v16112_v30  ;;  %2693 = vmatmul.mubr.f32.gmra.mrb[8].mxu0 %v21111_v59  ;;  %v16148_v13 = vpack.c.bf16 %v21456_v15, %v21455_v47  ;;  %v16165_v11 = vpack.c.bf16 %v21463_v32, %v21461_v61  ;;  %v21494_v47 = vand.u32 4294901760, %v21493_v25  ;;  %v21498_v61 = vld [vmem:[#allocation206_spill] sm:$0xff] }
 0x398   : > { %7121 = vmatmul.mubr.f32.gmra.mrb[8].mxu1 %v21111_v59  ;;  %2699 = vmatprep.mubr.f32.mxu0 %v21112_v55  ;;  %v21458_v59 = vand.u32 4294901760, %v15125_v43  ;;  %v21466_v43 = vld [vmem:[#allocation235_spill] sm:$0xff]  ;;  %v21499_v44 = vand.u32 4294901760, %v21498_v61  ;;  %v16265_v61 = vsub.f32 %v256_v1, %v16244_v7  ;;  %v21538_v1 = vld [vmem:[#allocation184_spill] sm:$0xff] }
 0x399   : > { %11042 = vmatpush1.bf16.xpose.msra.mxu1 %v16121_v48  ;;  %7127 = vmatprep.mubr.f32.mxu1 %v21112_v55  ;;  %21457 = vst [vmem:[#allocation168_spill] sm:$0xff] %v16148_v13  ;;  %21464 = vst [vmem:[#allocation171_spill] sm:$0xff] %v16165_v11  ;;  %v16214_v15 = vpack.c.bf16 %v21494_v47, %v21492_v56  ;;  %v21523_v56 = vld [vmem:[#allocation46_spill] sm:$0xff] }
 0x39a   : > { %11044 = vmatprep.subr.bf16.mxu1 %v16129_v31  ;;  %v16157_v55 = vpack.c.bf16 %v21459_v51, %v21458_v59  ;;  %v21496_v59 = vld [vmem:[#allocation32_spill] sm:$0xff]  ;;  %v21524_v25 = vand.u32 4294901760, %v21523_v56  ;;  %v21691_v31 = vld [vmem:[#allocation226_spill] sm:$0xff] }
 0x39b   : > { %2701 = vmatmul.mubr.f32.gmra.mrb[10].mxu0 %v21117_v19  ;;  %21495 = vst [vmem:[#allocation185_spill] sm:$0xff] %v16214_v15  ;;  %v21497_v51 = vand.u32 4294901760, %v21496_v59  ;;  %v21526_v59 = vld [vmem:[#allocation247_spill] sm:$0xff] }
 0x39c   : > { %7129 = vmatmul.mubr.f32.gmra.mrb[10].mxu1 %v21117_v19  ;;  %2707 = vmatprep.mubr.f32.mxu0 %v21118_v20  ;;  %21460 = vst [vmem:[#allocation165_spill] sm:$0xff] %v16157_v55  ;;  %v21465_v19 = vld [vmem:[#allocation232_spill] sm:$0xff] }
 0x39d   : > { %7135 = vmatprep.mubr.f32.mxu1 %v21118_v20  ;;  %v21468_v20 = vand.u32 4294901760, %v21467_v17  ;;  %v16220_v32 = vpack.c.bf16 %v21499_v44, %v21497_v51  ;;  %v21503_v17 = vld [vmem:[#allocation259_spill] sm:$0xff]  ;;  %v21527_v51 = vld [vmem:[#allocation250_spill] sm:$0xff]  ;;  %21528 = vst [vmem:[#allocation232_spill] sm:$0xff] %v16265_v61  ;;  %v21529_v44 = vld [vmem:[#allocation41_spill] sm:$0xff] }
 0x39e   : > { %10278 = vmatpush1.bf16.xpose.msra.mxu0 %v16142_v23 }
 0x39f   : > { %10280 = vmatprep.subr.bf16.mxu0 %v16148_v13  ;;  %2709 = vmatmul.mubr.f32.gmra.mrb[12].mxu0 %v21465_v19  ;;  %v16178_v58 = vpack.c.bf16 %v21470_v27, %v21468_v20  ;;  %21500 = vst [vmem:[#allocation188_spill] sm:$0xff] %v16220_v32  ;;  %v21504_v20 = vand.u32 4294901760, %v21503_v17  ;;  %v21506_v27 = vand.u32 4294901760, %v21505_v63  ;;  %v21534_v63 = vand.u32 4294901760, %v15401_v12  ;;  %v21541_v12 = vld [vmem:[#allocation52_spill] sm:$0xff] }
 0x3a0   : > { %7137 = vmatmul.mubr.f32.gmra.mrb[12].mxu1 %v21465_v19  ;;  %2715 = vmatprep.mubr.f32.mxu0 %v21466_v43  ;;  %v21501_v19 = vld [vmem:[#allocation166_spill] sm:$0xff] }
 0x3a1   : > { %11046 = vmatpush1.bf16.xpose.msra.mxu1 %v16157_v55  ;;  %7143 = vmatprep.mubr.f32.mxu1 %v21466_v43  ;;  %21471 = vst [vmem:[#allocation174_spill] sm:$0xff] %v16178_v58  ;;  %v21502_v43 = vld [vmem:[#allocation167_spill] sm:$0xff]  ;;  %v16229_v62 = vpack.c.bf16 %v21506_v27, %v21504_v20 }
 0x3a2   : > { %11048 = vmatprep.subr.bf16.mxu1 %v16165_v11  ;;  %v21535_v27 = vld [vmem:[#allocation47_spill] sm:$0xff] }
 0x3a3   : > { %2717 = vmatmul.mubr.f32.gmra.mrb[14].mxu0 %v21477_v49  ;;  %21507 = vst [vmem:[#allocation186_spill] sm:$0xff] %v16229_v62  ;;  %v21536_v41 = vand.u32 4294901760, %v21535_v27  ;;  %v21558_v27 = vld [vmem:[#allocation234_spill] sm:$0xff] }
 0x3a4   : > { %7145 = vmatmul.mubr.f32.gmra.mrb[14].mxu1 %v21477_v49  ;;  %2723 = vmatprep.mubr.f32.mxu0 %v21478_v52  ;;  %v21510_v49 = vld [vmem:[#allocation38_spill] sm:$0xff] }
 0x3a5   : > { %7151 = vmatprep.mubr.f32.mxu1 %v21478_v52  ;;  %v21511_v52 = vand.u32 4294901760, %v21510_v49  ;;  %v21539_v49 = vld [vmem:[#allocation255_spill] sm:$0xff] }
 0x3a6   : > { %10282 = vmatpush1.bf16.xpose.msra.mxu0 %v16178_v58 }
 0x3a7   : > { %10284 = vmatprep.subr.bf16.mxu0 %v16184_v10  ;;  %2725 = vmatmul.mubr.f32.gmra.mrb[16].mxu0 %v21489_v60  ;;  %v16238_v6 = vpack.c.bf16 %v21511_v52, %v21509_v26  ;;  %v16279_v26 = vpack.c.bf16 %v21536_v41, %v21534_v63  ;;  %v16286_v52 = vand.u32 4294901760, %v16265_v61  ;;  %v21559_v41 = vand.u32 4294901760, %v21558_v27  ;;  %v21576_v27 = vld [vmem:[#allocation240_spill] sm:$0xff] }
 0x3a8   : > { %7153 = vmatmul.mubr.f32.gmra.mrb[16].mxu1 %v21489_v60  ;;  %2731 = vmatprep.mubr.f32.mxu0 %v21490_v3  ;;  %v16253_v60 = vpack.c.bf16 %v21519_v42, %v21517_v21  ;;  %v21547_v42 = vand.u32 4294901760, %v21546_v50  ;;  %v21565_v50 = vld [vmem:[#allocation67_spill] sm:$0xff] }
 0x3a9   : > { %11050 = vmatpush1.bf16.xpose.msra.mxu1 %v16193_v33  ;;  %7159 = vmatprep.mubr.f32.mxu1 %v21490_v3  ;;  %21512 = vst [vmem:[#allocation189_spill] sm:$0xff] %v16238_v6  ;;  %v21521_v3 = vld [vmem:[#allocation219_spill] sm:$0xff]  ;;  %21537 = vst [vmem:[#allocation215_spill] sm:$0xff] %v16279_v26 }
 0x3aa   : > { %11052 = vmatprep.subr.bf16.mxu1 %v16201_v45  ;;  %21520 = vst [vmem:[#allocation193_spill] sm:$0xff] %v16253_v60  ;;  %v21522_v46 = vand.u32 4294901760, %v21521_v3  ;;  %21540 = vst [vmem:[#allocation216_spill] sm:$0xff] %v16286_v52  ;;  %v21548_v3 = vld [vmem:[#allocation65_spill] sm:$0xff]  ;;  %v21665_v33 = vld [vmem:[#allocation195_spill] sm:$0xff] }
 0x3ab   : > { %2733 = vmatmul.mubr.f32.gmra.mrb[18].mxu0 %v21501_v19  ;;  %v21675_v45 = vld [vmem:[#allocation36_spill] sm:$0xff] }
 0x3ac   : > { %7161 = vmatmul.mubr.f32.gmra.mrb[18].mxu1 %v21501_v19  ;;  %2739 = vmatprep.mubr.f32.mxu0 %v21502_v43  ;;  %v16259_v47 = vpack.c.bf16 %v21524_v25, %v21522_v46  ;;  %v21530_v19 = vand.u32 4294901760, %v21529_v44  ;;  %v21549_v46 = vand.u32 4294901760, %v21548_v3  ;;  %v21551_v25 = vld [vmem:[#allocation256_spill] sm:$0xff]  ;;  %v21553_v44 = vld [vmem:[#allocation55_spill] sm:$0xff] }
 0x3ad   : > { %7167 = vmatprep.mubr.f32.mxu1 %v21502_v43  ;;  %v21531_v43 = vld [vmem:[#allocation210_spill] sm:$0xff]  ;;  %v21567_v3 = vld [vmem:[#allocation68_spill] sm:$0xff] }
 0x3ae   : > { %10286 = vmatpush1.bf16.xpose.msra.mxu0 %v16214_v15  ;;  %21525 = vst [vmem:[#allocation214_spill] sm:$0xff] %v16259_v47  ;;  %v21532_v17 = vand.u32 4294901760, %v21531_v43  ;;  %v16301_v56 = vpack.c.bf16 %v21549_v46, %v21547_v42  ;;  %v21555_v43 = vld [vmem:[#allocation56_spill] sm:$0xff]  ;;  %v21566_v42 = vand.u32 4294901760, %v21565_v50  ;;  %v21568_v46 = vand.u32 4294901760, %v21567_v3  ;;  %v21662_v15 = vld [vmem:[#allocation15_spill] sm:$0xff] }
 0x3af   : > { %10288 = vmatprep.subr.bf16.mxu0 %v16220_v32  ;;  %2741 = vmatmul.mubr.f32.gmra.mrb[20].mxu0 %v21513_v14  ;;  %v21661_v32 = vld [vmem:[#allocation14_spill] sm:$0xff] }
 0x3b0   : > { %7169 = vmatmul.mubr.f32.gmra.mrb[20].mxu1 %v21513_v14  ;;  %2747 = vmatprep.mubr.f32.mxu0 %v21514_v0  ;;  %v16271_v20 = vpack.c.bf16 %v21532_v17, %v21530_v19  ;;  %v21542_v14 = vand.u32 4294901760, %v21541_v12  ;;  %21550 = vst [vmem:[#allocation244_spill] sm:$0xff] %v16301_v56  ;;  %v21554_v19 = vand.u32 4294901760, %v21553_v44  ;;  %v21556_v17 = vand.u32 4294901760, %v21555_v43 }
 0x3b1   : > { %11054 = vmatpush1.bf16.xpose.msra.mxu1 %v16229_v62  ;;  %7175 = vmatprep.mubr.f32.mxu1 %v21514_v0  ;;  %v21543_v0 = vld [vmem:[#allocation53_spill] sm:$0xff] }
 0x3b2   : > { %11056 = vmatprep.subr.bf16.mxu1 %v16238_v6  ;;  %21533 = vst [vmem:[#allocation235_spill] sm:$0xff] %v16271_v20  ;;  %v21544_v37 = vand.u32 4294901760, %v21543_v0  ;;  %v16312_v63 = vpack.c.bf16 %v21556_v17, %v21554_v19  ;;  %v21564_v0 = vld [vmem:[#allocation266_spill] sm:$0xff]  ;;  %v21572_v19 = vld [vmem:[#allocation80_spill] sm:$0xff] }
 0x3b3   : > { %2749 = vmatmul.mubr.f32.gmra.mrb[22].mxu0 %v21526_v59  ;;  %v21573_v43 = vand.u32 4294901760, %v21572_v19  ;;  %v21588_v19 = vld [vmem:[#allocation245_spill] sm:$0xff] }
 0x3b4   : > { %7177 = vmatmul.mubr.f32.gmra.mrb[22].mxu1 %v21526_v59  ;;  %2755 = vmatprep.mubr.f32.mxu0 %v21527_v51  ;;  %v16295_v21 = vpack.c.bf16 %v21544_v37, %v21542_v14  ;;  %v21552_v59 = vld [vmem:[#allocation258_spill] sm:$0xff]  ;;  %21557 = vst [vmem:[#allocation236_spill] sm:$0xff] %v16312_v63  ;;  %v21563_v14 = vld [vmem:[#allocation264_spill] sm:$0xff] }
 0x3b5   : > { %7183 = vmatprep.mubr.f32.mxu1 %v21527_v51  ;;  %v2918_v51 = vsub.f32 %v16265_v61, %v16286_v52 }
 0x3b6   : > { %10290 = vmatpush1.bf16.xpose.msra.mxu0 %v16253_v60  ;;  %21545 = vst [vmem:[#allocation243_spill] sm:$0xff] %v16295_v21  ;;  %v21644_v60 = vld [vmem:[#allocation134_spill] sm:$0xff] }
 0x3b7   : > { %10292 = vmatprep.subr.bf16.mxu0 %v16259_v47  ;;  %2757 = vmatmul.mubr.f32.gmra.mrb[24].mxu0 %v21538_v1  ;;  %v2919_v37 = vand.u32 4294901760, %v2918_v51  ;;  %v21575_v51 = vld [vmem:[#allocation267_spill] sm:$0xff] }
 0x3b8   : > { %7185 = vmatmul.mubr.f32.gmra.mrb[24].mxu1 %v21538_v1  ;;  %2763 = vmatprep.mubr.f32.mxu0 %v21539_v49  ;;  %v21560_v1 = vld [vmem:[#allocation157_spill] sm:$0xff] }
 0x3b9   : > { %11058 = vmatpush1.bf16.xpose.msra.mxu1 %v16271_v20  ;;  %7191 = vmatprep.mubr.f32.mxu1 %v21539_v49  ;;  %v21561_v49 = vand.u32 4294901760, %v21560_v1  ;;  %v21578_v1 = vld [vmem:[#allocation158_spill] sm:$0xff] }
 0x3ba   : > { %11060 = vmatprep.subr.bf16.mxu1 %v16279_v26 }
 0x3bb   : > { %2765 = vmatmul.mubr.f32.gmra.mrb[26].mxu0 %v21551_v25  ;;  %v16320_v12 = vpack.c.bf16 %v21561_v49, %v21559_v41  ;;  %v21577_v41 = vand.u32 4294901760, %v21576_v27  ;;  %v21579_v49 = vand.u32 4294901760, %v21578_v1 }
 0x3bc   : > { %7193 = vmatmul.mubr.f32.gmra.mrb[26].mxu1 %v21551_v25  ;;  %2771 = vmatprep.mubr.f32.mxu0 %v21552_v59  ;;  %v16333_v25 = vpack.c.bf16 %v21568_v46, %v21566_v42  ;;  %v21583_v42 = vld [vmem:[#allocation86_spill] sm:$0xff] }
 0x3bd   : > { %7199 = vmatprep.mubr.f32.mxu1 %v21552_v59  ;;  %21562 = vst [vmem:[#allocation239_spill] sm:$0xff] %v16320_v12  ;;  %v21570_v59 = vld [vmem:[#allocation79_spill] sm:$0xff]  ;;  %v21584_v3 = vand.u32 4294901760, %v21583_v42 }
 0x3be   : > { %10294 = vmatpush1.bf16.xpose.msra.mxu0 %v16295_v21  ;;  %21569 = vst [vmem:[#allocation228_spill] sm:$0xff] %v16333_v25  ;;  %v21571_v44 = vand.u32 4294901760, %v21570_v59  ;;  %v21586_v59 = vld [vmem:[#allocation170_spill] sm:$0xff] }
 0x3bf   : > { %10296 = vmatprep.subr.bf16.mxu0 %v16301_v56  ;;  %2773 = vmatmul.mubr.f32.gmra.mrb[28].mxu0 %v21563_v14  ;;  %v21623_v56 = vld [vmem:[#allocation113_spill] sm:$0xff] }
 0x3c0   : > { %7201 = vmatmul.mubr.f32.gmra.mrb[28].mxu1 %v21563_v14  ;;  %2779 = vmatprep.mubr.f32.mxu0 %v21564_v0  ;;  %v16339_v17 = vpack.c.bf16 %v21573_v43, %v21571_v44  ;;  %v16347_v14 = vpack.c.bf16 %v21579_v49, %v21577_v41  ;;  %v21587_v44 = vand.u32 4294901760, %v21586_v59  ;;  %v21589_v43 = vand.u32 4294901760, %v21588_v19  ;;  %v21593_v41 = vld [vmem:[#allocation181_spill] sm:$0xff]  ;;  %v21601_v59 = vld [vmem:[#allocation94_spill] sm:$0xff]  ;;  %v21603_v19 = vld [vmem:[#allocation95_spill] sm:$0xff] }
 0x3c1   : > { %11062 = vmatpush1.bf16.xpose.msra.mxu1 %v16312_v63  ;;  %7207 = vmatprep.mubr.f32.mxu1 %v21564_v0  ;;  %v21581_v0 = vld [vmem:[#allocation85_spill] sm:$0xff]  ;;  %v21594_v1 = vand.u32 4294901760, %v21593_v41  ;;  %v21621_v41 = vld [vmem:[#allocation112_spill] sm:$0xff] }
 0x3c2   : > { %11064 = vmatprep.subr.bf16.mxu1 %v16320_v12  ;;  %21574 = vst [vmem:[#allocation229_spill] sm:$0xff] %v16339_v17  ;;  %21580 = vst [vmem:[#allocation173_spill] sm:$0xff] %v16347_v14  ;;  %v21582_v50 = vand.u32 4294901760, %v21581_v0  ;;  %v255_v0 = vld [vmem:[%s12672_s9 + $0x10] sm:$0xff] }
 0x3c3   : > { %2781 = vmatmul.mubr.f32.gmra.mrb[30].mxu0 %v21575_v51  ;;  %v21618_v12 = vld [vmem:[#allocation109_spill] sm:$0xff] }
 0x3c4   : > { %7209 = vmatmul.mubr.f32.gmra.mrb[30].mxu1 %v21575_v51  ;;  %2920 = vmatprep.mubr.f32.mxu0 %v2919_v37  ;;  %v16354_v46 = vpack.c.bf16 %v21584_v3, %v21582_v50  ;;  %v16363_v51 = vpack.c.bf16 %v21589_v43, %v21587_v44  ;;  %v21596_v50 = vld [vmem:[#allocation89_spill] sm:$0xff]  ;;  %v21598_v3 = vld [vmem:[#allocation246_spill] sm:$0xff]  ;;  %v21604_v44 = vand.u32 4294901760, %v21603_v19 }
 0x3c5   : > { %7348 = vmatprep.mubr.f32.mxu1 %v2919_v37  ;;  %v21591_v37 = vld [vmem:[#allocation251_spill] sm:$0xff]  ;;  %v21597_v42 = vand.u32 4294901760, %v21596_v50  ;;  %v21622_v50 = vand.u32 4294901760, %v21621_v41 }
 0x3c6   : > { %10298 = vmatpush1.bf16.xpose.msra.mxu0 %v16333_v25  ;;  %21585 = vst [vmem:[#allocation248_spill] sm:$0xff] %v16354_v46  ;;  %21590 = vst [vmem:[#allocation160_spill] sm:$0xff] %v16363_v51  ;;  %v21592_v27 = vand.u32 4294901760, %v21591_v37  ;;  %v16386_v37 = vand.u32 4294901760, %v255_v0  ;;  %v21637_v41 = vld [vmem:[#allocation191_spill] sm:$0xff] }
 0x3c7   : > { %10300 = vmatprep.subr.bf16.mxu0 %v16339_v17  ;;  %v21599_v17 = vand.u32 4294901760, %v21598_v3  ;;  %v21610_v3 = vld [vmem:[#allocation13_spill] sm:$0xff]  ;;  %v21638_v20 = vand.u32 4294901760, %v21637_v41  ;;  %v21653_v41 = vld [vmem:[#allocation136_spill] sm:$0xff] }
 0x3c8   : > { %v16369_v49 = vpack.c.bf16 %v21594_v1, %v21592_v27  ;;  %21606 = vst [vmem:[#allocation32_spill] sm:$0xff] %v16386_v37  ;;  %v21607_v27 = vld [vmem:[#allocation175_spill] sm:$0xff]  ;;  %v21608_v1 = vld [vmem:[#allocation177_spill] sm:$0xff] }
 0x3c9   : > { %11066 = vmatpush1.bf16.xpose.msra.mxu1 %v16347_v14  ;;  %v16376_v14 = vpack.c.bf16 %v21599_v17, %v21597_v42  ;;  %v21609_v17 = vld [vmem:[#allocation183_spill] sm:$0xff]  ;;  %v21624_v42 = vand.u32 4294901760, %v21623_v56  ;;  %v21639_v56 = vld [vmem:[#allocation118_spill] sm:$0xff] }
 0x3ca   : > { %11068 = vmatprep.subr.bf16.mxu1 %v16354_v46  ;;  %21595 = vst [vmem:[#allocation164_spill] sm:$0xff] %v16369_v49  ;;  %v21602_v46 = vand.u32 4294901760, %v21601_v59  ;;  %v21611_v59 = vld [vmem:[#allocation100_spill] sm:$0xff] }
 0x3cb   : > { %21600 = vst [vmem:[#allocation249_spill] sm:$0xff] %v16376_v14  ;;  %v21612_v19 = vand.u32 4294901760, %v21611_v59  ;;  %v16410_v21 = vpack.c.bf16 %v21624_v42, %v21622_v50  ;;  %v21627_v59 = vld [vmem:[#allocation265_spill] sm:$0xff]  ;;  %v21640_v50 = vand.u32 4294901760, %v21639_v56  ;;  %v21654_v56 = vand.u32 4294901760, %v21653_v41 }
 0x3cc   : > { %v16383_v43 = vpack.c.bf16 %v21604_v44, %v21602_v46  ;;  %v21613_v46 = vld [vmem:[#allocation101_spill] sm:$0xff] }
 0x3cd   : > { %v21614_v44 = vand.u32 4294901760, %v21613_v46  ;;  %21625 = vst [vmem:[#allocation167_spill] sm:$0xff] %v16410_v21  ;;  %v21629_v46 = vld [vmem:[#allocation268_spill] sm:$0xff]  ;;  %v16431_v42 = vpack.c.bf16 %v21640_v50, %v21638_v20  ;;  %v21650_v20 = vand.u32 4294901760, %v21610_v3 }
 0x3ce   : > { %10302 = vmatpush1.bf16.xpose.msra.mxu0 %v16363_v51  ;;  %21605 = vst [vmem:[#allocation252_spill] sm:$0xff] %v16383_v43  ;;  %v16413_v51 = vsub.f32 %v255_v0, %v16386_v37  ;;  %v21642_v0 = vld [vmem:[#allocation133_spill] sm:$0xff] }
 0x3cf   : > { %10304 = vmatprep.subr.bf16.mxu0 %v16369_v49  ;;  %v16398_v25 = vpack.c.bf16 %v21614_v44, %v21612_v19  ;;  %v21616_v49 = vld [vmem:[#allocation104_spill] sm:$0xff]  ;;  %v21630_v19 = vand.u32 4294901760, %v21629_v46  ;;  %21641 = vst [vmem:[#allocation38_spill] sm:$0xff] %v16431_v42  ;;  %v21643_v47 = vand.u32 4294901760, %v21642_v0  ;;  %v21656_v0 = vld [vmem:[#allocation137_spill] sm:$0xff] }
 0x3d0   : > { %v21617_v52 = vand.u32 4294901760, %v21616_v49  ;;  %21626 = vst [vmem:[#allocation259_spill] sm:$0xff] %v16413_v51  ;;  %v21632_v49 = vld [vmem:[#allocation115_spill] sm:$0xff] }
 0x3d1   : > { %11070 = vmatpush1.bf16.xpose.msra.mxu1 %v16376_v14  ;;  %21615 = vst [vmem:[#allocation206_spill] sm:$0xff] %v16398_v25  ;;  %v21619_v14 = vand.u32 4294901760, %v21618_v12  ;;  %v21633_v26 = vand.u32 4294901760, %v21632_v49  ;;  %v21634_v12 = vld [vmem:[#allocation116_spill] sm:$0xff]  ;;  %v21649_v49 = vand.u32 4294901760, %v21609_v17 }
 0x3d2   : > { %11072 = vmatprep.subr.bf16.mxu1 %v16383_v43  ;;  %v21628_v43 = vand.u32 4294901760, %v21627_v59  ;;  %v21645_v59 = vand.u32 4294901760, %v21644_v60  ;;  %v21651_v60 = vld [vmem:[#allocation131_spill] sm:$0xff] }
 0x3d3   : > { %v16404_v63 = vpack.c.bf16 %v21619_v14, %v21617_v52  ;;  %v21635_v52 = vand.u32 4294901760, %v21634_v12  ;;  %v7603_v12 = vsub.f32 %v21609_v17, %v21649_v49  ;;  %v21676_v49 = vand.u32 4294901760, %v21675_v45 }
 0x3d4   : > { %v16419_v44 = vpack.c.bf16 %v21630_v19, %v21628_v43  ;;  %v16437_v6 = vpack.c.bf16 %v21645_v59, %v21643_v47  ;;  %v21647_v43 = vand.u32 4294901760, %v21607_v27  ;;  %v21648_v19 = vand.u32 4294901760, %v21608_v1 }
 0x3d5   : > { %21620 = vst [vmem:[#allocation166_spill] sm:$0xff] %v16404_v63  ;;  %v16425_v14 = vpack.c.bf16 %v21635_v52, %v21633_v26  ;;  %v7615_v52 = vsub.f32 %v21610_v3, %v21650_v20  ;;  %v21652_v47 = vand.u32 4294901760, %v21651_v60  ;;  %v21657_v59 = vand.u32 4294901760, %v21656_v0  ;;  %v21663_v20 = vld [vmem:[#allocation16_spill] sm:$0xff] }
 0x3d6   : > { %21631 = vst [vmem:[#allocation261_spill] sm:$0xff] %v16419_v44  ;;  %21646 = vst [vmem:[#allocation172_spill] sm:$0xff] %v16437_v6  ;;  %v3175_v46 = vsub.f32 %v21607_v27, %v21647_v43  ;;  %v3187_v26 = vsub.f32 %v21608_v1, %v21648_v19  ;;  %10306 = vmatpush1.bf16.xpose.msra.mxu0 %v16398_v25  ;;  %v21658_v43 = vld [vmem:[#allocation146_spill] sm:$0xff]  ;;  %v21664_v25 = vand.u32 4294901760, %v21663_v20  ;;  %v21666_v60 = vand.u32 4294901760, %v21665_v33  ;;  %v21680_v33 = vld [vmem:[#allocation211_spill] sm:$0xff] }
 0x3d7   : > { %21636 = vst [vmem:[#allocation37_spill] sm:$0xff] %v16425_v14  ;;  %v16456_v50 = vpack.c.bf16 %v21654_v56, %v21652_v47  ;;  %v21659_v19 = vand.u32 4294901760, %v21658_v43  ;;  %10308 = vmatprep.subr.bf16.mxu0 %v16410_v21  ;;  %v21668_v47 = vld [vmem:[#allocation200_spill] sm:$0xff]  ;;  %v21670_v56 = vld [vmem:[#allocation201_spill] sm:$0xff]  ;;  %v21692_v45 = vand.u32 4294901760, %v21691_v31 }
 0x3d8   : > { %v16471_v10 = vpack.c.bf16 %v21666_v60, %v21664_v25  ;;  %v21669_v41 = vand.u32 4294901760, %v21668_v47  ;;  %v21671_v0 = vand.u32 4294901760, %v21670_v56  ;;  %v21674_v43 = vld [vmem:[#allocation17_spill] sm:$0xff]  ;;  %v21677_v21 = vld [vmem:[#allocation208_spill] sm:$0xff]  ;;  %v21681_v25 = vand.u32 4294901760, %v21680_v33  ;;  %v21682_v60 = vld [vmem:[#allocation34_spill] sm:$0xff] }
 0x3d9   : > { %21655 = vst [vmem:[#allocation178_spill] sm:$0xff] %v16456_v50  ;;  %v16462_v62 = vpack.c.bf16 %v21659_v19, %v21657_v59  ;;  %v16480_v59 = vand.u32 4294901760, %v16413_v51  ;;  %v21678_v11 = vand.u32 4294901760, %v21677_v21  ;;  %v21683_v55 = vand.u32 4294901760, %v21682_v60  ;;  %v21685_v56 = vld [vmem:[#allocation42_spill] sm:$0xff]  ;;  %11074 = vmatpush1.bf16.xpose.msra.mxu1 %v16404_v63  ;;  %v21696_v60 = vld [vmem:[#allocation60_spill] sm:$0xff] }
 0x3da   : > { %21667 = vst [vmem:[#allocation33_spill] sm:$0xff] %v16471_v10  ;;  %v16477_v58 = vpack.c.bf16 %v21671_v0, %v21669_v41  ;;  %v21686_v41 = vand.u32 4294901760, %v21685_v56  ;;  %v21687_v0 = vld [vmem:[#allocation48_spill] sm:$0xff]  ;;  %v21690_v19 = vand.u32 4294901760, %v15885_v54  ;;  %v3188_v21 = vand.u32 4294901760, %v3187_v26  ;;  %11076 = vmatprep.subr.bf16.mxu1 %v16419_v44  ;;  %v21709_v63 = vld [vmem:[#allocation75_spill] sm:$0xff] }
 0x3db   : > { %21660 = vst [vmem:[#allocation207_spill] sm:$0xff] %v16462_v62  ;;  %21673 = vst [vmem:[#allocation46_spill] sm:$0xff] %v16480_v59  ;;  %v16487_v20 = vpack.c.bf16 %v21678_v11, %v21676_v49  ;;  %v16493_v47 = vpack.c.bf16 %v21683_v55, %v21681_v25  ;;  %v21688_v13 = vand.u32 4294901760, %v21687_v0  ;;  %v3176_v11 = vand.u32 4294901760, %v3175_v46  ;;  %v21694_v55 = vld [vmem:[#allocation54_spill] sm:$0xff]  ;;  %v21701_v46 = vld [vmem:[#allocation19_spill] sm:$0xff] }
 0x3dc   : > { %21672 = vst [vmem:[#allocation219_spill] sm:$0xff] %v16477_v58  ;;  %v16505_v48 = vpack.c.bf16 %v21692_v45, %v21690_v19  ;;  %v7604_v49 = vand.u32 4294901760, %v7603_v12  ;;  %v7616_v33 = vand.u32 4294901760, %v7615_v52  ;;  %v21695_v25 = vand.u32 4294901760, %v21694_v55  ;;  %v21702_v12 = vld [vmem:[#allocation57_spill] sm:$0xff]  ;;  %v21704_v0 = vld [vmem:[#allocation63_spill] sm:$0xff] }
 0x3dd   : > { %21679 = vst [vmem:[#allocation247_spill] sm:$0xff] %v16487_v20  ;;  %21684 = vst [vmem:[#allocation250_spill] sm:$0xff] %v16493_v47  ;;  %v16499_v23 = vpack.c.bf16 %v21688_v13, %v21686_v41  ;;  %v21697_v56 = vand.u32 4294901760, %v21696_v60  ;;  %v21699_v54 = vand.u32 4294901760, %v21661_v32  ;;  %v21700_v19 = vand.u32 4294901760, %v21662_v15 }
 0x3de   : > { %21693 = vst [vmem:[#allocation210_spill] sm:$0xff] %v16505_v48  ;;  %v21703_v52 = vand.u32 4294901760, %v21702_v12  ;;  %v21705_v45 = vand.u32 4294901760, %v21704_v0  ;;  %v2924_v55 = vsub.f32 %v16413_v51, %v16480_v59  ;;  %v21710_v30 = vand.u32 4294901760, %v21709_v63  ;;  %v21715_v0 = vld [vmem:[#allocation93_spill] sm:$0xff]  ;;  %10310 = vmatpush1.bf16.xpose.msra.mxu0 %v16425_v14 }
 0x3df   : > { %21689 = vst [vmem:[#allocation41_spill] sm:$0xff] %v16499_v23  ;;  %v16513_v13 = vpack.c.bf16 %v21697_v56, %v21695_v25  ;;  %v3181_v31 = vsub.f32 %v21661_v32, %v21699_v54  ;;  %v3193_v41 = vsub.f32 %v21662_v15, %v21700_v19  ;;  %v21707_v25 = vand.u32 4294901760, %v21674_v43  ;;  %v21708_v56 = vld [vmem:[#allocation20_spill] sm:$0xff]  ;;  %v21711_v19 = vld [vmem:[#allocation78_spill] sm:$0xff]  ;;  %10312 = vmatprep.subr.bf16.mxu0 %v16437_v6  ;;  %v21738_v14 = vld [vmem:[#allocation145_spill] sm:$0xff] }
 0x3e0   : > { %v16526_v44 = vpack.c.bf16 %v21705_v45, %v21703_v52  ;;  %v21712_v18 = vand.u32 4294901760, %v21711_v19  ;;  %v21714_v12 = vand.u32 4294901760, %v15953_v38  ;;  %v21716_v52 = vand.u32 4294901760, %v21715_v0 }
 0x3e1   : > { %21698 = vst [vmem:[#allocation47_spill] sm:$0xff] %v16513_v13  ;;  %v7609_v60 = vsub.f32 %v21674_v43, %v21707_v25  ;;  %v21719_v59 = vand.u32 4294901760, %v21718_v16  ;;  %v21722_v25 = vld [vmem:[#allocation24_spill] sm:$0xff]  ;;  %v21723_v63 = vand.u32 4294901760, %v15965_v5  ;;  %v21724_v19 = vand.u32 4294901760, %v15967_v40  ;;  %11078 = vmatpush1.bf16.xpose.msra.mxu1 %v16431_v42 }
 0x3e2   : > { %21706 = vst [vmem:[#allocation184_spill] sm:$0xff] %v16526_v44  ;;  %v16538_v26 = vpack.c.bf16 %v21712_v18, %v21710_v30  ;;  %v16544_v45 = vpack.c.bf16 %v21716_v52, %v21714_v12  ;;  %v19801_v54 = vand.u32 4294901760, %v21722_v25  ;;  %v21726_v38 = vand.u32 4294901760, %v15993_v4  ;;  %v21737_v52 = vld [vmem:[#allocation140_spill] sm:$0xff]  ;;  %11080 = vmatprep.subr.bf16.mxu1 %v16456_v50 }
 0x3e3   : > { %v16550_v28 = vpack.c.bf16 %v21720_v36, %v21719_v59  ;;  %v16557_v18 = vpack.c.bf16 %v21724_v19, %v21723_v63  ;;  %v21727_v30 = vand.u32 4294901760, %v15995_v57  ;;  %v16565_v0 = vpack.c.bf16 %v3188_v21, %v3176_v11  ;;  %v21730_v59 = vld [vmem:[#allocation26_spill] sm:$0xff] }
 0x3e4   : > { %21713 = vst [vmem:[#allocation255_spill] sm:$0xff] %v16538_v26  ;;  %21717 = vst [vmem:[#allocation52_spill] sm:$0xff] %v16544_v45  ;;  %v16567_v16 = vpack.c.bf16 %v7616_v33, %v7604_v49  ;;  %v3182_v34 = vand.u32 4294901760, %v3181_v31  ;;  %v3194_v36 = vand.u32 4294901760, %v3193_v41  ;;  %v21729_v5 = vand.u32 4294901760, %v21701_v46  ;;  %v21732_v49 = vld [vmem:[#allocation22_spill] sm:$0xff] }
 0x3e5   : > { %21721 = vst [vmem:[#allocation53_spill] sm:$0xff] %v16550_v28  ;;  %21725 = vst [vmem:[#allocation64_spill] sm:$0xff] %v16557_v18  ;;  %v16563_v12 = vpack.c.bf16 %v21727_v30, %v21726_v38  ;;  %v16575_v4 = vand.u32 4294901760, %v2924_v55  ;;  %v7610_v57 = vand.u32 4294901760, %v7609_v60  ;;  %v21731_v11 = vand.u32 4294901760, %v21708_v56  ;;  %v21733_v41 = vld [vmem:[#allocation30_spill] sm:$0xff] }
 0x3e6   : > { %v7621_v40 = vsub.f32 %v21701_v46, %v21729_v5  ;;  %v3211_v31 = vsub.f32 %v21722_v25, %v19801_v54  ;;  %v21734_v19 = vld [vmem:[#allocation194_spill] sm:$0xff]  ;;  %v21736_v55 = vld [vmem:[#allocation139_spill] sm:$0xff]  ;;  %v21740_v54 = vand.u32 4294901760, %v21730_v59  ;;  %v21742_v5 = vld [vmem:[#allocation148_spill] sm:$0xff]  ;;  %v16598_v42 = vpack.c.bf16 %v3194_v36, %v3182_v34  ;;  %10314 = vmatpush1.bf16.xpose.msra.mxu0 %v16462_v62 }
 0x3e7   : > { %21728 = vst [vmem:[#allocation65_spill] sm:$0xff] %v16563_v12  ;;  %v3199_v21 = vsub.f32 %v21708_v56, %v21731_v11  ;;  %v21735_v30 = vld [vmem:[#allocation130_spill] sm:$0xff]  ;;  %v21741_v38 = vld [vmem:[#allocation143_spill] sm:$0xff]  ;;  %v21743_v6 = vand.u32 4294901760, %v21732_v49  ;;  %v21748_v36 = vand.u32 4294901760, %v21736_v55  ;;  %v21750_v33 = vand.u32 4294901760, %v21738_v14  ;;  %10316 = vmatprep.subr.bf16.mxu0 %v16477_v58 }
 0x3e8   : > { %v7622_v53 = vand.u32 4294901760, %v7621_v40  ;;  %v7627_v63 = vsub.f32 %v21730_v59, %v21740_v54  ;;  %v3212_v51 = vand.u32 4294901760, %v3211_v31  ;;  %v21745_v40 = vand.u32 4294901760, %v21733_v41  ;;  %v21758_v62 = vld [vmem:[#allocation155_spill] sm:$0xff]  ;;  %v264_v46 = vld [vmem:[%s12672_s9 + $0x58] sm:$0xff] }
 0x3e9   : > { %v3200_v60 = vand.u32 4294901760, %v3199_v21  ;;  %v7639_v11 = vsub.f32 %v21732_v49, %v21743_v6  ;;  %v21746_v54 = vand.u32 4294901760, %v21734_v19  ;;  %v21747_v39 = vand.u32 4294901760, %v21735_v30  ;;  %11082 = vmatpush1.bf16.xpose.msra.mxu1 %v16471_v10 }
 0x3ea   : > { %v3205_v50 = vsub.f32 %v21733_v41, %v21745_v40  ;;  %v7645_v21 = vsub.f32 %v21736_v55, %v21748_v36  ;;  %v21749_v6 = vand.u32 4294901760, %v21737_v52  ;;  %v3235_v40 = vsub.f32 %v21738_v14, %v21750_v33  ;;  %11084 = vmatprep.subr.bf16.mxu1 %v16487_v20  ;;  %v21770_v20 = vld [vmem:[#allocation224_spill] sm:$0xff] }
 0x3eb   : > { %v3217_v9 = vsub.f32 %v21734_v19, %v21746_v54  ;;  %v7633_v34 = vsub.f32 %v21735_v30, %v21747_v39  ;;  %v7651_v54 = vsub.f32 %v21739_v2, %v21751_v22  ;;  %v16626_v61 = vpack.c.bf16 %v7622_v53, %v7610_v57  ;;  %v21755_v2 = vld [vmem:[#allocation151_spill] sm:$0xff]  ;;  %v21756_v53 = vld [vmem:[#allocation152_spill] sm:$0xff] }
 0x3ec   : > { %v3223_v31 = vsub.f32 %v21737_v52, %v21749_v6  ;;  %v7628_v39 = vand.u32 4294901760, %v7627_v63  ;;  %v21752_v30 = vand.u32 4294901760, %v21741_v38  ;;  %v21753_v55 = vand.u32 4294901760, %v21742_v5 }
 0x3ed   : > { %v7640_v33 = vand.u32 4294901760, %v7639_v11  ;;  %v21754_v14 = vand.u32 4294901760, %v21744_v29  ;;  %v16640_v63 = vpack.c.bf16 %v3212_v51, %v3200_v60  ;;  %v3206_v52 = vand.u32 4294901760, %v3205_v50 }
 0x3ee   : > { %v7663_v36 = vsub.f32 %v21741_v38, %v21752_v30  ;;  %v3229_v6 = vsub.f32 %v21742_v5, %v21753_v55  ;;  %v3218_v19 = vand.u32 4294901760, %v3217_v9  ;;  %v7634_v30 = vand.u32 4294901760, %v7633_v34  ;;  %v21761_v34 = vld [vmem:[#allocation197_spill] sm:$0xff]  ;;  %10318 = vmatpush1.bf16.xpose.msra.mxu0 %v16493_v47 }
 0x3ef   : > { %v3241_v22 = vsub.f32 %v21744_v29, %v21754_v14  ;;  %v7646_v38 = vand.u32 4294901760, %v7645_v21  ;;  %v3224_v55 = vand.u32 4294901760, %v3223_v31  ;;  %v3236_v5 = vand.u32 4294901760, %v3235_v40  ;;  %v21757_v14 = vld [vmem:[#allocation154_spill] sm:$0xff]  ;;  %v21764_v29 = vld [vmem:[#allocation204_spill] sm:$0xff]  ;;  %10320 = vmatprep.subr.bf16.mxu0 %v16505_v48  ;;  %v21774_v48 = vld [vmem:[#allocation233_spill] sm:$0xff] }
 0x3f0   : > { %v7652_v58 = vand.u32 4294901760, %v7651_v54  ;;  %v7664_v11 = vand.u32 4294901760, %v7663_v36  ;;  %v3230_v41 = vand.u32 4294901760, %v3229_v6  ;;  %v21759_v51 = vand.u32 4294901760, %v21755_v2  ;;  %v21762_v54 = vld [vmem:[#allocation202_spill] sm:$0xff]  ;;  %v21763_v6 = vld [vmem:[#allocation203_spill] sm:$0xff] }
 0x3f1   : > { %v3242_v57 = vand.u32 4294901760, %v3241_v22  ;;  %v21760_v50 = vand.u32 4294901760, %v21756_v53  ;;  %v19840_v21 = vand.u32 4294901760, %v21761_v34  ;;  %v16653_v31 = vpack.c.bf16 %v7640_v33, %v7628_v39  ;;  %11086 = vmatpush1.bf16.xpose.msra.mxu1 %v16499_v23 }
 0x3f2   : > { %v7657_v9 = vsub.f32 %v21755_v2, %v21759_v51  ;;  %v16655_v40 = vpack.c.bf16 %v3218_v19, %v3206_v52  ;;  %v19839_v36 = vand.u32 4294901760, %v21762_v54  ;;  %v19841_v49 = vand.u32 4294901760, %v21763_v6  ;;  %v21765_v51 = vld [vmem:[#allocation31_spill] sm:$0xff]  ;;  %v21766_v2 = vld [vmem:[#allocation209_spill] sm:$0xff]  ;;  %11088 = vmatprep.subr.bf16.mxu1 %v16513_v13 }
 0x3f3   : > { %v7669_v60 = vsub.f32 %v21756_v53, %v21760_v50  ;;  %v16659_v22 = vpack.c.bf16 %v7646_v38, %v7634_v30  ;;  %v16665_v50 = vpack.c.bf16 %v3236_v5, %v3224_v55  ;;  %v16667_v39 = vpack.c.bf16 %v7664_v11, %v7652_v58  ;;  %v260_v58 = vld [vmem:[%s12672_s9 + $0x38] sm:$0xff]  ;;  %v21778_v53 = vld [vmem:[#allocation241_spill] sm:$0xff] }
 0x3f4   : > { %v21767_v52 = vand.u32 4294901760, %v21757_v14  ;;  %v21768_v33 = vand.u32 4294901760, %v21758_v62  ;;  %v16676_v30 = vpack.c.bf16 %v3242_v57, %v3230_v41  ;;  %v7658_v10 = vand.u32 4294901760, %v7657_v9 }
 0x3f5   : > { %v7670_v59 = vand.u32 4294901760, %v7669_v60  ;;  %v7675_v5 = vsub.f32 %v21761_v34, %v19840_v21  ;;  %v7687_v55 = vsub.f32 %v21762_v54, %v19839_v36  ;;  %v3253_v11 = vsub.f32 %v21763_v6, %v19841_v49  ;;  %v21775_v6 = vld [vmem:[#allocation237_spill] sm:$0xff] }
 0x3f6   : > { %v3247_v19 = vsub.f32 %v21757_v14, %v21767_v52  ;;  %v3259_v38 = vsub.f32 %v21758_v62, %v21768_v33  ;;  %v21769_v52 = vld [vmem:[#allocation221_spill] sm:$0xff]  ;;  %v21771_v57 = vand.u32 4294901760, %v21764_v29  ;;  %v21772_v60 = vand.u32 4294901760, %v21765_v51  ;;  %10322 = vmatpush1.bf16.xpose.msra.mxu0 %v16526_v44 }
 0x3f7   : > { %v21773_v21 = vand.u32 4294901760, %v21766_v2  ;;  %v16703_v54 = vand.u32 4294901760, %v260_v58  ;;  %v7676_v34 = vand.u32 4294901760, %v7675_v5  ;;  %v259_v14 = vld [vmem:[%s12672_s9 + $0x30] sm:$0xff]  ;;  %v21780_v33 = vand.u32 4294901760, %v21769_v52  ;;  %10324 = vmatprep.subr.bf16.mxu0 %v16544_v45 }
 0x3f8   : > { %v3265_v9 = vsub.f32 %v21764_v29, %v21771_v57  ;;  %v7681_v36 = vsub.f32 %v21765_v51, %v21772_v60  ;;  %v3248_v41 = vand.u32 4294901760, %v3247_v19  ;;  %v3260_v47 = vand.u32 4294901760, %v3259_v38  ;;  %v21777_v57 = vld [vmem:[#allocation238_spill] sm:$0xff]  ;;  %v21779_v60 = vld [vmem:[#allocation161_spill] sm:$0xff] }
 0x3f9   : > { %v7693_v49 = vsub.f32 %v21766_v2, %v21773_v21  ;;  %21776 = vst [vmem:[#allocation256_spill] sm:$0xff] %v16703_v54  ;;  %v7688_v21 = vand.u32 4294901760, %v7687_v55  ;;  %v3254_v2 = vand.u32 4294901760, %v3253_v11  ;;  %v3271_v19 = vsub.f32 %v21769_v52, %v21780_v33  ;;  %11090 = vmatpush1.bf16.xpose.msra.mxu1 %v16538_v26  ;;  %v268_v52 = vld [vmem:[%s12672_s9 + $0x78] sm:$0xff] }
 0x3fa   : > { %v21781_v38 = vand.u32 4294901760, %v21770_v20  ;;  %v3266_v13 = vand.u32 4294901760, %v3265_v9  ;;  %v7682_v5 = vand.u32 4294901760, %v7681_v36  ;;  %v21782_v29 = vand.u32 4294901760, %v21774_v48  ;;  %11092 = vmatprep.subr.bf16.mxu1 %v16550_v28  ;;  %v21798_v28 = vld [vmem:[#allocation196_spill] sm:$0xff]  ;;  %v21799_v26 = vld [vmem:[#allocation198_spill] sm:$0xff] }
 0x3fb   : > { %v7694_v43 = vand.u32 4294901760, %v7693_v49  ;;  %v21783_v55 = vand.u32 4294901760, %v21775_v6  ;;  %v16724_v33 = vsub.f32 %v260_v58, %v16703_v54  ;;  %v16726_v62 = vand.u32 4294901760, %v259_v14 }
 0x3fc   : > { %v3283_v23 = vsub.f32 %v21770_v20, %v21781_v38  ;;  %v7699_v51 = vsub.f32 %v21774_v48, %v21782_v29  ;;  %v16728_v38 = vand.u32 4294901760, %v264_v46  ;;  %v16731_v49 = vpack.c.bf16 %v7670_v59, %v7658_v10  ;;  %v21790_v59 = vld [vmem:[#allocation242_spill] sm:$0xff]  ;;  %v263_v20 = vld [vmem:[%s12672_s9 + $0x50] sm:$0xff] }
 0x3fd   : > { %v7711_v11 = vsub.f32 %v21775_v6, %v21783_v55  ;;  %21784 = vst [vmem:[#allocation258_spill] sm:$0xff] %v16724_v33  ;;  %21785 = vst [vmem:[#allocation55_spill] sm:$0xff] %v16726_v62  ;;  %v21787_v29 = vand.u32 4294901760, %v21777_v57  ;;  %v21788_v9 = vand.u32 4294901760, %v21778_v53  ;;  %v21789_v58 = vand.u32 4294901760, %v21779_v60 }
 0x3fe   : > { %21786 = vst [vmem:[#allocation56_spill] sm:$0xff] %v16728_v38  ;;  %v16748_v6 = vpack.c.bf16 %v3260_v47, %v3248_v41  ;;  %v3272_v45 = vand.u32 4294901760, %v3271_v19  ;;  %v3284_v10 = vand.u32 4294901760, %v3283_v23  ;;  %v19878_v48 = vand.u32 4294901760, %v21790_v59  ;;  %10326 = vmatpush1.bf16.xpose.msra.mxu0 %v16557_v18 }
 0x3ff   : > { %v16736_v36 = vsub.f32 %v21777_v57, %v21787_v29  ;;  %v16741_v55 = vsub.f32 %v21778_v53, %v21788_v9  ;;  %v16746_v44 = vsub.f32 %v21779_v60, %v21789_v58  ;;  %v16753_v29 = vpack.c.bf16 %v7688_v21, %v7676_v34  ;;  %v21797_v58 = vld [vmem:[#allocation257_spill] sm:$0xff]  ;;  %v21800_v60 = vld [vmem:[#allocation23_spill] sm:$0xff]  ;;  %10328 = vmatprep.subr.bf16.mxu0 %v16565_v0 }
 0x400   : > { %v16755_v57 = vpack.c.bf16 %v3266_v13, %v3254_v2  ;;  %v16757_v9 = vpack.c.bf16 %v7694_v43, %v7682_v5  ;;  %v7700_v53 = vand.u32 4294901760, %v7699_v51  ;;  %v7712_v47 = vand.u32 4294901760, %v7711_v11  ;;  %v271_v0 = vld [vmem:[%s12672_s9 + $0x90] sm:$0xff] }
 0x401   : > { %v16762_v41 = vand.u32 4294901760, %v16724_v33  ;;  %v16765_v23 = vsub.f32 %v259_v14, %v16726_v62  ;;  %v16768_v34 = vsub.f32 %v264_v46, %v16728_v38  ;;  %v16773_v51 = vand.u32 4294901760, %v263_v20  ;;  %v21795_v14 = vld [vmem:[#allocation253_spill] sm:$0xff]  ;;  %11094 = vmatpush1.bf16.xpose.msra.mxu1 %v16563_v12 }
 0x402   : > { %v16775_v21 = vpack.c.bf16 %v3284_v10, %v3272_v45  ;;  %v16780_v19 = vsub.f32 %v21790_v59, %v19878_v48  ;;  %v16783_v11 = vand.u32 4294901760, %v268_v52  ;;  %v267_v46 = vld [vmem:[%s12672_s9 + $0x70] sm:$0xff]  ;;  %v272_v45 = vld [vmem:[%s12672_s9 + $0x98] sm:$0xff]  ;;  %v21801_v10 = vld [vmem:[#allocation28_spill] sm:$0xff]  ;;  %v16802_v13 = vpack.c.bf16 %v7712_v47, %v7700_v53  ;;  %11096 = vmatprep.subr.bf16.mxu1 %v16567_v16 }
 0x403   : > { %21791 = vst [vmem:[#allocation234_spill] sm:$0xff] %v16762_v41  ;;  %21792 = vst [vmem:[#allocation157_spill] sm:$0xff] %v16765_v23  ;;  %v2934_v5 = vsub.f32 %v16724_v33, %v16762_v41  ;;  %v16796_v59 = vand.u32 4294901760, %v16765_v23  ;;  %v16799_v2 = vand.u32 4294901760, %v16768_v34  ;;  %v21804_v38 = vld [vmem:[#allocation29_spill] sm:$0xff]  ;;  %v16806_v18 = vsub.f32 %v263_v20, %v16773_v51 }
 0x404   : > { %21793 = vst [vmem:[#allocation264_spill] sm:$0xff] %v16768_v34  ;;  %21794 = vst [vmem:[#allocation266_spill] sm:$0xff] %v16773_v51  ;;  %v16808_v48 = vand.u32 4294901760, %v267_v46  ;;  %v7718_v41 = vand.u32 4294901760, %v16780_v19  ;;  %v21807_v33 = vand.u32 4294901760, %v21795_v14  ;;  %v16815_v54 = vsub.f32 %v268_v52, %v16783_v11 }
 0x405   : > { %21796 = vst [vmem:[#allocation67_spill] sm:$0xff] %v16783_v11  ;;  %21802 = vst [vmem:[#allocation68_spill] sm:$0xff] %v16796_v59  ;;  %v16817_v37 = vand.u32 4294901760, %v272_v45  ;;  %v21810_v20 = vand.u32 4294901760, %v21797_v58  ;;  %v21811_v47 = vand.u32 4294901760, %v21798_v28  ;;  %v21812_v43 = vand.u32 4294901760, %v21799_v26  ;;  %2926 = vmatmul.mubr.f32.vlgmr.msra.gmra.mrb[0].mxu0 %v16575_v4 }
 0x406   : > { %21803 = vst [vmem:[#allocation79_spill] sm:$0xff] %v16799_v2  ;;  %21805 = vst [vmem:[#allocation80_spill] sm:$0xff] %v16806_v18  ;;  %v3295_v62 = vsub.f32 %v21795_v14, %v21807_v33  ;;  %v21813_v52 = vand.u32 4294901760, %v21800_v60  ;;  %v276_v11 = vld [vmem:[%s12672_s9 + $0xb8] sm:$0xff]  ;;  %v21814_v12 = vand.u32 4294901760, %v21801_v10  ;;  %v16851_v16 = vsub.f32 %v267_v46, %v16808_v48  ;;  %10330 = vmatpush1.bf16.xpose.msra.mxu0 %v16598_v42  ;;  %v279_v42 = vld [vmem:[%s12672_s9 + $0xd0] sm:$0xff] }
 0x407   : > { %21806 = vst [vmem:[#allocation267_spill] sm:$0xff] %v16808_v48  ;;  %21808 = vst [vmem:[#allocation240_spill] sm:$0xff] %v16815_v54  ;;  %v3307_v53 = vsub.f32 %v21797_v58, %v21810_v20  ;;  %v7723_v19 = vsub.f32 %v21798_v28, %v21811_v47  ;;  %v7735_v33 = vsub.f32 %v21799_v26, %v21812_v43  ;;  %v2935_v58 = vand.u32 4294901760, %v2934_v5 }
 0x408   : > { %21809 = vst [vmem:[#allocation158_spill] sm:$0xff] %v16817_v37  ;;  %v3301_v14 = vsub.f32 %v21800_v60, %v21813_v52  ;;  %v3313_v20 = vsub.f32 %v21801_v10, %v21814_v12  ;;  %v2940_v47 = vsub.f32 %v16765_v23, %v16796_v59  ;;  %v2950_v28 = vsub.f32 %v16768_v34, %v16799_v2  ;;  %v275_v12 = vld [vmem:[%s12672_s9 + $0xb0] sm:$0xff] }
 0x409   : > { %v21815_v43 = vand.u32 4294901760, %v21804_v38  ;;  %v16848_v52 = vand.u32 4294901760, %v16806_v18  ;;  %21817 = vst [vmem:[#allocation86_spill] sm:$0xff] %v16851_v16  ;;  %v16853_v60 = vand.u32 4294901760, %v271_v0  ;;  %v3296_v5 = vand.u32 4294901760, %v3295_v62  ;;  %2936 = vmatprep.mubr.f32.mxu0 %v2935_v58  ;;  %10332 = vmatprep.subr.bf16.mxu0 %v16640_v63 }
 0x40a   : > { %v16857_v59 = vand.u32 4294901760, %v16815_v54  ;;  %v16860_v2 = vsub.f32 %v272_v45, %v16817_v37  ;;  %v16862_v34 = vand.u32 4294901760, %v276_v11  ;;  %v3308_v23 = vand.u32 4294901760, %v3307_v53  ;;  %7354 = vmatmul.mubr.f32.vlgmr.msra.gmra.mrb[0].mxu1 %v16575_v4 }
 0x40b   : > { %v16845_v26 = vsub.f32 %v21804_v38, %v21815_v43  ;;  %21816 = vst [vmem:[#allocation85_spill] sm:$0xff] %v16848_v52  ;;  %21818 = vst [vmem:[#allocation170_spill] sm:$0xff] %v16853_v60  ;;  %v280_v43 = vld [vmem:[%s12672_s9 + $0xd8] sm:$0xff]  ;;  %v7724_v38 = vand.u32 4294901760, %v7723_v19  ;;  %v7736_v46 = vand.u32 4294901760, %v7735_v33  ;;  %v3302_v10 = vand.u32 4294901760, %v3301_v14  ;;  %11098 = vmatpush1.bf16.xpose.msra.mxu1 %v16626_v61  ;;  %7364 = vmatprep.mubr.f32.mxu1 %v2935_v58 }
 0x40c   : > { %21819 = vst [vmem:[#allocation245_spill] sm:$0xff] %v16857_v59  ;;  %21820 = vst [vmem:[#allocation251_spill] sm:$0xff] %v16860_v2  ;;  %v3314_v48 = vand.u32 4294901760, %v3313_v20  ;;  %v2941_v62 = vand.u32 4294901760, %v2940_v47  ;;  %v2951_v51 = vand.u32 4294901760, %v2950_v28  ;;  %v16867_v25 = vand.u32 4294901760, %v275_v12  ;;  %11100 = vmatprep.subr.bf16.mxu1 %v16653_v31 }
 0x40d   : > { %21821 = vst [vmem:[#allocation181_spill] sm:$0xff] %v16862_v34  ;;  %v2956_v45 = vsub.f32 %v16806_v18, %v16848_v52  ;;  %v16873_v37 = vand.u32 4294901760, %v16851_v16  ;;  %v16876_v53 = vsub.f32 %v271_v0, %v16853_v60  ;;  %v16878_v14 = vand.u32 4294901760, %v280_v43 }
 0x40e   : > { %21822 = vst [vmem:[#allocation89_spill] sm:$0xff] %v16867_v25  ;;  %v21826_v28 = vand.u32 4294901760, %v16736_v36  ;;  %v21827_v19 = vand.u32 4294901760, %v16741_v55  ;;  %v2966_v33 = vsub.f32 %v16815_v54, %v16857_v59  ;;  %v16891_v20 = vand.u32 4294901760, %v16860_v2  ;;  %v284_v59 = vld [vmem:[%s12672_s9 + $0xf8] sm:$0xff]  ;;  %2942 = vmatmul.mubr.f32.gmra.mrb[2].mxu0 %v2941_v62  ;;  %7370 = vmatmul.mubr.f32.gmra.mrb[2].mxu1 %v2941_v62  ;;  %v21840_v62 = vld [vmem:[#allocation217_spill] sm:$0xff] }
 0x40f   : > { %21823 = vst [vmem:[#allocation246_spill] sm:$0xff] %v16873_v37  ;;  %21824 = vst [vmem:[#allocation94_spill] sm:$0xff] %v16876_v53  ;;  %v16894_v0 = vsub.f32 %v276_v11, %v16862_v34  ;;  %v21830_v47 = vand.u32 4294901760, %v16746_v44  ;;  %v16901_v36 = vpack.c.bf16 %v3308_v23, %v3296_v5  ;;  %v16907_v52 = vpack.c.bf16 %v7736_v46, %v7724_v38  ;;  %v283_v5 = vld [vmem:[%s12672_s9 + $0xf0] sm:$0xff] }
 0x410   : > { %21825 = vst [vmem:[#allocation95_spill] sm:$0xff] %v16878_v14  ;;  %v16886_v63 = vpack.c.bf16 %v21827_v19, %v21826_v28  ;;  %21828 = vst [vmem:[#allocation175_spill] sm:$0xff] %v16891_v20  ;;  %v21831_v28 = vld [vmem:[#allocation205_spill] sm:$0xff]  ;;  %v16909_v11 = vpack.c.bf16 %v3314_v48, %v3302_v10  ;;  %v16912_v61 = vsub.f32 %v275_v12, %v16867_v25  ;;  %v16914_v44 = vand.u32 4294901760, %v279_v42 }
 0x411   : > { %21829 = vst [vmem:[#allocation177_spill] sm:$0xff] %v16894_v0  ;;  %v16899_v4 = vpack.c.bf16 %v7718_v41, %v21830_v47  ;;  %v19934_v19 = vand.u32 4294901760, %v21831_v28  ;;  %2952 = vmatprep.mubr.f32.mxu0 %v2951_v51  ;;  %v2957_v41 = vand.u32 4294901760, %v2956_v45  ;;  %v2972_v23 = vsub.f32 %v16851_v16, %v16873_v37  ;;  %v21838_v45 = vld [vmem:[#allocation35_spill] sm:$0xff]  ;;  %7380 = vmatprep.mubr.f32.mxu1 %v2951_v51  ;;  %v288_v37 = vld [vmem:[%s12672_s9 + $0x118] sm:$0xff]  ;;  %v21842_v16 = vld [vmem:[#allocation44_spill] sm:$0xff] }
 0x412   : > { %21832 = vst [vmem:[#allocation183_spill] sm:$0xff] %v16912_v61  ;;  %21833 = vst [vmem:[#allocation13_spill] sm:$0xff] %v16914_v44  ;;  %v16919_v58 = vand.u32 4294901760, %v16876_v53  ;;  %v16922_v31 = vsub.f32 %v280_v43, %v16878_v14  ;;  %v2967_v48 = vand.u32 4294901760, %v2966_v33  ;;  %v2982_v38 = vsub.f32 %v16860_v2, %v16891_v20  ;;  %v21839_v43 = vld [vmem:[#allocation40_spill] sm:$0xff]  ;;  %10334 = vmatpush1.bf16.xpose.msra.mxu0 %v16655_v40  ;;  %v21841_v20 = vld [vmem:[#allocation43_spill] sm:$0xff] }
 0x413   : > { %v16927_v10 = vand.u32 4294901760, %v16894_v0  ;;  %v16929_v12 = vand.u32 4294901760, %v284_v59  ;;  %v16935_v46 = vsub.f32 %v21831_v28, %v19934_v19  ;;  %v16945_v18 = vand.u32 4294901760, %v16912_v61  ;;  %10336 = vmatprep.subr.bf16.mxu0 %v16665_v50  ;;  %2958 = vmatmul.mubr.f32.gmra.mrb[4].mxu0 %v2957_v41  ;;  %v21851_v28 = vld [vmem:[#allocation50_spill] sm:$0xff] }
 0x414   : > { %21834 = vst [vmem:[#allocation100_spill] sm:$0xff] %v16919_v58  ;;  %21835 = vst [vmem:[#allocation101_spill] sm:$0xff] %v16922_v31  ;;  %v16948_v19 = vsub.f32 %v279_v42, %v16914_v44  ;;  %v2973_v55 = vand.u32 4294901760, %v2972_v23  ;;  %v2988_v51 = vsub.f32 %v16876_v53, %v16919_v58  ;;  %v16954_v40 = vand.u32 4294901760, %v16922_v31  ;;  %7386 = vmatmul.mubr.f32.gmra.mrb[4].mxu1 %v2957_v41  ;;  %v287_v23 = vld [vmem:[%s12672_s9 + $0x110] sm:$0xff] }
 0x415   : > { %21836 = vst [vmem:[#allocation104_spill] sm:$0xff] %v16927_v10  ;;  %21837 = vst [vmem:[#allocation109_spill] sm:$0xff] %v16929_v12  ;;  %v16956_v2 = vand.u32 4294901760, %v283_v5  ;;  %2968 = vmatprep.mubr.f32.mxu0 %v2967_v48  ;;  %v2983_v54 = vand.u32 4294901760, %v2982_v38  ;;  %v2998_v42 = vsub.f32 %v16894_v0, %v16927_v10  ;;  %v16961_v33 = vsub.f32 %v284_v59, %v16929_v12  ;;  %v21850_v41 = vld [vmem:[#allocation49_spill] sm:$0xff]  ;;  %v292_v10 = vld [vmem:[%s12672_s9 + $0x138] sm:$0xff] }
 0x416   : > { %21843 = vst [vmem:[#allocation112_spill] sm:$0xff] %v16945_v18  ;;  %21844 = vst [vmem:[#allocation113_spill] sm:$0xff] %v16948_v19  ;;  %v16963_v50 = vand.u32 4294901760, %v288_v37  ;;  %11102 = vmatpush1.bf16.xpose.msra.mxu1 %v16659_v22  ;;  %v7742_v47 = vand.u32 4294901760, %v16935_v46  ;;  %v21849_v58 = vand.u32 4294901760, %v21838_v45  ;;  %7396 = vmatprep.mubr.f32.mxu1 %v2967_v48  ;;  %v21852_v59 = vand.u32 4294901760, %v21839_v43 }
 0x417   : > { %21845 = vst [vmem:[#allocation265_spill] sm:$0xff] %v16954_v40  ;;  %21846 = vst [vmem:[#allocation268_spill] sm:$0xff] %v16956_v2  ;;  %11104 = vmatprep.subr.bf16.mxu1 %v16667_v39  ;;  %v21853_v46 = vand.u32 4294901760, %v21840_v62  ;;  %v16990_v44 = vand.u32 4294901760, %v16948_v19  ;;  %2974 = vmatmul.mubr.f32.gmra.mrb[6].mxu0 %v2973_v55  ;;  %v2989_v48 = vand.u32 4294901760, %v2988_v51  ;;  %v3014_v39 = vsub.f32 %v16922_v31, %v16954_v40  ;;  %v291_v51 = vld [vmem:[%s12672_s9 + $0x130] sm:$0xff] }
 0x418   : > { %21847 = vst [vmem:[#allocation115_spill] sm:$0xff] %v16961_v33  ;;  %21848 = vst [vmem:[#allocation116_spill] sm:$0xff] %v16963_v50  ;;  %v16971_v53 = vsub.f32 %v21838_v45, %v21849_v58  ;;  %v16980_v22 = vsub.f32 %v21839_v43, %v21852_v59  ;;  %v3004_v58 = vsub.f32 %v16912_v61, %v16945_v18  ;;  %v16997_v38 = vand.u32 4294901760, %v287_v23 }
 0x419   : > { %v16985_v0 = vsub.f32 %v21840_v62, %v21853_v46  ;;  %21854 = vst [vmem:[#allocation191_spill] sm:$0xff] %v16990_v44  ;;  %v16995_v59 = vsub.f32 %v283_v5, %v16956_v2  ;;  %7402 = vmatmul.mubr.f32.gmra.mrb[6].mxu1 %v2973_v55  ;;  %2984 = vmatprep.mubr.f32.mxu0 %v2983_v54  ;;  %v2999_v46 = vand.u32 4294901760, %v2998_v42  ;;  %v17000_v62 = vand.u32 4294901760, %v16961_v33 }
 0x41a   : > { %21856 = vst [vmem:[#allocation133_spill] sm:$0xff] %v16997_v38  ;;  %v17003_v18 = vsub.f32 %v288_v37, %v16963_v50  ;;  %v17005_v61 = vand.u32 4294901760, %v292_v10  ;;  %v21860_v43 = vand.u32 4294901760, %v21841_v20  ;;  %v21861_v5 = vand.u32 4294901760, %v21842_v16  ;;  %7412 = vmatprep.mubr.f32.mxu1 %v2983_v54  ;;  %v296_v50 = vld [vmem:[%s12672_s9 + $0x158] sm:$0xff]  ;;  %10338 = vmatpush1.bf16.xpose.msra.mxu0 %v16676_v30 }
 0x41b   : > { %21855 = vst [vmem:[#allocation118_spill] sm:$0xff] %v16995_v59  ;;  %21857 = vst [vmem:[#allocation134_spill] sm:$0xff] %v17000_v62  ;;  %v21862_v55 = vand.u32 4294901760, %v21850_v41  ;;  %v21863_v45 = vand.u32 4294901760, %v21851_v28  ;;  %10340 = vmatprep.subr.bf16.mxu0 %v16748_v6  ;;  %2990 = vmatmul.mubr.f32.gmra.mrb[8].mxu0 %v2989_v48  ;;  %v17033_v54 = vsub.f32 %v287_v23, %v16997_v38  ;;  %v17035_v30 = vand.u32 4294901760, %v291_v51 }
 0x41c   : > { %21858 = vst [vmem:[#allocation131_spill] sm:$0xff] %v17003_v18  ;;  %21859 = vst [vmem:[#allocation136_spill] sm:$0xff] %v17005_v61  ;;  %v7759_v40 = vsub.f32 %v21841_v20, %v21860_v43  ;;  %v3325_v31 = vsub.f32 %v21842_v16, %v21861_v5  ;;  %v3320_v43 = vand.u32 4294901760, %v16971_v53  ;;  %v3332_v20 = vand.u32 4294901760, %v16980_v22  ;;  %v295_v53 = vld [vmem:[%s12672_s9 + $0x150] sm:$0xff]  ;;  %3000 = vmatprep.mubr.f32.mxu0 %v2999_v46 }
 0x41d   : > { %v3337_v42 = vsub.f32 %v21850_v41, %v21862_v55  ;;  %v17020_v37 = vsub.f32 %v21851_v28, %v21863_v45  ;;  %v3005_v5 = vand.u32 4294901760, %v3004_v58  ;;  %v3020_v16 = vsub.f32 %v16948_v19, %v16990_v44  ;;  %21865 = vst [vmem:[#allocation146_spill] sm:$0xff] %v17033_v54  ;;  %21866 = vst [vmem:[#allocation14_spill] sm:$0xff] %v17035_v30  ;;  %v300_v44 = vld [vmem:[%s12672_s9 + $0x178] sm:$0xff] }
 0x41e   : > { %v3015_v55 = vand.u32 4294901760, %v3014_v39  ;;  %v17030_v45 = vand.u32 4294901760, %v16995_v59  ;;  %7418 = vmatmul.mubr.f32.gmra.mrb[8].mxu1 %v2989_v48  ;;  %v3030_v22 = vsub.f32 %v16961_v33, %v17000_v62  ;;  %v17041_v58 = vand.u32 4294901760, %v17003_v18 }
 0x41f   : > { %v17044_v6 = vsub.f32 %v292_v10, %v17005_v61  ;;  %v17046_v39 = vand.u32 4294901760, %v296_v50  ;;  %11106 = vmatpush1.bf16.xpose.msra.mxu1 %v16731_v49  ;;  %v7748_v23 = vand.u32 4294901760, %v16985_v0  ;;  %v7760_v19 = vand.u32 4294901760, %v7759_v40  ;;  %7428 = vmatprep.mubr.f32.mxu1 %v2999_v46  ;;  %v21871_v10 = vld [vmem:[#allocation218_spill] sm:$0xff] }
 0x420   : > { %21864 = vst [vmem:[#allocation137_spill] sm:$0xff] %v17030_v45  ;;  %21867 = vst [vmem:[#allocation15_spill] sm:$0xff] %v17041_v58  ;;  %v3326_v48 = vand.u32 4294901760, %v3325_v31  ;;  %v3338_v28 = vand.u32 4294901760, %v3337_v42  ;;  %11108 = vmatprep.subr.bf16.mxu1 %v16753_v29  ;;  %v21870_v62 = vand.u32 4294901760, %v16845_v26  ;;  %v3021_v61 = vand.u32 4294901760, %v3020_v16  ;;  %3006 = vmatmul.mubr.f32.gmra.mrb[10].mxu0 %v3005_v5 }
 0x421   : > { %21868 = vst [vmem:[#allocation16_spill] sm:$0xff] %v17044_v6  ;;  %21869 = vst [vmem:[#allocation195_spill] sm:$0xff] %v17046_v39  ;;  %v17057_v38 = vand.u32 4294901760, %v295_v53  ;;  %v3036_v49 = vsub.f32 %v16995_v59, %v17030_v45  ;;  %v17062_v0 = vand.u32 4294901760, %v17033_v54  ;;  %v17065_v31 = vsub.f32 %v291_v51, %v17035_v30  ;;  %v299_v26 = vld [vmem:[%s12672_s9 + $0x170] sm:$0xff]  ;;  %3016 = vmatprep.mubr.f32.mxu0 %v3015_v55  ;;  %v21879_v45 = vld [vmem:[#allocation223_spill] sm:$0xff] }
 0x422   : > { %v17054_v33 = vpack.c.bf16 %v7742_v47, %v21870_v62  ;;  %v17067_v29 = vand.u32 4294901760, %v300_v44  ;;  %7434 = vmatmul.mubr.f32.gmra.mrb[10].mxu1 %v3005_v5  ;;  %v3031_v47 = vand.u32 4294901760, %v3030_v22  ;;  %v3046_v16 = vsub.f32 %v17003_v18, %v17041_v58  ;;  %v304_v5 = vld [vmem:[%s12672_s9 + $0x198] sm:$0xff]  ;;  %10342 = vmatpush1.bf16.xpose.msra.mxu0 %v16755_v57 }
 0x423   : > { %21872 = vst [vmem:[#allocation200_spill] sm:$0xff] %v17057_v38  ;;  %21873 = vst [vmem:[#allocation201_spill] sm:$0xff] %v17062_v0  ;;  %v17073_v62 = vand.u32 4294901760, %v17044_v6  ;;  %v17076_v40 = vsub.f32 %v296_v50, %v17046_v39  ;;  %v17078_v46 = vpack.c.bf16 %v3332_v20, %v3320_v43  ;;  %v17080_v42 = vpack.c.bf16 %v7760_v19, %v7748_v23  ;;  %v21887_v50 = vld [vmem:[#allocation61_spill] sm:$0xff]  ;;  %v21891_v59 = vld [vmem:[#allocation58_spill] sm:$0xff] }
 0x424   : > { %21874 = vst [vmem:[#allocation36_spill] sm:$0xff] %v17065_v31  ;;  %21875 = vst [vmem:[#allocation208_spill] sm:$0xff] %v17067_v29  ;;  %v17082_v51 = vpack.c.bf16 %v3338_v28, %v3326_v48  ;;  %7444 = vmatprep.mubr.f32.mxu1 %v3015_v55  ;;  %v21878_v22 = vand.u32 4294901760, %v21871_v10  ;;  %v17094_v20 = vsub.f32 %v295_v53, %v17057_v38  ;;  %v17096_v19 = vand.u32 4294901760, %v299_v26 }
 0x425   : > { %21876 = vst [vmem:[#allocation211_spill] sm:$0xff] %v17073_v62  ;;  %21877 = vst [vmem:[#allocation34_spill] sm:$0xff] %v17076_v40  ;;  %10344 = vmatprep.subr.bf16.mxu0 %v16775_v21  ;;  %3022 = vmatmul.mubr.f32.gmra.mrb[12].mxu0 %v3021_v61  ;;  %v3037_v28 = vand.u32 4294901760, %v3036_v49  ;;  %v3052_v57 = vsub.f32 %v17033_v54, %v17062_v0  ;;  %v17102_v43 = vand.u32 4294901760, %v17065_v31  ;;  %v3047_v53 = vand.u32 4294901760, %v3046_v16  ;;  %v303_v49 = vld [vmem:[%s12672_s9 + $0x190] sm:$0xff] }
 0x426   : > { %v17090_v58 = vsub.f32 %v21871_v10, %v21878_v22  ;;  %21880 = vst [vmem:[#allocation42_spill] sm:$0xff] %v17094_v20  ;;  %21881 = vst [vmem:[#allocation48_spill] sm:$0xff] %v17096_v19  ;;  %v17105_v55 = vsub.f32 %v300_v44, %v17067_v29  ;;  %7450 = vmatmul.mubr.f32.gmra.mrb[12].mxu1 %v3021_v61  ;;  %3032 = vmatprep.mubr.f32.mxu0 %v3031_v47  ;;  %v17110_v21 = vand.u32 4294901760, %v17076_v40  ;;  %v21886_v22 = vld [vmem:[#allocation227_spill] sm:$0xff]  ;;  %v21888_v44 = vld [vmem:[#allocation62_spill] sm:$0xff] }
 0x427   : > { %21882 = vst [vmem:[#allocation226_spill] sm:$0xff] %v17102_v43  ;;  %v3062_v23 = vsub.f32 %v17044_v6, %v17073_v62  ;;  %v17112_v48 = vand.u32 4294901760, %v304_v5  ;;  %11110 = vmatpush1.bf16.xpose.msra.mxu1 %v16757_v9  ;;  %v21889_v61 = vld [vmem:[#allocation230_spill] sm:$0xff]  ;;  %7460 = vmatprep.mubr.f32.mxu1 %v3031_v47  ;;  %v21890_v62 = vld [vmem:[#allocation231_spill] sm:$0xff]  ;;  %v17125_v29 = vand.u32 4294901760, %v17094_v20  ;;  %v17128_v9 = vsub.f32 %v299_v26, %v17096_v19 }
 0x428   : > { %21883 = vst [vmem:[#allocation54_spill] sm:$0xff] %v17105_v55  ;;  %21884 = vst [vmem:[#allocation60_spill] sm:$0xff] %v17110_v21  ;;  %v308_v16 = vld [vmem:[%s12672_s9 + $0x1b8] sm:$0xff]  ;;  %11112 = vmatprep.subr.bf16.mxu1 %v16802_v13  ;;  %v3053_v0 = vand.u32 4294901760, %v3052_v57  ;;  %v3068_v47 = vsub.f32 %v17065_v31, %v17102_v43  ;;  %v17133_v18 = vand.u32 4294901760, %v17105_v55  ;;  %v17135_v13 = vand.u32 4294901760, %v303_v49 }
 0x429   : > { %21885 = vst [vmem:[#allocation57_spill] sm:$0xff] %v17112_v48  ;;  %21892 = vst [vmem:[#allocation63_spill] sm:$0xff] %v17125_v29  ;;  %3038 = vmatmul.mubr.f32.gmra.mrb[14].mxu0 %v3037_v28  ;;  %v3063_v10 = vand.u32 4294901760, %v3062_v23  ;;  %v3078_v6 = vsub.f32 %v17076_v40, %v17110_v21  ;;  %v17140_v26 = vsub.f32 %v304_v5, %v17112_v48  ;;  %v17142_v54 = vand.u32 4294901760, %v308_v16  ;;  %v307_v57 = vld [vmem:[%s12672_s9 + $0x1b0] sm:$0xff]  ;;  %v312_v40 = vld [vmem:[%s12672_s9 + $0x1d8] sm:$0xff] }
 0x42a   : > { %21893 = vst [vmem:[#allocation20_spill] sm:$0xff] %v17128_v9  ;;  %21894 = vst [vmem:[#allocation75_spill] sm:$0xff] %v17133_v18  ;;  %7466 = vmatmul.mubr.f32.gmra.mrb[14].mxu1 %v3037_v28  ;;  %3048 = vmatprep.mubr.f32.mxu0 %v3047_v53  ;;  %v7766_v41 = vand.u32 4294901760, %v17090_v58  ;;  %v21898_v43 = vand.u32 4294901760, %v21879_v45  ;;  %v21899_v28 = vand.u32 4294901760, %v21886_v22  ;;  %v21900_v21 = vand.u32 4294901760, %v21887_v50 }
 0x42b   : > { %21895 = vst [vmem:[#allocation78_spill] sm:$0xff] %v17135_v13  ;;  %21896 = vst [vmem:[#allocation93_spill] sm:$0xff] %v17140_v26  ;;  %7476 = vmatprep.mubr.f32.mxu1 %v3047_v53  ;;  %10346 = vmatpush1.bf16.xpose.msra.mxu0 %v16886_v63  ;;  %v21901_v58 = vand.u32 4294901760, %v21888_v44  ;;  %v3084_v19 = vsub.f32 %v17094_v20, %v17125_v29  ;;  %v3069_v63 = vand.u32 4294901760, %v3068_v47  ;;  %v17187_v29 = vand.u32 4294901760, %v17140_v26  ;;  %v311_v47 = vld [vmem:[%s12672_s9 + $0x1d0] sm:$0xff] }
 0x42c   : > { %21897 = vst [vmem:[#allocation99_spill] sm:$0xff] %v17142_v54  ;;  %v17149_v31 = vsub.f32 %v21879_v45, %v21898_v43  ;;  %v17154_v23 = vsub.f32 %v21886_v22, %v21899_v28  ;;  %v17159_v5 = vsub.f32 %v21887_v50, %v21900_v21  ;;  %v21902_v43 = vand.u32 4294901760, %v21889_v61  ;;  %10348 = vmatprep.subr.bf16.mxu0 %v16901_v36 }
 0x42d   : > { %v17166_v48 = vsub.f32 %v21888_v44, %v21901_v58  ;;  %v17176_v21 = vand.u32 4294901760, %v17128_v9  ;;  %3054 = vmatmul.mubr.f32.gmra.mrb[16].mxu0 %v3053_v0  ;;  %v3094_v53 = vsub.f32 %v17105_v55, %v17133_v18  ;;  %v17182_v58 = vsub.f32 %v303_v49, %v17135_v13  ;;  %21906 = vst [vmem:[#allocation272_spill] sm:$0xff] %v17187_v29 }
 0x42e   : > { %v17171_v28 = vsub.f32 %v21889_v61, %v21902_v43  ;;  %v17184_v44 = vand.u32 4294901760, %v307_v57  ;;  %7482 = vmatmul.mubr.f32.gmra.mrb[16].mxu1 %v3053_v0  ;;  %3064 = vmatprep.mubr.f32.mxu0 %v3063_v10  ;;  %v3079_v43 = vand.u32 4294901760, %v3078_v6  ;;  %v17190_v20 = vsub.f32 %v308_v16, %v17142_v54  ;;  %v316_v54 = vld [vmem:[%s12672_s9 + $0x1f8] sm:$0xff] }
 0x42f   : > { %21903 = vst [vmem:[#allocation61_spill] sm:$0xff] %v17176_v21  ;;  %21904 = vst [vmem:[#allocation270_spill] sm:$0xff] %v17182_v58  ;;  %v17192_v36 = vand.u32 4294901760, %v312_v40  ;;  %11114 = vmatpush1.bf16.xpose.msra.mxu1 %v16899_v4  ;;  %v21909_v18 = vand.u32 4294901760, %v17020_v37  ;;  %v3344_v55 = vand.u32 4294901760, %v17149_v31  ;;  %v21910_v0 = vand.u32 4294901760, %v21890_v62  ;;  %7492 = vmatprep.mubr.f32.mxu1 %v3063_v10 }
 0x430   : > { %21905 = vst [vmem:[#allocation271_spill] sm:$0xff] %v17184_v44  ;;  %21907 = vst [vmem:[#allocation273_spill] sm:$0xff] %v17190_v20  ;;  %v21911_v61 = vand.u32 4294901760, %v21891_v59  ;;  %11116 = vmatprep.subr.bf16.mxu1 %v16907_v52  ;;  %v7772_v4 = vand.u32 4294901760, %v17159_v5  ;;  %v3100_v37 = vsub.f32 %v17128_v9, %v17176_v21  ;;  %v3095_v31 = vand.u32 4294901760, %v3094_v53  ;;  %v315_v53 = vld [vmem:[%s12672_s9 + $0x1f0] sm:$0xff] }
 0x431   : > { %21908 = vst [vmem:[#allocation274_spill] sm:$0xff] %v17192_v36  ;;  %v17198_v49 = vpack.c.bf16 %v7766_v41, %v21909_v18  ;;  %v17204_v6 = vsub.f32 %v21890_v62, %v21910_v0  ;;  %v3356_v18 = vand.u32 4294901760, %v17154_v23  ;;  %v3085_v41 = vand.u32 4294901760, %v3084_v19  ;;  %3070 = vmatmul.mubr.f32.gmra.mrb[18].mxu0 %v3069_v63 }
 0x432   : > { %v17209_v16 = vsub.f32 %v21891_v59, %v21911_v61  ;;  %v17218_v0 = vand.u32 4294901760, %v17182_v58  ;;  %v17221_v61 = vsub.f32 %v307_v57, %v17184_v44  ;;  %v17223_v10 = vand.u32 4294901760, %v311_v47  ;;  %7498 = vmatmul.mubr.f32.gmra.mrb[18].mxu1 %v3069_v63  ;;  %3080 = vmatprep.mubr.f32.mxu0 %v3079_v43  ;;  %v21918_v63 = vld [vmem:[#allocation59_spill] sm:$0xff]  ;;  %v21920_v44 = vld [vmem:[#allocation74_spill] sm:$0xff] }
 0x433   : > { %v3110_v52 = vsub.f32 %v17140_v26, %v17187_v29  ;;  %v17228_v19 = vand.u32 4294901760, %v17190_v20  ;;  %v17231_v23 = vsub.f32 %v312_v40, %v17192_v36  ;;  %v17233_v5 = vand.u32 4294901760, %v316_v54  ;;  %7508 = vmatprep.mubr.f32.mxu1 %v3079_v43  ;;  %10350 = vmatpush1.bf16.xpose.msra.mxu0 %v16909_v11  ;;  %v21919_v29 = vld [vmem:[#allocation73_spill] sm:$0xff]  ;;  %v21921_v40 = vld [vmem:[#allocation70_spill] sm:$0xff]  ;;  %v21927_v26 = vld [vmem:[#allocation71_spill] sm:$0xff] }
 0x434   : > { %21912 = vst [vmem:[#allocation275_spill] sm:$0xff] %v17218_v0  ;;  %21913 = vst [vmem:[#allocation276_spill] sm:$0xff] %v17221_v61  ;;  %v7784_v21 = vand.u32 4294901760, %v17166_v48  ;;  %v20042_v59 = vand.u32 4294901760, %v21918_v63  ;;  %v3101_v13 = vand.u32 4294901760, %v3100_v37  ;;  %10352 = vmatprep.subr.bf16.mxu0 %v17078_v46  ;;  %v3116_v48 = vsub.f32 %v17182_v58, %v17218_v0 }
 0x435   : > { %21914 = vst [vmem:[#allocation277_spill] sm:$0xff] %v17223_v10  ;;  %21915 = vst [vmem:[#allocation278_spill] sm:$0xff] %v17228_v19  ;;  %3086 = vmatmul.mubr.f32.gmra.mrb[20].mxu0 %v3085_v41  ;;  %v17248_v9 = vand.u32 4294901760, %v17221_v61  ;;  %v17251_v43 = vsub.f32 %v311_v47, %v17223_v10  ;;  %v17253_v11 = vand.u32 4294901760, %v315_v53  ;;  %v3111_v57 = vand.u32 4294901760, %v3110_v52  ;;  %v21940_v10 = vld [vmem:[#allocation83_spill] sm:$0xff] }
 0x436   : > { %21916 = vst [vmem:[#allocation279_spill] sm:$0xff] %v17231_v23  ;;  %21917 = vst [vmem:[#allocation280_spill] sm:$0xff] %v17233_v5  ;;  %7514 = vmatmul.mubr.f32.gmra.mrb[20].mxu1 %v3085_v41  ;;  %3096 = vmatprep.mubr.f32.mxu0 %v3095_v31  ;;  %v3126_v37 = vsub.f32 %v17190_v20, %v17228_v19  ;;  %v17258_v46 = vand.u32 4294901760, %v17231_v23  ;;  %v17261_v36 = vsub.f32 %v316_v54, %v17233_v5 }
 0x437   : > { %21922 = vst [vmem:[#allocation281_spill] sm:$0xff] %v17248_v9  ;;  %21923 = vst [vmem:[#allocation282_spill] sm:$0xff] %v17251_v43  ;;  %11118 = vmatpush1.bf16.xpose.msra.mxu1 %v17054_v33  ;;  %v10355_v62 = vpack.c.bf16 %v3356_v18, %v3344_v55  ;;  %v7778_v47 = vand.u32 4294901760, %v17209_v16  ;;  %v7789_v41 = vsub.f32 %v21918_v63, %v20042_v59  ;;  %7524 = vmatprep.mubr.f32.mxu1 %v3095_v31  ;;  %v21930_v55 = vld [vmem:[#allocation76_spill] sm:$0xff]  ;;  %v21931_v16 = vld [vmem:[#allocation77_spill] sm:$0xff] }
 0x438   : > { %21924 = vst [vmem:[#allocation283_spill] sm:$0xff] %v17253_v11  ;;  %21925 = vst [vmem:[#allocation284_spill] sm:$0xff] %v17258_v46  ;;  %11120 = vmatprep.subr.bf16.mxu1 %v17080_v42  ;;  %v21928_v19 = vand.u32 4294901760, %v21919_v29  ;;  %v21929_v54 = vand.u32 4294901760, %v21920_v44  ;;  %v3117_v58 = vand.u32 4294901760, %v3116_v48  ;;  %v3132_v59 = vsub.f32 %v17221_v61, %v17248_v9 }
 0x439   : > { %21926 = vst [vmem:[#allocation285_spill] sm:$0xff] %v17261_v36  ;;  %3102 = vmatmul.mubr.f32.gmra.mrb[22].mxu0 %v3101_v13  ;;  %v17281_v31 = vand.u32 4294901760, %v17251_v43  ;;  %v17284_v42 = vsub.f32 %v315_v53, %v17253_v11  ;;  %v3142_v20 = vsub.f32 %v17231_v23, %v17258_v46  ;;  %v17292_v48 = vand.u32 4294901760, %v17261_v36  ;;  %v21937_v11 = vld [vmem:[#allocation163_spill] sm:$0xff]  ;;  %v21939_v46 = vld [vmem:[#allocation82_spill] sm:$0xff] }
 0x43a   : > { %v3367_v0 = vsub.f32 %v21919_v29, %v21928_v19  ;;  %v3379_v33 = vsub.f32 %v21920_v44, %v21929_v54  ;;  %v21934_v19 = vand.u32 4294901760, %v21921_v40  ;;  %7530 = vmatmul.mubr.f32.gmra.mrb[22].mxu1 %v3101_v13  ;;  %3112 = vmatprep.mubr.f32.mxu0 %v3111_v57  ;;  %v3127_v54 = vand.u32 4294901760, %v3126_v37 }
 0x43b   : > { %21932 = vst [vmem:[#allocation286_spill] sm:$0xff] %v17281_v31  ;;  %21933 = vst [vmem:[#allocation287_spill] sm:$0xff] %v17284_v42  ;;  %v11123_v18 = vpack.c.bf16 %v7784_v21, %v7772_v4  ;;  %v7790_v9 = vand.u32 4294901760, %v7789_v41  ;;  %v21936_v61 = vand.u32 4294901760, %v21927_v26  ;;  %7540 = vmatprep.mubr.f32.mxu1 %v3111_v57  ;;  %10354 = vmatpush1.bf16.xpose.msra.mxu0 %v17082_v51  ;;  %v21938_v37 = vand.u32 4294901760, %v21930_v55 }
 0x43c   : > { %v7795_v52 = vsub.f32 %v21921_v40, %v21934_v19  ;;  %21935 = vst [vmem:[#allocation288_spill] sm:$0xff] %v17292_v48  ;;  %v3368_v13 = vand.u32 4294901760, %v3367_v0  ;;  %10356 = vmatprep.subr.bf16.mxu0 %v10355_v62  ;;  %v3380_v21 = vand.u32 4294901760, %v3379_v33  ;;  %v3133_v4 = vand.u32 4294901760, %v3132_v59  ;;  %v21943_v33 = vld [vmem:[#allocation169_spill] sm:$0xff]  ;;  %v21944_v40 = vld [vmem:[#allocation88_spill] sm:$0xff] }
 0x43d   : > { %v7807_v53 = vsub.f32 %v21927_v26, %v21936_v61  ;;  %v3373_v19 = vsub.f32 %v21930_v55, %v21938_v37  ;;  %3118 = vmatmul.mubr.f32.gmra.mrb[24].mxu0 %v3117_v58  ;;  %v3148_v61 = vsub.f32 %v17251_v43, %v17281_v31  ;;  %v17307_v57 = vand.u32 4294901760, %v17284_v42  ;;  %v21945_v31 = vld [vmem:[#allocation180_spill] sm:$0xff] }
 0x43e   : > { %v7796_v51 = vand.u32 4294901760, %v7795_v52  ;;  %v21942_v0 = vand.u32 4294901760, %v21931_v16  ;;  %7546 = vmatmul.mubr.f32.gmra.mrb[24].mxu1 %v3117_v58  ;;  %3128 = vmatprep.mubr.f32.mxu0 %v3127_v54  ;;  %v3143_v37 = vand.u32 4294901760, %v3142_v20  ;;  %v3158_v62 = vsub.f32 %v17261_v36, %v17292_v48 }
 0x43f   : > { %21941 = vst [vmem:[#allocation289_spill] sm:$0xff] %v17307_v57  ;;  %11122 = vmatpush1.bf16.xpose.msra.mxu1 %v17198_v49  ;;  %v7808_v59 = vand.u32 4294901760, %v7807_v53  ;;  %7556 = vmatprep.mubr.f32.mxu1 %v3127_v54  ;;  %v21946_v52 = vand.u32 4294901760, %v17171_v28  ;;  %v21947_v58 = vand.u32 4294901760, %v17204_v6  ;;  %v21948_v20 = vand.u32 4294901760, %v21939_v46 }
 0x440   : > { %v3385_v41 = vsub.f32 %v21931_v16, %v21942_v0  ;;  %11124 = vmatprep.subr.bf16.mxu1 %v11123_v18  ;;  %v21949_v49 = vand.u32 4294901760, %v21940_v10  ;;  %v10359_v5 = vpack.c.bf16 %v3380_v21, %v3368_v13  ;;  %v21950_v23 = vand.u32 4294901760, %v21937_v11 }
 0x441   : > { %v10357_v0 = vpack.c.bf16 %v21947_v58, %v21946_v52  ;;  %v3391_v48 = vsub.f32 %v21939_v46, %v21948_v20  ;;  %3134 = vmatmul.mubr.f32.gmra.mrb[26].mxu0 %v3133_v4  ;;  %v3149_v18 = vand.u32 4294901760, %v3148_v61  ;;  %v3164_v28 = vsub.f32 %v17284_v42, %v17307_v57  ;;  %v21958_v42 = vld [vmem:[#allocation260_spill] sm:$0xff] }
 0x442   : > { %v3403_v53 = vsub.f32 %v21940_v10, %v21949_v49  ;;  %v7801_v43 = vsub.f32 %v21937_v11, %v21950_v23  ;;  %v11125_v6 = vpack.c.bf16 %v7790_v9, %v7778_v47  ;;  %v3374_v54 = vand.u32 4294901760, %v3373_v19  ;;  %7562 = vmatmul.mubr.f32.gmra.mrb[26].mxu1 %v3133_v4  ;;  %3144 = vmatprep.mubr.f32.mxu0 %v3143_v37  ;;  %v21954_v19 = vld [vmem:[#allocation91_spill] sm:$0xff] }
 0x443   : > { %v3386_v52 = vand.u32 4294901760, %v3385_v41  ;;  %v3159_v58 = vand.u32 4294901760, %v3158_v62  ;;  %v11127_v20 = vpack.c.bf16 %v7808_v59, %v7796_v51  ;;  %v21951_v36 = vand.u32 4294901760, %v21943_v33  ;;  %7572 = vmatprep.mubr.f32.mxu1 %v3143_v37  ;;  %10358 = vmatpush1.bf16.xpose.msra.mxu0 %v10357_v0  ;;  %v21955_v41 = vld [vmem:[#allocation92_spill] sm:$0xff]  ;;  %v21956_v62 = vld [vmem:[#allocation97_spill] sm:$0xff]  ;;  %v21961_v0 = vld [vmem:[#allocation110_spill] sm:$0xff] }
 0x444   : > { %v21952_v21 = vand.u32 4294901760, %v21944_v40  ;;  %v21953_v61 = vand.u32 4294901760, %v21945_v31  ;;  %v3392_v9 = vand.u32 4294901760, %v3391_v48  ;;  %v3404_v47 = vand.u32 4294901760, %v3403_v53  ;;  %10360 = vmatprep.subr.bf16.mxu0 %v10359_v5 }
 0x445   : > { %v7813_v13 = vsub.f32 %v21943_v33, %v21951_v36  ;;  %v20073_v4 = vand.u32 4294901760, %v21954_v19  ;;  %v21957_v36 = vld [vmem:[#allocation254_spill] sm:$0xff]  ;;  %3150 = vmatmul.mubr.f32.gmra.mrb[28].mxu0 %v3149_v18  ;;  %v20078_v48 = vand.u32 4294901760, %v21961_v0  ;;  %v10361_v53 = vpack.c.bf16 %v3386_v52, %v3374_v54 }
 0x446   : > { %v7819_v23 = vsub.f32 %v21944_v40, %v21952_v21  ;;  %v7831_v49 = vsub.f32 %v21945_v31, %v21953_v61  ;;  %v3165_v21 = vand.u32 4294901760, %v3164_v28  ;;  %v21959_v40 = vld [vmem:[#allocation98_spill] sm:$0xff]  ;;  %v21960_v61 = vld [vmem:[#allocation103_spill] sm:$0xff]  ;;  %7578 = vmatmul.mubr.f32.gmra.mrb[28].mxu1 %v3149_v18  ;;  %3160 = vmatprep.mubr.f32.mxu0 %v3159_v58  ;;  %v7802_v51 = vand.u32 4294901760, %v7801_v43 }
 0x447   : > { %11126 = vmatpush1.bf16.xpose.msra.mxu1 %v11125_v6  ;;  %v7814_v5 = vand.u32 4294901760, %v7813_v13  ;;  %7588 = vmatprep.mubr.f32.mxu1 %v3159_v58  ;;  %v3397_v28 = vsub.f32 %v21954_v19, %v20073_v4  ;;  %v21962_v11 = vand.u32 4294901760, %v21955_v41  ;;  %v10363_v33 = vpack.c.bf16 %v3404_v47, %v3392_v9  ;;  %v21968_v47 = vld [vmem:[#allocation262_spill] sm:$0xff] }
 0x448   : > { %11128 = vmatprep.subr.bf16.mxu1 %v11127_v20  ;;  %v7820_v59 = vand.u32 4294901760, %v7819_v23  ;;  %v7832_v57 = vand.u32 4294901760, %v7831_v49  ;;  %v21963_v18 = vand.u32 4294901760, %v21956_v62  ;;  %v21964_v43 = vand.u32 4294901760, %v21957_v36 }
 0x449   : > { %v3409_v37 = vsub.f32 %v21955_v41, %v21962_v11  ;;  %v21965_v52 = vand.u32 4294901760, %v21958_v42  ;;  %3166 = vmatmul.mubr.f32.gmra.mrb[30].mxu0 %v3165_v21  ;;  %v21966_v20 = vand.u32 4294901760, %v21959_v40  ;;  %v21967_v11 = vand.u32 4294901760, %v21960_v61 }
 0x44a   : > { %v7825_v6 = vsub.f32 %v21956_v62, %v21963_v18  ;;  %v3415_v54 = vsub.f32 %v21957_v36, %v21964_v43  ;;  %v7855_v49 = vsub.f32 %v21961_v0, %v20078_v48  ;;  %7594 = vmatmul.mubr.f32.gmra.mrb[30].mxu1 %v3165_v21  ;;  %3557 = vmatprep.mubr.f32.mxu0 %v16244_v7  ;;  %v20081_v18 = vand.u32 4294901760, %v21968_v47  ;;  %v21969_v43 = vld [vmem:[#allocation263_spill] sm:$0xff]  ;;  %v21970_v62 = vld [vmem:[#allocation121_spill] sm:$0xff]  ;;  %v21971_v48 = vld [vmem:[#allocation122_spill] sm:$0xff] }
 0x44b   : > { %v3427_v58 = vsub.f32 %v21958_v42, %v21965_v52  ;;  %v7837_v13 = vsub.f32 %v21959_v40, %v21966_v20  ;;  %v7843_v23 = vsub.f32 %v21960_v61, %v21967_v11  ;;  %v11129_v9 = vpack.c.bf16 %v7814_v5, %v7802_v51  ;;  %7985 = vmatprep.mubr.f32.mxu1 %v16244_v7 }
 0x44c   : > { %10362 = vmatpush1.bf16.xpose.msra.mxu0 %v10361_v53  ;;  %v11131_v20 = vpack.c.bf16 %v7832_v57, %v7820_v59  ;;  %v3398_v4 = vand.u32 4294901760, %v3397_v28  ;;  %v3410_v40 = vand.u32 4294901760, %v3409_v37  ;;  %v3416_v11 = vand.u32 4294901760, %v3415_v54  ;;  %v21974_v53 = vld [vmem:[#allocation107_spill] sm:$0xff] }
 0x44d   : > { %10364 = vmatprep.subr.bf16.mxu0 %v10363_v33  ;;  %v3428_v61 = vand.u32 4294901760, %v3427_v58  ;;  %v20086_v42 = vand.u32 4294901760, %v21970_v62  ;;  %v20085_v21 = vand.u32 4294901760, %v21971_v48  ;;  %v7826_v0 = vand.u32 4294901760, %v7825_v6  ;;  %v21973_v33 = vld [vmem:[#allocation106_spill] sm:$0xff]  ;;  %v21975_v58 = vld [vmem:[#allocation269_spill] sm:$0xff] }
 0x44e   : > { %v7838_v36 = vand.u32 4294901760, %v7837_v13  ;;  %v7844_v51 = vand.u32 4294901760, %v7843_v23  ;;  %v7856_v5 = vand.u32 4294901760, %v7855_v49  ;;  %v3421_v52 = vsub.f32 %v21968_v47, %v20081_v18  ;;  %v21976_v13 = vld [vmem:[#allocation119_spill] sm:$0xff] }
 0x44f   : > { %11130 = vmatpush1.bf16.xpose.msra.mxu1 %v11129_v9  ;;  %v21972_v57 = vand.u32 4294901760, %v21969_v43  ;;  %v20087_v28 = vand.u32 4294901760, %v21974_v53  ;;  %v10365_v54 = vpack.c.bf16 %v3410_v40, %v3398_v4  ;;  %v20091_v6 = vand.u32 4294901760, %v21975_v58 }
 0x450   : > { %11132 = vmatprep.subr.bf16.mxu1 %v11131_v20  ;;  %v20095_v23 = vand.u32 4294901760, %v21976_v13  ;;  %v10367_v49 = vpack.c.bf16 %v3428_v61, %v3416_v11  ;;  %v3439_v9 = vsub.f32 %v21970_v62, %v20086_v42  ;;  %v3451_v18 = vsub.f32 %v21971_v48, %v20085_v21  ;;  %v21979_v11 = vld [vmem:[#allocation125_spill] sm:$0xff]  ;;  %v21981_v42 = vld [vmem:[#allocation190_spill] sm:$0xff] }
 0x451   : > { %v3433_v59 = vsub.f32 %v21969_v43, %v21972_v57  ;;  %v11133_v57 = vpack.c.bf16 %v7838_v36, %v7826_v0  ;;  %v11135_v7 = vpack.c.bf16 %v7856_v5, %v7844_v51  ;;  %v3422_v37 = vand.u32 4294901760, %v3421_v52  ;;  %v21978_v0 = vld [vmem:[#allocation124_spill] sm:$0xff]  ;;  %v21985_v62 = vld [vmem:[#allocation18_spill] sm:$0xff] }
 0x452   : > { %v21977_v20 = vand.u32 4294901760, %v21973_v33  ;;  %v7861_v4 = vsub.f32 %v21974_v53, %v20087_v28  ;;  %v7867_v61 = vsub.f32 %v21975_v58, %v20091_v6  ;;  %v7879_v36 = vsub.f32 %v21976_v13, %v20095_v23  ;;  %v21984_v6 = vld [vmem:[#allocation12_spill] sm:$0xff] }
 0x453   : > { %v3434_v43 = vand.u32 4294901760, %v3433_v59  ;;  %v20098_v51 = vand.u32 4294901760, %v21979_v11  ;;  %v3440_v5 = vand.u32 4294901760, %v3439_v9  ;;  %v3452_v59 = vand.u32 4294901760, %v3451_v18 }
 0x454   : > { %v7849_v40 = vsub.f32 %v21973_v33, %v21977_v20  ;;  %10366 = vmatpush1.bf16.xpose.msra.mxu0 %v10365_v54  ;;  %v21980_v20 = vld [vmem:[#allocation187_spill] sm:$0xff]  ;;  %v20097_v28 = vand.u32 4294901760, %v21981_v42  ;;  %v21983_v33 = vld [vmem:[#allocation128_spill] sm:$0xff]  ;;  %v7862_v13 = vand.u32 4294901760, %v7861_v4  ;;  %v7880_v9 = vand.u32 4294901760, %v7879_v36 }
 0x455   : > { %10368 = vmatprep.subr.bf16.mxu0 %v10367_v49  ;;  %v21982_v54 = vld [vmem:[#allocation127_spill] sm:$0xff]  ;;  %v10369_v23 = vpack.c.bf16 %v3434_v43, %v3422_v37  ;;  %v7868_v49 = vand.u32 4294901760, %v7867_v61  ;;  %v21986_v18 = vand.u32 4294901760, %v21978_v0  ;;  %v3457_v53 = vsub.f32 %v21979_v11, %v20098_v51 }
 0x456   : > { %v7850_v52 = vand.u32 4294901760, %v7849_v40  ;;  %v10371_v48 = vpack.c.bf16 %v3452_v59, %v3440_v5  ;;  %v21987_v58 = vand.u32 4294901760, %v21980_v20  ;;  %v3475_v43 = vsub.f32 %v21981_v42, %v20097_v28  ;;  %v21992_v59 = vld [vmem:[#allocation199_spill] sm:$0xff]  ;;  %v21993_v28 = vld [vmem:[#allocation25_spill] sm:$0xff] }
 0x457   : > { %11134 = vmatpush1.bf16.xpose.msra.mxu1 %v11133_v57  ;;  %v3445_v21 = vsub.f32 %v21978_v0, %v21986_v18  ;;  %v21989_v57 = vand.u32 4294901760, %v21983_v33  ;;  %v21990_v4 = vand.u32 4294901760, %v21984_v6  ;;  %v21991_v36 = vand.u32 4294901760, %v21985_v62  ;;  %v21995_v0 = vld [vmem:[#allocation212_spill] sm:$0xff] }
 0x458   : > { %11136 = vmatprep.subr.bf16.mxu1 %v11135_v7  ;;  %v3463_v47 = vsub.f32 %v21980_v20, %v21987_v58  ;;  %v21988_v7 = vand.u32 4294901760, %v21982_v54  ;;  %v11137_v5 = vpack.c.bf16 %v7862_v13, %v7850_v52  ;;  %v20109_v18 = vand.u32 4294901760, %v21992_v59 }
 0x459   : > { %v7885_v40 = vsub.f32 %v21983_v33, %v21989_v57  ;;  %v7891_v61 = vsub.f32 %v21984_v6, %v21990_v4  ;;  %v7903_v58 = vsub.f32 %v21985_v62, %v21991_v36  ;;  %v20108_v51 = vand.u32 4294901760, %v21993_v28  ;;  %v21994_v33 = vld [vmem:[#allocation39_spill] sm:$0xff] }
 0x45a   : > { %v7873_v37 = vsub.f32 %v21982_v54, %v21988_v7  ;;  %v11139_v42 = vpack.c.bf16 %v7880_v9, %v7868_v49  ;;  %v3446_v7 = vand.u32 4294901760, %v3445_v21  ;;  %v3458_v54 = vand.u32 4294901760, %v3457_v53  ;;  %v21997_v53 = vld [vmem:[#allocation27_spill] sm:$0xff]  ;;  %v21998_v49 = vld [vmem:[#allocation213_spill] sm:$0xff] }
 0x45b   : > { %v3464_v20 = vand.u32 4294901760, %v3463_v47  ;;  %v3476_v57 = vand.u32 4294901760, %v3475_v43  ;;  %v20111_v11 = vand.u32 4294901760, %v21994_v33  ;;  %v20110_v4 = vand.u32 4294901760, %v21995_v0  ;;  %v21999_v43 = vld [vmem:[#allocation220_spill] sm:$0xff] }
 0x45c   : > { %10370 = vmatpush1.bf16.xpose.msra.mxu0 %v10369_v23  ;;  %v7874_v6 = vand.u32 4294901760, %v7873_v37  ;;  %v7886_v41 = vand.u32 4294901760, %v7885_v40  ;;  %v7892_v19 = vand.u32 4294901760, %v7891_v61  ;;  %v7904_v36 = vand.u32 4294901760, %v7903_v58 }
 0x45d   : > { %10372 = vmatprep.subr.bf16.mxu0 %v10371_v48  ;;  %v3469_v13 = vsub.f32 %v21992_v59, %v20109_v18  ;;  %v3481_v21 = vsub.f32 %v21993_v28, %v20108_v51  ;;  %v21996_v48 = vld [vmem:[#allocation21_spill] sm:$0xff]  ;;  %v20112_v23 = vand.u32 4294901760, %v21997_v53  ;;  %v10373_v52 = vpack.c.bf16 %v3458_v54, %v3446_v7  ;;  %v22018_v59 = vld [vmem:[#allocation90_spill] sm:$0xff] }
 0x45e   : > { %v20116_v9 = vand.u32 4294901760, %v21998_v49  ;;  %v20119_v37 = vand.u32 4294901760, %v21999_v43  ;;  %v10375_v40 = vpack.c.bf16 %v3476_v57, %v3464_v20  ;;  %v3487_v61 = vsub.f32 %v21994_v33, %v20111_v11  ;;  %v22002_v57 = vld [vmem:[#allocation45_spill] sm:$0xff]  ;;  %v22004_v11 = vld [vmem:[#allocation72_spill] sm:$0xff] }
 0x45f   : > { %11138 = vmatpush1.bf16.xpose.msra.mxu1 %v11137_v5  ;;  %v3499_v58 = vsub.f32 %v21995_v0, %v20110_v4  ;;  %v11141_v5 = vpack.c.bf16 %v7886_v41, %v7874_v6  ;;  %v11143_v51 = vpack.c.bf16 %v7904_v36, %v7892_v19  ;;  %v3470_v18 = vand.u32 4294901760, %v3469_v13  ;;  %v22001_v19 = vld [vmem:[#allocation222_spill] sm:$0xff]  ;;  %v22008_v6 = vld [vmem:[#allocation84_spill] sm:$0xff] }
 0x460   : > { %11140 = vmatprep.subr.bf16.mxu1 %v11139_v42  ;;  %v3482_v47 = vand.u32 4294901760, %v3481_v21  ;;  %v22000_v42 = vand.u32 4294901760, %v21996_v48  ;;  %v7909_v20 = vsub.f32 %v21997_v53, %v20112_v23  ;;  %v7915_v7 = vsub.f32 %v21998_v49, %v20116_v9  ;;  %v22007_v9 = vld [vmem:[#allocation69_spill] sm:$0xff] }
 0x461   : > { %v7927_v41 = vsub.f32 %v21999_v43, %v20119_v37  ;;  %v20123_v36 = vand.u32 4294901760, %v22002_v57  ;;  %v3488_v13 = vand.u32 4294901760, %v3487_v61  ;;  %v3500_v21 = vand.u32 4294901760, %v3499_v58 }
 0x462   : > { %v7897_v54 = vsub.f32 %v21996_v48, %v22000_v42  ;;  %v22003_v42 = vld [vmem:[#allocation66_spill] sm:$0xff]  ;;  %v20122_v23 = vand.u32 4294901760, %v22004_v11  ;;  %v22006_v48 = vld [vmem:[#allocation225_spill] sm:$0xff]  ;;  %v10377_v33 = vpack.c.bf16 %v3482_v47, %v3470_v18  ;;  %v7910_v43 = vand.u32 4294901760, %v7909_v20 }
 0x463   : > { %v20132_v28 = vand.u32 4294901760, %v22008_v6  ;;  %v7928_v61 = vand.u32 4294901760, %v7927_v41  ;;  %v22009_v58 = vand.u32 4294901760, %v22001_v19  ;;  %v3505_v53 = vsub.f32 %v22002_v57, %v20123_v36 }
 0x464   : > { %10374 = vmatpush1.bf16.xpose.msra.mxu0 %v10373_v52  ;;  %v22005_v52 = vld [vmem:[#allocation51_spill] sm:$0xff]  ;;  %v7898_v37 = vand.u32 4294901760, %v7897_v54  ;;  %v10379_v0 = vpack.c.bf16 %v3500_v21, %v3488_v13  ;;  %v22010_v49 = vand.u32 4294901760, %v22003_v42  ;;  %v3523_v47 = vsub.f32 %v22004_v11, %v20122_v23  ;;  %v22014_v21 = vld [vmem:[#allocation81_spill] sm:$0xff] }
 0x465   : > { %10376 = vmatprep.subr.bf16.mxu0 %v10375_v40  ;;  %v7916_v40 = vand.u32 4294901760, %v7915_v7  ;;  %v3493_v4 = vsub.f32 %v22001_v19, %v22009_v58  ;;  %v22012_v54 = vand.u32 4294901760, %v22006_v48  ;;  %v22013_v7 = vand.u32 4294901760, %v22007_v9  ;;  %v22015_v23 = vld [vmem:[#allocation87_spill] sm:$0xff]  ;;  %v22017_v19 = vld [vmem:[#allocation105_spill] sm:$0xff] }
 0x466   : > { %v3511_v18 = vsub.f32 %v22003_v42, %v22010_v49  ;;  %v11145_v13 = vpack.c.bf16 %v7910_v43, %v7898_v37  ;;  %v7951_v49 = vsub.f32 %v22008_v6, %v20132_v28  ;;  %v20133_v28 = vand.u32 4294901760, %v22018_v59 }
 0x467   : > { %11142 = vmatpush1.bf16.xpose.msra.mxu1 %v11141_v5  ;;  %v7933_v20 = vsub.f32 %v22006_v48, %v22012_v54  ;;  %v7939_v41 = vsub.f32 %v22007_v9, %v22013_v7  ;;  %v11147_v11 = vpack.c.bf16 %v7928_v61, %v7916_v40  ;;  %v3524_v54 = vand.u32 4294901760, %v3523_v47  ;;  %v22016_v48 = vld [vmem:[#allocation108_spill] sm:$0xff] }
 0x468   : > { %11144 = vmatprep.subr.bf16.mxu1 %v11143_v51  ;;  %v22011_v51 = vand.u32 4294901760, %v22005_v52  ;;  %v3512_v42 = vand.u32 4294901760, %v3511_v18  ;;  %v20136_v57 = vand.u32 4294901760, %v22016_v48  ;;  %v20135_v7 = vand.u32 4294901760, %v22017_v19  ;;  %v22022_v18 = vld [vmem:[#allocation111_spill] sm:$0xff] }
 0x469   : > { %v7934_v37 = vand.u32 4294901760, %v7933_v20  ;;  %v7940_v9 = vand.u32 4294901760, %v7939_v41  ;;  %v7952_v58 = vand.u32 4294901760, %v7951_v49  ;;  %v22019_v36 = vand.u32 4294901760, %v22014_v21 }
 0x46a   : > { %v7921_v5 = vsub.f32 %v22005_v52, %v22011_v51  ;;  %v3494_v51 = vand.u32 4294901760, %v3493_v4  ;;  %v3506_v52 = vand.u32 4294901760, %v3505_v53  ;;  %v22020_v4 = vand.u32 4294901760, %v22015_v23  ;;  %v22021_v53 = vld [vmem:[#allocation96_spill] sm:$0xff] }
 0x46b   : > { %v20134_v40 = vand.u32 4294901760, %v22021_v53  ;;  %v20137_v47 = vand.u32 4294901760, %v22022_v18  ;;  %v10383_v20 = vpack.c.bf16 %v3524_v54, %v3512_v42  ;;  %v3535_v41 = vsub.f32 %v22016_v48, %v20136_v57 }
 0x46c   : > { %10378 = vmatpush1.bf16.xpose.msra.mxu0 %v10377_v33  ;;  %v7922_v43 = vand.u32 4294901760, %v7921_v5  ;;  %v3517_v33 = vsub.f32 %v22014_v21, %v22019_v36  ;;  %v10381_v61 = vpack.c.bf16 %v3506_v52, %v3494_v51  ;;  %v20139_v5 = vand.u32 4294901760, %v16000_v35 }
 0x46d   : > { %10380 = vmatprep.subr.bf16.mxu0 %v10379_v0  ;;  %v3529_v0 = vsub.f32 %v22015_v23, %v22020_v4  ;;  %v3547_v36 = vsub.f32 %v22017_v19, %v20135_v7  ;;  %v7945_v49 = vsub.f32 %v22018_v59, %v20133_v28  ;;  %v7957_v42 = vsub.f32 %v22021_v53, %v20134_v40  ;;  %v22023_v4 = vld [vmem:[#allocation117_spill] sm:$0xff]  ;;  %v22024_v7 = vld [vmem:[#allocation123_spill] sm:$0xff] }
 0x46e   : > { %v3518_v52 = vand.u32 4294901760, %v3517_v33  ;;  %v7963_v54 = vsub.f32 %v22022_v18, %v20137_v47  ;;  %v20142_v28 = vand.u32 4294901760, %v22023_v4  ;;  %v20140_v57 = vand.u32 4294901760, %v22024_v7 }
 0x46f   : > { %11146 = vmatpush1.bf16.xpose.msra.mxu1 %v11145_v13  ;;  %v11149_v13 = vpack.c.bf16 %v7934_v37, %v7922_v43  ;;  %v3530_v51 = vand.u32 4294901760, %v3529_v0  ;;  %v7975_v43 = vsub.f32 %v16000_v35, %v20139_v5  ;;  %v20143_v37 = vand.u32 4294901760, %v16012_v24 }
 0x470   : > { %11148 = vmatprep.subr.bf16.mxu1 %v11147_v11  ;;  %v11151_v11 = vpack.c.bf16 %v7952_v58, %v7940_v9  ;;  %v3536_v9 = vand.u32 4294901760, %v3535_v41  ;;  %v3548_v58 = vand.u32 4294901760, %v3547_v36  ;;  %v7946_v33 = vand.u32 4294901760, %v7945_v49 }
 0x471   : > { %v10385_v0 = vpack.c.bf16 %v3530_v51, %v3518_v52  ;;  %v7958_v40 = vand.u32 4294901760, %v7957_v42  ;;  %v7964_v47 = vand.u32 4294901760, %v7963_v54  ;;  %v7976_v18 = vand.u32 4294901760, %v7975_v43 }
 0x472   : > { %v3541_v5 = vsub.f32 %v16012_v24, %v20143_v37  ;;  %v10387_v41 = vpack.c.bf16 %v3548_v58, %v3536_v9  ;;  %v7981_v49 = vsub.f32 %v22024_v7, %v20140_v57  ;;  %v11159_v58 = vpack.c.bf16 %v21610_v3, %v21609_v17  ;;  %v22043_v37 = vld [vmem:[#allocation67_spill] sm:$0xff] }
 0x473   : > { %v11153_v36 = vpack.c.bf16 %v7958_v40, %v7946_v33  ;;  %v10391_v40 = vpack.c.bf16 %v21608_v1, %v21607_v27  ;;  %v22026_v33 = vld [vmem:[#allocation32_spill] sm:$0xff] }
 0x474   : > { %10382 = vmatpush1.bf16.xpose.msra.mxu0 %v10381_v61  ;;  %v20141_v61 = vand.u32 4294901760, %v16026_v8  ;;  %v3542_v52 = vand.u32 4294901760, %v3541_v5  ;;  %v7982_v54 = vand.u32 4294901760, %v7981_v49 }
 0x475   : > { %10384 = vmatprep.subr.bf16.mxu0 %v10383_v20  ;;  %v3553_v20 = vsub.f32 %v22023_v4, %v20142_v28  ;;  %v22042_v28 = vld [vmem:[#allocation266_spill] sm:$0xff] }
 0x477   : > { %11150 = vmatpush1.bf16.xpose.msra.mxu1 %v11149_v13  ;;  %v7969_v13 = vsub.f32 %v16026_v8, %v20141_v61  ;;  %v3554_v51 = vand.u32 4294901760, %v3553_v20  ;;  %v22028_v20 = vld [vmem:[#allocation19_spill] sm:$0xff] }
 0x478   : > { %11152 = vmatprep.subr.bf16.mxu1 %v11151_v11  ;;  %v11155_v11 = vpack.c.bf16 %v7976_v18, %v7964_v47  ;;  %v10393_v18 = vpack.c.bf16 %v21662_v15, %v21661_v32  ;;  %v22025_v47 = vld [vmem:[#allocation24_spill] sm:$0xff] }
 0x479   : > { %v7970_v42 = vand.u32 4294901760, %v7969_v13  ;;  %v10389_v43 = vpack.c.bf16 %v3554_v51, %v3542_v52  ;;  %v10395_v5 = vpack.c.bf16 %v22025_v47, %v21708_v56  ;;  %v22030_v13 = vld [vmem:[#allocation22_spill] sm:$0xff] }
 0x47a   : > { %v22032_v52 = vld [vmem:[#allocation30_spill] sm:$0xff] }
 0x47b   : > { %v11157_v9 = vpack.c.bf16 %v7982_v54, %v7970_v42  ;;  %v22033_v51 = vld [vmem:[#allocation194_spill] sm:$0xff]  ;;  %v22034_v54 = vld [vmem:[#allocation55_spill] sm:$0xff] }
 0x47c   : > { %10386 = vmatpush1.bf16.xpose.msra.mxu0 %v10385_v0  ;;  %v22027_v0 = vld [vmem:[#allocation17_spill] sm:$0xff]  ;;  %v10397_v42 = vpack.c.bf16 %v22033_v51, %v22032_v52 }
 0x47d   : > { %10388 = vmatprep.subr.bf16.mxu0 %v10387_v41  ;;  %v11161_v41 = vpack.c.bf16 %v22028_v20, %v22027_v0 }
 0x47f   : > { %11154 = vmatpush1.bf16.xpose.msra.mxu1 %v11153_v36  ;;  %v22029_v36 = vld [vmem:[#allocation26_spill] sm:$0xff] }
 0x480   : > { %11156 = vmatprep.subr.bf16.mxu1 %v11155_v11  ;;  %v11163_v49 = vpack.c.bf16 %v22030_v13, %v22029_v36  ;;  %v22031_v11 = vld [vmem:[#allocation256_spill] sm:$0xff] }
 0x484   : > { %10390 = vmatpush1.bf16.xpose.msra.mxu0 %v10389_v43  ;;  %v22035_v43 = vld [vmem:[#allocation140_spill] sm:$0xff] }
 0x485   : > { %10392 = vmatprep.subr.bf16.mxu0 %v10391_v40  ;;  %v22036_v40 = vld [vmem:[#allocation145_spill] sm:$0xff] }
 0x487   : > { %11158 = vmatpush1.bf16.xpose.msra.mxu1 %v11157_v9  ;;  %v10399_v9 = vpack.c.bf16 %v22036_v40, %v22035_v43 }
 0x488   : > { %11160 = vmatprep.subr.bf16.mxu1 %v11159_v58  ;;  %v22037_v58 = vld [vmem:[#allocation56_spill] sm:$0xff] }
 0x48b   : > { %3559 = vmatmul.mubr.f32.vlgmr.msra.gmra.mrb[0].mxu0 %v22026_v33 }
 0x48c   : > { %10394 = vmatpush1.bf16.xpose.msra.mxu0 %v10393_v18  ;;  %3565 = vmatprep.mubr.f32.mxu0 %v22031_v11  ;;  %v22038_v18 = vld [vmem:[#allocation130_spill] sm:$0xff] }
 0x48d   : > { %10396 = vmatprep.subr.bf16.mxu0 %v10395_v5  ;;  %v22039_v5 = vld [vmem:[#allocation139_spill] sm:$0xff] }
 0x48e   : > { %7987 = vmatmul.mubr.f32.vlgmr.msra.gmra.mrb[0].mxu1 %v22026_v33  ;;  %v11165_v57 = vpack.c.bf16 %v22039_v5, %v22038_v18  ;;  %v22046_v5 = vld [vmem:[#allocation154_spill] sm:$0xff]  ;;  %v22048_v18 = vld [vmem:[#allocation267_spill] sm:$0xff] }
 0x48f   : > { %11162 = vmatpush1.bf16.xpose.msra.mxu1 %v11161_v41  ;;  %7993 = vmatprep.mubr.f32.mxu1 %v22031_v11  ;;  %v22040_v41 = vld [vmem:[#allocation142_spill] sm:$0xff]  ;;  %v22045_v11 = vld [vmem:[#allocation149_spill] sm:$0xff] }
 0x490   : > { %11164 = vmatprep.subr.bf16.mxu1 %v11163_v49  ;;  %3567 = vmatmul.mubr.f32.gmra.mrb[2].mxu0 %v22034_v54  ;;  %v22041_v49 = vld [vmem:[#allocation143_spill] sm:$0xff] }
 0x491   : > { %3573 = vmatprep.mubr.f32.mxu0 %v22037_v58  ;;  %v11167_v61 = vpack.c.bf16 %v22041_v49, %v22040_v41  ;;  %v22050_v49 = vld [vmem:[#allocation151_spill] sm:$0xff] }
 0x492   : > { %7995 = vmatmul.mubr.f32.gmra.mrb[2].mxu1 %v22034_v54  ;;  %v22044_v54 = vld [vmem:[#allocation148_spill] sm:$0xff] }
 0x493   : > { %8001 = vmatprep.mubr.f32.mxu1 %v22037_v58  ;;  %v10401_v33 = vpack.c.bf16 %v22045_v11, %v22044_v54  ;;  %v22047_v58 = vld [vmem:[#allocation155_spill] sm:$0xff] }
 0x494   : > { %10398 = vmatpush1.bf16.xpose.msra.mxu0 %v10397_v42  ;;  %v10403_v42 = vpack.c.bf16 %v22047_v58, %v22046_v5  ;;  %v22055_v58 = vld [vmem:[#allocation204_spill] sm:$0xff] }
 0x495   : > { %10400 = vmatprep.subr.bf16.mxu0 %v10399_v9  ;;  %3575 = vmatmul.mubr.f32.gmra.mrb[4].mxu0 %v22042_v28  ;;  %v22049_v9 = vld [vmem:[#allocation158_spill] sm:$0xff] }
 0x496   : > { %8003 = vmatmul.mubr.f32.gmra.mrb[4].mxu1 %v22042_v28  ;;  %3581 = vmatprep.mubr.f32.mxu0 %v22043_v37  ;;  %v22051_v28 = vld [vmem:[#allocation152_spill] sm:$0xff] }
 0x497   : > { %11166 = vmatpush1.bf16.xpose.msra.mxu1 %v11165_v57  ;;  %8009 = vmatprep.mubr.f32.mxu1 %v22043_v37  ;;  %v11169_v41 = vpack.c.bf16 %v22051_v28, %v22050_v49  ;;  %v22052_v57 = vld [vmem:[#allocation197_spill] sm:$0xff] }
 0x498   : > { %11168 = vmatprep.subr.bf16.mxu1 %v11167_v61  ;;  %v22053_v61 = vld [vmem:[#allocation202_spill] sm:$0xff]  ;;  %v22056_v49 = vld [vmem:[#allocation221_spill] sm:$0xff] }
 0x499   : > { %3583 = vmatmul.mubr.f32.gmra.mrb[6].mxu0 %v22048_v18  ;;  %v11171_v37 = vpack.c.bf16 %v22053_v61, %v22052_v57 }
 0x49a   : > { %8011 = vmatmul.mubr.f32.gmra.mrb[6].mxu1 %v22048_v18  ;;  %3589 = vmatprep.mubr.f32.mxu0 %v22049_v9  ;;  %v22054_v18 = vld [vmem:[#allocation203_spill] sm:$0xff] }
 0x49b   : > { %8017 = vmatprep.mubr.f32.mxu1 %v22049_v9  ;;  %v10405_v28 = vpack.c.bf16 %v22055_v58, %v22054_v18  ;;  %v22057_v9 = vld [vmem:[#allocation224_spill] sm:$0xff]  ;;  %v22062_v58 = vld [vmem:[#allocation13_spill] sm:$0xff] }
 0x49c   : > { %10402 = vmatpush1.bf16.xpose.msra.mxu0 %v10401_v33  ;;  %v10407_v33 = vpack.c.bf16 %v22057_v9, %v22056_v49  ;;  %v22064_v9 = vld [vmem:[#allocation241_spill] sm:$0xff] }
 0x49d   : > { %10404 = vmatprep.subr.bf16.mxu0 %v10403_v42  ;;  %3591 = vmatmul.mubr.f32.gmra.mrb[8].mxu0 %v16853_v60  ;;  %v22058_v42 = vld [vmem:[#allocation31_spill] sm:$0xff] }
 0x49e   : > { %8019 = vmatmul.mubr.f32.gmra.mrb[8].mxu1 %v16853_v60  ;;  %3597 = vmatprep.mubr.f32.mxu0 %v16862_v34  ;;  %v22059_v60 = vld [vmem:[#allocation209_spill] sm:$0xff] }
 0x49f   : > { %11170 = vmatpush1.bf16.xpose.msra.mxu1 %v11169_v41  ;;  %8025 = vmatprep.mubr.f32.mxu1 %v16862_v34  ;;  %v11173_v61 = vpack.c.bf16 %v22059_v60, %v22058_v42  ;;  %v22060_v41 = vld [vmem:[#allocation233_spill] sm:$0xff] }
 0x4a0   : > { %11172 = vmatprep.subr.bf16.mxu1 %v11171_v37  ;;  %v22061_v37 = vld [vmem:[#allocation237_spill] sm:$0xff] }
 0x4a1   : > { %3599 = vmatmul.mubr.f32.gmra.mrb[10].mxu0 %v16867_v25  ;;  %v11175_v34 = vpack.c.bf16 %v22061_v37, %v22060_v41  ;;  %v22065_v42 = vld [vmem:[#allocation253_spill] sm:$0xff] }
 0x4a2   : > { %8027 = vmatmul.mubr.f32.gmra.mrb[10].mxu1 %v16867_v25  ;;  %3605 = vmatprep.mubr.f32.mxu0 %v16878_v14  ;;  %v22063_v25 = vld [vmem:[#allocation238_spill] sm:$0xff]  ;;  %v22068_v37 = vld [vmem:[#allocation161_spill] sm:$0xff] }
 0x4a3   : > { %8033 = vmatprep.mubr.f32.mxu1 %v16878_v14  ;;  %v10409_v60 = vpack.c.bf16 %v22064_v9, %v22063_v25  ;;  %v22066_v14 = vld [vmem:[#allocation257_spill] sm:$0xff] }
 0x4a4   : > { %10406 = vmatpush1.bf16.xpose.msra.mxu0 %v10405_v28  ;;  %v10411_v28 = vpack.c.bf16 %v22066_v14, %v22065_v42  ;;  %v22072_v9 = vld [vmem:[#allocation133_spill] sm:$0xff]  ;;  %v22073_v14 = vld [vmem:[#allocation136_spill] sm:$0xff] }
 0x4a5   : > { %10408 = vmatprep.subr.bf16.mxu0 %v10407_v33  ;;  %3607 = vmatmul.mubr.f32.gmra.mrb[12].mxu0 %v22062_v58  ;;  %v22067_v33 = vld [vmem:[#allocation116_spill] sm:$0xff] }
 0x4a6   : > { %8035 = vmatmul.mubr.f32.gmra.mrb[12].mxu1 %v22062_v58  ;;  %3613 = vmatprep.mubr.f32.mxu0 %v16929_v12  ;;  %v22069_v58 = vld [vmem:[#allocation242_spill] sm:$0xff]  ;;  %v22075_v42 = vld [vmem:[#allocation28_spill] sm:$0xff] }
 0x4a7   : > { %11174 = vmatpush1.bf16.xpose.msra.mxu1 %v11173_v61  ;;  %8041 = vmatprep.mubr.f32.mxu1 %v16929_v12  ;;  %v11177_v41 = vpack.c.bf16 %v22069_v58, %v22068_v37  ;;  %v22070_v61 = vld [vmem:[#allocation196_spill] sm:$0xff]  ;;  %v22076_v37 = vld [vmem:[#allocation35_spill] sm:$0xff] }
 0x4a8   : > { %11176 = vmatprep.subr.bf16.mxu1 %v11175_v34  ;;  %v22071_v34 = vld [vmem:[#allocation198_spill] sm:$0xff] }
 0x4a9   : > { %3615 = vmatmul.mubr.f32.gmra.mrb[14].mxu0 %v16956_v2  ;;  %v11179_v12 = vpack.c.bf16 %v22071_v34, %v22070_v61 }
 0x4aa   : > { %8043 = vmatmul.mubr.f32.gmra.mrb[14].mxu1 %v16956_v2  ;;  %3621 = vmatprep.mubr.f32.mxu0 %v22067_v33  ;;  %v22074_v2 = vld [vmem:[#allocation23_spill] sm:$0xff] }
 0x4ab   : > { %8049 = vmatprep.mubr.f32.mxu1 %v22067_v33  ;;  %v10413_v58 = vpack.c.bf16 %v22075_v42, %v22074_v2  ;;  %v22077_v33 = vld [vmem:[#allocation40_spill] sm:$0xff] }
 0x4ac   : > { %10410 = vmatpush1.bf16.xpose.msra.mxu0 %v10409_v60  ;;  %v10415_v60 = vpack.c.bf16 %v22077_v33, %v22076_v37  ;;  %v22082_v33 = vld [vmem:[#allocation208_spill] sm:$0xff]  ;;  %v22084_v37 = vld [vmem:[#allocation49_spill] sm:$0xff] }
 0x4ad   : > { %10412 = vmatprep.subr.bf16.mxu0 %v10411_v28  ;;  %3623 = vmatmul.mubr.f32.gmra.mrb[16].mxu0 %v22072_v9  ;;  %v22078_v28 = vld [vmem:[#allocation29_spill] sm:$0xff] }
 0x4ae   : > { %8051 = vmatmul.mubr.f32.gmra.mrb[16].mxu1 %v22072_v9  ;;  %3629 = vmatprep.mubr.f32.mxu0 %v22073_v14  ;;  %v22079_v9 = vld [vmem:[#allocation205_spill] sm:$0xff] }
 0x4af   : > { %11178 = vmatpush1.bf16.xpose.msra.mxu1 %v11177_v41  ;;  %8057 = vmatprep.mubr.f32.mxu1 %v22073_v14  ;;  %v11181_v34 = vpack.c.bf16 %v22079_v9, %v22078_v28  ;;  %v22080_v41 = vld [vmem:[#allocation217_spill] sm:$0xff] }
 0x4b0   : > { %11180 = vmatprep.subr.bf16.mxu1 %v11179_v12  ;;  %v22081_v12 = vld [vmem:[#allocation43_spill] sm:$0xff] }
 0x4b1   : > { %3631 = vmatmul.mubr.f32.gmra.mrb[18].mxu0 %v17035_v30  ;;  %v11183_v14 = vpack.c.bf16 %v22081_v12, %v22080_v41  ;;  %v22087_v12 = vld [vmem:[#allocation50_spill] sm:$0xff] }
 0x4b2   : > { %8059 = vmatmul.mubr.f32.gmra.mrb[18].mxu1 %v17035_v30  ;;  %3637 = vmatprep.mubr.f32.mxu0 %v17046_v39  ;;  %v22083_v30 = vld [vmem:[#allocation44_spill] sm:$0xff] }
 0x4b3   : > { %8065 = vmatprep.mubr.f32.mxu1 %v17046_v39  ;;  %v10417_v9 = vpack.c.bf16 %v22084_v37, %v22083_v30  ;;  %v22085_v39 = vld [vmem:[#allocation48_spill] sm:$0xff] }
 0x4b4   : > { %10414 = vmatpush1.bf16.xpose.msra.mxu0 %v10413_v58  ;;  %v10419_v58 = vpack.c.bf16 %v21886_v22, %v21879_v45  ;;  %v22091_v22 = vld [vmem:[#allocation99_spill] sm:$0xff] }
 0x4b5   : > { %10416 = vmatprep.subr.bf16.mxu0 %v10415_v60  ;;  %3639 = vmatmul.mubr.f32.gmra.mrb[20].mxu0 %v17057_v38  ;;  %v22086_v60 = vld [vmem:[#allocation57_spill] sm:$0xff]  ;;  %v22093_v45 = vld [vmem:[#allocation231_spill] sm:$0xff] }
 0x4b6   : > { %8067 = vmatmul.mubr.f32.gmra.mrb[20].mxu1 %v17057_v38  ;;  %3645 = vmatprep.mubr.f32.mxu0 %v22082_v33  ;;  %v22088_v38 = vld [vmem:[#allocation218_spill] sm:$0xff] }
 0x4b7   : > { %11182 = vmatpush1.bf16.xpose.msra.mxu1 %v11181_v34  ;;  %8073 = vmatprep.mubr.f32.mxu1 %v22082_v33  ;;  %v11185_v41 = vpack.c.bf16 %v22088_v38, %v22087_v12  ;;  %v22090_v33 = vld [vmem:[#allocation78_spill] sm:$0xff] }
 0x4b8   : > { %11184 = vmatprep.subr.bf16.mxu1 %v11183_v14  ;;  %v22089_v14 = vld [vmem:[#allocation62_spill] sm:$0xff] }
 0x4b9   : > { %3647 = vmatmul.mubr.f32.gmra.mrb[22].mxu0 %v22085_v39  ;;  %v11187_v34 = vpack.c.bf16 %v22089_v14, %v21887_v50  ;;  %v22096_v14 = vld [vmem:[#allocation58_spill] sm:$0xff] }
 0x4ba   : > { %8075 = vmatmul.mubr.f32.gmra.mrb[22].mxu1 %v22085_v39  ;;  %3653 = vmatprep.mubr.f32.mxu0 %v22086_v60  ;;  %v22092_v39 = vld [vmem:[#allocation230_spill] sm:$0xff] }
 0x4bb   : > { %8081 = vmatprep.mubr.f32.mxu1 %v22086_v60  ;;  %v10421_v38 = vpack.c.bf16 %v22093_v45, %v22092_v39  ;;  %v22094_v60 = vld [vmem:[#allocation271_spill] sm:$0xff] }
 0x4bc   : > { %10418 = vmatpush1.bf16.xpose.msra.mxu0 %v10417_v9  ;;  %v10423_v9 = vpack.c.bf16 %v21920_v44, %v21919_v29  ;;  %v22099_v44 = vld [vmem:[#allocation280_spill] sm:$0xff] }
 0x4bd   : > { %10420 = vmatprep.subr.bf16.mxu0 %v10419_v58  ;;  %3655 = vmatmul.mubr.f32.gmra.mrb[24].mxu0 %v22090_v33  ;;  %v22095_v58 = vld [vmem:[#allocation274_spill] sm:$0xff] }
 0x4be   : > { %8083 = vmatmul.mubr.f32.gmra.mrb[24].mxu1 %v22090_v33  ;;  %3661 = vmatprep.mubr.f32.mxu0 %v22091_v22  ;;  %v11189_v33 = vpack.c.bf16 %v21918_v63, %v22096_v14  ;;  %v22109_v63 = vld [vmem:[#allocation97_spill] sm:$0xff]  ;;  %v22110_v14 = vld [vmem:[#allocation98_spill] sm:$0xff] }
 0x4bf   : > { %11186 = vmatpush1.bf16.xpose.msra.mxu1 %v11185_v41  ;;  %8089 = vmatprep.mubr.f32.mxu1 %v22091_v22  ;;  %v22097_v41 = vld [vmem:[#allocation70_spill] sm:$0xff]  ;;  %v22098_v22 = vld [vmem:[#allocation277_spill] sm:$0xff]  ;;  %v11197_v29 = vpack.c.bf16 %v22110_v14, %v22109_v63 }
 0x4c0   : > { %11188 = vmatprep.subr.bf16.mxu1 %v11187_v34  ;;  %v11191_v34 = vpack.c.bf16 %v21927_v26, %v22097_v41  ;;  %v22102_v26 = vld [vmem:[#allocation163_spill] sm:$0xff] }
 0x4c1   : > { %3663 = vmatmul.mubr.f32.gmra.mrb[26].mxu0 %v22094_v60 }
 0x4c2   : > { %8091 = vmatmul.mubr.f32.gmra.mrb[26].mxu1 %v22094_v60  ;;  %3669 = vmatprep.mubr.f32.mxu0 %v22095_v58  ;;  %v10425_v60 = vpack.c.bf16 %v21931_v16, %v21930_v55  ;;  %v22107_v16 = vld [vmem:[#allocation254_spill] sm:$0xff]  ;;  %v22108_v55 = vld [vmem:[#allocation260_spill] sm:$0xff] }
 0x4c3   : > { %8097 = vmatprep.mubr.f32.mxu1 %v22095_v58  ;;  %v22100_v58 = vld [vmem:[#allocation283_spill] sm:$0xff] }
 0x4c4   : > { %10422 = vmatpush1.bf16.xpose.msra.mxu0 %v10421_v38  ;;  %v10427_v38 = vpack.c.bf16 %v21940_v10, %v21939_v46  ;;  %v22106_v10 = vld [vmem:[#allocation92_spill] sm:$0xff] }
 0x4c5   : > { %10424 = vmatprep.subr.bf16.mxu0 %v10423_v9  ;;  %3671 = vmatmul.mubr.f32.gmra.mrb[28].mxu0 %v22098_v22  ;;  %v22101_v9 = vld [vmem:[#allocation232_spill] sm:$0xff] }
 0x4c6   : > { %8099 = vmatmul.mubr.f32.gmra.mrb[28].mxu1 %v22098_v22  ;;  %3677 = vmatprep.mubr.f32.mxu0 %v22099_v44  ;;  %v22103_v22 = vld [vmem:[#allocation169_spill] sm:$0xff] }
 0x4c7   : > { %11190 = vmatpush1.bf16.xpose.msra.mxu1 %v11189_v33  ;;  %8105 = vmatprep.mubr.f32.mxu1 %v22099_v44  ;;  %v11193_v41 = vpack.c.bf16 %v22103_v22, %v22102_v26  ;;  %v22104_v33 = vld [vmem:[#allocation88_spill] sm:$0xff]  ;;  %v22105_v44 = vld [vmem:[#allocation91_spill] sm:$0xff]  ;;  %v22112_v26 = vld [vmem:[#allocation110_spill] sm:$0xff] }
 0x4c8   : > { %11192 = vmatprep.subr.bf16.mxu1 %v11191_v34  ;;  %v11195_v34 = vpack.c.bf16 %v21945_v31, %v22104_v33  ;;  %v10429_v46 = vpack.c.bf16 %v22106_v10, %v22105_v44  ;;  %v22111_v22 = vld [vmem:[#allocation103_spill] sm:$0xff]  ;;  %v22116_v31 = vld [vmem:[#allocation122_spill] sm:$0xff] }
 0x4c9   : > { %3679 = vmatmul.mubr.f32.gmra.mrb[30].mxu0 %v22100_v58  ;;  %v22117_v10 = vld [vmem:[#allocation106_spill] sm:$0xff]  ;;  %v22118_v44 = vld [vmem:[#allocation107_spill] sm:$0xff] }
 0x4ca   : > { %8107 = vmatmul.mubr.f32.gmra.mrb[30].mxu1 %v22100_v58  ;;  %3879 = vmatprep.mubr.f32.mxu0 %v22101_v9  ;;  %v10431_v58 = vpack.c.bf16 %v22108_v55, %v22107_v16  ;;  %v11201_v45 = vpack.c.bf16 %v22118_v44, %v22117_v10  ;;  %v22119_v55 = vld [vmem:[#allocation269_spill] sm:$0xff]  ;;  %v22120_v16 = vld [vmem:[#allocation119_spill] sm:$0xff] }
 0x4cb   : > { %8307 = vmatprep.mubr.f32.mxu1 %v22101_v9  ;;  %v11199_v9 = vpack.c.bf16 %v22112_v26, %v22111_v22  ;;  %v11203_v14 = vpack.c.bf16 %v22120_v16, %v22119_v55  ;;  %v22124_v26 = vld [vmem:[#allocation190_spill] sm:$0xff]  ;;  %v22131_v16 = vld [vmem:[#allocation212_spill] sm:$0xff] }
 0x4cc   : > { %10426 = vmatpush1.bf16.xpose.msra.mxu0 %v10425_v60  ;;  %v22113_v60 = vld [vmem:[#allocation262_spill] sm:$0xff] }
 0x4cd   : > { %10428 = vmatprep.subr.bf16.mxu0 %v10427_v38  ;;  %v22114_v38 = vld [vmem:[#allocation263_spill] sm:$0xff] }
 0x4cf   : > { %11194 = vmatpush1.bf16.xpose.msra.mxu1 %v11193_v41  ;;  %v10433_v41 = vpack.c.bf16 %v22114_v38, %v22113_v60  ;;  %v22125_v38 = vld [vmem:[#allocation127_spill] sm:$0xff]  ;;  %v22126_v60 = vld [vmem:[#allocation128_spill] sm:$0xff] }
 0x4d0   : > { %11196 = vmatprep.subr.bf16.mxu1 %v11195_v34  ;;  %v22115_v34 = vld [vmem:[#allocation121_spill] sm:$0xff]  ;;  %v11205_v63 = vpack.c.bf16 %v22126_v60, %v22125_v38 }
 0x4d1   : > { %v10435_v33 = vpack.c.bf16 %v22116_v31, %v22115_v34  ;;  %v22127_v31 = vld [vmem:[#allocation12_spill] sm:$0xff] }
 0x4d2   : > { %v11207_v44 = vpack.c.bf16 %v21985_v62, %v22127_v31  ;;  %v22139_v62 = vld [vmem:[#allocation72_spill] sm:$0xff] }
 0x4d4   : > { %10430 = vmatpush1.bf16.xpose.msra.mxu0 %v10429_v46  ;;  %v22121_v46 = vld [vmem:[#allocation124_spill] sm:$0xff] }
 0x4d5   : > { %10432 = vmatprep.subr.bf16.mxu0 %v10431_v58  ;;  %v22122_v58 = vld [vmem:[#allocation125_spill] sm:$0xff] }
 0x4d7   : > { %11198 = vmatpush1.bf16.xpose.msra.mxu1 %v11197_v29  ;;  %v10437_v29 = vpack.c.bf16 %v22122_v58, %v22121_v46  ;;  %v22132_v58 = vld [vmem:[#allocation21_spill] sm:$0xff]  ;;  %v22133_v46 = vld [vmem:[#allocation27_spill] sm:$0xff] }
 0x4d8   : > { %11200 = vmatprep.subr.bf16.mxu1 %v11199_v9  ;;  %v22123_v9 = vld [vmem:[#allocation187_spill] sm:$0xff]  ;;  %v11209_v10 = vpack.c.bf16 %v22133_v46, %v22132_v58 }
 0x4d9   : > { %v10439_v22 = vpack.c.bf16 %v22124_v26, %v22123_v9  ;;  %v22134_v26 = vld [vmem:[#allocation213_spill] sm:$0xff]  ;;  %v22135_v9 = vld [vmem:[#allocation220_spill] sm:$0xff] }
 0x4da   : > { %v11211_v60 = vpack.c.bf16 %v22135_v9, %v22134_v26 }
 0x4dc   : > { %10434 = vmatpush1.bf16.xpose.msra.mxu0 %v10433_v41  ;;  %v22128_v41 = vld [vmem:[#allocation199_spill] sm:$0xff] }
 0x4dd   : > { %10436 = vmatprep.subr.bf16.mxu0 %v10435_v33  ;;  %v22129_v33 = vld [vmem:[#allocation25_spill] sm:$0xff] }
 0x4df   : > { %11202 = vmatpush1.bf16.xpose.msra.mxu1 %v11201_v45  ;;  %v10441_v45 = vpack.c.bf16 %v22129_v33, %v22128_v41  ;;  %v22140_v33 = vld [vmem:[#allocation51_spill] sm:$0xff]  ;;  %v22141_v41 = vld [vmem:[#allocation225_spill] sm:$0xff] }
 0x4e0   : > { %11204 = vmatprep.subr.bf16.mxu1 %v11203_v14  ;;  %v22130_v14 = vld [vmem:[#allocation39_spill] sm:$0xff]  ;;  %v11213_v38 = vpack.c.bf16 %v22141_v41, %v22140_v33 }
 0x4e1   : > { %v10443_v55 = vpack.c.bf16 %v22131_v16, %v22130_v14  ;;  %v22142_v16 = vld [vmem:[#allocation69_spill] sm:$0xff] }
 0x4e2   : > { %v11215_v46 = vpack.c.bf16 %v22008_v6, %v22142_v16 }
 0x4e4   : > { %10438 = vmatpush1.bf16.xpose.msra.mxu0 %v10437_v29  ;;  %v22136_v29 = vld [vmem:[#allocation222_spill] sm:$0xff] }
 0x4e5   : > { %10440 = vmatprep.subr.bf16.mxu0 %v10439_v22  ;;  %v22137_v22 = vld [vmem:[#allocation45_spill] sm:$0xff] }
 0x4e7   : > { %11206 = vmatpush1.bf16.xpose.msra.mxu1 %v11205_v63  ;;  %v10445_v63 = vpack.c.bf16 %v22137_v22, %v22136_v29 }
 0x4e8   : > { %11208 = vmatprep.subr.bf16.mxu1 %v11207_v44  ;;  %v22138_v44 = vld [vmem:[#allocation66_spill] sm:$0xff] }
 0x4e9   : > { %v10447_v31 = vpack.c.bf16 %v22139_v62, %v22138_v44 }
 0x4ec   : > { %10442 = vmatpush1.bf16.xpose.msra.mxu0 %v10441_v45  ;;  %v22143_v45 = vld [vmem:[#allocation111_spill] sm:$0xff] }
 0x4ed   : > { %10444 = vmatprep.subr.bf16.mxu0 %v10443_v55  ;;  %v10451_v55 = vpack.c.bf16 %v22017_v19, %v22016_v48  ;;  %v11219_v41 = vpack.c.bf16 %v16000_v35, %v22143_v45  ;;  %v22148_v35 = vld [vmem:[#allocation258_spill] sm:$0xff] }
 0x4ef   : > { %11210 = vmatpush1.bf16.xpose.msra.mxu1 %v11209_v10  ;;  %v10449_v10 = vpack.c.bf16 %v22015_v23, %v22014_v21 }
 0x4f0   : > { %11212 = vmatprep.subr.bf16.mxu1 %v11211_v60  ;;  %v11217_v60 = vpack.c.bf16 %v22021_v53, %v22018_v59  ;;  %v22146_v53 = vld [vmem:[#allocation259_spill] sm:$0xff] }
 0x4f4   : > { %10446 = vmatpush1.bf16.xpose.msra.mxu0 %v10445_v63  ;;  %v22145_v63 = vld [vmem:[#allocation120_spill] sm:$0xff] }
 0x4f5   : > { %10448 = vmatprep.subr.bf16.mxu0 %v10447_v31  ;;  %v10453_v31 = vpack.c.bf16 %v22023_v4, %v16012_v24 }
 0x4f7   : > { %11214 = vmatpush1.bf16.xpose.msra.mxu1 %v11213_v38  ;;  %v11221_v38 = vpack.c.bf16 %v22024_v7, %v16026_v8  ;;  %v22219_v7 = vld [vmem:[#allocation167_spill] sm:$0xff] }
 0x4f8   : > { %11216 = vmatprep.subr.bf16.mxu1 %v11215_v46  ;;  %v22144_v46 = vld [vmem:[#allocation102_spill] sm:$0xff] }
 0x4fc   : > { %10450 = vmatpush1.bf16.xpose.msra.mxu0 %v10449_v10  ;;  %v22147_v10 = vld [vmem:[#allocation126_spill] sm:$0xff] }
 0x4fd   : > { %10452 = vmatprep.subr.bf16.mxu0 %v10451_v55  ;;  %v22149_v55 = vld [vmem:[#allocation132_spill] sm:$0xff] }
 0x4ff   : > { %11218 = vmatpush1.bf16.xpose.msra.mxu1 %v11217_v60  ;;  %v22151_v60 = vld [vmem:[#allocation135_spill] sm:$0xff] }
 0x500   : > { %11220 = vmatprep.subr.bf16.mxu1 %v11219_v41  ;;  %v22150_v41 = vld [vmem:[#allocation129_spill] sm:$0xff] }
 0x504   : > { %10454 = vmatpush1.bf16.xpose.msra.mxu0 %v10453_v31  ;;  %v22152_v31 = vld [vmem:[#allocation157_spill] sm:$0xff] }
 0x505   : > { %10456 = vmatprep.subr.bf16.mxu0 %v22144_v46  ;;  %v22217_v46 = vld [vmem:[#allocation252_spill] sm:$0xff] }
 0x507   : > { %11222 = vmatpush1.bf16.xpose.msra.mxu1 %v11221_v38  ;;  %v22153_v38 = vld [vmem:[#allocation264_spill] sm:$0xff] }
 0x508   : > { %11224 = vmatprep.subr.bf16.mxu1 %v22145_v63  ;;  %v22155_v63 = vld [vmem:[#allocation144_spill] sm:$0xff] }
 0x50b   : > { %3882 = vmatmul.mubr.f32.vlgmr.msra.gmra.mrb[0].mxu0 %v22146_v53 }
 0x50c   : > { %10458 = vmatpush1.bf16.xpose.msra.mxu0 %v22147_v10  ;;  %3889 = vmatprep.mubr.f32.mxu0 %v22148_v35  ;;  %v22154_v10 = vld [vmem:[#allocation138_spill] sm:$0xff] }
 0x50d   : > { %10460 = vmatprep.subr.bf16.mxu0 %v22149_v55  ;;  %v22156_v55 = vld [vmem:[#allocation80_spill] sm:$0xff] }
 0x50e   : > { %8310 = vmatmul.mubr.f32.vlgmr.msra.gmra.mrb[0].mxu1 %v22146_v53  ;;  %v22157_v53 = vld [vmem:[#allocation240_spill] sm:$0xff] }
 0x50f   : > { %11226 = vmatpush1.bf16.xpose.msra.mxu1 %v22150_v41  ;;  %8317 = vmatprep.mubr.f32.mxu1 %v22148_v35  ;;  %v22158_v35 = vld [vmem:[#allocation141_spill] sm:$0xff]  ;;  %v22160_v41 = vld [vmem:[#allocation86_spill] sm:$0xff] }
 0x510   : > { %11228 = vmatprep.subr.bf16.mxu1 %v22151_v60  ;;  %3892 = vmatmul.mubr.f32.gmra.mrb[2].mxu0 %v22152_v31  ;;  %v22159_v60 = vld [vmem:[#allocation147_spill] sm:$0xff] }
 0x511   : > { %3899 = vmatprep.mubr.f32.mxu0 %v22153_v38 }
 0x512   : > { %8320 = vmatmul.mubr.f32.gmra.mrb[2].mxu1 %v22152_v31  ;;  %v22161_v31 = vld [vmem:[#allocation251_spill] sm:$0xff] }
 0x513   : > { %8327 = vmatprep.mubr.f32.mxu1 %v22153_v38  ;;  %v22162_v38 = vld [vmem:[#allocation150_spill] sm:$0xff] }
 0x514   : > { %10462 = vmatpush1.bf16.xpose.msra.mxu0 %v22154_v10  ;;  %v22213_v10 = vld [vmem:[#allocation248_spill] sm:$0xff] }
 0x515   : > { %10464 = vmatprep.subr.bf16.mxu0 %v22155_v63  ;;  %3902 = vmatmul.mubr.f32.gmra.mrb[4].mxu0 %v22156_v55  ;;  %v22163_v63 = vld [vmem:[#allocation156_spill] sm:$0xff] }
 0x516   : > { %8330 = vmatmul.mubr.f32.gmra.mrb[4].mxu1 %v22156_v55  ;;  %3909 = vmatprep.mubr.f32.mxu0 %v22157_v53  ;;  %v22164_v55 = vld [vmem:[#allocation94_spill] sm:$0xff] }
 0x517   : > { %11230 = vmatpush1.bf16.xpose.msra.mxu1 %v22158_v35  ;;  %8337 = vmatprep.mubr.f32.mxu1 %v22157_v53  ;;  %v22165_v35 = vld [vmem:[#allocation177_spill] sm:$0xff] }
 0x518   : > { %11232 = vmatprep.subr.bf16.mxu1 %v22159_v60  ;;  %v22166_v53 = vld [vmem:[#allocation153_spill] sm:$0xff]  ;;  %v22167_v60 = vld [vmem:[#allocation159_spill] sm:$0xff] }
 0x519   : > { %3912 = vmatmul.mubr.f32.gmra.mrb[6].mxu0 %v22160_v41 }
 0x51a   : > { %8340 = vmatmul.mubr.f32.gmra.mrb[6].mxu1 %v22160_v41  ;;  %3919 = vmatprep.mubr.f32.mxu0 %v22161_v31  ;;  %v22168_v41 = vld [vmem:[#allocation183_spill] sm:$0xff] }
 0x51b   : > { %8347 = vmatprep.mubr.f32.mxu1 %v22161_v31  ;;  %v22169_v31 = vld [vmem:[#allocation101_spill] sm:$0xff] }
 0x51c   : > { %10466 = vmatpush1.bf16.xpose.msra.mxu0 %v22162_v38  ;;  %v22171_v38 = vld [vmem:[#allocation168_spill] sm:$0xff] }
 0x51d   : > { %10468 = vmatprep.subr.bf16.mxu0 %v22163_v63  ;;  %3922 = vmatmul.mubr.f32.gmra.mrb[8].mxu0 %v22164_v55  ;;  %v22170_v63 = vld [vmem:[#allocation162_spill] sm:$0xff] }
 0x51e   : > { %8350 = vmatmul.mubr.f32.gmra.mrb[8].mxu1 %v22164_v55  ;;  %3929 = vmatprep.mubr.f32.mxu0 %v22165_v35  ;;  %v22172_v55 = vld [vmem:[#allocation113_spill] sm:$0xff] }
 0x51f   : > { %11234 = vmatpush1.bf16.xpose.msra.mxu1 %v22166_v53  ;;  %8357 = vmatprep.mubr.f32.mxu1 %v22165_v35  ;;  %v22173_v53 = vld [vmem:[#allocation115_spill] sm:$0xff]  ;;  %v22174_v35 = vld [vmem:[#allocation165_spill] sm:$0xff] }
 0x520   : > { %11236 = vmatprep.subr.bf16.mxu1 %v22167_v60  ;;  %v22175_v60 = vld [vmem:[#allocation171_spill] sm:$0xff] }
 0x521   : > { %3932 = vmatmul.mubr.f32.gmra.mrb[10].mxu0 %v22168_v41 }
 0x522   : > { %8360 = vmatmul.mubr.f32.gmra.mrb[10].mxu1 %v22168_v41  ;;  %3939 = vmatprep.mubr.f32.mxu0 %v22169_v31  ;;  %v22176_v41 = vld [vmem:[#allocation118_spill] sm:$0xff] }
 0x523   : > { %8367 = vmatprep.mubr.f32.mxu1 %v22169_v31  ;;  %v22177_v31 = vld [vmem:[#allocation131_spill] sm:$0xff] }
 0x524   : > { %10470 = vmatpush1.bf16.xpose.msra.mxu0 %v22170_v63  ;;  %v22179_v63 = vld [vmem:[#allocation179_spill] sm:$0xff] }
 0x525   : > { %10472 = vmatprep.subr.bf16.mxu0 %v22171_v38  ;;  %3942 = vmatmul.mubr.f32.gmra.mrb[12].mxu0 %v22172_v55  ;;  %v22178_v38 = vld [vmem:[#allocation174_spill] sm:$0xff] }
 0x526   : > { %8370 = vmatmul.mubr.f32.gmra.mrb[12].mxu1 %v22172_v55  ;;  %3949 = vmatprep.mubr.f32.mxu0 %v22173_v53  ;;  %v22180_v55 = vld [vmem:[#allocation146_spill] sm:$0xff] }
 0x527   : > { %11238 = vmatpush1.bf16.xpose.msra.mxu1 %v22174_v35  ;;  %8377 = vmatprep.mubr.f32.mxu1 %v22173_v53  ;;  %v22181_v35 = vld [vmem:[#allocation16_spill] sm:$0xff] }
 0x528   : > { %11240 = vmatprep.subr.bf16.mxu1 %v22175_v60  ;;  %v22182_v53 = vld [vmem:[#allocation176_spill] sm:$0xff]  ;;  %v22183_v60 = vld [vmem:[#allocation182_spill] sm:$0xff] }
 0x529   : > { %3952 = vmatmul.mubr.f32.gmra.mrb[14].mxu0 %v22176_v41 }
 0x52a   : > { %8380 = vmatmul.mubr.f32.gmra.mrb[14].mxu1 %v22176_v41  ;;  %3959 = vmatprep.mubr.f32.mxu0 %v22177_v31  ;;  %v22184_v41 = vld [vmem:[#allocation36_spill] sm:$0xff] }
 0x52b   : > { %8387 = vmatprep.mubr.f32.mxu1 %v22177_v31  ;;  %v22185_v31 = vld [vmem:[#allocation34_spill] sm:$0xff] }
 0x52c   : > { %10474 = vmatpush1.bf16.xpose.msra.mxu0 %v22178_v38  ;;  %v22187_v38 = vld [vmem:[#allocation188_spill] sm:$0xff] }
 0x52d   : > { %10476 = vmatprep.subr.bf16.mxu0 %v22179_v63  ;;  %3962 = vmatmul.mubr.f32.gmra.mrb[16].mxu0 %v22180_v55  ;;  %v22186_v63 = vld [vmem:[#allocation185_spill] sm:$0xff] }
 0x52e   : > { %8390 = vmatmul.mubr.f32.gmra.mrb[16].mxu1 %v22180_v55  ;;  %3969 = vmatprep.mubr.f32.mxu0 %v22181_v35  ;;  %v22188_v55 = vld [vmem:[#allocation42_spill] sm:$0xff] }
 0x52f   : > { %11242 = vmatpush1.bf16.xpose.msra.mxu1 %v22182_v53  ;;  %8397 = vmatprep.mubr.f32.mxu1 %v22181_v35  ;;  %v22189_v53 = vld [vmem:[#allocation54_spill] sm:$0xff] }
 0x530   : > { %11244 = vmatprep.subr.bf16.mxu1 %v22183_v60  ;;  %v22190_v35 = vld [vmem:[#allocation186_spill] sm:$0xff]  ;;  %v22191_v60 = vld [vmem:[#allocation189_spill] sm:$0xff] }
 0x531   : > { %3972 = vmatmul.mubr.f32.gmra.mrb[18].mxu0 %v22184_v41 }
 0x532   : > { %8400 = vmatmul.mubr.f32.gmra.mrb[18].mxu1 %v22184_v41  ;;  %3979 = vmatprep.mubr.f32.mxu0 %v22185_v31  ;;  %v22192_v41 = vld [vmem:[#allocation20_spill] sm:$0xff] }
 0x533   : > { %8407 = vmatprep.mubr.f32.mxu1 %v22185_v31  ;;  %v22193_v31 = vld [vmem:[#allocation93_spill] sm:$0xff] }
 0x534   : > { %10478 = vmatpush1.bf16.xpose.msra.mxu0 %v22186_v63  ;;  %v22195_v63 = vld [vmem:[#allocation214_spill] sm:$0xff] }
 0x535   : > { %10480 = vmatprep.subr.bf16.mxu0 %v22187_v38  ;;  %3982 = vmatmul.mubr.f32.gmra.mrb[20].mxu0 %v22188_v55  ;;  %v22194_v38 = vld [vmem:[#allocation193_spill] sm:$0xff] }
 0x536   : > { %8410 = vmatmul.mubr.f32.gmra.mrb[20].mxu1 %v22188_v55  ;;  %3989 = vmatprep.mubr.f32.mxu0 %v22189_v53  ;;  %v22196_v55 = vld [vmem:[#allocation270_spill] sm:$0xff] }
 0x537   : > { %11246 = vmatpush1.bf16.xpose.msra.mxu1 %v22190_v35  ;;  %8417 = vmatprep.mubr.f32.mxu1 %v22189_v53  ;;  %v22197_v35 = vld [vmem:[#allocation273_spill] sm:$0xff]  ;;  %v22198_v53 = vld [vmem:[#allocation235_spill] sm:$0xff] }
 0x538   : > { %11248 = vmatprep.subr.bf16.mxu1 %v22191_v60  ;;  %v22199_v60 = vld [vmem:[#allocation215_spill] sm:$0xff] }
 0x539   : > { %3992 = vmatmul.mubr.f32.gmra.mrb[22].mxu0 %v22192_v41 }
 0x53a   : > { %8420 = vmatmul.mubr.f32.gmra.mrb[22].mxu1 %v22192_v41  ;;  %3999 = vmatprep.mubr.f32.mxu0 %v22193_v31  ;;  %v22200_v41 = vld [vmem:[#allocation276_spill] sm:$0xff] }
 0x53b   : > { %8427 = vmatprep.mubr.f32.mxu1 %v22193_v31  ;;  %v22201_v31 = vld [vmem:[#allocation279_spill] sm:$0xff] }
 0x53c   : > { %10482 = vmatpush1.bf16.xpose.msra.mxu0 %v22194_v38  ;;  %v22203_v38 = vld [vmem:[#allocation244_spill] sm:$0xff] }
 0x53d   : > { %10484 = vmatprep.subr.bf16.mxu0 %v22195_v63  ;;  %4002 = vmatmul.mubr.f32.gmra.mrb[24].mxu0 %v22196_v55  ;;  %v22202_v63 = vld [vmem:[#allocation243_spill] sm:$0xff] }
 0x53e   : > { %8430 = vmatmul.mubr.f32.gmra.mrb[24].mxu1 %v22196_v55  ;;  %4009 = vmatprep.mubr.f32.mxu0 %v22197_v35  ;;  %v22204_v55 = vld [vmem:[#allocation282_spill] sm:$0xff] }
 0x53f   : > { %11250 = vmatpush1.bf16.xpose.msra.mxu1 %v22198_v53  ;;  %8437 = vmatprep.mubr.f32.mxu1 %v22197_v35  ;;  %v22205_v53 = vld [vmem:[#allocation285_spill] sm:$0xff]  ;;  %v22206_v35 = vld [vmem:[#allocation236_spill] sm:$0xff] }
 0x540   : > { %11252 = vmatprep.subr.bf16.mxu1 %v22199_v60  ;;  %v22207_v60 = vld [vmem:[#allocation239_spill] sm:$0xff] }
 0x541   : > { %4012 = vmatmul.mubr.f32.gmra.mrb[26].mxu0 %v22200_v41 }
 0x542   : > { %8440 = vmatmul.mubr.f32.gmra.mrb[26].mxu1 %v22200_v41  ;;  %4019 = vmatprep.mubr.f32.mxu0 %v22201_v31  ;;  %v22208_v41 = vld [vmem:[#allocation287_spill] sm:$0xff] }
 0x543   : > { %8447 = vmatprep.mubr.f32.mxu1 %v22201_v31  ;;  %v22209_v31 = vld [vmem:[#allocation216_spill] sm:$0xff] }
 0x544   : > { %10486 = vmatpush1.bf16.xpose.msra.mxu0 %v22202_v63  ;;  %v22211_v63 = vld [vmem:[#allocation229_spill] sm:$0xff] }
 0x545   : > { %10488 = vmatprep.subr.bf16.mxu0 %v22203_v38  ;;  %4022 = vmatmul.mubr.f32.gmra.mrb[28].mxu0 %v22204_v55  ;;  %v22210_v38 = vld [vmem:[#allocation228_spill] sm:$0xff] }
 0x546   : > { %8450 = vmatmul.mubr.f32.gmra.mrb[28].mxu1 %v22204_v55  ;;  %4029 = vmatprep.mubr.f32.mxu0 %v22205_v53  ;;  %v22212_v55 = vld [vmem:[#allocation173_spill] sm:$0xff] }
 0x547   : > { %11254 = vmatpush1.bf16.xpose.msra.mxu1 %v22206_v35  ;;  %8457 = vmatprep.mubr.f32.mxu1 %v22205_v53  ;;  %v22214_v35 = vld [vmem:[#allocation160_spill] sm:$0xff] }
 0x548   : > { %11256 = vmatprep.subr.bf16.mxu1 %v22207_v60  ;;  %v22215_v53 = vld [vmem:[#allocation164_spill] sm:$0xff]  ;;  %v22216_v60 = vld [vmem:[#allocation249_spill] sm:$0xff] }
 0x549   : > { %4032 = vmatmul.mubr.f32.gmra.mrb[30].mxu0 %v22208_v41 }
 0x54a   : > { %8460 = vmatmul.mubr.f32.gmra.mrb[30].mxu1 %v22208_v41  ;;  %4169 = vmatprep.mubr.f32.mxu0 %v22209_v31  ;;  %v22218_v41 = vld [vmem:[#allocation206_spill] sm:$0xff] }
 0x54b   : > { %8597 = vmatprep.mubr.f32.mxu1 %v22209_v31  ;;  %v22220_v31 = vld [vmem:[#allocation166_spill] sm:$0xff] }
 0x54c   : > { %10490 = vmatpush1.bf16.xpose.msra.mxu0 %v22210_v38  ;;  %v22221_v38 = vld [vmem:[#allocation261_spill] sm:$0xff] }
 0x54d   : > { %10492 = vmatprep.subr.bf16.mxu0 %v22211_v63  ;;  %v22222_v63 = vld [vmem:[#allocation37_spill] sm:$0xff] }
 0x54f   : > { %11258 = vmatpush1.bf16.xpose.msra.mxu1 %v22212_v55  ;;  %v22223_v55 = vld [vmem:[#allocation172_spill] sm:$0xff] }
 0x550   : > { %11260 = vmatprep.subr.bf16.mxu1 %v22213_v10  ;;  %v22224_v10 = vld [vmem:[#allocation38_spill] sm:$0xff] }
 0x554   : > { %10494 = vmatpush1.bf16.xpose.msra.mxu0 %v22214_v35  ;;  %v22225_v35 = vld [vmem:[#allocation178_spill] sm:$0xff] }
 0x555   : > { %10496 = vmatprep.subr.bf16.mxu0 %v22215_v53  ;;  %v22226_v53 = vld [vmem:[#allocation207_spill] sm:$0xff] }
 0x557   : > { %11262 = vmatpush1.bf16.xpose.msra.mxu1 %v22216_v60  ;;  %v22227_v60 = vld [vmem:[#allocation219_spill] sm:$0xff] }
 0x558   : > { %11264 = vmatprep.subr.bf16.mxu1 %v22217_v46  ;;  %v22228_v46 = vld [vmem:[#allocation33_spill] sm:$0xff] }
 0x55c   : > { %10498 = vmatpush1.bf16.xpose.msra.mxu0 %v22218_v41  ;;  %v22229_v41 = vld [vmem:[#allocation247_spill] sm:$0xff] }
 0x55d   : > { %10500 = vmatprep.subr.bf16.mxu0 %v22219_v7  ;;  %v22230_v7 = vld [vmem:[#allocation250_spill] sm:$0xff] }
 0x55f   : > { %11266 = vmatpush1.bf16.xpose.msra.mxu1 %v22220_v31  ;;  %v22231_v31 = vld [vmem:[#allocation210_spill] sm:$0xff] }
 0x560   : > { %11268 = vmatprep.subr.bf16.mxu1 %v22221_v38  ;;  %v22232_v38 = vld [vmem:[#allocation41_spill] sm:$0xff] }
 0x564   : > { %10502 = vmatpush1.bf16.xpose.msra.mxu0 %v22222_v63  ;;  %v22233_v63 = vld [vmem:[#allocation47_spill] sm:$0xff] }
 0x565   : > { %10504 = vmatprep.subr.bf16.mxu0 %v22223_v55  ;;  %v22234_v55 = vld [vmem:[#allocation184_spill] sm:$0xff] }
 0x567   : > { %11270 = vmatpush1.bf16.xpose.msra.mxu1 %v22224_v10  ;;  %v22235_v10 = vld [vmem:[#allocation52_spill] sm:$0xff] }
 0x568   : > { %11272 = vmatprep.subr.bf16.mxu1 %v22225_v35  ;;  %v22236_v35 = vld [vmem:[#allocation255_spill] sm:$0xff] }
 0x56c   : > { %10506 = vmatpush1.bf16.xpose.msra.mxu0 %v22226_v53  ;;  %v22237_v53 = vld [vmem:[#allocation53_spill] sm:$0xff] }
 0x56d   : > { %10508 = vmatprep.subr.bf16.mxu0 %v22227_v60 }
 0x56f   : > { %11274 = vmatpush1.bf16.xpose.msra.mxu1 %v22228_v46  ;;  %v22238_v46 = vand.u32 4294901760, %v21607_v27  ;;  %v22246_v27 = vand.u32 4294901760, %v21708_v56  ;;  %v22254_v56 = vand.u32 4294901760, %v22032_v52  ;;  %v22264_v52 = vld [vmem:[#allocation142_spill] sm:$0xff] }
 0x570   : > { %11276 = vmatprep.subr.bf16.mxu1 %v22229_v41  ;;  %v22239_v41 = vand.u32 4294901760, %v21608_v1  ;;  %v22247_v1 = vand.u32 4294901760, %v22025_v47  ;;  %v22255_v47 = vand.u32 4294901760, %v22033_v51  ;;  %v22265_v51 = vand.u32 4294901760, %v22264_v52  ;;  %v22287_v52 = vld [vmem:[#allocation204_spill] sm:$0xff] }
 0x572   : > { %v10519_v60 = vpack.c.bf16 %v22239_v41, %v22238_v46  ;;  %v10523_v46 = vpack.c.bf16 %v22247_v1, %v22246_v27  ;;  %v22248_v41 = vld [vmem:[#allocation46_spill] sm:$0xff]  ;;  %v22262_v27 = vld [vmem:[#allocation139_spill] sm:$0xff] }
 0x573   : > { %v22263_v1 = vand.u32 4294901760, %v22262_v27  ;;  %v22284_v27 = vld [vmem:[#allocation100_spill] sm:$0xff] }
 0x574   : > { %10510 = vmatpush1.bf16.xpose.msra.mxu0 %v22230_v7  ;;  %v22240_v7 = vld [vmem:[#allocation64_spill] sm:$0xff] }
 0x575   : > { %10512 = vmatprep.subr.bf16.mxu0 %v22231_v31  ;;  %v22241_v31 = vand.u32 4294901760, %v21609_v17  ;;  %v22249_v17 = vand.u32 4294901760, %v22027_v0  ;;  %v10525_v0 = vpack.c.bf16 %v22255_v47, %v22254_v56 }
 0x577   : > { %11278 = vmatpush1.bf16.xpose.msra.mxu1 %v22232_v38  ;;  %v22242_v38 = vand.u32 4294901760, %v21610_v3  ;;  %v22250_v3 = vand.u32 4294901760, %v22028_v20  ;;  %v22256_v20 = vld [vmem:[#allocation68_spill] sm:$0xff] }
 0x578   : > { %11280 = vmatprep.subr.bf16.mxu1 %v22233_v63 }
 0x579   : > { %v11287_v63 = vpack.c.bf16 %v22242_v38, %v22241_v31 }
 0x57c   : > { %10514 = vmatpush1.bf16.xpose.msra.mxu0 %v22234_v55  ;;  %v22243_v55 = vld [vmem:[#allocation65_spill] sm:$0xff] }
 0x57d   : > { %10516 = vmatprep.subr.bf16.mxu0 %v22235_v10 }
 0x57f   : > { %11282 = vmatpush1.bf16.xpose.msra.mxu1 %v22236_v35  ;;  %v22244_v35 = vand.u32 4294901760, %v21661_v32  ;;  %v22252_v32 = vand.u32 4294901760, %v22030_v13  ;;  %v22258_v13 = vand.u32 4294901760, %v22036_v40  ;;  %v22268_v40 = vld [vmem:[#allocation85_spill] sm:$0xff] }
 0x580   : > { %11284 = vmatprep.subr.bf16.mxu1 %v22237_v53  ;;  %v22245_v53 = vand.u32 4294901760, %v21662_v15  ;;  %v22253_v15 = vld [vmem:[#allocation234_spill] sm:$0xff] }
 0x582   : > { %v10521_v10 = vpack.c.bf16 %v22245_v53, %v22244_v35  ;;  %v22259_v35 = vld [vmem:[#allocation79_spill] sm:$0xff]  ;;  %v22260_v53 = vld [vmem:[#allocation130_spill] sm:$0xff] }
 0x583   : > { %v22261_v31 = vand.u32 4294901760, %v22260_v53 }
 0x584   : > { %10518 = vmatpush1.bf16.xpose.msra.mxu0 %v22240_v7 }
 0x585   : > { %10520 = vmatprep.subr.bf16.mxu0 %v10519_v60  ;;  %v11289_v60 = vpack.c.bf16 %v22250_v3, %v22249_v17  ;;  %v22269_v3 = vld [vmem:[#allocation245_spill] sm:$0xff] }
 0x587   : > { %11286 = vmatpush1.bf16.xpose.msra.mxu1 %v22243_v55 }
 0x588   : > { %11288 = vmatprep.subr.bf16.mxu1 %v11287_v63  ;;  %v22251_v63 = vand.u32 4294901760, %v22029_v36  ;;  %v22257_v36 = vand.u32 4294901760, %v22035_v43 }
 0x58a   : > { %v11291_v38 = vpack.c.bf16 %v22252_v32, %v22251_v63  ;;  %v22271_v63 = vand.u32 4294901760, %v22045_v11  ;;  %v22281_v11 = vand.u32 4294901760, %v22052_v57  ;;  %v22289_v57 = vand.u32 4294901760, %v22056_v49  ;;  %v22300_v49 = vld [vmem:[#allocation237_spill] sm:$0xff] }
 0x58b   : > { %4173 = vmatmul.mubr.f32.vlgmr.msra.gmra.mrb[0].mxu0 %v22248_v41 }
 0x58c   : > { %10522 = vmatpush1.bf16.xpose.msra.mxu0 %v10521_v10  ;;  %4181 = vmatprep.mubr.f32.mxu0 %v22253_v15  ;;  %v10527_v10 = vpack.c.bf16 %v22258_v13, %v22257_v36  ;;  %v22277_v36 = vld [vmem:[#allocation151_spill] sm:$0xff] }
 0x58d   : > { %10524 = vmatprep.subr.bf16.mxu0 %v10523_v46  ;;  %v11293_v46 = vpack.c.bf16 %v22263_v1, %v22261_v31  ;;  %v22278_v13 = vand.u32 4294901760, %v22277_v36  ;;  %v22285_v1 = vld [vmem:[#allocation104_spill] sm:$0xff]  ;;  %v22302_v36 = vld [vmem:[#allocation191_spill] sm:$0xff] }
 0x58e   : > { %8601 = vmatmul.mubr.f32.vlgmr.msra.gmra.mrb[0].mxu1 %v22248_v41  ;;  %v22266_v41 = vld [vmem:[#allocation143_spill] sm:$0xff] }
 0x58f   : > { %11290 = vmatpush1.bf16.xpose.msra.mxu1 %v11289_v60  ;;  %8609 = vmatprep.mubr.f32.mxu1 %v22253_v15  ;;  %v22267_v17 = vand.u32 4294901760, %v22266_v41  ;;  %v22270_v60 = vand.u32 4294901760, %v22044_v54  ;;  %v22273_v15 = vld [vmem:[#allocation155_spill] sm:$0xff]  ;;  %v22282_v54 = vld [vmem:[#allocation202_spill] sm:$0xff] }
 0x590   : > { %11292 = vmatprep.subr.bf16.mxu1 %v11291_v38  ;;  %4185 = vmatmul.mubr.f32.gmra.mrb[2].mxu0 %v22256_v20  ;;  %v22272_v38 = vand.u32 4294901760, %v22046_v5  ;;  %v22274_v56 = vand.u32 4294901760, %v22273_v15  ;;  %v22283_v5 = vand.u32 4294901760, %v22282_v54  ;;  %v22307_v54 = vld [vmem:[#allocation253_spill] sm:$0xff] }
 0x591   : > { %4193 = vmatprep.mubr.f32.mxu0 %v22259_v35  ;;  %v11295_v43 = vpack.c.bf16 %v22267_v17, %v22265_v51  ;;  %v10529_v32 = vpack.c.bf16 %v22271_v63, %v22270_v60  ;;  %v22288_v51 = vand.u32 4294901760, %v22287_v52  ;;  %v22290_v17 = vld [vmem:[#allocation224_spill] sm:$0xff]  ;;  %v22293_v60 = vld [vmem:[#allocation265_spill] sm:$0xff]  ;;  %v22294_v63 = vld [vmem:[#allocation31_spill] sm:$0xff] }
 0x592   : > { %8613 = vmatmul.mubr.f32.gmra.mrb[2].mxu1 %v22256_v20  ;;  %v10531_v47 = vpack.c.bf16 %v22274_v56, %v22272_v38  ;;  %v22276_v20 = vld [vmem:[#allocation175_spill] sm:$0xff]  ;;  %v11299_v31 = vpack.c.bf16 %v22283_v5, %v22281_v11  ;;  %v22296_v38 = vld [vmem:[#allocation209_spill] sm:$0xff]  ;;  %v22308_v5 = vand.u32 4294901760, %v22307_v54 }
 0x593   : > { %8621 = vmatprep.mubr.f32.mxu1 %v22259_v35  ;;  %v22297_v15 = vand.u32 4294901760, %v22296_v38  ;;  %v22312_v52 = vld [vmem:[#allocation15_spill] sm:$0xff]  ;;  %v22322_v38 = vand.u32 4294901760, %v22074_v2  ;;  %v22333_v2 = vld [vmem:[#allocation217_spill] sm:$0xff] }
 0x594   : > { %10526 = vmatpush1.bf16.xpose.msra.mxu0 %v10525_v0  ;;  %v22275_v0 = vld [vmem:[#allocation246_spill] sm:$0xff] }
 0x595   : > { %10528 = vmatprep.subr.bf16.mxu0 %v10527_v10  ;;  %4197 = vmatmul.mubr.f32.gmra.mrb[4].mxu0 %v22268_v40  ;;  %v22279_v10 = vld [vmem:[#allocation152_spill] sm:$0xff] }
 0x596   : > { %8625 = vmatmul.mubr.f32.gmra.mrb[4].mxu1 %v22268_v40  ;;  %4205 = vmatprep.mubr.f32.mxu0 %v22269_v3  ;;  %v22280_v35 = vand.u32 4294901760, %v22279_v10  ;;  %v22304_v10 = vand.u32 4294901760, %v22063_v25  ;;  %v22317_v25 = vand.u32 4294901760, %v22070_v61  ;;  %v22324_v61 = vld [vmem:[#allocation35_spill] sm:$0xff] }
 0x597   : > { %11294 = vmatpush1.bf16.xpose.msra.mxu1 %v11293_v46  ;;  %8633 = vmatprep.mubr.f32.mxu1 %v22269_v3  ;;  %v22286_v46 = vand.u32 4294901760, %v22054_v18  ;;  %v22292_v3 = vld [vmem:[#allocation112_spill] sm:$0xff]  ;;  %v22298_v18 = vld [vmem:[#allocation233_spill] sm:$0xff] }
 0x598   : > { %11296 = vmatprep.subr.bf16.mxu1 %v11295_v43  ;;  %v11297_v53 = vpack.c.bf16 %v22280_v35, %v22278_v13  ;;  %v22291_v43 = vand.u32 4294901760, %v22290_v17  ;;  %v22303_v13 = vld [vmem:[#allocation134_spill] sm:$0xff]  ;;  %v22305_v35 = vld [vmem:[#allocation241_spill] sm:$0xff] }
 0x599   : > { %4209 = vmatmul.mubr.f32.gmra.mrb[6].mxu0 %v22275_v0  ;;  %v10533_v41 = vpack.c.bf16 %v22288_v51, %v22286_v46  ;;  %v22311_v46 = vld [vmem:[#allocation137_spill] sm:$0xff] }
 0x59a   : > { %8637 = vmatmul.mubr.f32.gmra.mrb[6].mxu1 %v22275_v0  ;;  %4217 = vmatprep.mubr.f32.mxu0 %v22276_v20  ;;  %v10535_v40 = vpack.c.bf16 %v22291_v43, %v22289_v57  ;;  %v22301_v0 = vand.u32 4294901760, %v22300_v49  ;;  %v22313_v51 = vld [vmem:[#allocation161_spill] sm:$0xff]  ;;  %v22315_v57 = vld [vmem:[#allocation242_spill] sm:$0xff] }
 0x59b   : > { %8645 = vmatprep.mubr.f32.mxu1 %v22276_v20  ;;  %v22316_v17 = vand.u32 4294901760, %v22315_v57 }
 0x59c   : > { %10530 = vmatpush1.bf16.xpose.msra.mxu0 %v10529_v32  ;;  %v22295_v32 = vand.u32 4294901760, %v22294_v63  ;;  %v22320_v63 = vld [vmem:[#allocation201_spill] sm:$0xff] }
 0x59d   : > { %10532 = vmatprep.subr.bf16.mxu0 %v10531_v47  ;;  %4221 = vmatmul.mubr.f32.gmra.mrb[8].mxu0 %v22284_v27  ;;  %v22299_v47 = vand.u32 4294901760, %v22298_v18  ;;  %v22325_v18 = vand.u32 4294901760, %v22324_v61  ;;  %v22356_v61 = vld [vmem:[#allocation231_spill] sm:$0xff] }
 0x59e   : > { %8649 = vmatmul.mubr.f32.gmra.mrb[8].mxu1 %v22284_v27  ;;  %4229 = vmatprep.mubr.f32.mxu0 %v22285_v1  ;;  %v11301_v56 = vpack.c.bf16 %v22297_v15, %v22295_v32  ;;  %v22321_v32 = vld [vmem:[#allocation211_spill] sm:$0xff]  ;;  %v22323_v15 = vand.u32 4294901760, %v22075_v42  ;;  %v22334_v42 = vand.u32 4294901760, %v22333_v2 }
 0x59f   : > { %11298 = vmatpush1.bf16.xpose.msra.mxu1 %v11297_v53  ;;  %8657 = vmatprep.mubr.f32.mxu1 %v22285_v1  ;;  %v11303_v20 = vpack.c.bf16 %v22301_v0, %v22299_v47  ;;  %v22306_v53 = vand.u32 4294901760, %v22305_v35  ;;  %v22326_v47 = vld [vmem:[#allocation40_spill] sm:$0xff]  ;;  %v22366_v2 = vld [vmem:[#allocation59_spill] sm:$0xff] }
 0x5a0   : > { %11300 = vmatprep.subr.bf16.mxu1 %v11299_v31  ;;  %v22309_v31 = vld [vmem:[#allocation257_spill] sm:$0xff]  ;;  %v22327_v49 = vand.u32 4294901760, %v22326_v47 }
 0x5a1   : > { %4233 = vmatmul.mubr.f32.gmra.mrb[10].mxu0 %v22292_v3  ;;  %v10537_v11 = vpack.c.bf16 %v22306_v53, %v22304_v10  ;;  %v22310_v27 = vand.u32 4294901760, %v22309_v31  ;;  %v22331_v10 = vld [vmem:[#allocation205_spill] sm:$0xff]  ;;  %v22337_v31 = vld [vmem:[#allocation63_spill] sm:$0xff] }
 0x5a2   : > { %8661 = vmatmul.mubr.f32.gmra.mrb[10].mxu1 %v22292_v3  ;;  %4241 = vmatprep.mubr.f32.mxu0 %v22293_v60  ;;  %v10543_v0 = vpack.c.bf16 %v22327_v49, %v22325_v18  ;;  %v22332_v35 = vand.u32 4294901760, %v22331_v10  ;;  %v22357_v18 = vand.u32 4294901760, %v22356_v61  ;;  %v22363_v10 = vld [vmem:[#allocation284_spill] sm:$0xff] }
 0x5a3   : > { %8669 = vmatprep.mubr.f32.mxu1 %v22293_v60  ;;  %v10539_v1 = vpack.c.bf16 %v22310_v27, %v22308_v5  ;;  %v22338_v27 = vld [vmem:[#allocation75_spill] sm:$0xff]  ;;  %v22390_v61 = vld [vmem:[#allocation180_spill] sm:$0xff] }
 0x5a4   : > { %10534 = vmatpush1.bf16.xpose.msra.mxu0 %v10533_v41  ;;  %v22314_v41 = vand.u32 4294901760, %v22313_v51 }
 0x5a5   : > { %10536 = vmatprep.subr.bf16.mxu0 %v10535_v40  ;;  %4245 = vmatmul.mubr.f32.gmra.mrb[12].mxu0 %v22302_v36  ;;  %v22318_v40 = vld [vmem:[#allocation198_spill] sm:$0xff] }
 0x5a6   : > { %8673 = vmatmul.mubr.f32.gmra.mrb[12].mxu1 %v22302_v36  ;;  %4253 = vmatprep.mubr.f32.mxu0 %v22303_v13  ;;  %v11305_v43 = vpack.c.bf16 %v22316_v17, %v22314_v41  ;;  %v22319_v3 = vand.u32 4294901760, %v22318_v40  ;;  %v22329_v36 = vld [vmem:[#allocation60_spill] sm:$0xff]  ;;  %v22343_v41 = vld [vmem:[#allocation227_spill] sm:$0xff]  ;;  %v22347_v40 = vand.u32 4294901760, %v22087_v12  ;;  %v22355_v12 = vand.u32 4294901760, %v22092_v39  ;;  %v22368_v39 = vld [vmem:[#allocation70_spill] sm:$0xff] }
 0x5a7   : > { %11302 = vmatpush1.bf16.xpose.msra.mxu1 %v11301_v56  ;;  %8681 = vmatprep.mubr.f32.mxu1 %v22303_v13  ;;  %v10541_v56 = vpack.c.bf16 %v22323_v15, %v22322_v38  ;;  %v22330_v13 = vand.u32 4294901760, %v22078_v28  ;;  %v22339_v28 = vand.u32 4294901760, %v22083_v30  ;;  %v22344_v57 = vand.u32 4294901760, %v22343_v41  ;;  %v22353_v15 = vld [vmem:[#allocation275_spill] sm:$0xff] }
 0x5a8   : > { %11304 = vmatprep.subr.bf16.mxu1 %v11303_v20  ;;  %v11307_v60 = vpack.c.bf16 %v22319_v3, %v22317_v25  ;;  %v22328_v20 = vld [vmem:[#allocation226_spill] sm:$0xff]  ;;  %v22346_v25 = vld [vmem:[#allocation272_spill] sm:$0xff]  ;;  %v22350_v30 = vand.u32 4294901760, %v21887_v50  ;;  %v10549_v47 = vpack.c.bf16 %v22357_v18, %v22355_v12  ;;  %v22358_v50 = vld [vmem:[#allocation73_spill] sm:$0xff]  ;;  %v22391_v18 = vand.u32 4294901760, %v22390_v61 }
 0x5a9   : > { %4257 = vmatmul.mubr.f32.gmra.mrb[14].mxu0 %v22311_v46  ;;  %v11309_v53 = vpack.c.bf16 %v22332_v35, %v22330_v13  ;;  %v22348_v3 = vld [vmem:[#allocation218_spill] sm:$0xff]  ;;  %v22359_v49 = vand.u32 4294901760, %v22358_v50  ;;  %v22362_v13 = vld [vmem:[#allocation281_spill] sm:$0xff]  ;;  %v22392_v50 = vld [vmem:[#allocation91_spill] sm:$0xff] }
 0x5aa   : > { %8685 = vmatmul.mubr.f32.gmra.mrb[14].mxu1 %v22311_v46  ;;  %4265 = vmatprep.mubr.f32.mxu0 %v22312_v52  ;;  %v22364_v35 = vld [vmem:[#allocation58_spill] sm:$0xff] }
 0x5ab   : > { %8693 = vmatprep.mubr.f32.mxu1 %v22312_v52  ;;  %v22341_v52 = vld [vmem:[#allocation223_spill] sm:$0xff] }
 0x5ac   : > { %10538 = vmatpush1.bf16.xpose.msra.mxu0 %v10537_v11  ;;  %v22335_v11 = vld [vmem:[#allocation43_spill] sm:$0xff]  ;;  %v22342_v51 = vand.u32 4294901760, %v22341_v52 }
 0x5ad   : > { %10540 = vmatprep.subr.bf16.mxu0 %v10539_v1  ;;  %4269 = vmatmul.mubr.f32.gmra.mrb[16].mxu0 %v22320_v63  ;;  %v22336_v54 = vand.u32 4294901760, %v22335_v11  ;;  %v22340_v1 = vand.u32 4294901760, %v22084_v37  ;;  %v22351_v37 = vld [vmem:[#allocation62_spill] sm:$0xff] }
 0x5ae   : > { %8697 = vmatmul.mubr.f32.gmra.mrb[16].mxu1 %v22320_v63  ;;  %4277 = vmatprep.mubr.f32.mxu0 %v22321_v32  ;;  %v10547_v17 = vpack.c.bf16 %v22344_v57, %v22342_v51  ;;  %v22376_v51 = vld [vmem:[#allocation77_spill] sm:$0xff] }
 0x5af   : > { %11306 = vmatpush1.bf16.xpose.msra.mxu1 %v11305_v43  ;;  %8705 = vmatprep.mubr.f32.mxu1 %v22321_v32  ;;  %v11311_v5 = vpack.c.bf16 %v22336_v54, %v22334_v42  ;;  %v10545_v46 = vpack.c.bf16 %v22340_v1, %v22339_v28  ;;  %v22345_v43 = vld [vmem:[#allocation61_spill] sm:$0xff]  ;;  %v22352_v32 = vand.u32 4294901760, %v22351_v37  ;;  %v22367_v42 = vand.u32 4294901760, %v22366_v2  ;;  %v22372_v28 = vld [vmem:[#allocation286_spill] sm:$0xff]  ;;  %v22373_v1 = vld [vmem:[#allocation288_spill] sm:$0xff] }
 0x5b0   : > { %11308 = vmatprep.subr.bf16.mxu1 %v11307_v60  ;;  %v22349_v60 = vand.u32 4294901760, %v22348_v3  ;;  %v22369_v54 = vand.u32 4294901760, %v22368_v39  ;;  %v22377_v41 = vand.u32 4294901760, %v22376_v51  ;;  %v22402_v39 = vld [vmem:[#allocation98_spill] sm:$0xff] }
 0x5b1   : > { %4281 = vmatmul.mubr.f32.gmra.mrb[18].mxu0 %v22328_v20  ;;  %v11315_v38 = vpack.c.bf16 %v22352_v32, %v22350_v30  ;;  %v22384_v30 = vld [vmem:[#allocation163_spill] sm:$0xff]  ;;  %v22386_v32 = vld [vmem:[#allocation169_spill] sm:$0xff] }
 0x5b2   : > { %8709 = vmatmul.mubr.f32.gmra.mrb[18].mxu1 %v22328_v20  ;;  %4289 = vmatprep.mubr.f32.mxu0 %v22329_v36  ;;  %v11313_v63 = vpack.c.bf16 %v22349_v60, %v22347_v40  ;;  %v22382_v60 = vld [vmem:[#allocation289_spill] sm:$0xff]  ;;  %v22385_v37 = vand.u32 4294901760, %v22384_v30 }
 0x5b3   : > { %8717 = vmatprep.mubr.f32.mxu1 %v22329_v36 }
 0x5b4   : > { %10542 = vmatpush1.bf16.xpose.msra.mxu0 %v10541_v56  ;;  %v22354_v56 = vld [vmem:[#allocation278_spill] sm:$0xff] }
 0x5b5   : > { %10544 = vmatprep.subr.bf16.mxu0 %v10543_v0  ;;  %4293 = vmatmul.mubr.f32.gmra.mrb[20].mxu0 %v22337_v31  ;;  %v22360_v0 = vld [vmem:[#allocation74_spill] sm:$0xff] }
 0x5b6   : > { %8721 = vmatmul.mubr.f32.gmra.mrb[20].mxu1 %v22337_v31  ;;  %4301 = vmatprep.mubr.f32.mxu0 %v22338_v27  ;;  %v22361_v20 = vand.u32 4294901760, %v22360_v0  ;;  %v22394_v0 = vld [vmem:[#allocation92_spill] sm:$0xff] }
 0x5b7   : > { %11310 = vmatpush1.bf16.xpose.msra.mxu1 %v11309_v53  ;;  %8729 = vmatprep.mubr.f32.mxu1 %v22338_v27  ;;  %v22365_v53 = vand.u32 4294901760, %v22364_v35  ;;  %v22398_v35 = vld [vmem:[#allocation260_spill] sm:$0xff] }
 0x5b8   : > { %11312 = vmatprep.subr.bf16.mxu1 %v11311_v5  ;;  %v10551_v36 = vpack.c.bf16 %v22361_v20, %v22359_v49  ;;  %v22370_v5 = vld [vmem:[#allocation71_spill] sm:$0xff]  ;;  %v22393_v49 = vand.u32 4294901760, %v22392_v50  ;;  %v22395_v20 = vand.u32 4294901760, %v22394_v0 }
 0x5b9   : > { %4305 = vmatmul.mubr.f32.gmra.mrb[22].mxu0 %v22345_v43  ;;  %v11317_v11 = vpack.c.bf16 %v22367_v42, %v22365_v53  ;;  %v22371_v31 = vand.u32 4294901760, %v22370_v5  ;;  %v22399_v53 = vand.u32 4294901760, %v22398_v35  ;;  %v22400_v42 = vld [vmem:[#allocation97_spill] sm:$0xff] }
 0x5ba   : > { %8733 = vmatmul.mubr.f32.gmra.mrb[22].mxu1 %v22345_v43  ;;  %4313 = vmatprep.mubr.f32.mxu0 %v22346_v25 }
 0x5bb   : > { %8741 = vmatprep.mubr.f32.mxu1 %v22346_v25  ;;  %v11319_v27 = vpack.c.bf16 %v22371_v31, %v22369_v54  ;;  %v22380_v25 = vld [vmem:[#allocation83_spill] sm:$0xff]  ;;  %v22403_v54 = vand.u32 4294901760, %v22402_v39 }
 0x5bc   : > { %10546 = vmatpush1.bf16.xpose.msra.mxu0 %v10545_v46  ;;  %v22374_v46 = vld [vmem:[#allocation76_spill] sm:$0xff]  ;;  %v22381_v40 = vand.u32 4294901760, %v22380_v25  ;;  %v22404_v31 = vld [vmem:[#allocation103_spill] sm:$0xff]  ;;  %v22413_v25 = vld [vmem:[#allocation122_spill] sm:$0xff] }
 0x5bd   : > { %10548 = vmatprep.subr.bf16.mxu0 %v10547_v17  ;;  %4317 = vmatmul.mubr.f32.gmra.mrb[24].mxu0 %v22353_v15  ;;  %v22375_v52 = vand.u32 4294901760, %v22374_v46  ;;  %v22378_v17 = vld [vmem:[#allocation82_spill] sm:$0xff] }
 0x5be   : > { %8745 = vmatmul.mubr.f32.gmra.mrb[24].mxu1 %v22353_v15  ;;  %4325 = vmatprep.mubr.f32.mxu0 %v22354_v56  ;;  %v22379_v43 = vand.u32 4294901760, %v22378_v17 }
 0x5bf   : > { %11314 = vmatpush1.bf16.xpose.msra.mxu1 %v11313_v63  ;;  %8753 = vmatprep.mubr.f32.mxu1 %v22354_v56  ;;  %v10553_v57 = vpack.c.bf16 %v22377_v41, %v22375_v52  ;;  %v22383_v63 = vld [vmem:[#allocation192_spill] sm:$0xff]  ;;  %v22408_v52 = vld [vmem:[#allocation262_spill] sm:$0xff]  ;;  %v22410_v41 = vld [vmem:[#allocation263_spill] sm:$0xff] }
 0x5c0   : > { %11316 = vmatprep.subr.bf16.mxu1 %v11315_v38  ;;  %v10555_v3 = vpack.c.bf16 %v22381_v40, %v22379_v43  ;;  %v22387_v38 = vand.u32 4294901760, %v22386_v32  ;;  %v22388_v56 = vld [vmem:[#allocation88_spill] sm:$0xff]  ;;  %v22409_v51 = vand.u32 4294901760, %v22408_v52  ;;  %v22412_v43 = vand.u32 4294901760, %v22115_v34  ;;  %v22425_v34 = vld [vmem:[#allocation125_spill] sm:$0xff] }
 0x5c1   : > { %4329 = vmatmul.mubr.f32.gmra.mrb[26].mxu0 %v22362_v13  ;;  %v22389_v12 = vand.u32 4294901760, %v22388_v56  ;;  %v22414_v40 = vand.u32 4294901760, %v22413_v25  ;;  %v22441_v52 = vld [vmem:[#allocation25_spill] sm:$0xff] }
 0x5c2   : > { %8757 = vmatmul.mubr.f32.gmra.mrb[26].mxu1 %v22362_v13  ;;  %4337 = vmatprep.mubr.f32.mxu0 %v22363_v10  ;;  %v11321_v15 = vpack.c.bf16 %v22387_v38, %v22385_v37  ;;  %v22396_v13 = vld [vmem:[#allocation254_spill] sm:$0xff]  ;;  %v22417_v37 = vld [vmem:[#allocation107_spill] sm:$0xff] }
 0x5c3   : > { %8765 = vmatprep.mubr.f32.mxu1 %v22363_v10  ;;  %v22397_v10 = vand.u32 4294901760, %v22396_v13  ;;  %v22418_v32 = vand.u32 4294901760, %v22417_v37  ;;  %v22429_v13 = vld [vmem:[#allocation190_spill] sm:$0xff]  ;;  %v22449_v37 = vand.u32 4294901760, %v22134_v26 }
 0x5c4   : > { %10550 = vmatpush1.bf16.xpose.msra.mxu0 %v10549_v47  ;;  %v11323_v47 = vpack.c.bf16 %v22391_v18, %v22389_v12  ;;  %v22421_v12 = vld [vmem:[#allocation119_spill] sm:$0xff] }
 0x5c5   : > { %10552 = vmatprep.subr.bf16.mxu0 %v10551_v36  ;;  %4341 = vmatmul.mubr.f32.gmra.mrb[28].mxu0 %v22372_v28  ;;  %v10557_v36 = vpack.c.bf16 %v22395_v20, %v22393_v49  ;;  %v10559_v2 = vpack.c.bf16 %v22399_v53, %v22397_v10  ;;  %v22422_v61 = vand.u32 4294901760, %v22421_v12  ;;  %v22426_v49 = vand.u32 4294901760, %v22425_v34  ;;  %v22427_v20 = vld [vmem:[#allocation187_spill] sm:$0xff] }
 0x5c6   : > { %8769 = vmatmul.mubr.f32.gmra.mrb[28].mxu1 %v22372_v28  ;;  %4349 = vmatprep.mubr.f32.mxu0 %v22373_v1  ;;  %v22406_v28 = vld [vmem:[#allocation110_spill] sm:$0xff]  ;;  %v22430_v10 = vand.u32 4294901760, %v22429_v13  ;;  %v22431_v53 = vld [vmem:[#allocation127_spill] sm:$0xff]  ;;  %v22453_v12 = vand.u32 4294901760, %v22138_v44  ;;  %v22459_v34 = vand.u32 4294901760, %v22008_v6  ;;  %v22462_v44 = vand.u32 4294901760, %v22016_v48 }
 0x5c7   : > { %11318 = vmatpush1.bf16.xpose.msra.mxu1 %v11317_v11  ;;  %8777 = vmatprep.mubr.f32.mxu1 %v22373_v1  ;;  %v22401_v11 = vand.u32 4294901760, %v22400_v42  ;;  %v22407_v1 = vand.u32 4294901760, %v22406_v28  ;;  %v22433_v42 = vld [vmem:[#allocation128_spill] sm:$0xff]  ;;  %v22467_v6 = vand.u32 4294901760, %v22143_v45  ;;  %v22471_v48 = vand.u32 4294901760, %v22023_v4  ;;  %v22482_v4 = vld [vmem:[#allocation135_spill] sm:$0xff] }
 0x5c8   : > { %11320 = vmatprep.subr.bf16.mxu1 %v11319_v27  ;;  %v22405_v27 = vand.u32 4294901760, %v22404_v31  ;;  %v22437_v31 = vld [vmem:[#allocation18_spill] sm:$0xff]  ;;  %v22476_v45 = vld [vmem:[#allocation120_spill] sm:$0xff] }
 0x5c9   : > { %4353 = vmatmul.mubr.f32.gmra.mrb[30].mxu0 %v22382_v60  ;;  %v11325_v5 = vpack.c.bf16 %v22403_v54, %v22401_v11  ;;  %v22434_v11 = vand.u32 4294901760, %v22433_v42  ;;  %v22435_v54 = vld [vmem:[#allocation12_spill] sm:$0xff] }
 0x5ca   : > { %8781 = vmatmul.mubr.f32.gmra.mrb[30].mxu1 %v22382_v60  ;;  %4616 = vmatprep.mubr.f32.mxu0 %v22383_v63  ;;  %v11327_v46 = vpack.c.bf16 %v22407_v1, %v22405_v27  ;;  %v22415_v60 = vld [vmem:[#allocation106_spill] sm:$0xff]  ;;  %v22438_v27 = vand.u32 4294901760, %v22437_v31  ;;  %v22439_v1 = vld [vmem:[#allocation199_spill] sm:$0xff] }
 0x5cb   : > { %9044 = vmatprep.mubr.f32.mxu1 %v22383_v63  ;;  %v22416_v30 = vand.u32 4294901760, %v22415_v60  ;;  %v22483_v31 = vld [vmem:[#allocation55_spill] sm:$0xff] }
 0x5cc   : > { %10554 = vmatpush1.bf16.xpose.msra.mxu0 %v10553_v57  ;;  %v22411_v57 = vand.u32 4294901760, %v22410_v41 }
 0x5cd   : > { %10556 = vmatprep.subr.bf16.mxu0 %v10555_v3  ;;  %v10563_v3 = vpack.c.bf16 %v22414_v40, %v22412_v43  ;;  %v11329_v38 = vpack.c.bf16 %v22418_v32, %v22416_v30  ;;  %v22446_v40 = vand.u32 4294901760, %v22132_v58  ;;  %v22450_v32 = vand.u32 4294901760, %v22135_v9 }
 0x5ce   : > { %v10561_v17 = vpack.c.bf16 %v22411_v57, %v22409_v51  ;;  %v22442_v51 = vand.u32 4294901760, %v22441_v52  ;;  %v22443_v57 = vand.u32 4294901760, %v22130_v14  ;;  %v22452_v14 = vand.u32 4294901760, %v22137_v22  ;;  %v22488_v52 = vld [vmem:[#allocation67_spill] sm:$0xff] }
 0x5cf   : > { %11322 = vmatpush1.bf16.xpose.msra.mxu1 %v11321_v15  ;;  %v22419_v15 = vld [vmem:[#allocation269_spill] sm:$0xff]  ;;  %v22454_v58 = vand.u32 4294901760, %v22139_v62  ;;  %v22458_v9 = vand.u32 4294901760, %v22142_v16  ;;  %v22461_v22 = vand.u32 4294901760, %v22015_v23  ;;  %v22470_v23 = vand.u32 4294901760, %v16012_v24  ;;  %v22480_v24 = vld [vmem:[#allocation132_spill] sm:$0xff] }
 0x5d0   : > { %11324 = vmatprep.subr.bf16.mxu1 %v11323_v47  ;;  %v22420_v56 = vand.u32 4294901760, %v22419_v15  ;;  %v22423_v47 = vld [vmem:[#allocation124_spill] sm:$0xff]  ;;  %v22451_v15 = vand.u32 4294901760, %v22136_v29  ;;  %v22460_v29 = vand.u32 4294901760, %v22014_v21  ;;  %v22472_v21 = vand.u32 4294901760, %v16026_v8  ;;  %v22481_v8 = vld [vmem:[#allocation129_spill] sm:$0xff] }
 0x5d1   : > { %v22424_v50 = vand.u32 4294901760, %v22423_v47  ;;  %v22456_v47 = vld [vmem:[#allocation225_spill] sm:$0xff] }
 0x5d2   : > { %v11331_v18 = vpack.c.bf16 %v22422_v61, %v22420_v56  ;;  %v10573_v56 = vpack.c.bf16 %v22452_v14, %v22451_v15  ;;  %v10575_v61 = vpack.c.bf16 %v22454_v58, %v22453_v12  ;;  %v22457_v26 = vand.u32 4294901760, %v22456_v47  ;;  %v22502_v15 = vld [vmem:[#allocation168_spill] sm:$0xff]  ;;  %v22503_v14 = vld [vmem:[#allocation13_spill] sm:$0xff]  ;;  %v22506_v58 = vld [vmem:[#allocation171_spill] sm:$0xff] }
 0x5d3   : > { %v10565_v0 = vpack.c.bf16 %v22426_v49, %v22424_v50  ;;  %v11343_v49 = vpack.c.bf16 %v22459_v34, %v22458_v9  ;;  %v10577_v62 = vpack.c.bf16 %v22461_v22, %v22460_v29  ;;  %v22505_v12 = vld [vmem:[#allocation165_spill] sm:$0xff]  ;;  %v22509_v47 = vld [vmem:[#allocation174_spill] sm:$0xff]  ;;  %v22512_v9 = vld [vmem:[#allocation136_spill] sm:$0xff] }
 0x5d4   : > { %10558 = vmatpush1.bf16.xpose.msra.mxu0 %v10557_v36  ;;  %v22428_v36 = vand.u32 4294901760, %v22427_v20  ;;  %v22464_v20 = vand.u32 4294901760, %v22018_v59  ;;  %v22473_v59 = vld [vmem:[#allocation123_spill] sm:$0xff]  ;;  %v22513_v34 = vld [vmem:[#allocation176_spill] sm:$0xff]  ;;  %v22515_v29 = vld [vmem:[#allocation14_spill] sm:$0xff] }
 0x5d5   : > { %10560 = vmatprep.subr.bf16.mxu0 %v10559_v2  ;;  %v22432_v2 = vand.u32 4294901760, %v22431_v53  ;;  %v22516_v22 = vld [vmem:[#allocation195_spill] sm:$0xff] }
 0x5d6   : > { %v10567_v35 = vpack.c.bf16 %v22430_v10, %v22428_v36  ;;  %v22465_v36 = vld [vmem:[#allocation96_spill] sm:$0xff]  ;;  %v22468_v10 = vld [vmem:[#allocation114_spill] sm:$0xff] }
 0x5d7   : > { %11326 = vmatpush1.bf16.xpose.msra.mxu1 %v11325_v5  ;;  %v11333_v39 = vpack.c.bf16 %v22434_v11, %v22432_v2  ;;  %v22436_v5 = vand.u32 4294901760, %v22435_v54  ;;  %v22466_v16 = vand.u32 4294901760, %v22465_v36  ;;  %v22474_v2 = vand.u32 4294901760, %v22473_v59  ;;  %v22475_v11 = vld [vmem:[#allocation102_spill] sm:$0xff]  ;;  %v22522_v36 = vld [vmem:[#allocation189_spill] sm:$0xff]  ;;  %v22533_v59 = vld [vmem:[#allocation243_spill] sm:$0xff] }
 0x5d8   : > { %11328 = vmatprep.subr.bf16.mxu1 %v11327_v46  ;;  %v22440_v46 = vand.u32 4294901760, %v22439_v1  ;;  %v22478_v54 = vld [vmem:[#allocation126_spill] sm:$0xff]  ;;  %v22486_v1 = vld [vmem:[#allocation144_spill] sm:$0xff] }
 0x5d9   : > { %v11335_v28 = vpack.c.bf16 %v22438_v27, %v22436_v5  ;;  %v11345_v13 = vpack.c.bf16 %v22466_v16, %v22464_v20  ;;  %v11349_v42 = vpack.c.bf16 %v22474_v2, %v22472_v21  ;;  %v22479_v5 = vld [vmem:[#allocation256_spill] sm:$0xff]  ;;  %v22521_v20 = vld [vmem:[#allocation186_spill] sm:$0xff] }
 0x5da   : > { %v10569_v41 = vpack.c.bf16 %v22442_v51, %v22440_v46  ;;  %v22484_v27 = vld [vmem:[#allocation56_spill] sm:$0xff]  ;;  %v22487_v46 = vld [vmem:[#allocation266_spill] sm:$0xff]  ;;  %v22489_v51 = vld [vmem:[#allocation141_spill] sm:$0xff] }
 0x5db   : > { %v22523_v16 = vld [vmem:[#allocation48_spill] sm:$0xff]  ;;  %v22532_v21 = vld [vmem:[#allocation274_spill] sm:$0xff] }
 0x5dc   : > { %10562 = vmatpush1.bf16.xpose.msra.mxu0 %v10561_v17  ;;  %v22444_v17 = vld [vmem:[#allocation212_spill] sm:$0xff] }
 0x5dd   : > { %10564 = vmatprep.subr.bf16.mxu0 %v10563_v3  ;;  %v22445_v43 = vand.u32 4294901760, %v22444_v17  ;;  %v22447_v3 = vld [vmem:[#allocation27_spill] sm:$0xff]  ;;  %v22492_v17 = vld [vmem:[#allocation158_spill] sm:$0xff]  ;;  %v22534_v2 = vld [vmem:[#allocation244_spill] sm:$0xff] }
 0x5de   : > { %v22448_v60 = vand.u32 4294901760, %v22447_v3  ;;  %v22496_v3 = vld [vmem:[#allocation181_spill] sm:$0xff] }
 0x5df   : > { %11330 = vmatpush1.bf16.xpose.msra.mxu1 %v11329_v38  ;;  %v10571_v25 = vpack.c.bf16 %v22445_v43, %v22443_v57  ;;  %v11339_v38 = vpack.c.bf16 %v22450_v32, %v22449_v37  ;;  %v22491_v57 = vld [vmem:[#allocation267_spill] sm:$0xff]  ;;  %v22493_v43 = vld [vmem:[#allocation150_spill] sm:$0xff]  ;;  %v22499_v37 = vld [vmem:[#allocation89_spill] sm:$0xff] }
 0x5e0   : > { %11332 = vmatprep.subr.bf16.mxu1 %v11331_v18  ;;  %v11337_v30 = vpack.c.bf16 %v22448_v60, %v22446_v40  ;;  %v22455_v18 = vand.u32 4294901760, %v22140_v33  ;;  %v22463_v33 = vand.u32 4294901760, %v22017_v19  ;;  %v10581_v19 = vpack.c.bf16 %v22471_v48, %v22470_v23  ;;  %v22495_v40 = vld [vmem:[#allocation170_spill] sm:$0xff]  ;;  %v22497_v60 = vld [vmem:[#allocation153_spill] sm:$0xff]  ;;  %v22500_v32 = vld [vmem:[#allocation95_spill] sm:$0xff] }
 0x5e1   : > { %v22529_v23 = vld [vmem:[#allocation235_spill] sm:$0xff] }
 0x5e2   : > { %v11341_v50 = vpack.c.bf16 %v22457_v26, %v22455_v18  ;;  %v22508_v18 = vld [vmem:[#allocation116_spill] sm:$0xff]  ;;  %v22510_v26 = vld [vmem:[#allocation179_spill] sm:$0xff] }
 0x5e3   : > { %v22530_v48 = vld [vmem:[#allocation215_spill] sm:$0xff] }
 0x5e4   : > { %10566 = vmatpush1.bf16.xpose.msra.mxu0 %v10565_v0  ;;  %v10579_v0 = vpack.c.bf16 %v22463_v33, %v22462_v44  ;;  %v22518_v44 = vld [vmem:[#allocation188_spill] sm:$0xff] }
 0x5e5   : > { %10568 = vmatprep.subr.bf16.mxu0 %v10567_v35  ;;  %v22469_v35 = vand.u32 4294901760, %v22468_v10  ;;  %v22519_v33 = vld [vmem:[#allocation200_spill] sm:$0xff]  ;;  %v22526_v10 = vld [vmem:[#allocation214_spill] sm:$0xff] }
 0x5e7   : > { %11334 = vmatpush1.bf16.xpose.msra.mxu1 %v11333_v39  ;;  %v11347_v53 = vpack.c.bf16 %v22469_v35, %v22467_v6  ;;  %v22477_v39 = vld [vmem:[#allocation32_spill] sm:$0xff]  ;;  %v22525_v6 = vld [vmem:[#allocation193_spill] sm:$0xff]  ;;  %v22527_v35 = vld [vmem:[#allocation78_spill] sm:$0xff] }
 0x5e8   : > { %11336 = vmatprep.subr.bf16.mxu1 %v11335_v28  ;;  %v22485_v28 = vld [vmem:[#allocation138_spill] sm:$0xff] }
 0x5ec   : > { %10570 = vmatpush1.bf16.xpose.msra.mxu0 %v10569_v41  ;;  %v22490_v41 = vld [vmem:[#allocation147_spill] sm:$0xff] }
 0x5ed   : > { %10572 = vmatprep.subr.bf16.mxu0 %v10571_v25  ;;  %v22494_v25 = vld [vmem:[#allocation156_spill] sm:$0xff] }
 0x5ef   : > { %11338 = vmatpush1.bf16.xpose.msra.mxu1 %v11337_v30  ;;  %v22498_v30 = vld [vmem:[#allocation159_spill] sm:$0xff] }
 0x5f0   : > { %11340 = vmatprep.subr.bf16.mxu1 %v11339_v38  ;;  %v22501_v38 = vld [vmem:[#allocation162_spill] sm:$0xff] }
 0x5f4   : > { %10574 = vmatpush1.bf16.xpose.msra.mxu0 %v10573_v56  ;;  %v22504_v56 = vld [vmem:[#allocation109_spill] sm:$0xff] }
 0x5f5   : > { %10576 = vmatprep.subr.bf16.mxu0 %v10575_v61  ;;  %v22507_v61 = vld [vmem:[#allocation268_spill] sm:$0xff] }
 0x5f7   : > { %11342 = vmatpush1.bf16.xpose.msra.mxu1 %v11341_v50  ;;  %v22511_v50 = vld [vmem:[#allocation133_spill] sm:$0xff] }
 0x5f8   : > { %11344 = vmatprep.subr.bf16.mxu1 %v11343_v49  ;;  %v22514_v49 = vld [vmem:[#allocation182_spill] sm:$0xff] }
 0x5fc   : > { %10578 = vmatpush1.bf16.xpose.msra.mxu0 %v10577_v62  ;;  %v22517_v62 = vld [vmem:[#allocation185_spill] sm:$0xff] }
 0x5fd   : > { %10580 = vmatprep.subr.bf16.mxu0 %v10579_v0  ;;  %v22520_v0 = vld [vmem:[#allocation208_spill] sm:$0xff] }
 0x5ff   : > { %11346 = vmatpush1.bf16.xpose.msra.mxu1 %v11345_v13  ;;  %v22524_v13 = vld [vmem:[#allocation57_spill] sm:$0xff] }
 0x600   : > { %11348 = vmatprep.subr.bf16.mxu1 %v11347_v53  ;;  %v22528_v53 = vld [vmem:[#allocation99_spill] sm:$0xff] }
 0x604   : > { %10582 = vmatpush1.bf16.xpose.msra.mxu0 %v10581_v19  ;;  %v22531_v19 = vld [vmem:[#allocation271_spill] sm:$0xff] }
 0x605   : > { %10584 = vmatprep.subr.bf16.mxu0 %v22475_v11  ;;  %v22536_v11 = vld [vmem:[#allocation280_spill] sm:$0xff] }
 0x607   : > { %11350 = vmatpush1.bf16.xpose.msra.mxu1 %v11349_v42  ;;  %v22535_v42 = vld [vmem:[#allocation277_spill] sm:$0xff] }
 0x608   : > { %11352 = vmatprep.subr.bf16.mxu1 %v22476_v45  ;;  %v22537_v45 = vld [vmem:[#allocation236_spill] sm:$0xff] }
 0x60b   : > { %4618 = vmatmul.mubr.f32.vlgmr.msra.gmra.mrb[0].mxu0 %v22477_v39 }
 0x60c   : > { %10586 = vmatpush1.bf16.xpose.msra.mxu0 %v22478_v54  ;;  %4624 = vmatprep.mubr.f32.mxu0 %v22479_v5  ;;  %v22538_v54 = vld [vmem:[#allocation239_spill] sm:$0xff] }
 0x60d   : > { %10588 = vmatprep.subr.bf16.mxu0 %v22480_v24  ;;  %v22539_v24 = vld [vmem:[#allocation283_spill] sm:$0xff] }
 0x60e   : > { %9046 = vmatmul.mubr.f32.vlgmr.msra.gmra.mrb[0].mxu1 %v22477_v39 }
 0x60f   : > { %11354 = vmatpush1.bf16.xpose.msra.mxu1 %v22481_v8  ;;  %9052 = vmatprep.mubr.f32.mxu1 %v22479_v5  ;;  %v22540_v8 = vld [vmem:[#allocation228_spill] sm:$0xff] }
 0x610   : > { %11356 = vmatprep.subr.bf16.mxu1 %v22482_v4  ;;  %4626 = vmatmul.mubr.f32.gmra.mrb[2].mxu0 %v22483_v31  ;;  %v22541_v4 = vld [vmem:[#allocation229_spill] sm:$0xff] }
 0x611   : > { %4632 = vmatprep.mubr.f32.mxu0 %v22484_v27 }
 0x612   : > { %9054 = vmatmul.mubr.f32.gmra.mrb[2].mxu1 %v22483_v31 }
 0x613   : > { %9060 = vmatprep.mubr.f32.mxu1 %v22484_v27 }
 0x614   : > { %10590 = vmatpush1.bf16.xpose.msra.mxu0 %v22485_v28  ;;  %v22542_v28 = vld [vmem:[#allocation173_spill] sm:$0xff] }
 0x615   : > { %10592 = vmatprep.subr.bf16.mxu0 %v22486_v1  ;;  %4634 = vmatmul.mubr.f32.gmra.mrb[4].mxu0 %v22487_v46  ;;  %v22543_v1 = vld [vmem:[#allocation248_spill] sm:$0xff] }
 0x616   : > { %9062 = vmatmul.mubr.f32.gmra.mrb[4].mxu1 %v22487_v46  ;;  %4640 = vmatprep.mubr.f32.mxu0 %v22488_v52 }
 0x617   : > { %11358 = vmatpush1.bf16.xpose.msra.mxu1 %v22489_v51  ;;  %9068 = vmatprep.mubr.f32.mxu1 %v22488_v52  ;;  %v22544_v51 = vld [vmem:[#allocation160_spill] sm:$0xff] }
 0x618   : > { %11360 = vmatprep.subr.bf16.mxu1 %v22490_v41  ;;  %v22545_v41 = vld [vmem:[#allocation164_spill] sm:$0xff] }
 0x619   : > { %4642 = vmatmul.mubr.f32.gmra.mrb[6].mxu0 %v22491_v57 }
 0x61a   : > { %9070 = vmatmul.mubr.f32.gmra.mrb[6].mxu1 %v22491_v57  ;;  %4648 = vmatprep.mubr.f32.mxu0 %v22492_v17 }
 0x61b   : > { %9076 = vmatprep.mubr.f32.mxu1 %v22492_v17 }
 0x61c   : > { %10594 = vmatpush1.bf16.xpose.msra.mxu0 %v22493_v43  ;;  %v22546_v43 = vld [vmem:[#allocation249_spill] sm:$0xff] }
 0x61d   : > { %10596 = vmatprep.subr.bf16.mxu0 %v22494_v25  ;;  %4650 = vmatmul.mubr.f32.gmra.mrb[8].mxu0 %v22495_v40  ;;  %v22547_v25 = vld [vmem:[#allocation252_spill] sm:$0xff] }
 0x61e   : > { %9078 = vmatmul.mubr.f32.gmra.mrb[8].mxu1 %v22495_v40  ;;  %4656 = vmatprep.mubr.f32.mxu0 %v22496_v3 }
 0x61f   : > { %11362 = vmatpush1.bf16.xpose.msra.mxu1 %v22497_v60  ;;  %9084 = vmatprep.mubr.f32.mxu1 %v22496_v3  ;;  %v22548_v60 = vld [vmem:[#allocation206_spill] sm:$0xff] }
 0x620   : > { %11364 = vmatprep.subr.bf16.mxu1 %v22498_v30  ;;  %v22549_v30 = vld [vmem:[#allocation167_spill] sm:$0xff] }
 0x621   : > { %4658 = vmatmul.mubr.f32.gmra.mrb[10].mxu0 %v22499_v37 }
 0x622   : > { %9086 = vmatmul.mubr.f32.gmra.mrb[10].mxu1 %v22499_v37  ;;  %4664 = vmatprep.mubr.f32.mxu0 %v22500_v32 }
 0x623   : > { %9092 = vmatprep.mubr.f32.mxu1 %v22500_v32 }
 0x624   : > { %10598 = vmatpush1.bf16.xpose.msra.mxu0 %v22501_v38  ;;  %v22551_v38 = vld [vmem:[#allocation261_spill] sm:$0xff] }
 0x625   : > { %10600 = vmatprep.subr.bf16.mxu0 %v22502_v15  ;;  %4666 = vmatmul.mubr.f32.gmra.mrb[12].mxu0 %v22503_v14  ;;  %v22552_v15 = vld [vmem:[#allocation37_spill] sm:$0xff] }
 0x626   : > { %9094 = vmatmul.mubr.f32.gmra.mrb[12].mxu1 %v22503_v14  ;;  %4672 = vmatprep.mubr.f32.mxu0 %v22504_v56 }
 0x627   : > { %11366 = vmatpush1.bf16.xpose.msra.mxu1 %v22505_v12  ;;  %9100 = vmatprep.mubr.f32.mxu1 %v22504_v56  ;;  %v22553_v12 = vld [vmem:[#allocation172_spill] sm:$0xff] }
 0x628   : > { %11368 = vmatprep.subr.bf16.mxu1 %v22506_v58  ;;  %v22554_v58 = vld [vmem:[#allocation38_spill] sm:$0xff] }
 0x629   : > { %4674 = vmatmul.mubr.f32.gmra.mrb[14].mxu0 %v22507_v61 }
 0x62a   : > { %9102 = vmatmul.mubr.f32.gmra.mrb[14].mxu1 %v22507_v61  ;;  %4680 = vmatprep.mubr.f32.mxu0 %v22508_v18 }
 0x62b   : > { %9108 = vmatprep.mubr.f32.mxu1 %v22508_v18 }
 0x62c   : > { %10602 = vmatpush1.bf16.xpose.msra.mxu0 %v22509_v47  ;;  %v22555_v47 = vld [vmem:[#allocation178_spill] sm:$0xff] }
 0x62d   : > { %10604 = vmatprep.subr.bf16.mxu0 %v22510_v26  ;;  %4682 = vmatmul.mubr.f32.gmra.mrb[16].mxu0 %v22511_v50  ;;  %v22556_v26 = vld [vmem:[#allocation207_spill] sm:$0xff] }
 0x62e   : > { %9110 = vmatmul.mubr.f32.gmra.mrb[16].mxu1 %v22511_v50  ;;  %4688 = vmatprep.mubr.f32.mxu0 %v22512_v9 }
 0x62f   : > { %11370 = vmatpush1.bf16.xpose.msra.mxu1 %v22513_v34  ;;  %9116 = vmatprep.mubr.f32.mxu1 %v22512_v9  ;;  %v22557_v34 = vld [vmem:[#allocation219_spill] sm:$0xff] }
 0x630   : > { %11372 = vmatprep.subr.bf16.mxu1 %v22514_v49  ;;  %v22558_v49 = vld [vmem:[#allocation33_spill] sm:$0xff] }
 0x631   : > { %4690 = vmatmul.mubr.f32.gmra.mrb[18].mxu0 %v22515_v29 }
 0x632   : > { %9118 = vmatmul.mubr.f32.gmra.mrb[18].mxu1 %v22515_v29  ;;  %4696 = vmatprep.mubr.f32.mxu0 %v22516_v22 }
 0x633   : > { %9124 = vmatprep.mubr.f32.mxu1 %v22516_v22 }
 0x634   : > { %10606 = vmatpush1.bf16.xpose.msra.mxu0 %v22517_v62  ;;  %v22559_v62 = vld [vmem:[#allocation247_spill] sm:$0xff] }
 0x635   : > { %10608 = vmatprep.subr.bf16.mxu0 %v22518_v44  ;;  %4698 = vmatmul.mubr.f32.gmra.mrb[20].mxu0 %v22519_v33  ;;  %v22560_v44 = vld [vmem:[#allocation250_spill] sm:$0xff] }
 0x636   : > { %9126 = vmatmul.mubr.f32.gmra.mrb[20].mxu1 %v22519_v33  ;;  %4704 = vmatprep.mubr.f32.mxu0 %v22520_v0 }
 0x637   : > { %11374 = vmatpush1.bf16.xpose.msra.mxu1 %v22521_v20  ;;  %9132 = vmatprep.mubr.f32.mxu1 %v22520_v0  ;;  %v22561_v20 = vld [vmem:[#allocation210_spill] sm:$0xff] }
 0x638   : > { %11376 = vmatprep.subr.bf16.mxu1 %v22522_v36  ;;  %v22562_v36 = vld [vmem:[#allocation41_spill] sm:$0xff] }
 0x639   : > { %4706 = vmatmul.mubr.f32.gmra.mrb[22].mxu0 %v22523_v16 }
 0x63a   : > { %9134 = vmatmul.mubr.f32.gmra.mrb[22].mxu1 %v22523_v16  ;;  %4712 = vmatprep.mubr.f32.mxu0 %v22524_v13 }
 0x63b   : > { %9140 = vmatprep.mubr.f32.mxu1 %v22524_v13 }
 0x63c   : > { %10610 = vmatpush1.bf16.xpose.msra.mxu0 %v22525_v6  ;;  %v22563_v6 = vld [vmem:[#allocation47_spill] sm:$0xff] }
 0x63d   : > { %10612 = vmatprep.subr.bf16.mxu0 %v22526_v10  ;;  %4714 = vmatmul.mubr.f32.gmra.mrb[24].mxu0 %v22527_v35  ;;  %v22564_v10 = vld [vmem:[#allocation184_spill] sm:$0xff] }
 0x63e   : > { %9142 = vmatmul.mubr.f32.gmra.mrb[24].mxu1 %v22527_v35  ;;  %4720 = vmatprep.mubr.f32.mxu0 %v22528_v53 }
 0x63f   : > { %11378 = vmatpush1.bf16.xpose.msra.mxu1 %v22529_v23  ;;  %9148 = vmatprep.mubr.f32.mxu1 %v22528_v53  ;;  %v22565_v23 = vld [vmem:[#allocation52_spill] sm:$0xff] }
 0x640   : > { %11380 = vmatprep.subr.bf16.mxu1 %v22530_v48  ;;  %v22566_v48 = vld [vmem:[#allocation255_spill] sm:$0xff] }
 0x641   : > { %4722 = vmatmul.mubr.f32.gmra.mrb[26].mxu0 %v22531_v19 }
 0x642   : > { %9150 = vmatmul.mubr.f32.gmra.mrb[26].mxu1 %v22531_v19  ;;  %4728 = vmatprep.mubr.f32.mxu0 %v22532_v21 }
 0x643   : > { %9156 = vmatprep.mubr.f32.mxu1 %v22532_v21 }
 0x644   : > { %10614 = vmatpush1.bf16.xpose.msra.mxu0 %v22533_v59  ;;  %v22567_v59 = vld [vmem:[#allocation53_spill] sm:$0xff] }
 0x645   : > { %10616 = vmatprep.subr.bf16.mxu0 %v22534_v2  ;;  %4730 = vmatmul.mubr.f32.gmra.mrb[28].mxu0 %v22535_v42 }
 0x646   : > { %9158 = vmatmul.mubr.f32.gmra.mrb[28].mxu1 %v22535_v42  ;;  %4736 = vmatprep.mubr.f32.mxu0 %v22536_v11 }
 0x647   : > { %11382 = vmatpush1.bf16.xpose.msra.mxu1 %v22537_v45  ;;  %9164 = vmatprep.mubr.f32.mxu1 %v22536_v11 }
 0x648   : > { %11384 = vmatprep.subr.bf16.mxu1 %v22538_v54 }
 0x649   : > { %4738 = vmatmul.mubr.f32.gmra.mrb[30].mxu0 %v22539_v24 }
 0x64a   : > { %9166 = vmatmul.mubr.f32.gmra.mrb[30].mxu1 %v22539_v24  ;;  %4873 = vmatprep.mubr.f32.mxu0 %v22383_v63 }
 0x64b   : > { %9301 = vmatprep.mubr.f32.mxu1 %v22383_v63  ;;  %v22550_v63 = vld [vmem:[#allocation166_spill] sm:$0xff] }
 0x64c   : > { %10618 = vmatpush1.bf16.xpose.msra.mxu0 %v22540_v8 }
 0x64d   : > { %10620 = vmatprep.subr.bf16.mxu0 %v22541_v4 }
 0x64f   : > { %11386 = vmatpush1.bf16.xpose.msra.mxu1 %v22542_v28  ;;  %v12212_v28 = vld [vmem:[%s12672_s9 + $0x30] sm:$0xff] }
 0x650   : > { %11388 = vmatprep.subr.bf16.mxu1 %v22543_v1 }
 0x654   : > { %10622 = vmatpush1.bf16.xpose.msra.mxu0 %v22544_v51 }
 0x655   : > { %10624 = vmatprep.subr.bf16.mxu0 %v22545_v41 }
 0x657   : > { %11390 = vmatpush1.bf16.xpose.msra.mxu1 %v22546_v43 }
 0x658   : > { %11392 = vmatprep.subr.bf16.mxu1 %v22547_v25  ;;  %v12213_v25 = vld [vmem:[%s12672_s9 + $0x38] sm:$0xff] }
 0x65c   : > { %10626 = vmatpush1.bf16.xpose.msra.mxu0 %v22548_v60 }
 0x65d   : > { %10628 = vmatprep.subr.bf16.mxu0 %v22549_v30  ;;  %v12214_v30 = vld [vmem:[%s12672_s9 + $0x40] sm:$0xff] }
 0x65f   : > { %11394 = vmatpush1.bf16.xpose.msra.mxu1 %v22550_v63 }
 0x660   : > { %11396 = vmatprep.subr.bf16.mxu1 %v22551_v38 }
 0x664   : > { %10630 = vmatpush1.bf16.xpose.msra.mxu0 %v22552_v15 }
 0x665   : > { %10632 = vmatprep.subr.bf16.mxu0 %v22553_v12  ;;  %v12215_v12 = vld [vmem:[%s12672_s9 + $0x48] sm:$0xff] }
 0x667   : > { %11398 = vmatpush1.bf16.xpose.msra.mxu1 %v22554_v58 }
 0x668   : > { %11400 = vmatprep.subr.bf16.mxu1 %v22555_v47 }
 0x66c   : > { %10634 = vmatpush1.bf16.xpose.msra.mxu0 %v22556_v26 }
 0x66d   : > { %10636 = vmatprep.subr.bf16.mxu0 %v22557_v34 }
 0x66f   : > { %11402 = vmatpush1.bf16.xpose.msra.mxu1 %v22558_v49 }
 0x670   : > { %11404 = vmatprep.subr.bf16.mxu1 %v22559_v62 }
 0x674   : > { %10638 = vmatpush1.bf16.xpose.msra.mxu0 %v22560_v44 }
 0x675   : > { %10640 = vmatprep.subr.bf16.mxu0 %v22561_v20 }
 0x677   : > { %11406 = vmatpush1.bf16.xpose.msra.mxu1 %v22562_v36  ;;  %v12216_v36 = vld [vmem:[%s12672_s9 + $0x50] sm:$0xff] }
 0x678   : > { %11408 = vmatprep.subr.bf16.mxu1 %v22563_v6 }
 0x67c   : > { %10642 = vmatpush1.bf16.xpose.msra.mxu0 %v22564_v10 }
 0x67d   : > { %10644 = vmatprep.subr.bf16.mxu0 %v22565_v23 }
 0x67f   : > { %11410 = vmatpush1.bf16.xpose.msra.mxu1 %v22566_v48 }
 0x680   : > { %11412 = vmatprep.subr.bf16.mxu1 %v22567_v59  ;;  %v12217_v59 = vld [vmem:[%s12672_s9 + $0x58] sm:$0xff] }
 0x684   : > { %10646 = vmatpush1.bf16.xpose.msra.mxu0 %v22240_v7  ;;  %v9433_v7 = vlaneseq }
 0x687   : > { %11414 = vmatpush1.bf16.xpose.msra.mxu1 %v22243_v55  ;;  %v9434_v55 = vshrl.u32 %v9433_v7, 7 }
 0x68b   : > { %4875 = vmatmul.mubr.f32.vlgmr.msra.gmra.mrb[0].mxu0 %v22477_v39 }
 0x68c   : > { %4881 = vmatprep.mubr.f32.mxu0 %v22479_v5 }
 0x68e   : > { %9303 = vmatmul.mubr.f32.vlgmr.msra.gmra.mrb[0].mxu1 %v22477_v39  ;;  %v9435_v39 = vsub.s32 0, %v9434_v55 }
 0x68f   : > { %9309 = vmatprep.mubr.f32.mxu1 %v22479_v5  ;;  %4883 = vmatmul.mubr.f32.gmra.mrb[2].mxu0 %v22483_v31  ;;  %v9429_v5 = vld [vmem:[#allocation7] ss:$2 sm:$0xf] }
 0x690   : > { %4889 = vmatprep.mubr.f32.mxu0 %v22484_v27 }
 0x692   : > { %9311 = vmatmul.mubr.f32.gmra.mrb[2].mxu1 %v22483_v31  ;;  %v9439_v31 = vsub.s32 1, %v9434_v55 }
 0x693   : > { %9317 = vmatprep.mubr.f32.mxu1 %v22484_v27  ;;  %4891 = vmatmul.mubr.f32.gmra.mrb[4].mxu0 %v22487_v46  ;;  %v9443_v27 = vsub.s32 2, %v9434_v55 }
 0x694   : > { %4897 = vmatprep.mubr.f32.mxu0 %v22488_v52 }
 0x696   : > { %9319 = vmatmul.mubr.f32.gmra.mrb[4].mxu1 %v22487_v46  ;;  %v18382_v46 = vrot.slane %v9429_v5, %v9435_v39 }
 0x697   : > { %9325 = vmatprep.mubr.f32.mxu1 %v22488_v52  ;;  %4899 = vmatmul.mubr.f32.gmra.mrb[6].mxu0 %v22491_v57  ;;  %v9447_v52 = vsub.s32 3, %v9434_v55  ;;  %v12218_v55 = vld [vmem:[%s12672_s9 + $0x60] sm:$0xff] }
 0x698   : > { %4905 = vmatprep.mubr.f32.mxu0 %v22492_v17  ;;  %v9461_v63 = vmul.f32 %v12214_v30, %v18382_v46 }
 0x69a   : > { %9327 = vmatmul.mubr.f32.gmra.mrb[6].mxu1 %v22491_v57  ;;  %v18384_v57 = vrot.slane %v9429_v5, %v9439_v31 }
 0x69b   : > { %9333 = vmatprep.mubr.f32.mxu1 %v22492_v17  ;;  %4907 = vmatmul.mubr.f32.gmra.mrb[8].mxu0 %v22495_v40  ;;  %v9431_v17 = vld [vmem:[#allocation7 + $0x1] ss:$2 sm:$0xf] }
 0x69c   : > { %4913 = vmatprep.mubr.f32.mxu0 %v22496_v3  ;;  %v18409_v45 = vrot.slane %v9431_v17, %v9447_v52  ;;  %v9462_v58 = vmul.f32 %v12215_v12, %v18384_v57  ;;  %v12226_v12 = vld [vmem:[%s12672_s9 + $0xa0] sm:$0xff] }
 0x69e   : > { %9335 = vmatmul.mubr.f32.gmra.mrb[8].mxu1 %v22495_v40  ;;  %v18386_v40 = vrot.slane %v9429_v5, %v9443_v27 }
 0x69f   : > { %9341 = vmatprep.mubr.f32.mxu1 %v22496_v3  ;;  %4915 = vmatmul.mubr.f32.gmra.mrb[10].mxu0 %v22499_v37  ;;  %v12206_v3 = vld [vmem:[%s12672_s9] sm:$0xff] }
 0x6a0   : > { %4921 = vmatprep.mubr.f32.mxu0 %v22500_v32  ;;  %v9459_v1 = vmul.f32 %v12212_v28, %v18386_v40  ;;  %v9463_v6 = vmul.f32 %v12216_v36, %v18386_v40 }
 0x6a2   : > { %9343 = vmatmul.mubr.f32.gmra.mrb[10].mxu1 %v22499_v37  ;;  %v9453_v37 = vmul.f32 %v12206_v3, %v18382_v46 }
 0x6a3   : > { %9349 = vmatprep.mubr.f32.mxu1 %v22500_v32  ;;  %4923 = vmatmul.mubr.f32.gmra.mrb[12].mxu0 %v22503_v14  ;;  %v18390_v32 = vrot.slane %v9429_v5, %v9447_v52 }
 0x6a4   : > { %4929 = vmatprep.mubr.f32.mxu0 %v22504_v56 }
 0x6a5   : > { %v9460_v60 = vmul.f32 %v12213_v25, %v18390_v32  ;;  %v9464_v7 = vmul.f32 %v12217_v59, %v18390_v32 }
 0x6a6   : > { %9351 = vmatmul.mubr.f32.gmra.mrb[12].mxu1 %v22503_v14  ;;  %v12207_v14 = vld [vmem:[%s12672_s9 + $0x8] sm:$0xff] }
 0x6a7   : > { %9357 = vmatprep.mubr.f32.mxu1 %v22504_v56  ;;  %4931 = vmatmul.mubr.f32.gmra.mrb[14].mxu0 %v22507_v61  ;;  %v9454_v56 = vmul.f32 %v12207_v14, %v18384_v57 }
 0x6a8   : > { %4937 = vmatprep.mubr.f32.mxu0 %v22508_v18 }
 0x6aa   : > { %9359 = vmatmul.mubr.f32.gmra.mrb[14].mxu1 %v22507_v61  ;;  %v18394_v61 = vrot.slane %v9431_v17, %v9435_v39  ;;  %v9465_v39 = vmul.f32 %v12218_v55, %v18382_v46 }
 0x6ab   : > { %9365 = vmatprep.mubr.f32.mxu1 %v22508_v18  ;;  %4939 = vmatmul.mubr.f32.gmra.mrb[16].mxu0 %v22511_v50 }
 0x6ac   : > { %4945 = vmatprep.mubr.f32.mxu0 %v22512_v9 }
 0x6ae   : > { %9367 = vmatmul.mubr.f32.gmra.mrb[16].mxu1 %v22511_v50  ;;  %v12208_v50 = vld [vmem:[%s12672_s9 + $0x10] sm:$0xff] }
 0x6af   : > { %9373 = vmatprep.mubr.f32.mxu1 %v22512_v9  ;;  %4947 = vmatmul.mubr.f32.gmra.mrb[18].mxu0 %v22515_v29  ;;  %v9455_v9 = vmul.f32 %v12208_v50, %v18386_v40 }
 0x6b0   : > { %4953 = vmatprep.mubr.f32.mxu0 %v22516_v22 }
 0x6b2   : > { %9375 = vmatmul.mubr.f32.gmra.mrb[18].mxu1 %v22515_v29  ;;  %v18398_v29 = vrot.slane %v9431_v17, %v9439_v31 }
 0x6b3   : > { %9381 = vmatprep.mubr.f32.mxu1 %v22516_v22  ;;  %4955 = vmatmul.mubr.f32.gmra.mrb[20].mxu0 %v22519_v33 }
 0x6b4   : > { %4961 = vmatprep.mubr.f32.mxu0 %v22520_v0 }
 0x6b6   : > { %9383 = vmatmul.mubr.f32.gmra.mrb[20].mxu1 %v22519_v33 }
 0x6b7   : > { %9389 = vmatprep.mubr.f32.mxu1 %v22520_v0  ;;  %4963 = vmatmul.mubr.f32.gmra.mrb[22].mxu0 %v22523_v16  ;;  %v12209_v0 = vld [vmem:[%s12672_s9 + $0x18] sm:$0xff] }
 0x6b8   : > { %4969 = vmatprep.mubr.f32.mxu0 %v22524_v13 }
 0x6ba   : > { %9391 = vmatmul.mubr.f32.gmra.mrb[22].mxu1 %v22523_v16  ;;  %v9456_v16 = vmul.f32 %v12209_v0, %v18390_v32 }
 0x6bb   : > { %9397 = vmatprep.mubr.f32.mxu1 %v22524_v13  ;;  %4971 = vmatmul.mubr.f32.gmra.mrb[24].mxu0 %v22527_v35  ;;  %v12210_v13 = vld [vmem:[%s12672_s9 + $0x20] sm:$0xff] }
 0x6bc   : > { %4977 = vmatprep.mubr.f32.mxu0 %v22528_v53 }
 0x6be   : > { %9399 = vmatmul.mubr.f32.gmra.mrb[24].mxu1 %v22527_v35  ;;  %v9457_v35 = vmul.f32 %v12210_v13, %v18382_v46  ;;  %v12221_v13 = vld [vmem:[%s12672_s9 + $0x78] sm:$0xff] }
 0x6bf   : > { %9405 = vmatprep.mubr.f32.mxu1 %v22528_v53  ;;  %4979 = vmatmul.mubr.f32.gmra.mrb[26].mxu0 %v22531_v19  ;;  %v18404_v53 = vrot.slane %v9431_v17, %v9443_v27  ;;  %v12219_v27 = vld [vmem:[%s12672_s9 + $0x68] sm:$0xff] }
 0x6c0   : > { %4985 = vmatprep.mubr.f32.mxu0 %v22532_v21  ;;  %v9466_v52 = vmul.f32 %v12219_v27, %v18384_v57  ;;  %v12230_v27 = vld [vmem:[%s12672_s9 + $0xc0] sm:$0xff] }
 0x6c2   : > { %9407 = vmatmul.mubr.f32.gmra.mrb[26].mxu1 %v22531_v19 }
 0x6c3   : > { %9413 = vmatprep.mubr.f32.mxu1 %v22532_v21  ;;  %4987 = vmatmul.mubr.f32.gmra.mrb[28].mxu0 %v22535_v42  ;;  %v12211_v21 = vld [vmem:[%s12672_s9 + $0x28] sm:$0xff] }
 0x6c4   : > { %4993 = vmatprep.mubr.f32.mxu0 %v22536_v11  ;;  %v9458_v2 = vmul.f32 %v12211_v21, %v18384_v57 }
 0x6c6   : > { %9415 = vmatmul.mubr.f32.gmra.mrb[28].mxu1 %v22535_v42 }
 0x6c7   : > { %9421 = vmatprep.mubr.f32.mxu1 %v22536_v11  ;;  %4995 = vmatmul.mubr.f32.gmra.mrb[30].mxu0 %v22539_v24 }
 0x6ca   : > { %9423 = vmatmul.mubr.f32.gmra.mrb[30].mxu1 %v22539_v24 }
 0x75e   : > { %v4876_v18 = vpop.f32.mrb[0].mxu0 }
 0x75f   : > { %v9517_v22 = vsub.f32 %v4876_v18, %v9453_v37  ;;  %v4878_v33 = vpop.f32.mrb[1].mxu0 }
 0x760   : > { %v9518_v19 = vsub.f32 %v4878_v33, %v9454_v56 }
 0x761   : > { %v9602_v42 = vadd.f32 %v18394_v61, %v9517_v22  ;;  %v9304_v11 = vpop.f32.mrb[0].mxu1 }
 0x762   : > { %v9519_v54 = vsub.f32 %v9304_v11, %v9455_v9  ;;  %v9603_v24 = vadd.f32 %v18398_v29, %v9518_v19  ;;  %v9306_v8 = vpop.f32.mrb[1].mxu1  ;;  %v4884_v4 = vpop.f32.mrb[2].mxu0  ;;  %v12220_v9 = vld [vmem:[%s12672_s9 + $0x70] sm:$0xff]  ;;  %v12222_v19 = vld [vmem:[%s12672_s9 + $0x80] sm:$0xff]  ;;  %v12223_v11 = vld [vmem:[%s12672_s9 + $0x88] sm:$0xff] }
 0x763   : > { %9666 = vst [vmem:[%s18416_s20] sm:$0xff] %v9602_v42  ;;  %v9520_v51 = vsub.f32 %v9306_v8, %v9456_v16  ;;  %v9521_v41 = vsub.f32 %v4884_v4, %v9457_v35  ;;  %v4886_v43 = vpop.f32.mrb[3].mxu0  ;;  %v9467_v22 = vmul.f32 %v12220_v9, %v18386_v40  ;;  %v9468_v35 = vmul.f32 %v12221_v13, %v18390_v32 }
 0x764   : > { %v9604_v38 = vadd.f32 %v18404_v53, %v9519_v54  ;;  %9667 = vst [vmem:[%s18416_s20 + $0x8] sm:$0xff] %v9603_v24  ;;  %v9522_v15 = vsub.f32 %v4886_v43, %v9458_v2  ;;  %v9469_v21 = vmul.f32 %v12222_v19, %v18382_v46  ;;  %v9470_v54 = vmul.f32 %v12223_v11, %v18384_v57  ;;  %v12224_v43 = vld [vmem:[%s12672_s9 + $0x90] sm:$0xff]  ;;  %v12234_v11 = vld [vmem:[%s12672_s9 + $0xe0] sm:$0xff] }
 0x765   : > { %v9605_v47 = vadd.f32 %v18409_v45, %v9520_v51  ;;  %v9606_v26 = vadd.f32 %v18394_v61, %v9521_v41  ;;  %v9312_v34 = vpop.f32.mrb[2].mxu1  ;;  %v9471_v25 = vmul.f32 %v12224_v43, %v18386_v40 }
 0x766   : > { %9668 = vst [vmem:[%s18416_s20 + $0x10] sm:$0xff] %v9604_v38  ;;  %v9523_v49 = vsub.f32 %v9312_v34, %v9459_v1  ;;  %v9607_v62 = vadd.f32 %v18398_v29, %v9522_v15  ;;  %v9314_v44 = vpop.f32.mrb[3].mxu1  ;;  %v4892_v20 = vpop.f32.mrb[4].mxu0  ;;  %v12225_v38 = vld [vmem:[%s12672_s9 + $0x98] sm:$0xff]  ;;  %v12227_v34 = vld [vmem:[%s12672_s9 + $0xa8] sm:$0xff] }
 0x767   : > { %9669 = vst [vmem:[%s18416_s20 + $0x18] sm:$0xff] %v9605_v47  ;;  %9670 = vst [vmem:[%s18416_s20 + $0x20] sm:$0xff] %v9606_v26  ;;  %v9524_v10 = vsub.f32 %v9314_v44, %v9460_v60  ;;  %v9525_v23 = vsub.f32 %v4892_v20, %v9461_v63  ;;  %v4894_v48 = vpop.f32.mrb[5].mxu0  ;;  %v9472_v15 = vmul.f32 %v12225_v38, %v18390_v32 }
 0x768   : > { %v9608_v5 = vadd.f32 %v18404_v53, %v9523_v49  ;;  %9671 = vst [vmem:[%s18416_s20 + $0x28] sm:$0xff] %v9607_v62  ;;  %v9526_v31 = vsub.f32 %v4894_v48, %v9462_v58  ;;  %v9473_v58 = vmul.f32 %v12226_v12, %v18382_v46  ;;  %v9474_v49 = vmul.f32 %v12227_v34, %v18384_v57  ;;  %v12228_v48 = vld [vmem:[%s12672_s9 + $0xb0] sm:$0xff]  ;;  %v12238_v34 = vld [vmem:[%s12672_s9 + $0x100] sm:$0xff] }
 0x769   : > { %v9609_v17 = vadd.f32 %v18409_v45, %v9524_v10  ;;  %v9610_v3 = vadd.f32 %v18394_v61, %v9525_v23  ;;  %v9320_v37 = vpop.f32.mrb[4].mxu1  ;;  %v9475_v59 = vmul.f32 %v12228_v48, %v18386_v40 }
 0x76a   : > { %9672 = vst [vmem:[%s18416_s20 + $0x30] sm:$0xff] %v9608_v5  ;;  %v9527_v14 = vsub.f32 %v9320_v37, %v9463_v6  ;;  %v9611_v56 = vadd.f32 %v18398_v29, %v9526_v31  ;;  %v9322_v18 = vpop.f32.mrb[5].mxu1  ;;  %v4900_v50 = vpop.f32.mrb[6].mxu0  ;;  %v12229_v5 = vld [vmem:[%s12672_s9 + $0xb8] sm:$0xff]  ;;  %v12231_v37 = vld [vmem:[%s12672_s9 + $0xc8] sm:$0xff] }
 0x76b   : > { %9673 = vst [vmem:[%s18416_s20 + $0x38] sm:$0xff] %v9609_v17  ;;  %9674 = vst [vmem:[%s18416_s20 + $0x40] sm:$0xff] %v9610_v3  ;;  %v9528_v33 = vsub.f32 %v9322_v18, %v9464_v7  ;;  %v9529_v0 = vsub.f32 %v4900_v50, %v9465_v39  ;;  %v4902_v16 = vpop.f32.mrb[7].mxu0  ;;  %v9476_v31 = vmul.f32 %v12229_v5, %v18390_v32 }
 0x76c   : > { %v9612_v2 = vadd.f32 %v18404_v53, %v9527_v14  ;;  %9675 = vst [vmem:[%s18416_s20 + $0x48] sm:$0xff] %v9611_v56  ;;  %v9530_v42 = vsub.f32 %v4902_v16, %v9466_v52  ;;  %v9477_v52 = vmul.f32 %v12230_v27, %v18382_v46  ;;  %v9478_v14 = vmul.f32 %v12231_v37, %v18384_v57  ;;  %v12232_v16 = vld [vmem:[%s12672_s9 + $0xd0] sm:$0xff]  ;;  %v12242_v37 = vld [vmem:[%s12672_s9 + $0x120] sm:$0xff] }
 0x76d   : > { %v9613_v24 = vadd.f32 %v18409_v45, %v9528_v33  ;;  %v9614_v8 = vadd.f32 %v18394_v61, %v9529_v0  ;;  %v9328_v4 = vpop.f32.mrb[6].mxu1  ;;  %v9479_v13 = vmul.f32 %v12232_v16, %v18386_v40 }
 0x76e   : > { %9676 = vst [vmem:[%s18416_s20 + $0x50] sm:$0xff] %v9612_v2  ;;  %v9531_v28 = vsub.f32 %v9328_v4, %v9467_v22  ;;  %v9615_v1 = vadd.f32 %v18398_v29, %v9530_v42  ;;  %v9330_v51 = vpop.f32.mrb[7].mxu1  ;;  %v4908_v41 = vpop.f32.mrb[8].mxu0  ;;  %v12233_v2 = vld [vmem:[%s12672_s9 + $0xd8] sm:$0xff]  ;;  %v12235_v4 = vld [vmem:[%s12672_s9 + $0xe8] sm:$0xff] }
 0x76f   : > { %9677 = vst [vmem:[%s18416_s20 + $0x58] sm:$0xff] %v9613_v24  ;;  %9678 = vst [vmem:[%s18416_s20 + $0x60] sm:$0xff] %v9614_v8  ;;  %v9532_v60 = vsub.f32 %v9330_v51, %v9468_v35  ;;  %v9533_v30 = vsub.f32 %v4908_v41, %v9469_v21  ;;  %v4910_v63 = vpop.f32.mrb[9].mxu0  ;;  %v9480_v42 = vmul.f32 %v12233_v2, %v18390_v32 }
 0x770   : > { %v9616_v47 = vadd.f32 %v18404_v53, %v9531_v28  ;;  %9679 = vst [vmem:[%s18416_s20 + $0x68] sm:$0xff] %v9615_v1  ;;  %v9534_v26 = vsub.f32 %v4910_v63, %v9470_v54  ;;  %v9481_v54 = vmul.f32 %v12234_v11, %v18382_v46  ;;  %v9482_v28 = vmul.f32 %v12235_v4, %v18384_v57  ;;  %v12236_v63 = vld [vmem:[%s12672_s9 + $0xf0] sm:$0xff]  ;;  %v12246_v4 = vld [vmem:[%s12672_s9 + $0x140] sm:$0xff] }
 0x771   : > { %v9617_v62 = vadd.f32 %v18409_v45, %v9532_v60  ;;  %v9618_v44 = vadd.f32 %v18394_v61, %v9533_v30  ;;  %v9336_v20 = vpop.f32.mrb[8].mxu1  ;;  %v9483_v38 = vmul.f32 %v12236_v63, %v18386_v40 }
 0x772   : > { %9680 = vst [vmem:[%s18416_s20 + $0x70] sm:$0xff] %v9616_v47  ;;  %v9535_v36 = vsub.f32 %v9336_v20, %v9471_v25  ;;  %v9619_v6 = vadd.f32 %v18398_v29, %v9534_v26  ;;  %v9338_v10 = vpop.f32.mrb[9].mxu1  ;;  %v4916_v23 = vpop.f32.mrb[10].mxu0  ;;  %v12237_v47 = vld [vmem:[%s12672_s9 + $0xf8] sm:$0xff]  ;;  %v12239_v20 = vld [vmem:[%s12672_s9 + $0x108] sm:$0xff] }
 0x773   : > { %9681 = vst [vmem:[%s18416_s20 + $0x78] sm:$0xff] %v9617_v62  ;;  %9682 = vst [vmem:[%s18416_s20 + $0x80] sm:$0xff] %v9618_v44  ;;  %v9536_v7 = vsub.f32 %v9338_v10, %v9472_v15  ;;  %v9537_v55 = vsub.f32 %v4916_v23, %v9473_v58  ;;  %v4918_v39 = vpop.f32.mrb[11].mxu0  ;;  %v9484_v26 = vmul.f32 %v12237_v47, %v18390_v32 }
 0x774   : > { %v9620_v17 = vadd.f32 %v18404_v53, %v9535_v36  ;;  %9683 = vst [vmem:[%s18416_s20 + $0x88] sm:$0xff] %v9619_v6  ;;  %v9538_v3 = vsub.f32 %v4918_v39, %v9474_v49  ;;  %v9485_v49 = vmul.f32 %v12238_v34, %v18382_v46  ;;  %v9486_v36 = vmul.f32 %v12239_v20, %v18384_v57  ;;  %v12240_v39 = vld [vmem:[%s12672_s9 + $0x110] sm:$0xff]  ;;  %v12250_v20 = vld [vmem:[%s12672_s9 + $0x160] sm:$0xff] }
 0x775   : > { %v9621_v56 = vadd.f32 %v18409_v45, %v9536_v7  ;;  %v9622_v18 = vadd.f32 %v18394_v61, %v9537_v55  ;;  %v9344_v50 = vpop.f32.mrb[10].mxu1  ;;  %v9487_v5 = vmul.f32 %v12240_v39, %v18386_v40 }
 0x776   : > { %9684 = vst [vmem:[%s18416_s20 + $0x90] sm:$0xff] %v9620_v17  ;;  %v9539_v9 = vsub.f32 %v9344_v50, %v9475_v59  ;;  %v9623_v22 = vadd.f32 %v18398_v29, %v9538_v3  ;;  %v9346_v33 = vpop.f32.mrb[11].mxu1  ;;  %v4924_v0 = vpop.f32.mrb[12].mxu0  ;;  %v12241_v17 = vld [vmem:[%s12672_s9 + $0x118] sm:$0xff]  ;;  %v12243_v50 = vld [vmem:[%s12672_s9 + $0x128] sm:$0xff] }
 0x777   : > { %9685 = vst [vmem:[%s18416_s20 + $0x98] sm:$0xff] %v9621_v56  ;;  %9686 = vst [vmem:[%s18416_s20 + $0xa0] sm:$0xff] %v9622_v18  ;;  %v9540_v35 = vsub.f32 %v9346_v33, %v9476_v31  ;;  %v9541_v19 = vsub.f32 %v4924_v0, %v9477_v52  ;;  %v4926_v21 = vpop.f32.mrb[13].mxu0  ;;  %v9488_v3 = vmul.f32 %v12241_v17, %v18390_v32 }
 0x778   : > { %v9624_v24 = vadd.f32 %v18404_v53, %v9539_v9  ;;  %9687 = vst [vmem:[%s18416_s20 + $0xa8] sm:$0xff] %v9623_v22  ;;  %v9542_v8 = vsub.f32 %v4926_v21, %v9478_v14  ;;  %v9489_v14 = vmul.f32 %v12242_v37, %v18382_v46  ;;  %v9490_v9 = vmul.f32 %v12243_v50, %v18384_v57  ;;  %v12244_v21 = vld [vmem:[%s12672_s9 + $0x130] sm:$0xff]  ;;  %v12254_v50 = vld [vmem:[%s12672_s9 + $0x180] sm:$0xff] }
 0x779   : > { %v9625_v1 = vadd.f32 %v18409_v45, %v9540_v35  ;;  %v9626_v51 = vadd.f32 %v18394_v61, %v9541_v19  ;;  %v9352_v41 = vpop.f32.mrb[12].mxu1  ;;  %v9491_v2 = vmul.f32 %v12244_v21, %v18386_v40 }
 0x77a   : > { %9688 = vst [vmem:[%s18416_s20 + $0xb0] sm:$0xff] %v9624_v24  ;;  %v9543_v43 = vsub.f32 %v9352_v41, %v9479_v13  ;;  %v9627_v25 = vadd.f32 %v18398_v29, %v9542_v8  ;;  %v9354_v60 = vpop.f32.mrb[13].mxu1  ;;  %v4932_v30 = vpop.f32.mrb[14].mxu0  ;;  %v12245_v24 = vld [vmem:[%s12672_s9 + $0x138] sm:$0xff]  ;;  %v12247_v41 = vld [vmem:[%s12672_s9 + $0x148] sm:$0xff] }
 0x77b   : > { %9689 = vst [vmem:[%s18416_s20 + $0xb8] sm:$0xff] %v9625_v1  ;;  %9690 = vst [vmem:[%s18416_s20 + $0xc0] sm:$0xff] %v9626_v51  ;;  %v9544_v15 = vsub.f32 %v9354_v60, %v9480_v42  ;;  %v9545_v12 = vsub.f32 %v4932_v30, %v9481_v54  ;;  %v4934_v58 = vpop.f32.mrb[15].mxu0  ;;  %v9492_v8 = vmul.f32 %v12245_v24, %v18390_v32 }
 0x77c   : > { %v9628_v62 = vadd.f32 %v18404_v53, %v9543_v43  ;;  %9691 = vst [vmem:[%s18416_s20 + $0xc8] sm:$0xff] %v9627_v25  ;;  %v9546_v44 = vsub.f32 %v4934_v58, %v9482_v28  ;;  %v9493_v28 = vmul.f32 %v12246_v4, %v18382_v46  ;;  %v9494_v43 = vmul.f32 %v12247_v41, %v18384_v57  ;;  %v12248_v58 = vld [vmem:[%s12672_s9 + $0x150] sm:$0xff]  ;;  %v12258_v41 = vld [vmem:[%s12672_s9 + $0x1a0] sm:$0xff] }
 0x77d   : > { %v9629_v6 = vadd.f32 %v18409_v45, %v9544_v15  ;;  %v9630_v10 = vadd.f32 %v18394_v61, %v9545_v12  ;;  %v9360_v23 = vpop.f32.mrb[14].mxu1  ;;  %v9495_v47 = vmul.f32 %v12248_v58, %v18386_v40 }
 0x77e   : > { %9692 = vst [vmem:[%s18416_s20 + $0xd0] sm:$0xff] %v9628_v62  ;;  %v9547_v48 = vsub.f32 %v9360_v23, %v9483_v38  ;;  %v9631_v59 = vadd.f32 %v18398_v29, %v9546_v44  ;;  %v9362_v7 = vpop.f32.mrb[15].mxu1  ;;  %v4940_v55 = vpop.f32.mrb[16].mxu0  ;;  %v12249_v62 = vld [vmem:[%s12672_s9 + $0x158] sm:$0xff]  ;;  %v12251_v23 = vld [vmem:[%s12672_s9 + $0x168] sm:$0xff] }
 0x77f   : > { %9693 = vst [vmem:[%s18416_s20 + $0xd8] sm:$0xff] %v9629_v6  ;;  %9694 = vst [vmem:[%s18416_s20 + $0xe0] sm:$0xff] %v9630_v10  ;;  %v9548_v31 = vsub.f32 %v9362_v7, %v9484_v26  ;;  %v9549_v27 = vsub.f32 %v4940_v55, %v9485_v49  ;;  %v4942_v52 = vpop.f32.mrb[17].mxu0  ;;  %v9496_v44 = vmul.f32 %v12249_v62, %v18390_v32 }
 0x780   : > { %v9632_v56 = vadd.f32 %v18404_v53, %v9547_v48  ;;  %9695 = vst [vmem:[%s18416_s20 + $0xe8] sm:$0xff] %v9631_v59  ;;  %v9550_v18 = vsub.f32 %v4942_v52, %v9486_v36  ;;  %v9497_v36 = vmul.f32 %v12250_v20, %v18382_v46  ;;  %v9498_v48 = vmul.f32 %v12251_v23, %v18384_v57  ;;  %v12252_v52 = vld [vmem:[%s12672_s9 + $0x170] sm:$0xff]  ;;  %v12262_v23 = vld [vmem:[%s12672_s9 + $0x1c0] sm:$0xff] }
 0x781   : > { %v9633_v22 = vadd.f32 %v18409_v45, %v9548_v31  ;;  %v9634_v33 = vadd.f32 %v18394_v61, %v9549_v27  ;;  %v9368_v0 = vpop.f32.mrb[16].mxu1  ;;  %v9499_v17 = vmul.f32 %v12252_v52, %v18386_v40 }
 0x782   : > { %9696 = vst [vmem:[%s18416_s20 + $0xf0] sm:$0xff] %v9632_v56  ;;  %v9551_v16 = vsub.f32 %v9368_v0, %v9487_v5  ;;  %v9635_v13 = vadd.f32 %v18398_v29, %v9550_v18  ;;  %v9370_v35 = vpop.f32.mrb[17].mxu1  ;;  %v4948_v19 = vpop.f32.mrb[18].mxu0  ;;  %v12253_v56 = vld [vmem:[%s12672_s9 + $0x178] sm:$0xff]  ;;  %v12255_v0 = vld [vmem:[%s12672_s9 + $0x188] sm:$0xff] }
 0x783   : > { %9697 = vst [vmem:[%s18416_s20 + $0xf8] sm:$0xff] %v9633_v22  ;;  %9698 = vst [vmem:[%s18416_s20 + $0x100] sm:$0xff] %v9634_v33  ;;  %v9552_v42 = vsub.f32 %v9370_v35, %v9488_v3  ;;  %v9553_v11 = vsub.f32 %v4948_v19, %v9489_v14  ;;  %v4950_v54 = vpop.f32.mrb[19].mxu0  ;;  %v9500_v18 = vmul.f32 %v12253_v56, %v18390_v32 }
 0x784   : > { %v9636_v1 = vadd.f32 %v18404_v53, %v9551_v16  ;;  %9699 = vst [vmem:[%s18416_s20 + $0x108] sm:$0xff] %v9635_v13  ;;  %v9554_v51 = vsub.f32 %v4950_v54, %v9490_v9  ;;  %v9501_v9 = vmul.f32 %v12254_v50, %v18382_v46  ;;  %v9502_v16 = vmul.f32 %v12255_v0, %v18384_v57  ;;  %v12256_v54 = vld [vmem:[%s12672_s9 + $0x190] sm:$0xff]  ;;  %v12266_v0 = vld [vmem:[%s12672_s9 + $0x1e0] sm:$0xff] }
 0x785   : > { %v9637_v25 = vadd.f32 %v18409_v45, %v9552_v42  ;;  %v9638_v60 = vadd.f32 %v18394_v61, %v9553_v11  ;;  %v9376_v30 = vpop.f32.mrb[18].mxu1  ;;  %v9503_v24 = vmul.f32 %v12256_v54, %v18386_v40 }
 0x786   : > { %9700 = vst [vmem:[%s18416_s20 + $0x110] sm:$0xff] %v9636_v1  ;;  %v9555_v63 = vsub.f32 %v9376_v30, %v9491_v2  ;;  %v9639_v38 = vadd.f32 %v18398_v29, %v9554_v51  ;;  %v9378_v15 = vpop.f32.mrb[19].mxu1  ;;  %v4956_v12 = vpop.f32.mrb[20].mxu0  ;;  %v12257_v1 = vld [vmem:[%s12672_s9 + $0x198] sm:$0xff]  ;;  %v12259_v30 = vld [vmem:[%s12672_s9 + $0x1a8] sm:$0xff] }
 0x787   : > { %9701 = vst [vmem:[%s18416_s20 + $0x118] sm:$0xff] %v9637_v25  ;;  %9702 = vst [vmem:[%s18416_s20 + $0x120] sm:$0xff] %v9638_v60  ;;  %v9556_v26 = vsub.f32 %v9378_v15, %v9492_v8  ;;  %v9557_v34 = vsub.f32 %v4956_v12, %v9493_v28  ;;  %v4958_v49 = vpop.f32.mrb[21].mxu0  ;;  %v9504_v51 = vmul.f32 %v12257_v1, %v18390_v32 }
 0x788   : > { %v9640_v6 = vadd.f32 %v18404_v53, %v9555_v63  ;;  %9703 = vst [vmem:[%s18416_s20 + $0x128] sm:$0xff] %v9639_v38  ;;  %v9558_v10 = vsub.f32 %v4958_v49, %v9494_v43  ;;  %v9505_v43 = vmul.f32 %v12258_v41, %v18382_v46  ;;  %v9506_v63 = vmul.f32 %v12259_v30, %v18384_v57  ;;  %v12260_v49 = vld [vmem:[%s12672_s9 + $0x1b0] sm:$0xff]  ;;  %v12269_v41 = vld [vmem:[%s12672_s9 + $0x1f8] sm:$0xff] }
 0x789   : > { %v9641_v59 = vadd.f32 %v18409_v45, %v9556_v26  ;;  %v9642_v7 = vadd.f32 %v18394_v61, %v9557_v34  ;;  %v9384_v55 = vpop.f32.mrb[20].mxu1  ;;  %v9507_v62 = vmul.f32 %v12260_v49, %v18386_v40 }
 0x78a   : > { %9704 = vst [vmem:[%s18416_s20 + $0x130] sm:$0xff] %v9640_v6  ;;  %v9559_v39 = vsub.f32 %v9384_v55, %v9495_v47  ;;  %v9643_v5 = vadd.f32 %v18398_v29, %v9558_v10  ;;  %v9386_v31 = vpop.f32.mrb[21].mxu1  ;;  %v4964_v27 = vpop.f32.mrb[22].mxu0  ;;  %v12261_v6 = vld [vmem:[%s12672_s9 + $0x1b8] sm:$0xff]  ;;  %v12263_v55 = vld [vmem:[%s12672_s9 + $0x1c8] sm:$0xff] }
 0x78b   : > { %9705 = vst [vmem:[%s18416_s20 + $0x138] sm:$0xff] %v9641_v59  ;;  %9706 = vst [vmem:[%s18416_s20 + $0x140] sm:$0xff] %v9642_v7  ;;  %v9560_v3 = vsub.f32 %v9386_v31, %v9496_v44  ;;  %v9561_v37 = vsub.f32 %v4964_v27, %v9497_v36  ;;  %v4966_v14 = vpop.f32.mrb[23].mxu0  ;;  %v9508_v10 = vmul.f32 %v12261_v6, %v18390_v32 }
 0x78c   : > { %v9644_v22 = vadd.f32 %v18404_v53, %v9559_v39  ;;  %9707 = vst [vmem:[%s18416_s20 + $0x148] sm:$0xff] %v9643_v5  ;;  %v9562_v33 = vsub.f32 %v4966_v14, %v9498_v48  ;;  %v9509_v48 = vmul.f32 %v12262_v23, %v18382_v46  ;;  %v9510_v39 = vmul.f32 %v12263_v55, %v18384_v57  ;;  %v12264_v14 = vld [vmem:[%s12672_s9 + $0x1d0] sm:$0xff] }
 0x78d   : > { %v9645_v13 = vadd.f32 %v18409_v45, %v9560_v3  ;;  %v9646_v35 = vadd.f32 %v18394_v61, %v9561_v37  ;;  %v9392_v19 = vpop.f32.mrb[22].mxu1  ;;  %v9511_v56 = vmul.f32 %v12264_v14, %v18386_v40 }
 0x78e   : > { %9708 = vst [vmem:[%s18416_s20 + $0x150] sm:$0xff] %v9644_v22  ;;  %v9563_v21 = vsub.f32 %v9392_v19, %v9499_v17  ;;  %v9647_v2 = vadd.f32 %v18398_v29, %v9562_v33  ;;  %v9394_v42 = vpop.f32.mrb[23].mxu1  ;;  %v4972_v11 = vpop.f32.mrb[24].mxu0  ;;  %v12265_v22 = vld [vmem:[%s12672_s9 + $0x1d8] sm:$0xff]  ;;  %v12267_v19 = vld [vmem:[%s12672_s9 + $0x1e8] sm:$0xff] }
 0x78f   : > { %9709 = vst [vmem:[%s18416_s20 + $0x158] sm:$0xff] %v9645_v13  ;;  %9710 = vst [vmem:[%s18416_s20 + $0x160] sm:$0xff] %v9646_v35  ;;  %v9564_v8 = vsub.f32 %v9394_v42, %v9500_v18  ;;  %v9565_v4 = vsub.f32 %v4972_v11, %v9501_v9  ;;  %v4974_v28 = vpop.f32.mrb[25].mxu0  ;;  %v9512_v33 = vmul.f32 %v12265_v22, %v18390_v32 }
 0x790   : > { %v9648_v25 = vadd.f32 %v18404_v53, %v9563_v21  ;;  %9711 = vst [vmem:[%s18416_s20 + $0x168] sm:$0xff] %v9647_v2  ;;  %v9566_v60 = vsub.f32 %v4974_v28, %v9502_v16  ;;  %v9513_v16 = vmul.f32 %v12266_v0, %v18382_v46  ;;  %v9514_v21 = vmul.f32 %v12267_v19, %v18384_v57 }
 0x791   : > { %v9649_v38 = vadd.f32 %v18409_v45, %v9564_v8  ;;  %v9650_v15 = vadd.f32 %v18394_v61, %v9565_v4  ;;  %v9400_v12 = vpop.f32.mrb[24].mxu1  ;;  %v12268_v4 = vld [vmem:[%s12672_s9 + $0x1f0] sm:$0xff] }
 0x792   : > { %9712 = vst [vmem:[%s18416_s20 + $0x170] sm:$0xff] %v9648_v25  ;;  %v9567_v58 = vsub.f32 %v9400_v12, %v9503_v24  ;;  %v9651_v47 = vadd.f32 %v18398_v29, %v9566_v60  ;;  %v9402_v26 = vpop.f32.mrb[25].mxu1  ;;  %v4980_v34 = vpop.f32.mrb[26].mxu0  ;;  %v9515_v28 = vmul.f32 %v12268_v4, %v18386_v40 }
 0x793   : > { %9713 = vst [vmem:[%s18416_s20 + $0x178] sm:$0xff] %v9649_v38  ;;  %9714 = vst [vmem:[%s18416_s20 + $0x180] sm:$0xff] %v9650_v15  ;;  %v9568_v44 = vsub.f32 %v9402_v26, %v9504_v51  ;;  %v9569_v20 = vsub.f32 %v4980_v34, %v9505_v43  ;;  %v4982_v36 = vpop.f32.mrb[27].mxu0  ;;  %v9516_v43 = vmul.f32 %v12269_v41, %v18390_v32 }
 0x794   : > { %v9652_v59 = vadd.f32 %v18404_v53, %v9567_v58  ;;  %9715 = vst [vmem:[%s18416_s20 + $0x188] sm:$0xff] %v9651_v47  ;;  %v9570_v7 = vsub.f32 %v4982_v36, %v9506_v63 }
 0x795   : > { %v9653_v5 = vadd.f32 %v18409_v45, %v9568_v44  ;;  %v9654_v31 = vadd.f32 %v18394_v61, %v9569_v20  ;;  %v9408_v27 = vpop.f32.mrb[26].mxu1 }
 0x796   : > { %9716 = vst [vmem:[%s18416_s20 + $0x190] sm:$0xff] %v9652_v59  ;;  %v9571_v52 = vsub.f32 %v9408_v27, %v9507_v62  ;;  %v9655_v17 = vadd.f32 %v18398_v29, %v9570_v7  ;;  %v9410_v3 = vpop.f32.mrb[27].mxu1  ;;  %v4988_v37 = vpop.f32.mrb[28].mxu0 }
 0x797   : > { %9717 = vst [vmem:[%s18416_s20 + $0x198] sm:$0xff] %v9653_v5  ;;  %9718 = vst [vmem:[%s18416_s20 + $0x1a0] sm:$0xff] %v9654_v31  ;;  %v9572_v18 = vsub.f32 %v9410_v3, %v9508_v10  ;;  %v9573_v50 = vsub.f32 %v4988_v37, %v9509_v48  ;;  %v4990_v9 = vpop.f32.mrb[29].mxu0 }
 0x798   : > { %v9656_v13 = vadd.f32 %v18404_v53, %v9571_v52  ;;  %9719 = vst [vmem:[%s18416_s20 + $0x1a8] sm:$0xff] %v9655_v17  ;;  %v9574_v35 = vsub.f32 %v4990_v9, %v9510_v39 }
 0x799   : > { %v9657_v2 = vadd.f32 %v18409_v45, %v9572_v18  ;;  %v9658_v42 = vadd.f32 %v18394_v61, %v9573_v50  ;;  %v9416_v11 = vpop.f32.mrb[28].mxu1 }
 0x79a   : > { %9720 = vst [vmem:[%s18416_s20 + $0x1b0] sm:$0xff] %v9656_v13  ;;  %v9575_v54 = vsub.f32 %v9416_v11, %v9511_v56  ;;  %v9659_v46 = vadd.f32 %v18398_v29, %v9574_v35  ;;  %v9418_v24 = vpop.f32.mrb[29].mxu1  ;;  %v4996_v8 = vpop.f32.mrb[30].mxu0 }
 0x79b   : > { %9721 = vst [vmem:[%s18416_s20 + $0x1b8] sm:$0xff] %v9657_v2  ;;  %9722 = vst [vmem:[%s18416_s20 + $0x1c0] sm:$0xff] %v9658_v42  ;;  %v9576_v57 = vsub.f32 %v9418_v24, %v9512_v33  ;;  %v9577_v1 = vsub.f32 %v4996_v8, %v9513_v16  ;;  %v4998_v51 = vpop.f32.mrb[31].mxu0 }
 0x79c   : > { %v9660_v25 = vadd.f32 %v18404_v53, %v9575_v54  ;;  %9723 = vst [vmem:[%s18416_s20 + $0x1c8] sm:$0xff] %v9659_v46  ;;  %v9578_v60 = vsub.f32 %v4998_v51, %v9514_v21 }
 0x79d   : > { %v9661_v30 = vadd.f32 %v18409_v45, %v9576_v57  ;;  %v9662_v40 = vadd.f32 %v18394_v61, %v9577_v1  ;;  %v9424_v63 = vpop.f32.mrb[30].mxu1 }
 0x79e   : > { %9724 = vst [vmem:[%s18416_s20 + $0x1d0] sm:$0xff] %v9660_v25  ;;  %v9579_v38 = vsub.f32 %v9424_v63, %v9515_v28  ;;  %v9663_v32 = vadd.f32 %v18398_v29, %v9578_v60  ;;  %v9426_v15 = vpop.f32.mrb[31].mxu1 }
 0x79f   : > { %9725 = vst [vmem:[%s18416_s20 + $0x1d8] sm:$0xff] %v9661_v30  ;;  %9726 = vst [vmem:[%s18416_s20 + $0x1e0] sm:$0xff] %v9662_v40  ;;  %v9580_v12 = vsub.f32 %v9426_v15, %v9516_v43 }
 0x7a0   : > { %v9664_v58 = vadd.f32 %v18404_v53, %v9579_v38  ;;  %9727 = vst [vmem:[%s18416_s20 + $0x1e8] sm:$0xff] %v9663_v32 }
 0x7a1   : > { %v9665_v61 = vadd.f32 %v18409_v45, %v9580_v12 }
 0x7a2   : > { %9728 = vst [vmem:[%s18416_s20 + $0x1f0] sm:$0xff] %v9664_v58 }
 0x7a3   : > { %9729 = vst [vmem:[%s18416_s20 + $0x1f8] sm:$0xff] %v9665_v61 }
 0x7a4   : > { %12369 = shalt.err (!%p12366_p11)
}
 0x7a5   : > { %s12370_s21 = scalar_lea.hbm %s18660_s8, 8192  ;;  %s12374_s4 = scalar_lea.hbm %s18717_s3, 16384 }
 0x7a6   : > { %p12371_p0 = scmp.ne.s32.totalorder %s18660_s8, %s12370_s21  ;;  %p12375_p6 = scmp.lt.u32.totalorder %s18660_s8, %s18717_s3 }
 0x7a7   : > { %p12376_p7 = scmp.lt.u32.totalorder %s12374_s4, %s12370_s21  ;;  %p12378_p8 = scmp.lt.u32.totalorder %s12370_s21, %s18660_s8 }
 0x7a8   : > { %p12372_p4 = pnand %p12371_p0, %p22568_p12 }
 0x7a9   : > { %p12377_p2 = por %p12376_p7, %p12375_p6 }
 0x7aa   : > { %p12373_p13 = pneg %p12372_p4 }
 0x7ab   : > { %p12379_p1 = por %p12378_p8, %p12377_p2 }
 0x7ad   : > { %p12380_p10 = pnand %p12379_p1, %p12373_p13 }
 0x7af   : > { %12383 = shalt.err (!%p12380_p10)
}
 0x7b0   : > { %s12450_s20 = smov 512   ;;  %s12451_s22 = smov 32  }
 0x7b1   : > { %12129 = dma.vmem_to_hbm [thread:$0]  (%p22568_p12), %s18662_s24, 8192, %s18660_s8, %s9731_s15, %s12450_s20, %s12450_s20, %s12451_s22  }
 0x7b2 PF: > { %s9762_s11 = sand.u32 1, %s12422_s12   ;;  %p22569_p3 = scmp.ne.s32.totalorder %s20202_s23, 0 }
 0x7b3   : > { %p22570_p5 = scmp.ge.s32.totalorder %s12442_s17, 2  ;;  %s9763_s18 = scalar_lea.sflag [#allocation4], %s9762_s11 }
 0x7b5   : > { %p12143_p9 = pnand %p22570_p5, %p22569_p3 }
 0x7b7   : > { %12417 = dma.done.wait (!%p12143_p9), %s9763_s18, 8192  }
 0x7b8   : > { %12419 = vsyncadd (!%p12143_p9), %s9763_s18, 4294959104  ;;  %s20_s17 = sadd.s32 1, %s12442_s17   ;;  %s22571_s12 = smov %s12426_s13 }
 0x7b9   : > { %p17_p11 = scmp.ge.s32.totalorder %s20_s17, 4   ;;  %s22572_s13 = smov %s12430_s14 }
 0x7ba   : > { %s22573_s14 = smov %s12617_s5  ;;  %s22574_s15 = smov %s12438_s16 }
 0x7bb   : > { %s22575_s16 = smov %s22577_s19  ;;  %19 = sbr.rel (!%p17_p11) target bundleno = 7 (0x7), region = 88 }
 0x7c2   :  { %9768 = vsyncpa [#allocation3], 1 }
 0x7c3   :  { %9770 = vsyncpa [#allocation3 + $0x1], 1 }
 0x7c4   :  { %9771 = vsyncpa [#allocation6], 1 }
 0x7c5   :  { %9772 = vsyncpa [#allocation4], 1 }
 0x7c6   :  { %9774 = vsyncpa [#allocation4 + $0x1], 1 }

</bundles_post_ra>
